<compile_context>
chip_gen: v7x
topology: tpu7x:2x2x1
jax: 0.10.0
libtpu: 0.0.40
codegen_flags: <defaults>
</compile_context>

<pallas_src>
import jax
import jax.numpy as jnp
from jax.experimental import pallas as pl
from jax.experimental.pallas import tpu as pltpu

EPS = 1e-5


# --------------------------------------------------------------------------
# Fused UpConv kernel.
#
#   x1_ref : (N*H1*W1, C1)           low-res input, channels-last flattened
#   x2_ref : (4, N, H1, W1, Cup)     skip connection as (p,q) parity planes
#   wup_ref: (C1, 4*Cup)             ConvTranspose2d weight, cols (p, q, c)
#   bup_ref: (1, 4*Cup)              ConvTranspose2d bias, tiled (p, q, c)
#   w1_ref : (9*Cc, Cout)            conv1 weight, rows (kh, kw, cin)
#   w2_ref : (9*Cout, Cout)          conv2 weight, rows (kh, kw, cin)
#   g*/be* : (1, Cout)               BatchNorm affine params
#   out_ref: (N*H1, W1*4*Cout)       lane-dense output slab, cols (j, p, q, c)
#   xcp_ref: (4, N, H1+2, W1+2, Cc)  scratch: padded concat parity planes
#   hp_ref : (4, N, H1+2, W1+2, Cout) scratch: padded BN1/ReLU parity planes
# --------------------------------------------------------------------------
def _upconv_kernel(x1_ref, x2_ref, wup_ref, bup_ref,
                   w1_ref, g1_ref, be1_ref,
                   w2_ref, g2_ref, be2_ref,
                   out_ref, xcp_ref, hp_ref):
    _, N, H1, W1, Cup = x2_ref.shape
    M1 = N * H1 * W1
    C1 = x1_ref.shape[-1]
    Cc = C1                      # concat channels = 2 * Cup = in_ch
    Cout = g1_ref.shape[-1]
    M = 4 * M1                   # N * H * W
    inv_m = 1.0 / M

    # ---- zero padded scratches once (single memsets, no border-column writes)
    xcp_ref[...] = jnp.zeros(xcp_ref.shape, jnp.float32)
    hp_ref[...] = jnp.zeros(hp_ref.shape, jnp.float32)

    # ---- ConvTranspose2d(k=2, s=2): ONE matmul; each output-parity plane is
    #      a lane slice.  The interleaved upsampled map is never built; each
    #      parity plane is lane-concatenated with the matching skip parity
    #      plane and written (zero-padded) straight into VMEM.
    y = jnp.dot(x1_ref[...], wup_ref[...],
                preferred_element_type=jnp.float32) + bup_ref[...]
    for p in range(2):
        for q in range(2):
            k = 2 * p + q
            up_pq = y[:, k * Cup:(k + 1) * Cup].reshape(N, H1, W1, Cup)
            xcp_ref[k, :, 1:H1 + 1, 1:W1 + 1, :] = jnp.concatenate(
                [up_pq, x2_ref[k]], axis=-1)

    # 3x3 SAME conv in parity-plane form: for output parity (po, qo) and tap
    # (dh, dw), the input pixel (2i+po+dh-1, 2j+qo+dw-1) lies in parity plane
    # ((po+dh-1)%2, (qo+dw-1)%2) at row/col offset (po+dh-1)//2, (qo+dw-1)//2,
    # so every tap is one contiguous window load of a single plane followed by
    # one MXU matmul (no im2col scratch, no strided/masked patch stores).
    def conv3x3(pad_ref, w_ref, cin):
        planes = []
        for po in range(2):
            for qo in range(2):
                acc = jnp.zeros((M1, Cout), jnp.float32)
                for dh in range(3):
                    e = po + dh - 1
                    pe, oh = e % 2, e // 2
                    for dw in range(3):
                        f = qo + dw - 1
                        qe, ow = f % 2, f // 2
                        win = pad_ref[2 * pe + qe, :,
                                      1 + oh:1 + oh + H1,
                                      1 + ow:1 + ow + W1, :]
                        t = dh * 3 + dw
                        acc += jnp.dot(win.reshape(M1, cin),
                                       w_ref[t * cin:(t + 1) * cin, :],
                                       preferred_element_type=jnp.float32)
                planes.append(acc)       # index = 2*po + qo
        return planes

    def bn_relu(planes, g_ref, be_ref):
        # Training-mode BatchNorm: biased batch stats over all N*H*W pixels
        # (= the four parity planes together).  Conv bias cancels against the
        # mean subtraction, so it is never added.  Two-pass centered variance.
        total = jnp.zeros((1, Cout), jnp.float32)
        for a in planes:
            total += jnp.sum(a, axis=0, keepdims=True)
        mean = total * inv_m
        vtot = jnp.zeros((1, Cout), jnp.float32)
        for a in planes:
            d = a - mean
            vtot += jnp.sum(d * d, axis=0, keepdims=True)
        var = vtot * inv_m
        scale = g_ref[...] * jax.lax.rsqrt(var + EPS)
        shift = be_ref[...] - mean * scale
        return [jnp.maximum(a * scale + shift, 0.0) for a in planes]

    # ---- conv1 -> BN1 -> ReLU ----
    h1 = bn_relu(conv3x3(xcp_ref, w1_ref, Cc), g1_ref, be1_ref)
    for k in range(4):
        hp_ref[k, :, 1:H1 + 1, 1:W1 + 1, :] = h1[k].reshape(N, H1, W1, Cout)

    # ---- conv2 -> BN2 -> ReLU ----
    o = bn_relu(conv3x3(hp_ref, w2_ref, Cout), g2_ref, be2_ref)

    # ---- lane-dense output slab (N*H1, W1*4*Cout), columns ordered
    #      (j, p, q, c): one unmasked full-lane store instead of many 8-lane
    #      masked stores; the wrapper undoes the ordering inside the NCHW
    #      relayout it must do anyway.
    o3 = [v.reshape(N * H1, W1, Cout) for v in o]
    o_all = jnp.concatenate(o3, axis=-1)               # (N*H1, W1, 4*Cout)
    out_ref[...] = jnp.concatenate(
        [o_all[:, j, :] for j in range(W1)], axis=-1)  # (N*H1, W1*4*Cout)


# --------------------------------------------------------------------------
# Wrapper: UpConv.forward(x1, x2)
# --------------------------------------------------------------------------
def up_conv(x1_nchw, x2_nchw, wup, bup, w1, b1, g1, be1, w2, b2, g2, be2):
    """
    x1_nchw: (N, in_ch,    H1,  W1)   low-res feature map
    x2_nchw: (N, in_ch//2, 2H1, 2W1)  skip connection
    wup    : (in_ch, in_ch//2, 2, 2)  ConvTranspose2d weight (PyTorch layout)
    bup    : (in_ch//2,)
    w1     : (3, 3, in_ch,  out_ch)   conv1 weight (HWIO)
    w2     : (3, 3, out_ch, out_ch)   conv2 weight (HWIO)
    b1/b2  : conv biases (mathematically cancelled by training-mode BN)
    returns (N, out_ch, 2H1, 2W1)
    """
    del b1, b2  # cancelled exactly by BN mean subtraction
    N, C1, H1, W1 = x1_nchw.shape
    Cup = C1 // 2
    Cc = C1
    Cout = w1.shape[-1]
    H, W = 2 * H1, 2 * W1
    M1 = N * H1 * W1

    # Wrapper-side work is layout plumbing only (the NCHW -> channels-last
    # relayout that is needed in any case); no activation-sized compute,
    # no concat/pad/interleave in XLA.
    x1_flat = jnp.transpose(x1_nchw, (0, 2, 3, 1)).reshape(M1, C1)
    x2_planes = jnp.transpose(
        x2_nchw.reshape(N, Cup, H1, 2, W1, 2),
        (3, 5, 0, 2, 4, 1)).reshape(4, N, H1, W1, Cup)
    wup_flat = jnp.transpose(wup, (0, 2, 3, 1)).reshape(C1, 4 * Cup)
    bup_t = jnp.tile(bup, 4).reshape(1, 4 * Cup)
    w1f = w1.reshape(9 * Cc, Cout)
    w2f = w2.reshape(9 * Cout, Cout)

    flops = (2 * M1 * C1 * 4 * Cup              # transposed conv
             + 2 * (4 * M1) * 9 * Cc * Cout     # conv1
             + 2 * (4 * M1) * 9 * Cout * Cout   # conv2
             + 12 * 4 * M1 * Cout)              # BN/ReLU epilogues
    bytes_accessed = 4 * (M1 * C1 + 4 * M1 * Cup + C1 * 4 * Cup + 4 * Cup
                          + 9 * Cc * Cout + 9 * Cout * Cout + 4 * Cout
                          + 4 * M1 * Cout)

    vmem = pl.BlockSpec(memory_space=pltpu.MemorySpace.VMEM)
    out_slab = pl.pallas_call(
        _upconv_kernel,
        out_shape=jax.ShapeDtypeStruct((N * H1, W1 * 4 * Cout), jnp.float32),
        in_specs=[vmem] * 10,
        out_specs=vmem,
        scratch_shapes=[
            pltpu.VMEM((4, N, H1 + 2, W1 + 2, Cc), jnp.float32),
            pltpu.VMEM((4, N, H1 + 2, W1 + 2, Cout), jnp.float32),
        ],
        compiler_params=pltpu.CompilerParams(vmem_limit_bytes=32 << 20),
        cost_estimate=pl.CostEstimate(
            flops=int(flops),
            transcendentals=int(2 * Cout),
            bytes_accessed=int(bytes_accessed)),
    )(x1_flat, x2_planes, wup_flat, bup_t,
      w1f, g1.reshape(1, Cout), be1.reshape(1, Cout),
      w2f, g2.reshape(1, Cout), be2.reshape(1, Cout))

    # undo the lane-dense (j, p, q, c) column ordering; folds into the NCHW
    # relayout that is required regardless.
    out = (out_slab.reshape(N, H1, W1, 2, 2, Cout)
           .transpose(0, 5, 1, 3, 2, 4)
           .reshape(N, Cout, H, W))
    return out


# --------------------------------------------------------------------------
# Pure-JAX reference (same semantics) for the correctness check.
# --------------------------------------------------------------------------
def _reference(x1, x2, wup, bup, w1, b1, g1, be1, w2, b2, g2, be2):
    x1n = jnp.transpose(x1, (0, 2, 3, 1))
    # transposed conv = fractionally-strided conv with spatially-flipped kernel
    wup_hwio = jnp.transpose(wup, (2, 3, 0, 1))[::-1, ::-1, :, :]
    up = jax.lax.conv_general_dilated(
        x1n, wup_hwio, window_strides=(1, 1), padding=((1, 1), (1, 1)),
        lhs_dilation=(2, 2),
        dimension_numbers=('NHWC', 'HWIO', 'NHWC')) + bup

    x2n = jnp.transpose(x2, (0, 2, 3, 1))
    y = jnp.concatenate([up, x2n], axis=-1)

    def conv(t, w, b):
        return jax.lax.conv_general_dilated(
            t, w, (1, 1), 'SAME',
            dimension_numbers=('NHWC', 'HWIO', 'NHWC')) + b

    def bn_relu(t, g, be):
        m = jnp.mean(t, axis=(0, 1, 2), keepdims=True)
        v = jnp.mean((t - m) ** 2, axis=(0, 1, 2), keepdims=True)
        return jnp.maximum((t - m) * jax.lax.rsqrt(v + EPS) * g + be, 0.0)

    y = bn_relu(conv(y, w1, b1), g1, be1)
    y = bn_relu(conv(y, w2, b2), g2, be2)
    return jnp.transpose(y, (0, 3, 1, 2))


if __name__ == "__main__":
    # UpConv(in_ch=4, out_ch=8): x1 is (N,4,8,8), skip x2 is (N,2,16,16).
    N, in_ch, out_ch = 2, 4, 8
    H1 = W1 = 8
    Cup = in_ch // 2

    key = jax.random.PRNGKey(0)
    (kx1, kx2, kwu, kbu, kw1, kb1, kw2, kb2,
     kg1, kbe1, kg2, kbe2) = jax.random.split(key, 12)

    x1 = jax.random.normal(kx1, (N, in_ch, H1, W1), jnp.float32)
    x2 = jax.random.normal(kx2, (N, Cup, 2 * H1, 2 * W1), jnp.float32)

    # ConvTranspose2d(in_ch, in_ch//2, 2, stride=2) params (PyTorch layout).
    bu = 1.0 / (in_ch * 4) ** 0.5
    wup = jax.random.uniform(kwu, (in_ch, Cup, 2, 2), jnp.float32, -bu, bu)
    bup = jax.random.uniform(kbu, (Cup,), jnp.float32, -bu, bu)

    # DoubleConv(in_ch, out_ch) conv params, weights kept in HWIO.
    bd1 = 1.0 / (in_ch * 9) ** 0.5
    w1 = jax.random.uniform(kw1, (3, 3, in_ch, out_ch), jnp.float32, -bd1, bd1)
    b1 = jax.random.uniform(kb1, (out_ch,), jnp.float32, -bd1, bd1)
    bd2 = 1.0 / (out_ch * 9) ** 0.5
    w2 = jax.random.uniform(kw2, (3, 3, out_ch, out_ch), jnp.float32, -bd2, bd2)
    b2 = jax.random.uniform(kb2, (out_ch,), jnp.float32, -bd2, bd2)

    # BatchNorm affine params (perturbed from 1/0 defaults to exercise them).
    g1 = 1.0 + 0.1 * jax.random.normal(kg1, (out_ch,), jnp.float32)
    be1 = 0.1 * jax.random.normal(kbe1, (out_ch,), jnp.float32)
    g2 = 1.0 + 0.1 * jax.random.normal(kg2, (out_ch,), jnp.float32)
    be2 = 0.1 * jax.random.normal(kbe2, (out_ch,), jnp.float32)

    out = jax.block_until_ready(
        up_conv(x1, x2, wup, bup, w1, b1, g1, be1, w2, b2, g2, be2))
    ref = jax.block_until_ready(
        _reference(x1, x2, wup, bup, w1, b1, g1, be1, w2, b2, g2, be2))

    assert out.shape == (N, out_ch, 2 * H1, 2 * W1)
    err = float(jnp.max(jnp.abs(out - ref)))
    assert jnp.allclose(out, ref, rtol=1e-3, atol=1e-3), f"max abs err {err}"

    print("KERNEL_OK")
</pallas_src>

<mosaic_0001>
module attributes {stable_mosaic.version = 11 : i64} {
  func.func @_upconv_kernel(%arg0: memref<128x4xf32, #tpu.memory_space<vmem>>, %arg1: memref<4x2x8x8x2xf32, #tpu.memory_space<vmem>>, %arg2: memref<4x8xf32, #tpu.memory_space<vmem>>, %arg3: memref<1x8xf32, #tpu.memory_space<vmem>>, %arg4: memref<36x8xf32, #tpu.memory_space<vmem>>, %arg5: memref<1x8xf32, #tpu.memory_space<vmem>>, %arg6: memref<1x8xf32, #tpu.memory_space<vmem>>, %arg7: memref<72x8xf32, #tpu.memory_space<vmem>>, %arg8: memref<1x8xf32, #tpu.memory_space<vmem>>, %arg9: memref<1x8xf32, #tpu.memory_space<vmem>>, %arg10: memref<16x256xf32, #tpu.memory_space<vmem>>, %arg11: memref<4x2x10x10x4xf32, #tpu.memory_space<vmem>>, %arg12: memref<4x2x10x10x8xf32, #tpu.memory_space<vmem>>) attributes {dimension_semantics = [], scalar_prefetch = 0 : i64, scratch_operands = 2 : i64, tpu.core_type = #tpu.core_type<tc>} {
    %cst = arith.constant 0.000000e+00 : f32
    %0 = vector.broadcast %cst : f32 to vector<4x2x10x10x4xf32>
    %c0 = arith.constant 0 : index
    %c0_0 = arith.constant 0 : index
    %c0_1 = arith.constant 0 : index
    %c0_2 = arith.constant 0 : index
    %c0_3 = arith.constant 0 : index
    %1 = vector.load %arg11[%c0, %c0_0, %c0_1, %c0_2, %c0_3] : memref<4x2x10x10x4xf32, #tpu.memory_space<vmem>>, vector<4x2x10x10x4xf32>
    tpu.vector_store %arg11[%c0, %c0_0, %c0_1, %c0_2, %c0_3], %0 {strides = array<i32>} : memref<4x2x10x10x4xf32, #tpu.memory_space<vmem>>, vector<4x2x10x10x4xf32>,
    %cst_4 = arith.constant 0.000000e+00 : f32
    %2 = vector.broadcast %cst_4 : f32 to vector<4x2x10x10x8xf32>
    %c0_5 = arith.constant 0 : index
    %c0_6 = arith.constant 0 : index
    %c0_7 = arith.constant 0 : index
    %c0_8 = arith.constant 0 : index
    %c0_9 = arith.constant 0 : index
    %3 = vector.load %arg12[%c0_5, %c0_6, %c0_7, %c0_8, %c0_9] : memref<4x2x10x10x8xf32, #tpu.memory_space<vmem>>, vector<4x2x10x10x8xf32>
    tpu.vector_store %arg12[%c0_5, %c0_6, %c0_7, %c0_8, %c0_9], %2 {strides = array<i32>} : memref<4x2x10x10x8xf32, #tpu.memory_space<vmem>>, vector<4x2x10x10x8xf32>,
    %c0_10 = arith.constant 0 : index
    %c0_11 = arith.constant 0 : index
    %4 = vector.load %arg0[%c0_10, %c0_11] : memref<128x4xf32, #tpu.memory_space<vmem>>, vector<128x4xf32>
    %c0_12 = arith.constant 0 : index
    %c0_13 = arith.constant 0 : index
    %5 = vector.load %arg2[%c0_12, %c0_13] : memref<4x8xf32, #tpu.memory_space<vmem>>, vector<4x8xf32>
    %cst_14 = arith.constant dense<0.000000e+00> : vector<128x8xf32>
    %6 = tpu.matmul %4, %5, %cst_14 {dimension_numbers = #tpu.dot_dimension_numbers<[1], [0], [0], [1], [0, 0, 1, 1], [], []>} : vector<128x4xf32>, vector<4x8xf32>, vector<128x8xf32> -> vector<128x8xf32>
    %c0_15 = arith.constant 0 : index
    %c0_16 = arith.constant 0 : index
    %7 = vector.load %arg3[%c0_15, %c0_16] : memref<1x8xf32, #tpu.memory_space<vmem>>, vector<1x8xf32>
    %8 = vector.broadcast %7 : vector<1x8xf32> to vector<128x8xf32>
    %9 = arith.addf %6, %8 : vector<128x8xf32>
    %10 = vector.extract_strided_slice %9 {offsets = [0, 0], sizes = [128, 2], strides = [1, 1]} : vector<128x8xf32> to vector<128x2xf32>
    %11 = vector.shape_cast %10 : vector<128x2xf32> to vector<2x8x8x2xf32>
    %c0_17 = arith.constant 0 : index
    %c0_18 = arith.constant 0 : index
    %c0_19 = arith.constant 0 : index
    %c0_20 = arith.constant 0 : index
    %c0_21 = arith.constant 0 : index
    %12 = vector.load %arg1[%c0_17, %c0_18, %c0_19, %c0_20, %c0_21] : memref<4x2x8x8x2xf32, #tpu.memory_space<vmem>>, vector<1x2x8x8x2xf32>
    %13 = vector.shape_cast %12 : vector<1x2x8x8x2xf32> to vector<2x8x8x2xf32>
    %14 = tpu.concatenate %11, %13 in 3 : vector<2x8x8x2xf32>, vector<2x8x8x2xf32> -> vector<2x8x8x4xf32>
    %c0_22 = arith.constant 0 : index
    %c0_23 = arith.constant 0 : index
    %c1 = arith.constant 1 : index
    %c1_24 = arith.constant 1 : index
    %c0_25 = arith.constant 0 : index
    %15 = vector.load %arg11[%c0_22, %c0_23, %c1, %c1_24, %c0_25] : memref<4x2x10x10x4xf32, #tpu.memory_space<vmem>>, vector<1x2x8x8x4xf32>
    %16 = vector.shape_cast %15 : vector<1x2x8x8x4xf32> to vector<2x8x8x4xf32>
    %17 = vector.shape_cast %14 : vector<2x8x8x4xf32> to vector<1x2x8x8x4xf32>
    tpu.vector_store %arg11[%c0_22, %c0_23, %c1, %c1_24, %c0_25], %17 {strides = array<i32>} : memref<4x2x10x10x4xf32, #tpu.memory_space<vmem>>, vector<1x2x8x8x4xf32>,
    %18 = vector.extract_strided_slice %9 {offsets = [0, 2], sizes = [128, 2], strides = [1, 1]} : vector<128x8xf32> to vector<128x2xf32>
    %19 = vector.shape_cast %18 : vector<128x2xf32> to vector<2x8x8x2xf32>
    %c1_26 = arith.constant 1 : index
    %c0_27 = arith.constant 0 : index
    %c0_28 = arith.constant 0 : index
    %c0_29 = arith.constant 0 : index
    %c0_30 = arith.constant 0 : index
    %20 = vector.load %arg1[%c1_26, %c0_27, %c0_28, %c0_29, %c0_30] : memref<4x2x8x8x2xf32, #tpu.memory_space<vmem>>, vector<1x2x8x8x2xf32>
    %21 = vector.shape_cast %20 : vector<1x2x8x8x2xf32> to vector<2x8x8x2xf32>
    %22 = tpu.concatenate %19, %21 in 3 : vector<2x8x8x2xf32>, vector<2x8x8x2xf32> -> vector<2x8x8x4xf32>
    %c1_31 = arith.constant 1 : index
    %c0_32 = arith.constant 0 : index
    %c1_33 = arith.constant 1 : index
    %c1_34 = arith.constant 1 : index
    %c0_35 = arith.constant 0 : index
    %23 = vector.load %arg11[%c1_31, %c0_32, %c1_33, %c1_34, %c0_35] : memref<4x2x10x10x4xf32, #tpu.memory_space<vmem>>, vector<1x2x8x8x4xf32>
    %24 = vector.shape_cast %23 : vector<1x2x8x8x4xf32> to vector<2x8x8x4xf32>
    %25 = vector.shape_cast %22 : vector<2x8x8x4xf32> to vector<1x2x8x8x4xf32>
    tpu.vector_store %arg11[%c1_31, %c0_32, %c1_33, %c1_34, %c0_35], %25 {strides = array<i32>} : memref<4x2x10x10x4xf32, #tpu.memory_space<vmem>>, vector<1x2x8x8x4xf32>,
    %26 = vector.extract_strided_slice %9 {offsets = [0, 4], sizes = [128, 2], strides = [1, 1]} : vector<128x8xf32> to vector<128x2xf32>
    %27 = vector.shape_cast %26 : vector<128x2xf32> to vector<2x8x8x2xf32>
    %c2 = arith.constant 2 : index
    %c0_36 = arith.constant 0 : index
    %c0_37 = arith.constant 0 : index
    %c0_38 = arith.constant 0 : index
    %c0_39 = arith.constant 0 : index
    %28 = vector.load %arg1[%c2, %c0_36, %c0_37, %c0_38, %c0_39] : memref<4x2x8x8x2xf32, #tpu.memory_space<vmem>>, vector<1x2x8x8x2xf32>
    %29 = vector.shape_cast %28 : vector<1x2x8x8x2xf32> to vector<2x8x8x2xf32>
    %30 = tpu.concatenate %27, %29 in 3 : vector<2x8x8x2xf32>, vector<2x8x8x2xf32> -> vector<2x8x8x4xf32>
    %c2_40 = arith.constant 2 : index
    %c0_41 = arith.constant 0 : index
    %c1_42 = arith.constant 1 : index
    %c1_43 = arith.constant 1 : index
    %c0_44 = arith.constant 0 : index
    %31 = vector.load %arg11[%c2_40, %c0_41, %c1_42, %c1_43, %c0_44] : memref<4x2x10x10x4xf32, #tpu.memory_space<vmem>>, vector<1x2x8x8x4xf32>
    %32 = vector.shape_cast %31 : vector<1x2x8x8x4xf32> to vector<2x8x8x4xf32>
    %33 = vector.shape_cast %30 : vector<2x8x8x4xf32> to vector<1x2x8x8x4xf32>
    tpu.vector_store %arg11[%c2_40, %c0_41, %c1_42, %c1_43, %c0_44], %33 {strides = array<i32>} : memref<4x2x10x10x4xf32, #tpu.memory_space<vmem>>, vector<1x2x8x8x4xf32>,
    %34 = vector.extract_strided_slice %9 {offsets = [0, 6], sizes = [128, 2], strides = [1, 1]} : vector<128x8xf32> to vector<128x2xf32>
    %35 = vector.shape_cast %34 : vector<128x2xf32> to vector<2x8x8x2xf32>
    %c3 = arith.constant 3 : index
    %c0_45 = arith.constant 0 : index
    %c0_46 = arith.constant 0 : index
    %c0_47 = arith.constant 0 : index
    %c0_48 = arith.constant 0 : index
    %36 = vector.load %arg1[%c3, %c0_45, %c0_46, %c0_47, %c0_48] : memref<4x2x8x8x2xf32, #tpu.memory_space<vmem>>, vector<1x2x8x8x2xf32>
    %37 = vector.shape_cast %36 : vector<1x2x8x8x2xf32> to vector<2x8x8x2xf32>
    %38 = tpu.concatenate %35, %37 in 3 : vector<2x8x8x2xf32>, vector<2x8x8x2xf32> -> vector<2x8x8x4xf32>
    %c3_49 = arith.constant 3 : index
    %c0_50 = arith.constant 0 : index
    %c1_51 = arith.constant 1 : index
    %c1_52 = arith.constant 1 : index
    %c0_53 = arith.constant 0 : index
    %39 = vector.load %arg11[%c3_49, %c0_50, %c1_51, %c1_52, %c0_53] : memref<4x2x10x10x4xf32, #tpu.memory_space<vmem>>, vector<1x2x8x8x4xf32>
    %40 = vector.shape_cast %39 : vector<1x2x8x8x4xf32> to vector<2x8x8x4xf32>
    %41 = vector.shape_cast %38 : vector<2x8x8x4xf32> to vector<1x2x8x8x4xf32>
    tpu.vector_store %arg11[%c3_49, %c0_50, %c1_51, %c1_52, %c0_53], %41 {strides = array<i32>} : memref<4x2x10x10x4xf32, #tpu.memory_space<vmem>>, vector<1x2x8x8x4xf32>,
    %cst_54 = arith.constant 0.000000e+00 : f32
    %42 = vector.broadcast %cst_54 : f32 to vector<128x8xf32>
    %c3_55 = arith.constant 3 : index
    %c0_56 = arith.constant 0 : index
    %c0_57 = arith.constant 0 : index
    %c0_58 = arith.constant 0 : index
    %c0_59 = arith.constant 0 : index
    %43 = vector.load %arg11[%c3_55, %c0_56, %c0_57, %c0_58, %c0_59] : memref<4x2x10x10x4xf32, #tpu.memory_space<vmem>>, vector<1x2x8x8x4xf32>
    %44 = vector.shape_cast %43 : vector<1x2x8x8x4xf32> to vector<2x8x8x4xf32>
    %45 = vector.shape_cast %44 : vector<2x8x8x4xf32> to vector<128x4xf32>
    %c0_60 = arith.constant 0 : index
    %c0_61 = arith.constant 0 : index
    %46 = vector.load %arg4[%c0_60, %c0_61] : memref<36x8xf32, #tpu.memory_space<vmem>>, vector<4x8xf32>
    %cst_62 = arith.constant dense<0.000000e+00> : vector<128x8xf32>
    %47 = tpu.matmul %45, %46, %cst_62 {dimension_numbers = #tpu.dot_dimension_numbers<[1], [0], [0], [1], [0, 0, 1, 1], [], []>} : vector<128x4xf32>, vector<4x8xf32>, vector<128x8xf32> -> vector<128x8xf32>
    %48 = arith.addf %42, %47 : vector<128x8xf32>
    %c2_63 = arith.constant 2 : index
    %c0_64 = arith.constant 0 : index
    %c0_65 = arith.constant 0 : index
    %c1_66 = arith.constant 1 : index
    %c0_67 = arith.constant 0 : index
    %49 = vector.load %arg11[%c2_63, %c0_64, %c0_65, %c1_66, %c0_67] : memref<4x2x10x10x4xf32, #tpu.memory_space<vmem>>, vector<1x2x8x8x4xf32>
    %50 = vector.shape_cast %49 : vector<1x2x8x8x4xf32> to vector<2x8x8x4xf32>
    %51 = vector.shape_cast %50 : vector<2x8x8x4xf32> to vector<128x4xf32>
    %c4 = arith.constant 4 : index
    %c0_68 = arith.constant 0 : index
    %52 = vector.load %arg4[%c4, %c0_68] : memref<36x8xf32, #tpu.memory_space<vmem>>, vector<4x8xf32>
    %cst_69 = arith.constant dense<0.000000e+00> : vector<128x8xf32>
    %53 = tpu.matmul %51, %52, %cst_69 {dimension_numbers = #tpu.dot_dimension_numbers<[1], [0], [0], [1], [0, 0, 1, 1], [], []>} : vector<128x4xf32>, vector<4x8xf32>, vector<128x8xf32> -> vector<128x8xf32>
    %54 = arith.addf %48, %53 : vector<128x8xf32>
    %c3_70 = arith.constant 3 : index
    %c0_71 = arith.constant 0 : index
    %c0_72 = arith.constant 0 : index
    %c1_73 = arith.constant 1 : index
    %c0_74 = arith.constant 0 : index
    %55 = vector.load %arg11[%c3_70, %c0_71, %c0_72, %c1_73, %c0_74] : memref<4x2x10x10x4xf32, #tpu.memory_space<vmem>>, vector<1x2x8x8x4xf32>
    %56 = vector.shape_cast %55 : vector<1x2x8x8x4xf32> to vector<2x8x8x4xf32>
    %57 = vector.shape_cast %56 : vector<2x8x8x4xf32> to vector<128x4xf32>
    %c8 = arith.constant 8 : index
    %c0_75 = arith.constant 0 : index
    %58 = vector.load %arg4[%c8, %c0_75] : memref<36x8xf32, #tpu.memory_space<vmem>>, vector<4x8xf32>
    %cst_76 = arith.constant dense<0.000000e+00> : vector<128x8xf32>
    %59 = tpu.matmul %57, %58, %cst_76 {dimension_numbers = #tpu.dot_dimension_numbers<[1], [0], [0], [1], [0, 0, 1, 1], [], []>} : vector<128x4xf32>, vector<4x8xf32>, vector<128x8xf32> -> vector<128x8xf32>
    %60 = arith.addf %54, %59 : vector<128x8xf32>
    %c1_77 = arith.constant 1 : index
    %c0_78 = arith.constant 0 : index
    %c1_79 = arith.constant 1 : index
    %c0_80 = arith.constant 0 : index
    %c0_81 = arith.constant 0 : index
    %61 = vector.load %arg11[%c1_77, %c0_78, %c1_79, %c0_80, %c0_81] : memref<4x2x10x10x4xf32, #tpu.memory_space<vmem>>, vector<1x2x8x8x4xf32>
    %62 = vector.shape_cast %61 : vector<1x2x8x8x4xf32> to vector<2x8x8x4xf32>
    %63 = vector.shape_cast %62 : vector<2x8x8x4xf32> to vector<128x4xf32>
    %c12 = arith.constant 12 : index
    %c0_82 = arith.constant 0 : index
    %64 = vector.load %arg4[%c12, %c0_82] : memref<36x8xf32, #tpu.memory_space<vmem>>, vector<4x8xf32>
    %cst_83 = arith.constant dense<0.000000e+00> : vector<128x8xf32>
    %65 = tpu.matmul %63, %64, %cst_83 {dimension_numbers = #tpu.dot_dimension_numbers<[1], [0], [0], [1], [0, 0, 1, 1], [], []>} : vector<128x4xf32>, vector<4x8xf32>, vector<128x8xf32> -> vector<128x8xf32>
    %66 = arith.addf %60, %65 : vector<128x8xf32>
    %c0_84 = arith.constant 0 : index
    %c0_85 = arith.constant 0 : index
    %c1_86 = arith.constant 1 : index
    %c1_87 = arith.constant 1 : index
    %c0_88 = arith.constant 0 : index
    %67 = vector.load %arg11[%c0_84, %c0_85, %c1_86, %c1_87, %c0_88] : memref<4x2x10x10x4xf32, #tpu.memory_space<vmem>>, vector<1x2x8x8x4xf32>
    %68 = vector.shape_cast %67 : vector<1x2x8x8x4xf32> to vector<2x8x8x4xf32>
    %69 = vector.shape_cast %68 : vector<2x8x8x4xf32> to vector<128x4xf32>
    %c16 = arith.constant 16 : index
    %c0_89 = arith.constant 0 : index
    %70 = vector.load %arg4[%c16, %c0_89] : memref<36x8xf32, #tpu.memory_space<vmem>>, vector<4x8xf32>
    %cst_90 = arith.constant dense<0.000000e+00> : vector<128x8xf32>
    %71 = tpu.matmul %69, %70, %cst_90 {dimension_numbers = #tpu.dot_dimension_numbers<[1], [0], [0], [1], [0, 0, 1, 1], [], []>} : vector<128x4xf32>, vector<4x8xf32>, vector<128x8xf32> -> vector<128x8xf32>
    %72 = arith.addf %66, %71 : vector<128x8xf32>
    %c1_91 = arith.constant 1 : index
    %c0_92 = arith.constant 0 : index
    %c1_93 = arith.constant 1 : index
    %c1_94 = arith.constant 1 : index
    %c0_95 = arith.constant 0 : index
    %73 = vector.load %arg11[%c1_91, %c0_92, %c1_93, %c1_94, %c0_95] : memref<4x2x10x10x4xf32, #tpu.memory_space<vmem>>, vector<1x2x8x8x4xf32>
    %74 = vector.shape_cast %73 : vector<1x2x8x8x4xf32> to vector<2x8x8x4xf32>
    %75 = vector.shape_cast %74 : vector<2x8x8x4xf32> to vector<128x4xf32>
    %c20 = arith.constant 20 : index
    %c0_96 = arith.constant 0 : index
    %76 = vector.load %arg4[%c20, %c0_96] : memref<36x8xf32, #tpu.memory_space<vmem>>, vector<4x8xf32>
    %cst_97 = arith.constant dense<0.000000e+00> : vector<128x8xf32>
    %77 = tpu.matmul %75, %76, %cst_97 {dimension_numbers = #tpu.dot_dimension_numbers<[1], [0], [0], [1], [0, 0, 1, 1], [], []>} : vector<128x4xf32>, vector<4x8xf32>, vector<128x8xf32> -> vector<128x8xf32>
    %78 = arith.addf %72, %77 : vector<128x8xf32>
    %c3_98 = arith.constant 3 : index
    %c0_99 = arith.constant 0 : index
    %c1_100 = arith.constant 1 : index
    %c0_101 = arith.constant 0 : index
    %c0_102 = arith.constant 0 : index
    %79 = vector.load %arg11[%c3_98, %c0_99, %c1_100, %c0_101, %c0_102] : memref<4x2x10x10x4xf32, #tpu.memory_space<vmem>>, vector<1x2x8x8x4xf32>
    %80 = vector.shape_cast %79 : vector<1x2x8x8x4xf32> to vector<2x8x8x4xf32>
    %81 = vector.shape_cast %80 : vector<2x8x8x4xf32> to vector<128x4xf32>
    %c24 = arith.constant 24 : index
    %c0_103 = arith.constant 0 : index
    %82 = vector.load %arg4[%c24, %c0_103] : memref<36x8xf32, #tpu.memory_space<vmem>>, vector<4x8xf32>
    %cst_104 = arith.constant dense<0.000000e+00> : vector<128x8xf32>
    %83 = tpu.matmul %81, %82, %cst_104 {dimension_numbers = #tpu.dot_dimension_numbers<[1], [0], [0], [1], [0, 0, 1, 1], [], []>} : vector<128x4xf32>, vector<4x8xf32>, vector<128x8xf32> -> vector<128x8xf32>
    %84 = arith.addf %78, %83 : vector<128x8xf32>
    %c2_105 = arith.constant 2 : index
    %c0_106 = arith.constant 0 : index
    %c1_107 = arith.constant 1 : index
    %c1_108 = arith.constant 1 : index
    %c0_109 = arith.constant 0 : index
    %85 = vector.load %arg11[%c2_105, %c0_106, %c1_107, %c1_108, %c0_109] : memref<4x2x10x10x4xf32, #tpu.memory_space<vmem>>, vector<1x2x8x8x4xf32>
    %86 = vector.shape_cast %85 : vector<1x2x8x8x4xf32> to vector<2x8x8x4xf32>
    %87 = vector.shape_cast %86 : vector<2x8x8x4xf32> to vector<128x4xf32>
    %c28 = arith.constant 28 : index
    %c0_110 = arith.constant 0 : index
    %88 = vector.load %arg4[%c28, %c0_110] : memref<36x8xf32, #tpu.memory_space<vmem>>, vector<4x8xf32>
    %cst_111 = arith.constant dense<0.000000e+00> : vector<128x8xf32>
    %89 = tpu.matmul %87, %88, %cst_111 {dimension_numbers = #tpu.dot_dimension_numbers<[1], [0], [0], [1], [0, 0, 1, 1], [], []>} : vector<128x4xf32>, vector<4x8xf32>, vector<128x8xf32> -> vector<128x8xf32>
    %90 = arith.addf %84, %89 : vector<128x8xf32>
    %c3_112 = arith.constant 3 : index
    %c0_113 = arith.constant 0 : index
    %c1_114 = arith.constant 1 : index
    %c1_115 = arith.constant 1 : index
    %c0_116 = arith.constant 0 : index
    %91 = vector.load %arg11[%c3_112, %c0_113, %c1_114, %c1_115, %c0_116] : memref<4x2x10x10x4xf32, #tpu.memory_space<vmem>>, vector<1x2x8x8x4xf32>
    %92 = vector.shape_cast %91 : vector<1x2x8x8x4xf32> to vector<2x8x8x4xf32>
    %93 = vector.shape_cast %92 : vector<2x8x8x4xf32> to vector<128x4xf32>
    %c32 = arith.constant 32 : index
    %c0_117 = arith.constant 0 : index
    %94 = vector.load %arg4[%c32, %c0_117] : memref<36x8xf32, #tpu.memory_space<vmem>>, vector<4x8xf32>
    %cst_118 = arith.constant dense<0.000000e+00> : vector<128x8xf32>
    %95 = tpu.matmul %93, %94, %cst_118 {dimension_numbers = #tpu.dot_dimension_numbers<[1], [0], [0], [1], [0, 0, 1, 1], [], []>} : vector<128x4xf32>, vector<4x8xf32>, vector<128x8xf32> -> vector<128x8xf32>
    %96 = arith.addf %90, %95 : vector<128x8xf32>
    %cst_119 = arith.constant 0.000000e+00 : f32
    %97 = vector.broadcast %cst_119 : f32 to vector<128x8xf32>
    %c2_120 = arith.constant 2 : index
    %c0_121 = arith.constant 0 : index
    %c0_122 = arith.constant 0 : index
    %c1_123 = arith.constant 1 : index
    %c0_124 = arith.constant 0 : index
    %98 = vector.load %arg11[%c2_120, %c0_121, %c0_122, %c1_123, %c0_124] : memref<4x2x10x10x4xf32, #tpu.memory_space<vmem>>, vector<1x2x8x8x4xf32>
    %99 = vector.shape_cast %98 : vector<1x2x8x8x4xf32> to vector<2x8x8x4xf32>
    %100 = vector.shape_cast %99 : vector<2x8x8x4xf32> to vector<128x4xf32>
    %c0_125 = arith.constant 0 : index
    %c0_126 = arith.constant 0 : index
    %101 = vector.load %arg4[%c0_125, %c0_126] : memref<36x8xf32, #tpu.memory_space<vmem>>, vector<4x8xf32>
    %cst_127 = arith.constant dense<0.000000e+00> : vector<128x8xf32>
    %102 = tpu.matmul %100, %101, %cst_127 {dimension_numbers = #tpu.dot_dimension_numbers<[1], [0], [0], [1], [0, 0, 1, 1], [], []>} : vector<128x4xf32>, vector<4x8xf32>, vector<128x8xf32> -> vector<128x8xf32>
    %103 = arith.addf %97, %102 : vector<128x8xf32>
    %c3_128 = arith.constant 3 : index
    %c0_129 = arith.constant 0 : index
    %c0_130 = arith.constant 0 : index
    %c1_131 = arith.constant 1 : index
    %c0_132 = arith.constant 0 : index
    %104 = vector.load %arg11[%c3_128, %c0_129, %c0_130, %c1_131, %c0_132] : memref<4x2x10x10x4xf32, #tpu.memory_space<vmem>>, vector<1x2x8x8x4xf32>
    %105 = vector.shape_cast %104 : vector<1x2x8x8x4xf32> to vector<2x8x8x4xf32>
    %106 = vector.shape_cast %105 : vector<2x8x8x4xf32> to vector<128x4xf32>
    %c4_133 = arith.constant 4 : index
    %c0_134 = arith.constant 0 : index
    %107 = vector.load %arg4[%c4_133, %c0_134] : memref<36x8xf32, #tpu.memory_space<vmem>>, vector<4x8xf32>
    %cst_135 = arith.constant dense<0.000000e+00> : vector<128x8xf32>
    %108 = tpu.matmul %106, %107, %cst_135 {dimension_numbers = #tpu.dot_dimension_numbers<[1], [0], [0], [1], [0, 0, 1, 1], [], []>} : vector<128x4xf32>, vector<4x8xf32>, vector<128x8xf32> -> vector<128x8xf32>
    %109 = arith.addf %103, %108 : vector<128x8xf32>
    %c2_136 = arith.constant 2 : index
    %c0_137 = arith.constant 0 : index
    %c0_138 = arith.constant 0 : index
    %c2_139 = arith.constant 2 : index
    %c0_140 = arith.constant 0 : index
    %110 = vector.load %arg11[%c2_136, %c0_137, %c0_138, %c2_139, %c0_140] : memref<4x2x10x10x4xf32, #tpu.memory_space<vmem>>, vector<1x2x8x8x4xf32>
    %111 = vector.shape_cast %110 : vector<1x2x8x8x4xf32> to vector<2x8x8x4xf32>
    %112 = vector.shape_cast %111 : vector<2x8x8x4xf32> to vector<128x4xf32>
    %c8_141 = arith.constant 8 : index
    %c0_142 = arith.constant 0 : index
    %113 = vector.load %arg4[%c8_141, %c0_142] : memref<36x8xf32, #tpu.memory_space<vmem>>, vector<4x8xf32>
    %cst_143 = arith.constant dense<0.000000e+00> : vector<128x8xf32>
    %114 = tpu.matmul %112, %113, %cst_143 {dimension_numbers = #tpu.dot_dimension_numbers<[1], [0], [0], [1], [0, 0, 1, 1], [], []>} : vector<128x4xf32>, vector<4x8xf32>, vector<128x8xf32> -> vector<128x8xf32>
    %115 = arith.addf %109, %114 : vector<128x8xf32>
    %c0_144 = arith.constant 0 : index
    %c0_145 = arith.constant 0 : index
    %c1_146 = arith.constant 1 : index
    %c1_147 = arith.constant 1 : index
    %c0_148 = arith.constant 0 : index
    %116 = vector.load %arg11[%c0_144, %c0_145, %c1_146, %c1_147, %c0_148] : memref<4x2x10x10x4xf32, #tpu.memory_space<vmem>>, vector<1x2x8x8x4xf32>
    %117 = vector.shape_cast %116 : vector<1x2x8x8x4xf32> to vector<2x8x8x4xf32>
    %118 = vector.shape_cast %117 : vector<2x8x8x4xf32> to vector<128x4xf32>
    %c12_149 = arith.constant 12 : index
    %c0_150 = arith.constant 0 : index
    %119 = vector.load %arg4[%c12_149, %c0_150] : memref<36x8xf32, #tpu.memory_space<vmem>>, vector<4x8xf32>
    %cst_151 = arith.constant dense<0.000000e+00> : vector<128x8xf32>
    %120 = tpu.matmul %118, %119, %cst_151 {dimension_numbers = #tpu.dot_dimension_numbers<[1], [0], [0], [1], [0, 0, 1, 1], [], []>} : vector<128x4xf32>, vector<4x8xf32>, vector<128x8xf32> -> vector<128x8xf32>
    %121 = arith.addf %115, %120 : vector<128x8xf32>
    %c1_152 = arith.constant 1 : index
    %c0_153 = arith.constant 0 : index
    %c1_154 = arith.constant 1 : index
    %c1_155 = arith.constant 1 : index
    %c0_156 = arith.constant 0 : index
    %122 = vector.load %arg11[%c1_152, %c0_153, %c1_154, %c1_155, %c0_156] : memref<4x2x10x10x4xf32, #tpu.memory_space<vmem>>, vector<1x2x8x8x4xf32>
    %123 = vector.shape_cast %122 : vector<1x2x8x8x4xf32> to vector<2x8x8x4xf32>
    %124 = vector.shape_cast %123 : vector<2x8x8x4xf32> to vector<128x4xf32>
    %c16_157 = arith.constant 16 : index
    %c0_158 = arith.constant 0 : index
    %125 = vector.load %arg4[%c16_157, %c0_158] : memref<36x8xf32, #tpu.memory_space<vmem>>, vector<4x8xf32>
    %cst_159 = arith.constant dense<0.000000e+00> : vector<128x8xf32>
    %126 = tpu.matmul %124, %125, %cst_159 {dimension_numbers = #tpu.dot_dimension_numbers<[1], [0], [0], [1], [0, 0, 1, 1], [], []>} : vector<128x4xf32>, vector<4x8xf32>, vector<128x8xf32> -> vector<128x8xf32>
    %127 = arith.addf %121, %126 : vector<128x8xf32>
    %c0_160 = arith.constant 0 : index
    %c0_161 = arith.constant 0 : index
    %c1_162 = arith.constant 1 : index
    %c2_163 = arith.constant 2 : index
    %c0_164 = arith.constant 0 : index
    %128 = vector.load %arg11[%c0_160, %c0_161, %c1_162, %c2_163, %c0_164] : memref<4x2x10x10x4xf32, #tpu.memory_space<vmem>>, vector<1x2x8x8x4xf32>
    %129 = vector.shape_cast %128 : vector<1x2x8x8x4xf32> to vector<2x8x8x4xf32>
    %130 = vector.shape_cast %129 : vector<2x8x8x4xf32> to vector<128x4xf32>
    %c20_165 = arith.constant 20 : index
    %c0_166 = arith.constant 0 : index
    %131 = vector.load %arg4[%c20_165, %c0_166] : memref<36x8xf32, #tpu.memory_space<vmem>>, vector<4x8xf32>
    %cst_167 = arith.constant dense<0.000000e+00> : vector<128x8xf32>
    %132 = tpu.matmul %130, %131, %cst_167 {dimension_numbers = #tpu.dot_dimension_numbers<[1], [0], [0], [1], [0, 0, 1, 1], [], []>} : vector<128x4xf32>, vector<4x8xf32>, vector<128x8xf32> -> vector<128x8xf32>
    %133 = arith.addf %127, %132 : vector<128x8xf32>
    %c2_168 = arith.constant 2 : index
    %c0_169 = arith.constant 0 : index
    %c1_170 = arith.constant 1 : index
    %c1_171 = arith.constant 1 : index
    %c0_172 = arith.constant 0 : index
    %134 = vector.load %arg11[%c2_168, %c0_169, %c1_170, %c1_171, %c0_172] : memref<4x2x10x10x4xf32, #tpu.memory_space<vmem>>, vector<1x2x8x8x4xf32>
    %135 = vector.shape_cast %134 : vector<1x2x8x8x4xf32> to vector<2x8x8x4xf32>
    %136 = vector.shape_cast %135 : vector<2x8x8x4xf32> to vector<128x4xf32>
    %c24_173 = arith.constant 24 : index
    %c0_174 = arith.constant 0 : index
    %137 = vector.load %arg4[%c24_173, %c0_174] : memref<36x8xf32, #tpu.memory_space<vmem>>, vector<4x8xf32>
    %cst_175 = arith.constant dense<0.000000e+00> : vector<128x8xf32>
    %138 = tpu.matmul %136, %137, %cst_175 {dimension_numbers = #tpu.dot_dimension_numbers<[1], [0], [0], [1], [0, 0, 1, 1], [], []>} : vector<128x4xf32>, vector<4x8xf32>, vector<128x8xf32> -> vector<128x8xf32>
    %139 = arith.addf %133, %138 : vector<128x8xf32>
    %c3_176 = arith.constant 3 : index
    %c0_177 = arith.constant 0 : index
    %c1_178 = arith.constant 1 : index
    %c1_179 = arith.constant 1 : index
    %c0_180 = arith.constant 0 : index
    %140 = vector.load %arg11[%c3_176, %c0_177, %c1_178, %c1_179, %c0_180] : memref<4x2x10x10x4xf32, #tpu.memory_space<vmem>>, vector<1x2x8x8x4xf32>
    %141 = vector.shape_cast %140 : vector<1x2x8x8x4xf32> to vector<2x8x8x4xf32>
    %142 = vector.shape_cast %141 : vector<2x8x8x4xf32> to vector<128x4xf32>
    %c28_181 = arith.constant 28 : index
    %c0_182 = arith.constant 0 : index
    %143 = vector.load %arg4[%c28_181, %c0_182] : memref<36x8xf32, #tpu.memory_space<vmem>>, vector<4x8xf32>
    %cst_183 = arith.constant dense<0.000000e+00> : vector<128x8xf32>
    %144 = tpu.matmul %142, %143, %cst_183 {dimension_numbers = #tpu.dot_dimension_numbers<[1], [0], [0], [1], [0, 0, 1, 1], [], []>} : vector<128x4xf32>, vector<4x8xf32>, vector<128x8xf32> -> vector<128x8xf32>
    %145 = arith.addf %139, %144 : vector<128x8xf32>
    %c2_184 = arith.constant 2 : index
    %c0_185 = arith.constant 0 : index
    %c1_186 = arith.constant 1 : index
    %c2_187 = arith.constant 2 : index
    %c0_188 = arith.constant 0 : index
    %146 = vector.load %arg11[%c2_184, %c0_185, %c1_186, %c2_187, %c0_188] : memref<4x2x10x10x4xf32, #tpu.memory_space<vmem>>, vector<1x2x8x8x4xf32>
    %147 = vector.shape_cast %146 : vector<1x2x8x8x4xf32> to vector<2x8x8x4xf32>
    %148 = vector.shape_cast %147 : vector<2x8x8x4xf32> to vector<128x4xf32>
    %c32_189 = arith.constant 32 : index
    %c0_190 = arith.constant 0 : index
    %149 = vector.load %arg4[%c32_189, %c0_190] : memref<36x8xf32, #tpu.memory_space<vmem>>, vector<4x8xf32>
    %cst_191 = arith.constant dense<0.000000e+00> : vector<128x8xf32>
    %150 = tpu.matmul %148, %149, %cst_191 {dimension_numbers = #tpu.dot_dimension_numbers<[1], [0], [0], [1], [0, 0, 1, 1], [], []>} : vector<128x4xf32>, vector<4x8xf32>, vector<128x8xf32> -> vector<128x8xf32>
    %151 = arith.addf %145, %150 : vector<128x8xf32>
    %cst_192 = arith.constant 0.000000e+00 : f32
    %152 = vector.broadcast %cst_192 : f32 to vector<128x8xf32>
    %c1_193 = arith.constant 1 : index
    %c0_194 = arith.constant 0 : index
    %c1_195 = arith.constant 1 : index
    %c0_196 = arith.constant 0 : index
    %c0_197 = arith.constant 0 : index
    %153 = vector.load %arg11[%c1_193, %c0_194, %c1_195, %c0_196, %c0_197] : memref<4x2x10x10x4xf32, #tpu.memory_space<vmem>>, vector<1x2x8x8x4xf32>
    %154 = vector.shape_cast %153 : vector<1x2x8x8x4xf32> to vector<2x8x8x4xf32>
    %155 = vector.shape_cast %154 : vector<2x8x8x4xf32> to vector<128x4xf32>
    %c0_198 = arith.constant 0 : index
    %c0_199 = arith.constant 0 : index
    %156 = vector.load %arg4[%c0_198, %c0_199] : memref<36x8xf32, #tpu.memory_space<vmem>>, vector<4x8xf32>
    %cst_200 = arith.constant dense<0.000000e+00> : vector<128x8xf32>
    %157 = tpu.matmul %155, %156, %cst_200 {dimension_numbers = #tpu.dot_dimension_numbers<[1], [0], [0], [1], [0, 0, 1, 1], [], []>} : vector<128x4xf32>, vector<4x8xf32>, vector<128x8xf32> -> vector<128x8xf32>
    %158 = arith.addf %152, %157 : vector<128x8xf32>
    %c0_201 = arith.constant 0 : index
    %c0_202 = arith.constant 0 : index
    %c1_203 = arith.constant 1 : index
    %c1_204 = arith.constant 1 : index
    %c0_205 = arith.constant 0 : index
    %159 = vector.load %arg11[%c0_201, %c0_202, %c1_203, %c1_204, %c0_205] : memref<4x2x10x10x4xf32, #tpu.memory_space<vmem>>, vector<1x2x8x8x4xf32>
    %160 = vector.shape_cast %159 : vector<1x2x8x8x4xf32> to vector<2x8x8x4xf32>
    %161 = vector.shape_cast %160 : vector<2x8x8x4xf32> to vector<128x4xf32>
    %c4_206 = arith.constant 4 : index
    %c0_207 = arith.constant 0 : index
    %162 = vector.load %arg4[%c4_206, %c0_207] : memref<36x8xf32, #tpu.memory_space<vmem>>, vector<4x8xf32>
    %cst_208 = arith.constant dense<0.000000e+00> : vector<128x8xf32>
    %163 = tpu.matmul %161, %162, %cst_208 {dimension_numbers = #tpu.dot_dimension_numbers<[1], [0], [0], [1], [0, 0, 1, 1], [], []>} : vector<128x4xf32>, vector<4x8xf32>, vector<128x8xf32> -> vector<128x8xf32>
    %164 = arith.addf %158, %163 : vector<128x8xf32>
    %c1_209 = arith.constant 1 : index
    %c0_210 = arith.constant 0 : index
    %c1_211 = arith.constant 1 : index
    %c1_212 = arith.constant 1 : index
    %c0_213 = arith.constant 0 : index
    %165 = vector.load %arg11[%c1_209, %c0_210, %c1_211, %c1_212, %c0_213] : memref<4x2x10x10x4xf32, #tpu.memory_space<vmem>>, vector<1x2x8x8x4xf32>
    %166 = vector.shape_cast %165 : vector<1x2x8x8x4xf32> to vector<2x8x8x4xf32>
    %167 = vector.shape_cast %166 : vector<2x8x8x4xf32> to vector<128x4xf32>
    %c8_214 = arith.constant 8 : index
    %c0_215 = arith.constant 0 : index
    %168 = vector.load %arg4[%c8_214, %c0_215] : memref<36x8xf32, #tpu.memory_space<vmem>>, vector<4x8xf32>
    %cst_216 = arith.constant dense<0.000000e+00> : vector<128x8xf32>
    %169 = tpu.matmul %167, %168, %cst_216 {dimension_numbers = #tpu.dot_dimension_numbers<[1], [0], [0], [1], [0, 0, 1, 1], [], []>} : vector<128x4xf32>, vector<4x8xf32>, vector<128x8xf32> -> vector<128x8xf32>
    %170 = arith.addf %164, %169 : vector<128x8xf32>
    %c3_217 = arith.constant 3 : index
    %c0_218 = arith.constant 0 : index
    %c1_219 = arith.constant 1 : index
    %c0_220 = arith.constant 0 : index
    %c0_221 = arith.constant 0 : index
    %171 = vector.load %arg11[%c3_217, %c0_218, %c1_219, %c0_220, %c0_221] : memref<4x2x10x10x4xf32, #tpu.memory_space<vmem>>, vector<1x2x8x8x4xf32>
    %172 = vector.shape_cast %171 : vector<1x2x8x8x4xf32> to vector<2x8x8x4xf32>
    %173 = vector.shape_cast %172 : vector<2x8x8x4xf32> to vector<128x4xf32>
    %c12_222 = arith.constant 12 : index
    %c0_223 = arith.constant 0 : index
    %174 = vector.load %arg4[%c12_222, %c0_223] : memref<36x8xf32, #tpu.memory_space<vmem>>, vector<4x8xf32>
    %cst_224 = arith.constant dense<0.000000e+00> : vector<128x8xf32>
    %175 = tpu.matmul %173, %174, %cst_224 {dimension_numbers = #tpu.dot_dimension_numbers<[1], [0], [0], [1], [0, 0, 1, 1], [], []>} : vector<128x4xf32>, vector<4x8xf32>, vector<128x8xf32> -> vector<128x8xf32>
    %176 = arith.addf %170, %175 : vector<128x8xf32>
    %c2_225 = arith.constant 2 : index
    %c0_226 = arith.constant 0 : index
    %c1_227 = arith.constant 1 : index
    %c1_228 = arith.constant 1 : index
    %c0_229 = arith.constant 0 : index
    %177 = vector.load %arg11[%c2_225, %c0_226, %c1_227, %c1_228, %c0_229] : memref<4x2x10x10x4xf32, #tpu.memory_space<vmem>>, vector<1x2x8x8x4xf32>
    %178 = vector.shape_cast %177 : vector<1x2x8x8x4xf32> to vector<2x8x8x4xf32>
    %179 = vector.shape_cast %178 : vector<2x8x8x4xf32> to vector<128x4xf32>
    %c16_230 = arith.constant 16 : index
    %c0_231 = arith.constant 0 : index
    %180 = vector.load %arg4[%c16_230, %c0_231] : memref<36x8xf32, #tpu.memory_space<vmem>>, vector<4x8xf32>
    %cst_232 = arith.constant dense<0.000000e+00> : vector<128x8xf32>
    %181 = tpu.matmul %179, %180, %cst_232 {dimension_numbers = #tpu.dot_dimension_numbers<[1], [0], [0], [1], [0, 0, 1, 1], [], []>} : vector<128x4xf32>, vector<4x8xf32>, vector<128x8xf32> -> vector<128x8xf32>
    %182 = arith.addf %176, %181 : vector<128x8xf32>
    %c3_233 = arith.constant 3 : index
    %c0_234 = arith.constant 0 : index
    %c1_235 = arith.constant 1 : index
    %c1_236 = arith.constant 1 : index
    %c0_237 = arith.constant 0 : index
    %183 = vector.load %arg11[%c3_233, %c0_234, %c1_235, %c1_236, %c0_237] : memref<4x2x10x10x4xf32, #tpu.memory_space<vmem>>, vector<1x2x8x8x4xf32>
    %184 = vector.shape_cast %183 : vector<1x2x8x8x4xf32> to vector<2x8x8x4xf32>
    %185 = vector.shape_cast %184 : vector<2x8x8x4xf32> to vector<128x4xf32>
    %c20_238 = arith.constant 20 : index
    %c0_239 = arith.constant 0 : index
    %186 = vector.load %arg4[%c20_238, %c0_239] : memref<36x8xf32, #tpu.memory_space<vmem>>, vector<4x8xf32>
    %cst_240 = arith.constant dense<0.000000e+00> : vector<128x8xf32>
    %187 = tpu.matmul %185, %186, %cst_240 {dimension_numbers = #tpu.dot_dimension_numbers<[1], [0], [0], [1], [0, 0, 1, 1], [], []>} : vector<128x4xf32>, vector<4x8xf32>, vector<128x8xf32> -> vector<128x8xf32>
    %188 = arith.addf %182, %187 : vector<128x8xf32>
    %c1_241 = arith.constant 1 : index
    %c0_242 = arith.constant 0 : index
    %c2_243 = arith.constant 2 : index
    %c0_244 = arith.constant 0 : index
    %c0_245 = arith.constant 0 : index
    %189 = vector.load %arg11[%c1_241, %c0_242, %c2_243, %c0_244, %c0_245] : memref<4x2x10x10x4xf32, #tpu.memory_space<vmem>>, vector<1x2x8x8x4xf32>
    %190 = vector.shape_cast %189 : vector<1x2x8x8x4xf32> to vector<2x8x8x4xf32>
    %191 = vector.shape_cast %190 : vector<2x8x8x4xf32> to vector<128x4xf32>
    %c24_246 = arith.constant 24 : index
    %c0_247 = arith.constant 0 : index
    %192 = vector.load %arg4[%c24_246, %c0_247] : memref<36x8xf32, #tpu.memory_space<vmem>>, vector<4x8xf32>
    %cst_248 = arith.constant dense<0.000000e+00> : vector<128x8xf32>
    %193 = tpu.matmul %191, %192, %cst_248 {dimension_numbers = #tpu.dot_dimension_numbers<[1], [0], [0], [1], [0, 0, 1, 1], [], []>} : vector<128x4xf32>, vector<4x8xf32>, vector<128x8xf32> -> vector<128x8xf32>
    %194 = arith.addf %188, %193 : vector<128x8xf32>
    %c0_249 = arith.constant 0 : index
    %c0_250 = arith.constant 0 : index
    %c2_251 = arith.constant 2 : index
    %c1_252 = arith.constant 1 : index
    %c0_253 = arith.constant 0 : index
    %195 = vector.load %arg11[%c0_249, %c0_250, %c2_251, %c1_252, %c0_253] : memref<4x2x10x10x4xf32, #tpu.memory_space<vmem>>, vector<1x2x8x8x4xf32>
    %196 = vector.shape_cast %195 : vector<1x2x8x8x4xf32> to vector<2x8x8x4xf32>
    %197 = vector.shape_cast %196 : vector<2x8x8x4xf32> to vector<128x4xf32>
    %c28_254 = arith.constant 28 : index
    %c0_255 = arith.constant 0 : index
    %198 = vector.load %arg4[%c28_254, %c0_255] : memref<36x8xf32, #tpu.memory_space<vmem>>, vector<4x8xf32>
    %cst_256 = arith.constant dense<0.000000e+00> : vector<128x8xf32>
    %199 = tpu.matmul %197, %198, %cst_256 {dimension_numbers = #tpu.dot_dimension_numbers<[1], [0], [0], [1], [0, 0, 1, 1], [], []>} : vector<128x4xf32>, vector<4x8xf32>, vector<128x8xf32> -> vector<128x8xf32>
    %200 = arith.addf %194, %199 : vector<128x8xf32>
    %c1_257 = arith.constant 1 : index
    %c0_258 = arith.constant 0 : index
    %c2_259 = arith.constant 2 : index
    %c1_260 = arith.constant 1 : index
    %c0_261 = arith.constant 0 : index
    %201 = vector.load %arg11[%c1_257, %c0_258, %c2_259, %c1_260, %c0_261] : memref<4x2x10x10x4xf32, #tpu.memory_space<vmem>>, vector<1x2x8x8x4xf32>
    %202 = vector.shape_cast %201 : vector<1x2x8x8x4xf32> to vector<2x8x8x4xf32>
    %203 = vector.shape_cast %202 : vector<2x8x8x4xf32> to vector<128x4xf32>
    %c32_262 = arith.constant 32 : index
    %c0_263 = arith.constant 0 : index
    %204 = vector.load %arg4[%c32_262, %c0_263] : memref<36x8xf32, #tpu.memory_space<vmem>>, vector<4x8xf32>
    %cst_264 = arith.constant dense<0.000000e+00> : vector<128x8xf32>
    %205 = tpu.matmul %203, %204, %cst_264 {dimension_numbers = #tpu.dot_dimension_numbers<[1], [0], [0], [1], [0, 0, 1, 1], [], []>} : vector<128x4xf32>, vector<4x8xf32>, vector<128x8xf32> -> vector<128x8xf32>
    %206 = arith.addf %200, %205 : vector<128x8xf32>
    %cst_265 = arith.constant 0.000000e+00 : f32
    %207 = vector.broadcast %cst_265 : f32 to vector<128x8xf32>
    %c0_266 = arith.constant 0 : index
    %c0_267 = arith.constant 0 : index
    %c1_268 = arith.constant 1 : index
    %c1_269 = arith.constant 1 : index
    %c0_270 = arith.constant 0 : index
    %208 = vector.load %arg11[%c0_266, %c0_267, %c1_268, %c1_269, %c0_270] : memref<4x2x10x10x4xf32, #tpu.memory_space<vmem>>, vector<1x2x8x8x4xf32>
    %209 = vector.shape_cast %208 : vector<1x2x8x8x4xf32> to vector<2x8x8x4xf32>
    %210 = vector.shape_cast %209 : vector<2x8x8x4xf32> to vector<128x4xf32>
    %c0_271 = arith.constant 0 : index
    %c0_272 = arith.constant 0 : index
    %211 = vector.load %arg4[%c0_271, %c0_272] : memref<36x8xf32, #tpu.memory_space<vmem>>, vector<4x8xf32>
    %cst_273 = arith.constant dense<0.000000e+00> : vector<128x8xf32>
    %212 = tpu.matmul %210, %211, %cst_273 {dimension_numbers = #tpu.dot_dimension_numbers<[1], [0], [0], [1], [0, 0, 1, 1], [], []>} : vector<128x4xf32>, vector<4x8xf32>, vector<128x8xf32> -> vector<128x8xf32>
    %213 = arith.addf %207, %212 : vector<128x8xf32>
    %c1_274 = arith.constant 1 : index
    %c0_275 = arith.constant 0 : index
    %c1_276 = arith.constant 1 : index
    %c1_277 = arith.constant 1 : index
    %c0_278 = arith.constant 0 : index
    %214 = vector.load %arg11[%c1_274, %c0_275, %c1_276, %c1_277, %c0_278] : memref<4x2x10x10x4xf32, #tpu.memory_space<vmem>>, vector<1x2x8x8x4xf32>
    %215 = vector.shape_cast %214 : vector<1x2x8x8x4xf32> to vector<2x8x8x4xf32>
    %216 = vector.shape_cast %215 : vector<2x8x8x4xf32> to vector<128x4xf32>
    %c4_279 = arith.constant 4 : index
    %c0_280 = arith.constant 0 : index
    %217 = vector.load %arg4[%c4_279, %c0_280] : memref<36x8xf32, #tpu.memory_space<vmem>>, vector<4x8xf32>
    %cst_281 = arith.constant dense<0.000000e+00> : vector<128x8xf32>
    %218 = tpu.matmul %216, %217, %cst_281 {dimension_numbers = #tpu.dot_dimension_numbers<[1], [0], [0], [1], [0, 0, 1, 1], [], []>} : vector<128x4xf32>, vector<4x8xf32>, vector<128x8xf32> -> vector<128x8xf32>
    %219 = arith.addf %213, %218 : vector<128x8xf32>
    %c0_282 = arith.constant 0 : index
    %c0_283 = arith.constant 0 : index
    %c1_284 = arith.constant 1 : index
    %c2_285 = arith.constant 2 : index
    %c0_286 = arith.constant 0 : index
    %220 = vector.load %arg11[%c0_282, %c0_283, %c1_284, %c2_285, %c0_286] : memref<4x2x10x10x4xf32, #tpu.memory_space<vmem>>, vector<1x2x8x8x4xf32>
    %221 = vector.shape_cast %220 : vector<1x2x8x8x4xf32> to vector<2x8x8x4xf32>
    %222 = vector.shape_cast %221 : vector<2x8x8x4xf32> to vector<128x4xf32>
    %c8_287 = arith.constant 8 : index
    %c0_288 = arith.constant 0 : index
    %223 = vector.load %arg4[%c8_287, %c0_288] : memref<36x8xf32, #tpu.memory_space<vmem>>, vector<4x8xf32>
    %cst_289 = arith.constant dense<0.000000e+00> : vector<128x8xf32>
    %224 = tpu.matmul %222, %223, %cst_289 {dimension_numbers = #tpu.dot_dimension_numbers<[1], [0], [0], [1], [0, 0, 1, 1], [], []>} : vector<128x4xf32>, vector<4x8xf32>, vector<128x8xf32> -> vector<128x8xf32>
    %225 = arith.addf %219, %224 : vector<128x8xf32>
    %c2_290 = arith.constant 2 : index
    %c0_291 = arith.constant 0 : index
    %c1_292 = arith.constant 1 : index
    %c1_293 = arith.constant 1 : index
    %c0_294 = arith.constant 0 : index
    %226 = vector.load %arg11[%c2_290, %c0_291, %c1_292, %c1_293, %c0_294] : memref<4x2x10x10x4xf32, #tpu.memory_space<vmem>>, vector<1x2x8x8x4xf32>
    %227 = vector.shape_cast %226 : vector<1x2x8x8x4xf32> to vector<2x8x8x4xf32>
    %228 = vector.shape_cast %227 : vector<2x8x8x4xf32> to vector<128x4xf32>
    %c12_295 = arith.constant 12 : index
    %c0_296 = arith.constant 0 : index
    %229 = vector.load %arg4[%c12_295, %c0_296] : memref<36x8xf32, #tpu.memory_space<vmem>>, vector<4x8xf32>
    %cst_297 = arith.constant dense<0.000000e+00> : vector<128x8xf32>
    %230 = tpu.matmul %228, %229, %cst_297 {dimension_numbers = #tpu.dot_dimension_numbers<[1], [0], [0], [1], [0, 0, 1, 1], [], []>} : vector<128x4xf32>, vector<4x8xf32>, vector<128x8xf32> -> vector<128x8xf32>
    %231 = arith.addf %225, %230 : vector<128x8xf32>
    %c3_298 = arith.constant 3 : index
    %c0_299 = arith.constant 0 : index
    %c1_300 = arith.constant 1 : index
    %c1_301 = arith.constant 1 : index
    %c0_302 = arith.constant 0 : index
    %232 = vector.load %arg11[%c3_298, %c0_299, %c1_300, %c1_301, %c0_302] : memref<4x2x10x10x4xf32, #tpu.memory_space<vmem>>, vector<1x2x8x8x4xf32>
    %233 = vector.shape_cast %232 : vector<1x2x8x8x4xf32> to vector<2x8x8x4xf32>
    %234 = vector.shape_cast %233 : vector<2x8x8x4xf32> to vector<128x4xf32>
    %c16_303 = arith.constant 16 : index
    %c0_304 = arith.constant 0 : index
    %235 = vector.load %arg4[%c16_303, %c0_304] : memref<36x8xf32, #tpu.memory_space<vmem>>, vector<4x8xf32>
    %cst_305 = arith.constant dense<0.000000e+00> : vector<128x8xf32>
    %236 = tpu.matmul %234, %235, %cst_305 {dimension_numbers = #tpu.dot_dimension_numbers<[1], [0], [0], [1], [0, 0, 1, 1], [], []>} : vector<128x4xf32>, vector<4x8xf32>, vector<128x8xf32> -> vector<128x8xf32>
    %237 = arith.addf %231, %236 : vector<128x8xf32>
    %c2_306 = arith.constant 2 : index
    %c0_307 = arith.constant 0 : index
    %c1_308 = arith.constant 1 : index
    %c2_309 = arith.constant 2 : index
    %c0_310 = arith.constant 0 : index
    %238 = vector.load %arg11[%c2_306, %c0_307, %c1_308, %c2_309, %c0_310] : memref<4x2x10x10x4xf32, #tpu.memory_space<vmem>>, vector<1x2x8x8x4xf32>
    %239 = vector.shape_cast %238 : vector<1x2x8x8x4xf32> to vector<2x8x8x4xf32>
    %240 = vector.shape_cast %239 : vector<2x8x8x4xf32> to vector<128x4xf32>
    %c20_311 = arith.constant 20 : index
    %c0_312 = arith.constant 0 : index
    %241 = vector.load %arg4[%c20_311, %c0_312] : memref<36x8xf32, #tpu.memory_space<vmem>>, vector<4x8xf32>
    %cst_313 = arith.constant dense<0.000000e+00> : vector<128x8xf32>
    %242 = tpu.matmul %240, %241, %cst_313 {dimension_numbers = #tpu.dot_dimension_numbers<[1], [0], [0], [1], [0, 0, 1, 1], [], []>} : vector<128x4xf32>, vector<4x8xf32>, vector<128x8xf32> -> vector<128x8xf32>
    %243 = arith.addf %237, %242 : vector<128x8xf32>
    %c0_314 = arith.constant 0 : index
    %c0_315 = arith.constant 0 : index
    %c2_316 = arith.constant 2 : index
    %c1_317 = arith.constant 1 : index
    %c0_318 = arith.constant 0 : index
    %244 = vector.load %arg11[%c0_314, %c0_315, %c2_316, %c1_317, %c0_318] : memref<4x2x10x10x4xf32, #tpu.memory_space<vmem>>, vector<1x2x8x8x4xf32>
    %245 = vector.shape_cast %244 : vector<1x2x8x8x4xf32> to vector<2x8x8x4xf32>
    %246 = vector.shape_cast %245 : vector<2x8x8x4xf32> to vector<128x4xf32>
    %c24_319 = arith.constant 24 : index
    %c0_320 = arith.constant 0 : index
    %247 = vector.load %arg4[%c24_319, %c0_320] : memref<36x8xf32, #tpu.memory_space<vmem>>, vector<4x8xf32>
    %cst_321 = arith.constant dense<0.000000e+00> : vector<128x8xf32>
    %248 = tpu.matmul %246, %247, %cst_321 {dimension_numbers = #tpu.dot_dimension_numbers<[1], [0], [0], [1], [0, 0, 1, 1], [], []>} : vector<128x4xf32>, vector<4x8xf32>, vector<128x8xf32> -> vector<128x8xf32>
    %249 = arith.addf %243, %248 : vector<128x8xf32>
    %c1_322 = arith.constant 1 : index
    %c0_323 = arith.constant 0 : index
    %c2_324 = arith.constant 2 : index
    %c1_325 = arith.constant 1 : index
    %c0_326 = arith.constant 0 : index
    %250 = vector.load %arg11[%c1_322, %c0_323, %c2_324, %c1_325, %c0_326] : memref<4x2x10x10x4xf32, #tpu.memory_space<vmem>>, vector<1x2x8x8x4xf32>
    %251 = vector.shape_cast %250 : vector<1x2x8x8x4xf32> to vector<2x8x8x4xf32>
    %252 = vector.shape_cast %251 : vector<2x8x8x4xf32> to vector<128x4xf32>
    %c28_327 = arith.constant 28 : index
    %c0_328 = arith.constant 0 : index
    %253 = vector.load %arg4[%c28_327, %c0_328] : memref<36x8xf32, #tpu.memory_space<vmem>>, vector<4x8xf32>
    %cst_329 = arith.constant dense<0.000000e+00> : vector<128x8xf32>
    %254 = tpu.matmul %252, %253, %cst_329 {dimension_numbers = #tpu.dot_dimension_numbers<[1], [0], [0], [1], [0, 0, 1, 1], [], []>} : vector<128x4xf32>, vector<4x8xf32>, vector<128x8xf32> -> vector<128x8xf32>
    %255 = arith.addf %249, %254 : vector<128x8xf32>
    %c0_330 = arith.constant 0 : index
    %c0_331 = arith.constant 0 : index
    %c2_332 = arith.constant 2 : index
    %c2_333 = arith.constant 2 : index
    %c0_334 = arith.constant 0 : index
    %256 = vector.load %arg11[%c0_330, %c0_331, %c2_332, %c2_333, %c0_334] : memref<4x2x10x10x4xf32, #tpu.memory_space<vmem>>, vector<1x2x8x8x4xf32>
    %257 = vector.shape_cast %256 : vector<1x2x8x8x4xf32> to vector<2x8x8x4xf32>
    %258 = vector.shape_cast %257 : vector<2x8x8x4xf32> to vector<128x4xf32>
    %c32_335 = arith.constant 32 : index
    %c0_336 = arith.constant 0 : index
    %259 = vector.load %arg4[%c32_335, %c0_336] : memref<36x8xf32, #tpu.memory_space<vmem>>, vector<4x8xf32>
    %cst_337 = arith.constant dense<0.000000e+00> : vector<128x8xf32>
    %260 = tpu.matmul %258, %259, %cst_337 {dimension_numbers = #tpu.dot_dimension_numbers<[1], [0], [0], [1], [0, 0, 1, 1], [], []>} : vector<128x4xf32>, vector<4x8xf32>, vector<128x8xf32> -> vector<128x8xf32>
    %261 = arith.addf %255, %260 : vector<128x8xf32>
    %cst_338 = arith.constant 0.000000e+00 : f32
    %262 = vector.broadcast %cst_338 : f32 to vector<1x8xf32>
    %cst_339 = arith.constant dense<0.000000e+00> : vector<8xf32>
    %263 = vector.multi_reduction <add>, %96, %cst_339 [0] : vector<128x8xf32> to vector<8xf32>
    %264 = vector.shape_cast %263 : vector<8xf32> to vector<1x8xf32>
    %265 = arith.addf %262, %264 : vector<1x8xf32>
    %cst_340 = arith.constant dense<0.000000e+00> : vector<8xf32>
    %266 = vector.multi_reduction <add>, %151, %cst_340 [0] : vector<128x8xf32> to vector<8xf32>
    %267 = vector.shape_cast %266 : vector<8xf32> to vector<1x8xf32>
    %268 = arith.addf %265, %267 : vector<1x8xf32>
    %cst_341 = arith.constant dense<0.000000e+00> : vector<8xf32>
    %269 = vector.multi_reduction <add>, %206, %cst_341 [0] : vector<128x8xf32> to vector<8xf32>
    %270 = vector.shape_cast %269 : vector<8xf32> to vector<1x8xf32>
    %271 = arith.addf %268, %270 : vector<1x8xf32>
    %cst_342 = arith.constant dense<0.000000e+00> : vector<8xf32>
    %272 = vector.multi_reduction <add>, %261, %cst_342 [0] : vector<128x8xf32> to vector<8xf32>
    %273 = vector.shape_cast %272 : vector<8xf32> to vector<1x8xf32>
    %274 = arith.addf %271, %273 : vector<1x8xf32>
    %cst_343 = arith.constant 0.001953125 : f32
    %275 = vector.broadcast %cst_343 : f32 to vector<1x8xf32>
    %276 = arith.mulf %274, %275 : vector<1x8xf32>
    %cst_344 = arith.constant 0.000000e+00 : f32
    %277 = vector.broadcast %cst_344 : f32 to vector<1x8xf32>
    %278 = vector.broadcast %276 : vector<1x8xf32> to vector<128x8xf32>
    %279 = arith.subf %96, %278 : vector<128x8xf32>
    %280 = arith.mulf %279, %279 : vector<128x8xf32>
    %cst_345 = arith.constant dense<0.000000e+00> : vector<8xf32>
    %281 = vector.multi_reduction <add>, %280, %cst_345 [0] : vector<128x8xf32> to vector<8xf32>
    %282 = vector.shape_cast %281 : vector<8xf32> to vector<1x8xf32>
    %283 = arith.addf %277, %282 : vector<1x8xf32>
    %284 = vector.broadcast %276 : vector<1x8xf32> to vector<128x8xf32>
    %285 = arith.subf %151, %284 : vector<128x8xf32>
    %286 = arith.mulf %285, %285 : vector<128x8xf32>
    %cst_346 = arith.constant dense<0.000000e+00> : vector<8xf32>
    %287 = vector.multi_reduction <add>, %286, %cst_346 [0] : vector<128x8xf32> to vector<8xf32>
    %288 = vector.shape_cast %287 : vector<8xf32> to vector<1x8xf32>
    %289 = arith.addf %283, %288 : vector<1x8xf32>
    %290 = vector.broadcast %276 : vector<1x8xf32> to vector<128x8xf32>
    %291 = arith.subf %206, %290 : vector<128x8xf32>
    %292 = arith.mulf %291, %291 : vector<128x8xf32>
    %cst_347 = arith.constant dense<0.000000e+00> : vector<8xf32>
    %293 = vector.multi_reduction <add>, %292, %cst_347 [0] : vector<128x8xf32> to vector<8xf32>
    %294 = vector.shape_cast %293 : vector<8xf32> to vector<1x8xf32>
    %295 = arith.addf %289, %294 : vector<1x8xf32>
    %296 = vector.broadcast %276 : vector<1x8xf32> to vector<128x8xf32>
    %297 = arith.subf %261, %296 : vector<128x8xf32>
    %298 = arith.mulf %297, %297 : vector<128x8xf32>
    %cst_348 = arith.constant dense<0.000000e+00> : vector<8xf32>
    %299 = vector.multi_reduction <add>, %298, %cst_348 [0] : vector<128x8xf32> to vector<8xf32>
    %300 = vector.shape_cast %299 : vector<8xf32> to vector<1x8xf32>
    %301 = arith.addf %295, %300 : vector<1x8xf32>
    %cst_349 = arith.constant 0.001953125 : f32
    %302 = vector.broadcast %cst_349 : f32 to vector<1x8xf32>
    %303 = arith.mulf %301, %302 : vector<1x8xf32>
    %c0_350 = arith.constant 0 : index
    %c0_351 = arith.constant 0 : index
    %304 = vector.load %arg5[%c0_350, %c0_351] : memref<1x8xf32, #tpu.memory_space<vmem>>, vector<1x8xf32>
    %cst_352 = arith.constant 9.99999974E-6 : f32
    %305 = vector.broadcast %cst_352 : f32 to vector<1x8xf32>
    %306 = arith.addf %303, %305 : vector<1x8xf32>
    %307 = math.rsqrt %306 : vector<1x8xf32>
    %308 = arith.mulf %304, %307 : vector<1x8xf32>
    %c0_353 = arith.constant 0 : index
    %c0_354 = arith.constant 0 : index
    %309 = vector.load %arg6[%c0_353, %c0_354] : memref<1x8xf32, #tpu.memory_space<vmem>>, vector<1x8xf32>
    %310 = arith.mulf %276, %308 : vector<1x8xf32>
    %311 = arith.subf %309, %310 : vector<1x8xf32>
    %312 = vector.broadcast %308 : vector<1x8xf32> to vector<128x8xf32>
    %313 = arith.mulf %96, %312 : vector<128x8xf32>
    %314 = vector.broadcast %311 : vector<1x8xf32> to vector<128x8xf32>
    %315 = arith.addf %313, %314 : vector<128x8xf32>
    %cst_355 = arith.constant 0.000000e+00 : f32
    %316 = vector.broadcast %cst_355 : f32 to vector<128x8xf32>
    %317 = arith.maximumf %315, %316 : vector<128x8xf32>
    %318 = vector.broadcast %308 : vector<1x8xf32> to vector<128x8xf32>
    %319 = arith.mulf %151, %318 : vector<128x8xf32>
    %320 = vector.broadcast %311 : vector<1x8xf32> to vector<128x8xf32>
    %321 = arith.addf %319, %320 : vector<128x8xf32>
    %cst_356 = arith.constant 0.000000e+00 : f32
    %322 = vector.broadcast %cst_356 : f32 to vector<128x8xf32>
    %323 = arith.maximumf %321, %322 : vector<128x8xf32>
    %324 = vector.broadcast %308 : vector<1x8xf32> to vector<128x8xf32>
    %325 = arith.mulf %206, %324 : vector<128x8xf32>
    %326 = vector.broadcast %311 : vector<1x8xf32> to vector<128x8xf32>
    %327 = arith.addf %325, %326 : vector<128x8xf32>
    %cst_357 = arith.constant 0.000000e+00 : f32
    %328 = vector.broadcast %cst_357 : f32 to vector<128x8xf32>
    %329 = arith.maximumf %327, %328 : vector<128x8xf32>
    %330 = vector.broadcast %308 : vector<1x8xf32> to vector<128x8xf32>
    %331 = arith.mulf %261, %330 : vector<128x8xf32>
    %332 = vector.broadcast %311 : vector<1x8xf32> to vector<128x8xf32>
    %333 = arith.addf %331, %332 : vector<128x8xf32>
    %cst_358 = arith.constant 0.000000e+00 : f32
    %334 = vector.broadcast %cst_358 : f32 to vector<128x8xf32>
    %335 = arith.maximumf %333, %334 : vector<128x8xf32>
    %336 = vector.shape_cast %317 : vector<128x8xf32> to vector<2x8x8x8xf32>
    %c0_359 = arith.constant 0 : index
    %c0_360 = arith.constant 0 : index
    %c1_361 = arith.constant 1 : index
    %c1_362 = arith.constant 1 : index
    %c0_363 = arith.constant 0 : index
    %337 = vector.load %arg12[%c0_359, %c0_360, %c1_361, %c1_362, %c0_363] : memref<4x2x10x10x8xf32, #tpu.memory_space<vmem>>, vector<1x2x8x8x8xf32>
    %338 = vector.shape_cast %337 : vector<1x2x8x8x8xf32> to vector<2x8x8x8xf32>
    %339 = vector.shape_cast %336 : vector<2x8x8x8xf32> to vector<1x2x8x8x8xf32>
    tpu.vector_store %arg12[%c0_359, %c0_360, %c1_361, %c1_362, %c0_363], %339 {strides = array<i32>} : memref<4x2x10x10x8xf32, #tpu.memory_space<vmem>>, vector<1x2x8x8x8xf32>,
    %340 = vector.shape_cast %323 : vector<128x8xf32> to vector<2x8x8x8xf32>
    %c1_364 = arith.constant 1 : index
    %c0_365 = arith.constant 0 : index
    %c1_366 = arith.constant 1 : index
    %c1_367 = arith.constant 1 : index
    %c0_368 = arith.constant 0 : index
    %341 = vector.load %arg12[%c1_364, %c0_365, %c1_366, %c1_367, %c0_368] : memref<4x2x10x10x8xf32, #tpu.memory_space<vmem>>, vector<1x2x8x8x8xf32>
    %342 = vector.shape_cast %341 : vector<1x2x8x8x8xf32> to vector<2x8x8x8xf32>
    %343 = vector.shape_cast %340 : vector<2x8x8x8xf32> to vector<1x2x8x8x8xf32>
    tpu.vector_store %arg12[%c1_364, %c0_365, %c1_366, %c1_367, %c0_368], %343 {strides = array<i32>} : memref<4x2x10x10x8xf32, #tpu.memory_space<vmem>>, vector<1x2x8x8x8xf32>,
    %344 = vector.shape_cast %329 : vector<128x8xf32> to vector<2x8x8x8xf32>
    %c2_369 = arith.constant 2 : index
    %c0_370 = arith.constant 0 : index
    %c1_371 = arith.constant 1 : index
    %c1_372 = arith.constant 1 : index
    %c0_373 = arith.constant 0 : index
    %345 = vector.load %arg12[%c2_369, %c0_370, %c1_371, %c1_372, %c0_373] : memref<4x2x10x10x8xf32, #tpu.memory_space<vmem>>, vector<1x2x8x8x8xf32>
    %346 = vector.shape_cast %345 : vector<1x2x8x8x8xf32> to vector<2x8x8x8xf32>
    %347 = vector.shape_cast %344 : vector<2x8x8x8xf32> to vector<1x2x8x8x8xf32>
    tpu.vector_store %arg12[%c2_369, %c0_370, %c1_371, %c1_372, %c0_373], %347 {strides = array<i32>} : memref<4x2x10x10x8xf32, #tpu.memory_space<vmem>>, vector<1x2x8x8x8xf32>,
    %348 = vector.shape_cast %335 : vector<128x8xf32> to vector<2x8x8x8xf32>
    %c3_374 = arith.constant 3 : index
    %c0_375 = arith.constant 0 : index
    %c1_376 = arith.constant 1 : index
    %c1_377 = arith.constant 1 : index
    %c0_378 = arith.constant 0 : index
    %349 = vector.load %arg12[%c3_374, %c0_375, %c1_376, %c1_377, %c0_378] : memref<4x2x10x10x8xf32, #tpu.memory_space<vmem>>, vector<1x2x8x8x8xf32>
    %350 = vector.shape_cast %349 : vector<1x2x8x8x8xf32> to vector<2x8x8x8xf32>
    %351 = vector.shape_cast %348 : vector<2x8x8x8xf32> to vector<1x2x8x8x8xf32>
    tpu.vector_store %arg12[%c3_374, %c0_375, %c1_376, %c1_377, %c0_378], %351 {strides = array<i32>} : memref<4x2x10x10x8xf32, #tpu.memory_space<vmem>>, vector<1x2x8x8x8xf32>,
    %cst_379 = arith.constant 0.000000e+00 : f32
    %352 = vector.broadcast %cst_379 : f32 to vector<128x8xf32>
    %c3_380 = arith.constant 3 : index
    %c0_381 = arith.constant 0 : index
    %c0_382 = arith.constant 0 : index
    %c0_383 = arith.constant 0 : index
    %c0_384 = arith.constant 0 : index
    %353 = vector.load %arg12[%c3_380, %c0_381, %c0_382, %c0_383, %c0_384] : memref<4x2x10x10x8xf32, #tpu.memory_space<vmem>>, vector<1x2x8x8x8xf32>
    %354 = vector.shape_cast %353 : vector<1x2x8x8x8xf32> to vector<2x8x8x8xf32>
    %355 = vector.shape_cast %354 : vector<2x8x8x8xf32> to vector<128x8xf32>
    %c0_385 = arith.constant 0 : index
    %c0_386 = arith.constant 0 : index
    %356 = vector.load %arg7[%c0_385, %c0_386] : memref<72x8xf32, #tpu.memory_space<vmem>>, vector<8x8xf32>
    %cst_387 = arith.constant dense<0.000000e+00> : vector<128x8xf32>
    %357 = tpu.matmul %355, %356, %cst_387 {dimension_numbers = #tpu.dot_dimension_numbers<[1], [0], [0], [1], [0, 0, 1, 1], [], []>} : vector<128x8xf32>, vector<8x8xf32>, vector<128x8xf32> -> vector<128x8xf32>
    %358 = arith.addf %352, %357 : vector<128x8xf32>
    %c2_388 = arith.constant 2 : index
    %c0_389 = arith.constant 0 : index
    %c0_390 = arith.constant 0 : index
    %c1_391 = arith.constant 1 : index
    %c0_392 = arith.constant 0 : index
    %359 = vector.load %arg12[%c2_388, %c0_389, %c0_390, %c1_391, %c0_392] : memref<4x2x10x10x8xf32, #tpu.memory_space<vmem>>, vector<1x2x8x8x8xf32>
    %360 = vector.shape_cast %359 : vector<1x2x8x8x8xf32> to vector<2x8x8x8xf32>
    %361 = vector.shape_cast %360 : vector<2x8x8x8xf32> to vector<128x8xf32>
    %c8_393 = arith.constant 8 : index
    %c0_394 = arith.constant 0 : index
    %362 = vector.load %arg7[%c8_393, %c0_394] : memref<72x8xf32, #tpu.memory_space<vmem>>, vector<8x8xf32>
    %cst_395 = arith.constant dense<0.000000e+00> : vector<128x8xf32>
    %363 = tpu.matmul %361, %362, %cst_395 {dimension_numbers = #tpu.dot_dimension_numbers<[1], [0], [0], [1], [0, 0, 1, 1], [], []>} : vector<128x8xf32>, vector<8x8xf32>, vector<128x8xf32> -> vector<128x8xf32>
    %364 = arith.addf %358, %363 : vector<128x8xf32>
    %c3_396 = arith.constant 3 : index
    %c0_397 = arith.constant 0 : index
    %c0_398 = arith.constant 0 : index
    %c1_399 = arith.constant 1 : index
    %c0_400 = arith.constant 0 : index
    %365 = vector.load %arg12[%c3_396, %c0_397, %c0_398, %c1_399, %c0_400] : memref<4x2x10x10x8xf32, #tpu.memory_space<vmem>>, vector<1x2x8x8x8xf32>
    %366 = vector.shape_cast %365 : vector<1x2x8x8x8xf32> to vector<2x8x8x8xf32>
    %367 = vector.shape_cast %366 : vector<2x8x8x8xf32> to vector<128x8xf32>
    %c16_401 = arith.constant 16 : index
    %c0_402 = arith.constant 0 : index
    %368 = vector.load %arg7[%c16_401, %c0_402] : memref<72x8xf32, #tpu.memory_space<vmem>>, vector<8x8xf32>
    %cst_403 = arith.constant dense<0.000000e+00> : vector<128x8xf32>
    %369 = tpu.matmul %367, %368, %cst_403 {dimension_numbers = #tpu.dot_dimension_numbers<[1], [0], [0], [1], [0, 0, 1, 1], [], []>} : vector<128x8xf32>, vector<8x8xf32>, vector<128x8xf32> -> vector<128x8xf32>
    %370 = arith.addf %364, %369 : vector<128x8xf32>
    %c1_404 = arith.constant 1 : index
    %c0_405 = arith.constant 0 : index
    %c1_406 = arith.constant 1 : index
    %c0_407 = arith.constant 0 : index
    %c0_408 = arith.constant 0 : index
    %371 = vector.load %arg12[%c1_404, %c0_405, %c1_406, %c0_407, %c0_408] : memref<4x2x10x10x8xf32, #tpu.memory_space<vmem>>, vector<1x2x8x8x8xf32>
    %372 = vector.shape_cast %371 : vector<1x2x8x8x8xf32> to vector<2x8x8x8xf32>
    %373 = vector.shape_cast %372 : vector<2x8x8x8xf32> to vector<128x8xf32>
    %c24_409 = arith.constant 24 : index
    %c0_410 = arith.constant 0 : index
    %374 = vector.load %arg7[%c24_409, %c0_410] : memref<72x8xf32, #tpu.memory_space<vmem>>, vector<8x8xf32>
    %cst_411 = arith.constant dense<0.000000e+00> : vector<128x8xf32>
    %375 = tpu.matmul %373, %374, %cst_411 {dimension_numbers = #tpu.dot_dimension_numbers<[1], [0], [0], [1], [0, 0, 1, 1], [], []>} : vector<128x8xf32>, vector<8x8xf32>, vector<128x8xf32> -> vector<128x8xf32>
    %376 = arith.addf %370, %375 : vector<128x8xf32>
    %c0_412 = arith.constant 0 : index
    %c0_413 = arith.constant 0 : index
    %c1_414 = arith.constant 1 : index
    %c1_415 = arith.constant 1 : index
    %c0_416 = arith.constant 0 : index
    %377 = vector.load %arg12[%c0_412, %c0_413, %c1_414, %c1_415, %c0_416] : memref<4x2x10x10x8xf32, #tpu.memory_space<vmem>>, vector<1x2x8x8x8xf32>
    %378 = vector.shape_cast %377 : vector<1x2x8x8x8xf32> to vector<2x8x8x8xf32>
    %379 = vector.shape_cast %378 : vector<2x8x8x8xf32> to vector<128x8xf32>
    %c32_417 = arith.constant 32 : index
    %c0_418 = arith.constant 0 : index
    %380 = vector.load %arg7[%c32_417, %c0_418] : memref<72x8xf32, #tpu.memory_space<vmem>>, vector<8x8xf32>
    %cst_419 = arith.constant dense<0.000000e+00> : vector<128x8xf32>
    %381 = tpu.matmul %379, %380, %cst_419 {dimension_numbers = #tpu.dot_dimension_numbers<[1], [0], [0], [1], [0, 0, 1, 1], [], []>} : vector<128x8xf32>, vector<8x8xf32>, vector<128x8xf32> -> vector<128x8xf32>
    %382 = arith.addf %376, %381 : vector<128x8xf32>
    %c1_420 = arith.constant 1 : index
    %c0_421 = arith.constant 0 : index
    %c1_422 = arith.constant 1 : index
    %c1_423 = arith.constant 1 : index
    %c0_424 = arith.constant 0 : index
    %383 = vector.load %arg12[%c1_420, %c0_421, %c1_422, %c1_423, %c0_424] : memref<4x2x10x10x8xf32, #tpu.memory_space<vmem>>, vector<1x2x8x8x8xf32>
    %384 = vector.shape_cast %383 : vector<1x2x8x8x8xf32> to vector<2x8x8x8xf32>
    %385 = vector.shape_cast %384 : vector<2x8x8x8xf32> to vector<128x8xf32>
    %c40 = arith.constant 40 : index
    %c0_425 = arith.constant 0 : index
    %386 = vector.load %arg7[%c40, %c0_425] : memref<72x8xf32, #tpu.memory_space<vmem>>, vector<8x8xf32>
    %cst_426 = arith.constant dense<0.000000e+00> : vector<128x8xf32>
    %387 = tpu.matmul %385, %386, %cst_426 {dimension_numbers = #tpu.dot_dimension_numbers<[1], [0], [0], [1], [0, 0, 1, 1], [], []>} : vector<128x8xf32>, vector<8x8xf32>, vector<128x8xf32> -> vector<128x8xf32>
    %388 = arith.addf %382, %387 : vector<128x8xf32>
    %c3_427 = arith.constant 3 : index
    %c0_428 = arith.constant 0 : index
    %c1_429 = arith.constant 1 : index
    %c0_430 = arith.constant 0 : index
    %c0_431 = arith.constant 0 : index
    %389 = vector.load %arg12[%c3_427, %c0_428, %c1_429, %c0_430, %c0_431] : memref<4x2x10x10x8xf32, #tpu.memory_space<vmem>>, vector<1x2x8x8x8xf32>
    %390 = vector.shape_cast %389 : vector<1x2x8x8x8xf32> to vector<2x8x8x8xf32>
    %391 = vector.shape_cast %390 : vector<2x8x8x8xf32> to vector<128x8xf32>
    %c48 = arith.constant 48 : index
    %c0_432 = arith.constant 0 : index
    %392 = vector.load %arg7[%c48, %c0_432] : memref<72x8xf32, #tpu.memory_space<vmem>>, vector<8x8xf32>
    %cst_433 = arith.constant dense<0.000000e+00> : vector<128x8xf32>
    %393 = tpu.matmul %391, %392, %cst_433 {dimension_numbers = #tpu.dot_dimension_numbers<[1], [0], [0], [1], [0, 0, 1, 1], [], []>} : vector<128x8xf32>, vector<8x8xf32>, vector<128x8xf32> -> vector<128x8xf32>
    %394 = arith.addf %388, %393 : vector<128x8xf32>
    %c2_434 = arith.constant 2 : index
    %c0_435 = arith.constant 0 : index
    %c1_436 = arith.constant 1 : index
    %c1_437 = arith.constant 1 : index
    %c0_438 = arith.constant 0 : index
    %395 = vector.load %arg12[%c2_434, %c0_435, %c1_436, %c1_437, %c0_438] : memref<4x2x10x10x8xf32, #tpu.memory_space<vmem>>, vector<1x2x8x8x8xf32>
    %396 = vector.shape_cast %395 : vector<1x2x8x8x8xf32> to vector<2x8x8x8xf32>
    %397 = vector.shape_cast %396 : vector<2x8x8x8xf32> to vector<128x8xf32>
    %c56 = arith.constant 56 : index
    %c0_439 = arith.constant 0 : index
    %398 = vector.load %arg7[%c56, %c0_439] : memref<72x8xf32, #tpu.memory_space<vmem>>, vector<8x8xf32>
    %cst_440 = arith.constant dense<0.000000e+00> : vector<128x8xf32>
    %399 = tpu.matmul %397, %398, %cst_440 {dimension_numbers = #tpu.dot_dimension_numbers<[1], [0], [0], [1], [0, 0, 1, 1], [], []>} : vector<128x8xf32>, vector<8x8xf32>, vector<128x8xf32> -> vector<128x8xf32>
    %400 = arith.addf %394, %399 : vector<128x8xf32>
    %c3_441 = arith.constant 3 : index
    %c0_442 = arith.constant 0 : index
    %c1_443 = arith.constant 1 : index
    %c1_444 = arith.constant 1 : index
    %c0_445 = arith.constant 0 : index
    %401 = vector.load %arg12[%c3_441, %c0_442, %c1_443, %c1_444, %c0_445] : memref<4x2x10x10x8xf32, #tpu.memory_space<vmem>>, vector<1x2x8x8x8xf32>
    %402 = vector.shape_cast %401 : vector<1x2x8x8x8xf32> to vector<2x8x8x8xf32>
    %403 = vector.shape_cast %402 : vector<2x8x8x8xf32> to vector<128x8xf32>
    %c64 = arith.constant 64 : index
    %c0_446 = arith.constant 0 : index
    %404 = vector.load %arg7[%c64, %c0_446] : memref<72x8xf32, #tpu.memory_space<vmem>>, vector<8x8xf32>
    %cst_447 = arith.constant dense<0.000000e+00> : vector<128x8xf32>
    %405 = tpu.matmul %403, %404, %cst_447 {dimension_numbers = #tpu.dot_dimension_numbers<[1], [0], [0], [1], [0, 0, 1, 1], [], []>} : vector<128x8xf32>, vector<8x8xf32>, vector<128x8xf32> -> vector<128x8xf32>
    %406 = arith.addf %400, %405 : vector<128x8xf32>
    %cst_448 = arith.constant 0.000000e+00 : f32
    %407 = vector.broadcast %cst_448 : f32 to vector<128x8xf32>
    %c2_449 = arith.constant 2 : index
    %c0_450 = arith.constant 0 : index
    %c0_451 = arith.constant 0 : index
    %c1_452 = arith.constant 1 : index
    %c0_453 = arith.constant 0 : index
    %408 = vector.load %arg12[%c2_449, %c0_450, %c0_451, %c1_452, %c0_453] : memref<4x2x10x10x8xf32, #tpu.memory_space<vmem>>, vector<1x2x8x8x8xf32>
    %409 = vector.shape_cast %408 : vector<1x2x8x8x8xf32> to vector<2x8x8x8xf32>
    %410 = vector.shape_cast %409 : vector<2x8x8x8xf32> to vector<128x8xf32>
    %c0_454 = arith.constant 0 : index
    %c0_455 = arith.constant 0 : index
    %411 = vector.load %arg7[%c0_454, %c0_455] : memref<72x8xf32, #tpu.memory_space<vmem>>, vector<8x8xf32>
    %cst_456 = arith.constant dense<0.000000e+00> : vector<128x8xf32>
    %412 = tpu.matmul %410, %411, %cst_456 {dimension_numbers = #tpu.dot_dimension_numbers<[1], [0], [0], [1], [0, 0, 1, 1], [], []>} : vector<128x8xf32>, vector<8x8xf32>, vector<128x8xf32> -> vector<128x8xf32>
    %413 = arith.addf %407, %412 : vector<128x8xf32>
    %c3_457 = arith.constant 3 : index
    %c0_458 = arith.constant 0 : index
    %c0_459 = arith.constant 0 : index
    %c1_460 = arith.constant 1 : index
    %c0_461 = arith.constant 0 : index
    %414 = vector.load %arg12[%c3_457, %c0_458, %c0_459, %c1_460, %c0_461] : memref<4x2x10x10x8xf32, #tpu.memory_space<vmem>>, vector<1x2x8x8x8xf32>
    %415 = vector.shape_cast %414 : vector<1x2x8x8x8xf32> to vector<2x8x8x8xf32>
    %416 = vector.shape_cast %415 : vector<2x8x8x8xf32> to vector<128x8xf32>
    %c8_462 = arith.constant 8 : index
    %c0_463 = arith.constant 0 : index
    %417 = vector.load %arg7[%c8_462, %c0_463] : memref<72x8xf32, #tpu.memory_space<vmem>>, vector<8x8xf32>
    %cst_464 = arith.constant dense<0.000000e+00> : vector<128x8xf32>
    %418 = tpu.matmul %416, %417, %cst_464 {dimension_numbers = #tpu.dot_dimension_numbers<[1], [0], [0], [1], [0, 0, 1, 1], [], []>} : vector<128x8xf32>, vector<8x8xf32>, vector<128x8xf32> -> vector<128x8xf32>
    %419 = arith.addf %413, %418 : vector<128x8xf32>
    %c2_465 = arith.constant 2 : index
    %c0_466 = arith.constant 0 : index
    %c0_467 = arith.constant 0 : index
    %c2_468 = arith.constant 2 : index
    %c0_469 = arith.constant 0 : index
    %420 = vector.load %arg12[%c2_465, %c0_466, %c0_467, %c2_468, %c0_469] : memref<4x2x10x10x8xf32, #tpu.memory_space<vmem>>, vector<1x2x8x8x8xf32>
    %421 = vector.shape_cast %420 : vector<1x2x8x8x8xf32> to vector<2x8x8x8xf32>
    %422 = vector.shape_cast %421 : vector<2x8x8x8xf32> to vector<128x8xf32>
    %c16_470 = arith.constant 16 : index
    %c0_471 = arith.constant 0 : index
    %423 = vector.load %arg7[%c16_470, %c0_471] : memref<72x8xf32, #tpu.memory_space<vmem>>, vector<8x8xf32>
    %cst_472 = arith.constant dense<0.000000e+00> : vector<128x8xf32>
    %424 = tpu.matmul %422, %423, %cst_472 {dimension_numbers = #tpu.dot_dimension_numbers<[1], [0], [0], [1], [0, 0, 1, 1], [], []>} : vector<128x8xf32>, vector<8x8xf32>, vector<128x8xf32> -> vector<128x8xf32>
    %425 = arith.addf %419, %424 : vector<128x8xf32>
    %c0_473 = arith.constant 0 : index
    %c0_474 = arith.constant 0 : index
    %c1_475 = arith.constant 1 : index
    %c1_476 = arith.constant 1 : index
    %c0_477 = arith.constant 0 : index
    %426 = vector.load %arg12[%c0_473, %c0_474, %c1_475, %c1_476, %c0_477] : memref<4x2x10x10x8xf32, #tpu.memory_space<vmem>>, vector<1x2x8x8x8xf32>
    %427 = vector.shape_cast %426 : vector<1x2x8x8x8xf32> to vector<2x8x8x8xf32>
    %428 = vector.shape_cast %427 : vector<2x8x8x8xf32> to vector<128x8xf32>
    %c24_478 = arith.constant 24 : index
    %c0_479 = arith.constant 0 : index
    %429 = vector.load %arg7[%c24_478, %c0_479] : memref<72x8xf32, #tpu.memory_space<vmem>>, vector<8x8xf32>
    %cst_480 = arith.constant dense<0.000000e+00> : vector<128x8xf32>
    %430 = tpu.matmul %428, %429, %cst_480 {dimension_numbers = #tpu.dot_dimension_numbers<[1], [0], [0], [1], [0, 0, 1, 1], [], []>} : vector<128x8xf32>, vector<8x8xf32>, vector<128x8xf32> -> vector<128x8xf32>
    %431 = arith.addf %425, %430 : vector<128x8xf32>
    %c1_481 = arith.constant 1 : index
    %c0_482 = arith.constant 0 : index
    %c1_483 = arith.constant 1 : index
    %c1_484 = arith.constant 1 : index
    %c0_485 = arith.constant 0 : index
    %432 = vector.load %arg12[%c1_481, %c0_482, %c1_483, %c1_484, %c0_485] : memref<4x2x10x10x8xf32, #tpu.memory_space<vmem>>, vector<1x2x8x8x8xf32>
    %433 = vector.shape_cast %432 : vector<1x2x8x8x8xf32> to vector<2x8x8x8xf32>
    %434 = vector.shape_cast %433 : vector<2x8x8x8xf32> to vector<128x8xf32>
    %c32_486 = arith.constant 32 : index
    %c0_487 = arith.constant 0 : index
    %435 = vector.load %arg7[%c32_486, %c0_487] : memref<72x8xf32, #tpu.memory_space<vmem>>, vector<8x8xf32>
    %cst_488 = arith.constant dense<0.000000e+00> : vector<128x8xf32>
    %436 = tpu.matmul %434, %435, %cst_488 {dimension_numbers = #tpu.dot_dimension_numbers<[1], [0], [0], [1], [0, 0, 1, 1], [], []>} : vector<128x8xf32>, vector<8x8xf32>, vector<128x8xf32> -> vector<128x8xf32>
    %437 = arith.addf %431, %436 : vector<128x8xf32>
    %c0_489 = arith.constant 0 : index
    %c0_490 = arith.constant 0 : index
    %c1_491 = arith.constant 1 : index
    %c2_492 = arith.constant 2 : index
    %c0_493 = arith.constant 0 : index
    %438 = vector.load %arg12[%c0_489, %c0_490, %c1_491, %c2_492, %c0_493] : memref<4x2x10x10x8xf32, #tpu.memory_space<vmem>>, vector<1x2x8x8x8xf32>
    %439 = vector.shape_cast %438 : vector<1x2x8x8x8xf32> to vector<2x8x8x8xf32>
    %440 = vector.shape_cast %439 : vector<2x8x8x8xf32> to vector<128x8xf32>
    %c40_494 = arith.constant 40 : index
    %c0_495 = arith.constant 0 : index
    %441 = vector.load %arg7[%c40_494, %c0_495] : memref<72x8xf32, #tpu.memory_space<vmem>>, vector<8x8xf32>
    %cst_496 = arith.constant dense<0.000000e+00> : vector<128x8xf32>
    %442 = tpu.matmul %440, %441, %cst_496 {dimension_numbers = #tpu.dot_dimension_numbers<[1], [0], [0], [1], [0, 0, 1, 1], [], []>} : vector<128x8xf32>, vector<8x8xf32>, vector<128x8xf32> -> vector<128x8xf32>
    %443 = arith.addf %437, %442 : vector<128x8xf32>
    %c2_497 = arith.constant 2 : index
    %c0_498 = arith.constant 0 : index
    %c1_499 = arith.constant 1 : index
    %c1_500 = arith.constant 1 : index
    %c0_501 = arith.constant 0 : index
    %444 = vector.load %arg12[%c2_497, %c0_498, %c1_499, %c1_500, %c0_501] : memref<4x2x10x10x8xf32, #tpu.memory_space<vmem>>, vector<1x2x8x8x8xf32>
    %445 = vector.shape_cast %444 : vector<1x2x8x8x8xf32> to vector<2x8x8x8xf32>
    %446 = vector.shape_cast %445 : vector<2x8x8x8xf32> to vector<128x8xf32>
    %c48_502 = arith.constant 48 : index
    %c0_503 = arith.constant 0 : index
    %447 = vector.load %arg7[%c48_502, %c0_503] : memref<72x8xf32, #tpu.memory_space<vmem>>, vector<8x8xf32>
    %cst_504 = arith.constant dense<0.000000e+00> : vector<128x8xf32>
    %448 = tpu.matmul %446, %447, %cst_504 {dimension_numbers = #tpu.dot_dimension_numbers<[1], [0], [0], [1], [0, 0, 1, 1], [], []>} : vector<128x8xf32>, vector<8x8xf32>, vector<128x8xf32> -> vector<128x8xf32>
    %449 = arith.addf %443, %448 : vector<128x8xf32>
    %c3_505 = arith.constant 3 : index
    %c0_506 = arith.constant 0 : index
    %c1_507 = arith.constant 1 : index
    %c1_508 = arith.constant 1 : index
    %c0_509 = arith.constant 0 : index
    %450 = vector.load %arg12[%c3_505, %c0_506, %c1_507, %c1_508, %c0_509] : memref<4x2x10x10x8xf32, #tpu.memory_space<vmem>>, vector<1x2x8x8x8xf32>
    %451 = vector.shape_cast %450 : vector<1x2x8x8x8xf32> to vector<2x8x8x8xf32>
    %452 = vector.shape_cast %451 : vector<2x8x8x8xf32> to vector<128x8xf32>
    %c56_510 = arith.constant 56 : index
    %c0_511 = arith.constant 0 : index
    %453 = vector.load %arg7[%c56_510, %c0_511] : memref<72x8xf32, #tpu.memory_space<vmem>>, vector<8x8xf32>
    %cst_512 = arith.constant dense<0.000000e+00> : vector<128x8xf32>
    %454 = tpu.matmul %452, %453, %cst_512 {dimension_numbers = #tpu.dot_dimension_numbers<[1], [0], [0], [1], [0, 0, 1, 1], [], []>} : vector<128x8xf32>, vector<8x8xf32>, vector<128x8xf32> -> vector<128x8xf32>
    %455 = arith.addf %449, %454 : vector<128x8xf32>
    %c2_513 = arith.constant 2 : index
    %c0_514 = arith.constant 0 : index
    %c1_515 = arith.constant 1 : index
    %c2_516 = arith.constant 2 : index
    %c0_517 = arith.constant 0 : index
    %456 = vector.load %arg12[%c2_513, %c0_514, %c1_515, %c2_516, %c0_517] : memref<4x2x10x10x8xf32, #tpu.memory_space<vmem>>, vector<1x2x8x8x8xf32>
    %457 = vector.shape_cast %456 : vector<1x2x8x8x8xf32> to vector<2x8x8x8xf32>
    %458 = vector.shape_cast %457 : vector<2x8x8x8xf32> to vector<128x8xf32>
    %c64_518 = arith.constant 64 : index
    %c0_519 = arith.constant 0 : index
    %459 = vector.load %arg7[%c64_518, %c0_519] : memref<72x8xf32, #tpu.memory_space<vmem>>, vector<8x8xf32>
    %cst_520 = arith.constant dense<0.000000e+00> : vector<128x8xf32>
    %460 = tpu.matmul %458, %459, %cst_520 {dimension_numbers = #tpu.dot_dimension_numbers<[1], [0], [0], [1], [0, 0, 1, 1], [], []>} : vector<128x8xf32>, vector<8x8xf32>, vector<128x8xf32> -> vector<128x8xf32>
    %461 = arith.addf %455, %460 : vector<128x8xf32>
    %cst_521 = arith.constant 0.000000e+00 : f32
    %462 = vector.broadcast %cst_521 : f32 to vector<128x8xf32>
    %c1_522 = arith.constant 1 : index
    %c0_523 = arith.constant 0 : index
    %c1_524 = arith.constant 1 : index
    %c0_525 = arith.constant 0 : index
    %c0_526 = arith.constant 0 : index
    %463 = vector.load %arg12[%c1_522, %c0_523, %c1_524, %c0_525, %c0_526] : memref<4x2x10x10x8xf32, #tpu.memory_space<vmem>>, vector<1x2x8x8x8xf32>
    %464 = vector.shape_cast %463 : vector<1x2x8x8x8xf32> to vector<2x8x8x8xf32>
    %465 = vector.shape_cast %464 : vector<2x8x8x8xf32> to vector<128x8xf32>
    %c0_527 = arith.constant 0 : index
    %c0_528 = arith.constant 0 : index
    %466 = vector.load %arg7[%c0_527, %c0_528] : memref<72x8xf32, #tpu.memory_space<vmem>>, vector<8x8xf32>
    %cst_529 = arith.constant dense<0.000000e+00> : vector<128x8xf32>
    %467 = tpu.matmul %465, %466, %cst_529 {dimension_numbers = #tpu.dot_dimension_numbers<[1], [0], [0], [1], [0, 0, 1, 1], [], []>} : vector<128x8xf32>, vector<8x8xf32>, vector<128x8xf32> -> vector<128x8xf32>
    %468 = arith.addf %462, %467 : vector<128x8xf32>
    %c0_530 = arith.constant 0 : index
    %c0_531 = arith.constant 0 : index
    %c1_532 = arith.constant 1 : index
    %c1_533 = arith.constant 1 : index
    %c0_534 = arith.constant 0 : index
    %469 = vector.load %arg12[%c0_530, %c0_531, %c1_532, %c1_533, %c0_534] : memref<4x2x10x10x8xf32, #tpu.memory_space<vmem>>, vector<1x2x8x8x8xf32>
    %470 = vector.shape_cast %469 : vector<1x2x8x8x8xf32> to vector<2x8x8x8xf32>
    %471 = vector.shape_cast %470 : vector<2x8x8x8xf32> to vector<128x8xf32>
    %c8_535 = arith.constant 8 : index
    %c0_536 = arith.constant 0 : index
    %472 = vector.load %arg7[%c8_535, %c0_536] : memref<72x8xf32, #tpu.memory_space<vmem>>, vector<8x8xf32>
    %cst_537 = arith.constant dense<0.000000e+00> : vector<128x8xf32>
    %473 = tpu.matmul %471, %472, %cst_537 {dimension_numbers = #tpu.dot_dimension_numbers<[1], [0], [0], [1], [0, 0, 1, 1], [], []>} : vector<128x8xf32>, vector<8x8xf32>, vector<128x8xf32> -> vector<128x8xf32>
    %474 = arith.addf %468, %473 : vector<128x8xf32>
    %c1_538 = arith.constant 1 : index
    %c0_539 = arith.constant 0 : index
    %c1_540 = arith.constant 1 : index
    %c1_541 = arith.constant 1 : index
    %c0_542 = arith.constant 0 : index
    %475 = vector.load %arg12[%c1_538, %c0_539, %c1_540, %c1_541, %c0_542] : memref<4x2x10x10x8xf32, #tpu.memory_space<vmem>>, vector<1x2x8x8x8xf32>
    %476 = vector.shape_cast %475 : vector<1x2x8x8x8xf32> to vector<2x8x8x8xf32>
    %477 = vector.shape_cast %476 : vector<2x8x8x8xf32> to vector<128x8xf32>
    %c16_543 = arith.constant 16 : index
    %c0_544 = arith.constant 0 : index
    %478 = vector.load %arg7[%c16_543, %c0_544] : memref<72x8xf32, #tpu.memory_space<vmem>>, vector<8x8xf32>
    %cst_545 = arith.constant dense<0.000000e+00> : vector<128x8xf32>
    %479 = tpu.matmul %477, %478, %cst_545 {dimension_numbers = #tpu.dot_dimension_numbers<[1], [0], [0], [1], [0, 0, 1, 1], [], []>} : vector<128x8xf32>, vector<8x8xf32>, vector<128x8xf32> -> vector<128x8xf32>
    %480 = arith.addf %474, %479 : vector<128x8xf32>
    %c3_546 = arith.constant 3 : index
    %c0_547 = arith.constant 0 : index
    %c1_548 = arith.constant 1 : index
    %c0_549 = arith.constant 0 : index
    %c0_550 = arith.constant 0 : index
    %481 = vector.load %arg12[%c3_546, %c0_547, %c1_548, %c0_549, %c0_550] : memref<4x2x10x10x8xf32, #tpu.memory_space<vmem>>, vector<1x2x8x8x8xf32>
    %482 = vector.shape_cast %481 : vector<1x2x8x8x8xf32> to vector<2x8x8x8xf32>
    %483 = vector.shape_cast %482 : vector<2x8x8x8xf32> to vector<128x8xf32>
    %c24_551 = arith.constant 24 : index
    %c0_552 = arith.constant 0 : index
    %484 = vector.load %arg7[%c24_551, %c0_552] : memref<72x8xf32, #tpu.memory_space<vmem>>, vector<8x8xf32>
    %cst_553 = arith.constant dense<0.000000e+00> : vector<128x8xf32>
    %485 = tpu.matmul %483, %484, %cst_553 {dimension_numbers = #tpu.dot_dimension_numbers<[1], [0], [0], [1], [0, 0, 1, 1], [], []>} : vector<128x8xf32>, vector<8x8xf32>, vector<128x8xf32> -> vector<128x8xf32>
    %486 = arith.addf %480, %485 : vector<128x8xf32>
    %c2_554 = arith.constant 2 : index
    %c0_555 = arith.constant 0 : index
    %c1_556 = arith.constant 1 : index
    %c1_557 = arith.constant 1 : index
    %c0_558 = arith.constant 0 : index
    %487 = vector.load %arg12[%c2_554, %c0_555, %c1_556, %c1_557, %c0_558] : memref<4x2x10x10x8xf32, #tpu.memory_space<vmem>>, vector<1x2x8x8x8xf32>
    %488 = vector.shape_cast %487 : vector<1x2x8x8x8xf32> to vector<2x8x8x8xf32>
    %489 = vector.shape_cast %488 : vector<2x8x8x8xf32> to vector<128x8xf32>
    %c32_559 = arith.constant 32 : index
    %c0_560 = arith.constant 0 : index
    %490 = vector.load %arg7[%c32_559, %c0_560] : memref<72x8xf32, #tpu.memory_space<vmem>>, vector<8x8xf32>
    %cst_561 = arith.constant dense<0.000000e+00> : vector<128x8xf32>
    %491 = tpu.matmul %489, %490, %cst_561 {dimension_numbers = #tpu.dot_dimension_numbers<[1], [0], [0], [1], [0, 0, 1, 1], [], []>} : vector<128x8xf32>, vector<8x8xf32>, vector<128x8xf32> -> vector<128x8xf32>
    %492 = arith.addf %486, %491 : vector<128x8xf32>
    %c3_562 = arith.constant 3 : index
    %c0_563 = arith.constant 0 : index
    %c1_564 = arith.constant 1 : index
    %c1_565 = arith.constant 1 : index
    %c0_566 = arith.constant 0 : index
    %493 = vector.load %arg12[%c3_562, %c0_563, %c1_564, %c1_565, %c0_566] : memref<4x2x10x10x8xf32, #tpu.memory_space<vmem>>, vector<1x2x8x8x8xf32>
    %494 = vector.shape_cast %493 : vector<1x2x8x8x8xf32> to vector<2x8x8x8xf32>
    %495 = vector.shape_cast %494 : vector<2x8x8x8xf32> to vector<128x8xf32>
    %c40_567 = arith.constant 40 : index
    %c0_568 = arith.constant 0 : index
    %496 = vector.load %arg7[%c40_567, %c0_568] : memref<72x8xf32, #tpu.memory_space<vmem>>, vector<8x8xf32>
    %cst_569 = arith.constant dense<0.000000e+00> : vector<128x8xf32>
    %497 = tpu.matmul %495, %496, %cst_569 {dimension_numbers = #tpu.dot_dimension_numbers<[1], [0], [0], [1], [0, 0, 1, 1], [], []>} : vector<128x8xf32>, vector<8x8xf32>, vector<128x8xf32> -> vector<128x8xf32>
    %498 = arith.addf %492, %497 : vector<128x8xf32>
    %c1_570 = arith.constant 1 : index
    %c0_571 = arith.constant 0 : index
    %c2_572 = arith.constant 2 : index
    %c0_573 = arith.constant 0 : index
    %c0_574 = arith.constant 0 : index
    %499 = vector.load %arg12[%c1_570, %c0_571, %c2_572, %c0_573, %c0_574] : memref<4x2x10x10x8xf32, #tpu.memory_space<vmem>>, vector<1x2x8x8x8xf32>
    %500 = vector.shape_cast %499 : vector<1x2x8x8x8xf32> to vector<2x8x8x8xf32>
    %501 = vector.shape_cast %500 : vector<2x8x8x8xf32> to vector<128x8xf32>
    %c48_575 = arith.constant 48 : index
    %c0_576 = arith.constant 0 : index
    %502 = vector.load %arg7[%c48_575, %c0_576] : memref<72x8xf32, #tpu.memory_space<vmem>>, vector<8x8xf32>
    %cst_577 = arith.constant dense<0.000000e+00> : vector<128x8xf32>
    %503 = tpu.matmul %501, %502, %cst_577 {dimension_numbers = #tpu.dot_dimension_numbers<[1], [0], [0], [1], [0, 0, 1, 1], [], []>} : vector<128x8xf32>, vector<8x8xf32>, vector<128x8xf32> -> vector<128x8xf32>
    %504 = arith.addf %498, %503 : vector<128x8xf32>
    %c0_578 = arith.constant 0 : index
    %c0_579 = arith.constant 0 : index
    %c2_580 = arith.constant 2 : index
    %c1_581 = arith.constant 1 : index
    %c0_582 = arith.constant 0 : index
    %505 = vector.load %arg12[%c0_578, %c0_579, %c2_580, %c1_581, %c0_582] : memref<4x2x10x10x8xf32, #tpu.memory_space<vmem>>, vector<1x2x8x8x8xf32>
    %506 = vector.shape_cast %505 : vector<1x2x8x8x8xf32> to vector<2x8x8x8xf32>
    %507 = vector.shape_cast %506 : vector<2x8x8x8xf32> to vector<128x8xf32>
    %c56_583 = arith.constant 56 : index
    %c0_584 = arith.constant 0 : index
    %508 = vector.load %arg7[%c56_583, %c0_584] : memref<72x8xf32, #tpu.memory_space<vmem>>, vector<8x8xf32>
    %cst_585 = arith.constant dense<0.000000e+00> : vector<128x8xf32>
    %509 = tpu.matmul %507, %508, %cst_585 {dimension_numbers = #tpu.dot_dimension_numbers<[1], [0], [0], [1], [0, 0, 1, 1], [], []>} : vector<128x8xf32>, vector<8x8xf32>, vector<128x8xf32> -> vector<128x8xf32>
    %510 = arith.addf %504, %509 : vector<128x8xf32>
    %c1_586 = arith.constant 1 : index
    %c0_587 = arith.constant 0 : index
    %c2_588 = arith.constant 2 : index
    %c1_589 = arith.constant 1 : index
    %c0_590 = arith.constant 0 : index
    %511 = vector.load %arg12[%c1_586, %c0_587, %c2_588, %c1_589, %c0_590] : memref<4x2x10x10x8xf32, #tpu.memory_space<vmem>>, vector<1x2x8x8x8xf32>
    %512 = vector.shape_cast %511 : vector<1x2x8x8x8xf32> to vector<2x8x8x8xf32>
    %513 = vector.shape_cast %512 : vector<2x8x8x8xf32> to vector<128x8xf32>
    %c64_591 = arith.constant 64 : index
    %c0_592 = arith.constant 0 : index
    %514 = vector.load %arg7[%c64_591, %c0_592] : memref<72x8xf32, #tpu.memory_space<vmem>>, vector<8x8xf32>
    %cst_593 = arith.constant dense<0.000000e+00> : vector<128x8xf32>
    %515 = tpu.matmul %513, %514, %cst_593 {dimension_numbers = #tpu.dot_dimension_numbers<[1], [0], [0], [1], [0, 0, 1, 1], [], []>} : vector<128x8xf32>, vector<8x8xf32>, vector<128x8xf32> -> vector<128x8xf32>
    %516 = arith.addf %510, %515 : vector<128x8xf32>
    %cst_594 = arith.constant 0.000000e+00 : f32
    %517 = vector.broadcast %cst_594 : f32 to vector<128x8xf32>
    %c0_595 = arith.constant 0 : index
    %c0_596 = arith.constant 0 : index
    %c1_597 = arith.constant 1 : index
    %c1_598 = arith.constant 1 : index
    %c0_599 = arith.constant 0 : index
    %518 = vector.load %arg12[%c0_595, %c0_596, %c1_597, %c1_598, %c0_599] : memref<4x2x10x10x8xf32, #tpu.memory_space<vmem>>, vector<1x2x8x8x8xf32>
    %519 = vector.shape_cast %518 : vector<1x2x8x8x8xf32> to vector<2x8x8x8xf32>
    %520 = vector.shape_cast %519 : vector<2x8x8x8xf32> to vector<128x8xf32>
    %c0_600 = arith.constant 0 : index
    %c0_601 = arith.constant 0 : index
    %521 = vector.load %arg7[%c0_600, %c0_601] : memref<72x8xf32, #tpu.memory_space<vmem>>, vector<8x8xf32>
    %cst_602 = arith.constant dense<0.000000e+00> : vector<128x8xf32>
    %522 = tpu.matmul %520, %521, %cst_602 {dimension_numbers = #tpu.dot_dimension_numbers<[1], [0], [0], [1], [0, 0, 1, 1], [], []>} : vector<128x8xf32>, vector<8x8xf32>, vector<128x8xf32> -> vector<128x8xf32>
    %523 = arith.addf %517, %522 : vector<128x8xf32>
    %c1_603 = arith.constant 1 : index
    %c0_604 = arith.constant 0 : index
    %c1_605 = arith.constant 1 : index
    %c1_606 = arith.constant 1 : index
    %c0_607 = arith.constant 0 : index
    %524 = vector.load %arg12[%c1_603, %c0_604, %c1_605, %c1_606, %c0_607] : memref<4x2x10x10x8xf32, #tpu.memory_space<vmem>>, vector<1x2x8x8x8xf32>
    %525 = vector.shape_cast %524 : vector<1x2x8x8x8xf32> to vector<2x8x8x8xf32>
    %526 = vector.shape_cast %525 : vector<2x8x8x8xf32> to vector<128x8xf32>
    %c8_608 = arith.constant 8 : index
    %c0_609 = arith.constant 0 : index
    %527 = vector.load %arg7[%c8_608, %c0_609] : memref<72x8xf32, #tpu.memory_space<vmem>>, vector<8x8xf32>
    %cst_610 = arith.constant dense<0.000000e+00> : vector<128x8xf32>
    %528 = tpu.matmul %526, %527, %cst_610 {dimension_numbers = #tpu.dot_dimension_numbers<[1], [0], [0], [1], [0, 0, 1, 1], [], []>} : vector<128x8xf32>, vector<8x8xf32>, vector<128x8xf32> -> vector<128x8xf32>
    %529 = arith.addf %523, %528 : vector<128x8xf32>
    %c0_611 = arith.constant 0 : index
    %c0_612 = arith.constant 0 : index
    %c1_613 = arith.constant 1 : index
    %c2_614 = arith.constant 2 : index
    %c0_615 = arith.constant 0 : index
    %530 = vector.load %arg12[%c0_611, %c0_612, %c1_613, %c2_614, %c0_615] : memref<4x2x10x10x8xf32, #tpu.memory_space<vmem>>, vector<1x2x8x8x8xf32>
    %531 = vector.shape_cast %530 : vector<1x2x8x8x8xf32> to vector<2x8x8x8xf32>
    %532 = vector.shape_cast %531 : vector<2x8x8x8xf32> to vector<128x8xf32>
    %c16_616 = arith.constant 16 : index
    %c0_617 = arith.constant 0 : index
    %533 = vector.load %arg7[%c16_616, %c0_617] : memref<72x8xf32, #tpu.memory_space<vmem>>, vector<8x8xf32>
    %cst_618 = arith.constant dense<0.000000e+00> : vector<128x8xf32>
    %534 = tpu.matmul %532, %533, %cst_618 {dimension_numbers = #tpu.dot_dimension_numbers<[1], [0], [0], [1], [0, 0, 1, 1], [], []>} : vector<128x8xf32>, vector<8x8xf32>, vector<128x8xf32> -> vector<128x8xf32>
    %535 = arith.addf %529, %534 : vector<128x8xf32>
    %c2_619 = arith.constant 2 : index
    %c0_620 = arith.constant 0 : index
    %c1_621 = arith.constant 1 : index
    %c1_622 = arith.constant 1 : index
    %c0_623 = arith.constant 0 : index
    %536 = vector.load %arg12[%c2_619, %c0_620, %c1_621, %c1_622, %c0_623] : memref<4x2x10x10x8xf32, #tpu.memory_space<vmem>>, vector<1x2x8x8x8xf32>
    %537 = vector.shape_cast %536 : vector<1x2x8x8x8xf32> to vector<2x8x8x8xf32>
    %538 = vector.shape_cast %537 : vector<2x8x8x8xf32> to vector<128x8xf32>
    %c24_624 = arith.constant 24 : index
    %c0_625 = arith.constant 0 : index
    %539 = vector.load %arg7[%c24_624, %c0_625] : memref<72x8xf32, #tpu.memory_space<vmem>>, vector<8x8xf32>
    %cst_626 = arith.constant dense<0.000000e+00> : vector<128x8xf32>
    %540 = tpu.matmul %538, %539, %cst_626 {dimension_numbers = #tpu.dot_dimension_numbers<[1], [0], [0], [1], [0, 0, 1, 1], [], []>} : vector<128x8xf32>, vector<8x8xf32>, vector<128x8xf32> -> vector<128x8xf32>
    %541 = arith.addf %535, %540 : vector<128x8xf32>
    %c3_627 = arith.constant 3 : index
    %c0_628 = arith.constant 0 : index
    %c1_629 = arith.constant 1 : index
    %c1_630 = arith.constant 1 : index
    %c0_631 = arith.constant 0 : index
    %542 = vector.load %arg12[%c3_627, %c0_628, %c1_629, %c1_630, %c0_631] : memref<4x2x10x10x8xf32, #tpu.memory_space<vmem>>, vector<1x2x8x8x8xf32>
    %543 = vector.shape_cast %542 : vector<1x2x8x8x8xf32> to vector<2x8x8x8xf32>
    %544 = vector.shape_cast %543 : vector<2x8x8x8xf32> to vector<128x8xf32>
    %c32_632 = arith.constant 32 : index
    %c0_633 = arith.constant 0 : index
    %545 = vector.load %arg7[%c32_632, %c0_633] : memref<72x8xf32, #tpu.memory_space<vmem>>, vector<8x8xf32>
    %cst_634 = arith.constant dense<0.000000e+00> : vector<128x8xf32>
    %546 = tpu.matmul %544, %545, %cst_634 {dimension_numbers = #tpu.dot_dimension_numbers<[1], [0], [0], [1], [0, 0, 1, 1], [], []>} : vector<128x8xf32>, vector<8x8xf32>, vector<128x8xf32> -> vector<128x8xf32>
    %547 = arith.addf %541, %546 : vector<128x8xf32>
    %c2_635 = arith.constant 2 : index
    %c0_636 = arith.constant 0 : index
    %c1_637 = arith.constant 1 : index
    %c2_638 = arith.constant 2 : index
    %c0_639 = arith.constant 0 : index
    %548 = vector.load %arg12[%c2_635, %c0_636, %c1_637, %c2_638, %c0_639] : memref<4x2x10x10x8xf32, #tpu.memory_space<vmem>>, vector<1x2x8x8x8xf32>
    %549 = vector.shape_cast %548 : vector<1x2x8x8x8xf32> to vector<2x8x8x8xf32>
    %550 = vector.shape_cast %549 : vector<2x8x8x8xf32> to vector<128x8xf32>
    %c40_640 = arith.constant 40 : index
    %c0_641 = arith.constant 0 : index
    %551 = vector.load %arg7[%c40_640, %c0_641] : memref<72x8xf32, #tpu.memory_space<vmem>>, vector<8x8xf32>
    %cst_642 = arith.constant dense<0.000000e+00> : vector<128x8xf32>
    %552 = tpu.matmul %550, %551, %cst_642 {dimension_numbers = #tpu.dot_dimension_numbers<[1], [0], [0], [1], [0, 0, 1, 1], [], []>} : vector<128x8xf32>, vector<8x8xf32>, vector<128x8xf32> -> vector<128x8xf32>
    %553 = arith.addf %547, %552 : vector<128x8xf32>
    %c0_643 = arith.constant 0 : index
    %c0_644 = arith.constant 0 : index
    %c2_645 = arith.constant 2 : index
    %c1_646 = arith.constant 1 : index
    %c0_647 = arith.constant 0 : index
    %554 = vector.load %arg12[%c0_643, %c0_644, %c2_645, %c1_646, %c0_647] : memref<4x2x10x10x8xf32, #tpu.memory_space<vmem>>, vector<1x2x8x8x8xf32>
    %555 = vector.shape_cast %554 : vector<1x2x8x8x8xf32> to vector<2x8x8x8xf32>
    %556 = vector.shape_cast %555 : vector<2x8x8x8xf32> to vector<128x8xf32>
    %c48_648 = arith.constant 48 : index
    %c0_649 = arith.constant 0 : index
    %557 = vector.load %arg7[%c48_648, %c0_649] : memref<72x8xf32, #tpu.memory_space<vmem>>, vector<8x8xf32>
    %cst_650 = arith.constant dense<0.000000e+00> : vector<128x8xf32>
    %558 = tpu.matmul %556, %557, %cst_650 {dimension_numbers = #tpu.dot_dimension_numbers<[1], [0], [0], [1], [0, 0, 1, 1], [], []>} : vector<128x8xf32>, vector<8x8xf32>, vector<128x8xf32> -> vector<128x8xf32>
    %559 = arith.addf %553, %558 : vector<128x8xf32>
    %c1_651 = arith.constant 1 : index
    %c0_652 = arith.constant 0 : index
    %c2_653 = arith.constant 2 : index
    %c1_654 = arith.constant 1 : index
    %c0_655 = arith.constant 0 : index
    %560 = vector.load %arg12[%c1_651, %c0_652, %c2_653, %c1_654, %c0_655] : memref<4x2x10x10x8xf32, #tpu.memory_space<vmem>>, vector<1x2x8x8x8xf32>
    %561 = vector.shape_cast %560 : vector<1x2x8x8x8xf32> to vector<2x8x8x8xf32>
    %562 = vector.shape_cast %561 : vector<2x8x8x8xf32> to vector<128x8xf32>
    %c56_656 = arith.constant 56 : index
    %c0_657 = arith.constant 0 : index
    %563 = vector.load %arg7[%c56_656, %c0_657] : memref<72x8xf32, #tpu.memory_space<vmem>>, vector<8x8xf32>
    %cst_658 = arith.constant dense<0.000000e+00> : vector<128x8xf32>
    %564 = tpu.matmul %562, %563, %cst_658 {dimension_numbers = #tpu.dot_dimension_numbers<[1], [0], [0], [1], [0, 0, 1, 1], [], []>} : vector<128x8xf32>, vector<8x8xf32>, vector<128x8xf32> -> vector<128x8xf32>
    %565 = arith.addf %559, %564 : vector<128x8xf32>
    %c0_659 = arith.constant 0 : index
    %c0_660 = arith.constant 0 : index
    %c2_661 = arith.constant 2 : index
    %c2_662 = arith.constant 2 : index
    %c0_663 = arith.constant 0 : index
    %566 = vector.load %arg12[%c0_659, %c0_660, %c2_661, %c2_662, %c0_663] : memref<4x2x10x10x8xf32, #tpu.memory_space<vmem>>, vector<1x2x8x8x8xf32>
    %567 = vector.shape_cast %566 : vector<1x2x8x8x8xf32> to vector<2x8x8x8xf32>
    %568 = vector.shape_cast %567 : vector<2x8x8x8xf32> to vector<128x8xf32>
    %c64_664 = arith.constant 64 : index
    %c0_665 = arith.constant 0 : index
    %569 = vector.load %arg7[%c64_664, %c0_665] : memref<72x8xf32, #tpu.memory_space<vmem>>, vector<8x8xf32>
    %cst_666 = arith.constant dense<0.000000e+00> : vector<128x8xf32>
    %570 = tpu.matmul %568, %569, %cst_666 {dimension_numbers = #tpu.dot_dimension_numbers<[1], [0], [0], [1], [0, 0, 1, 1], [], []>} : vector<128x8xf32>, vector<8x8xf32>, vector<128x8xf32> -> vector<128x8xf32>
    %571 = arith.addf %565, %570 : vector<128x8xf32>
    %cst_667 = arith.constant 0.000000e+00 : f32
    %572 = vector.broadcast %cst_667 : f32 to vector<1x8xf32>
    %cst_668 = arith.constant dense<0.000000e+00> : vector<8xf32>
    %573 = vector.multi_reduction <add>, %406, %cst_668 [0] : vector<128x8xf32> to vector<8xf32>
    %574 = vector.shape_cast %573 : vector<8xf32> to vector<1x8xf32>
    %575 = arith.addf %572, %574 : vector<1x8xf32>
    %cst_669 = arith.constant dense<0.000000e+00> : vector<8xf32>
    %576 = vector.multi_reduction <add>, %461, %cst_669 [0] : vector<128x8xf32> to vector<8xf32>
    %577 = vector.shape_cast %576 : vector<8xf32> to vector<1x8xf32>
    %578 = arith.addf %575, %577 : vector<1x8xf32>
    %cst_670 = arith.constant dense<0.000000e+00> : vector<8xf32>
    %579 = vector.multi_reduction <add>, %516, %cst_670 [0] : vector<128x8xf32> to vector<8xf32>
    %580 = vector.shape_cast %579 : vector<8xf32> to vector<1x8xf32>
    %581 = arith.addf %578, %580 : vector<1x8xf32>
    %cst_671 = arith.constant dense<0.000000e+00> : vector<8xf32>
    %582 = vector.multi_reduction <add>, %571, %cst_671 [0] : vector<128x8xf32> to vector<8xf32>
    %583 = vector.shape_cast %582 : vector<8xf32> to vector<1x8xf32>
    %584 = arith.addf %581, %583 : vector<1x8xf32>
    %cst_672 = arith.constant 0.001953125 : f32
    %585 = vector.broadcast %cst_672 : f32 to vector<1x8xf32>
    %586 = arith.mulf %584, %585 : vector<1x8xf32>
    %cst_673 = arith.constant 0.000000e+00 : f32
    %587 = vector.broadcast %cst_673 : f32 to vector<1x8xf32>
    %588 = vector.broadcast %586 : vector<1x8xf32> to vector<128x8xf32>
    %589 = arith.subf %406, %588 : vector<128x8xf32>
    %590 = arith.mulf %589, %589 : vector<128x8xf32>
    %cst_674 = arith.constant dense<0.000000e+00> : vector<8xf32>
    %591 = vector.multi_reduction <add>, %590, %cst_674 [0] : vector<128x8xf32> to vector<8xf32>
    %592 = vector.shape_cast %591 : vector<8xf32> to vector<1x8xf32>
    %593 = arith.addf %587, %592 : vector<1x8xf32>
    %594 = vector.broadcast %586 : vector<1x8xf32> to vector<128x8xf32>
    %595 = arith.subf %461, %594 : vector<128x8xf32>
    %596 = arith.mulf %595, %595 : vector<128x8xf32>
    %cst_675 = arith.constant dense<0.000000e+00> : vector<8xf32>
    %597 = vector.multi_reduction <add>, %596, %cst_675 [0] : vector<128x8xf32> to vector<8xf32>
    %598 = vector.shape_cast %597 : vector<8xf32> to vector<1x8xf32>
    %599 = arith.addf %593, %598 : vector<1x8xf32>
    %600 = vector.broadcast %586 : vector<1x8xf32> to vector<128x8xf32>
    %601 = arith.subf %516, %600 : vector<128x8xf32>
    %602 = arith.mulf %601, %601 : vector<128x8xf32>
    %cst_676 = arith.constant dense<0.000000e+00> : vector<8xf32>
    %603 = vector.multi_reduction <add>, %602, %cst_676 [0] : vector<128x8xf32> to vector<8xf32>
    %604 = vector.shape_cast %603 : vector<8xf32> to vector<1x8xf32>
    %605 = arith.addf %599, %604 : vector<1x8xf32>
    %606 = vector.broadcast %586 : vector<1x8xf32> to vector<128x8xf32>
    %607 = arith.subf %571, %606 : vector<128x8xf32>
    %608 = arith.mulf %607, %607 : vector<128x8xf32>
    %cst_677 = arith.constant dense<0.000000e+00> : vector<8xf32>
    %609 = vector.multi_reduction <add>, %608, %cst_677 [0] : vector<128x8xf32> to vector<8xf32>
    %610 = vector.shape_cast %609 : vector<8xf32> to vector<1x8xf32>
    %611 = arith.addf %605, %610 : vector<1x8xf32>
    %cst_678 = arith.constant 0.001953125 : f32
    %612 = vector.broadcast %cst_678 : f32 to vector<1x8xf32>
    %613 = arith.mulf %611, %612 : vector<1x8xf32>
    %c0_679 = arith.constant 0 : index
    %c0_680 = arith.constant 0 : index
    %614 = vector.load %arg8[%c0_679, %c0_680] : memref<1x8xf32, #tpu.memory_space<vmem>>, vector<1x8xf32>
    %cst_681 = arith.constant 9.99999974E-6 : f32
    %615 = vector.broadcast %cst_681 : f32 to vector<1x8xf32>
    %616 = arith.addf %613, %615 : vector<1x8xf32>
    %617 = math.rsqrt %616 : vector<1x8xf32>
    %618 = arith.mulf %614, %617 : vector<1x8xf32>
    %c0_682 = arith.constant 0 : index
    %c0_683 = arith.constant 0 : index
    %619 = vector.load %arg9[%c0_682, %c0_683] : memref<1x8xf32, #tpu.memory_space<vmem>>, vector<1x8xf32>
    %620 = arith.mulf %586, %618 : vector<1x8xf32>
    %621 = arith.subf %619, %620 : vector<1x8xf32>
    %622 = vector.broadcast %618 : vector<1x8xf32> to vector<128x8xf32>
    %623 = arith.mulf %406, %622 : vector<128x8xf32>
    %624 = vector.broadcast %621 : vector<1x8xf32> to vector<128x8xf32>
    %625 = arith.addf %623, %624 : vector<128x8xf32>
    %cst_684 = arith.constant 0.000000e+00 : f32
    %626 = vector.broadcast %cst_684 : f32 to vector<128x8xf32>
    %627 = arith.maximumf %625, %626 : vector<128x8xf32>
    %628 = vector.broadcast %618 : vector<1x8xf32> to vector<128x8xf32>
    %629 = arith.mulf %461, %628 : vector<128x8xf32>
    %630 = vector.broadcast %621 : vector<1x8xf32> to vector<128x8xf32>
    %631 = arith.addf %629, %630 : vector<128x8xf32>
    %cst_685 = arith.constant 0.000000e+00 : f32
    %632 = vector.broadcast %cst_685 : f32 to vector<128x8xf32>
    %633 = arith.maximumf %631, %632 : vector<128x8xf32>
    %634 = vector.broadcast %618 : vector<1x8xf32> to vector<128x8xf32>
    %635 = arith.mulf %516, %634 : vector<128x8xf32>
    %636 = vector.broadcast %621 : vector<1x8xf32> to vector<128x8xf32>
    %637 = arith.addf %635, %636 : vector<128x8xf32>
    %cst_686 = arith.constant 0.000000e+00 : f32
    %638 = vector.broadcast %cst_686 : f32 to vector<128x8xf32>
    %639 = arith.maximumf %637, %638 : vector<128x8xf32>
    %640 = vector.broadcast %618 : vector<1x8xf32> to vector<128x8xf32>
    %641 = arith.mulf %571, %640 : vector<128x8xf32>
    %642 = vector.broadcast %621 : vector<1x8xf32> to vector<128x8xf32>
    %643 = arith.addf %641, %642 : vector<128x8xf32>
    %cst_687 = arith.constant 0.000000e+00 : f32
    %644 = vector.broadcast %cst_687 : f32 to vector<128x8xf32>
    %645 = arith.maximumf %643, %644 : vector<128x8xf32>
    %646 = vector.shape_cast %627 : vector<128x8xf32> to vector<16x8x8xf32>
    %647 = vector.shape_cast %633 : vector<128x8xf32> to vector<16x8x8xf32>
    %648 = vector.shape_cast %639 : vector<128x8xf32> to vector<16x8x8xf32>
    %649 = vector.shape_cast %645 : vector<128x8xf32> to vector<16x8x8xf32>
    %650 = tpu.concatenate %646, %647, %648, %649 in 2 : vector<16x8x8xf32>, vector<16x8x8xf32>, vector<16x8x8xf32>, vector<16x8x8xf32> -> vector<16x8x32xf32>
    %651 = vector.extract_strided_slice %650 {offsets = [0, 0, 0], sizes = [16, 1, 32], strides = [1, 1, 1]} : vector<16x8x32xf32> to vector<16x1x32xf32>
    %652 = vector.shape_cast %651 : vector<16x1x32xf32> to vector<16x32xf32>
    %653 = vector.extract_strided_slice %650 {offsets = [0, 1, 0], sizes = [16, 1, 32], strides = [1, 1, 1]} : vector<16x8x32xf32> to vector<16x1x32xf32>
    %654 = vector.shape_cast %653 : vector<16x1x32xf32> to vector<16x32xf32>
    %655 = vector.extract_strided_slice %650 {offsets = [0, 2, 0], sizes = [16, 1, 32], strides = [1, 1, 1]} : vector<16x8x32xf32> to vector<16x1x32xf32>
    %656 = vector.shape_cast %655 : vector<16x1x32xf32> to vector<16x32xf32>
    %657 = vector.extract_strided_slice %650 {offsets = [0, 3, 0], sizes = [16, 1, 32], strides = [1, 1, 1]} : vector<16x8x32xf32> to vector<16x1x32xf32>
    %658 = vector.shape_cast %657 : vector<16x1x32xf32> to vector<16x32xf32>
    %659 = vector.extract_strided_slice %650 {offsets = [0, 4, 0], sizes = [16, 1, 32], strides = [1, 1, 1]} : vector<16x8x32xf32> to vector<16x1x32xf32>
    %660 = vector.shape_cast %659 : vector<16x1x32xf32> to vector<16x32xf32>
    %661 = vector.extract_strided_slice %650 {offsets = [0, 5, 0], sizes = [16, 1, 32], strides = [1, 1, 1]} : vector<16x8x32xf32> to vector<16x1x32xf32>
    %662 = vector.shape_cast %661 : vector<16x1x32xf32> to vector<16x32xf32>
    %663 = vector.extract_strided_slice %650 {offsets = [0, 6, 0], sizes = [16, 1, 32], strides = [1, 1, 1]} : vector<16x8x32xf32> to vector<16x1x32xf32>
    %664 = vector.shape_cast %663 : vector<16x1x32xf32> to vector<16x32xf32>
    %665 = vector.extract_strided_slice %650 {offsets = [0, 7, 0], sizes = [16, 1, 32], strides = [1, 1, 1]} : vector<16x8x32xf32> to vector<16x1x32xf32>
    %666 = vector.shape_cast %665 : vector<16x1x32xf32> to vector<16x32xf32>
    %667 = tpu.concatenate %652, %654, %656, %658, %660, %662, %664, %666 in 1 : vector<16x32xf32>, vector<16x32xf32>, vector<16x32xf32>, vector<16x32xf32>, vector<16x32xf32>, vector<16x32xf32>, vector<16x32xf32>, vector<16x32xf32> -> vector<16x256xf32>
    %c0_688 = arith.constant 0 : index
    %c0_689 = arith.constant 0 : index
    %668 = vector.load %arg10[%c0_688, %c0_689] : memref<16x256xf32, #tpu.memory_space<vmem>>, vector<16x256xf32>
    tpu.vector_store %arg10[%c0_688, %c0_689], %667 {strides = array<i32>} : memref<16x256xf32, #tpu.memory_space<vmem>>, vector<16x256xf32>,
    return
  }
}

</mosaic_0001>

<bundles_post_ra>
// kernel: tpu_custom_call.1
= control target key start
LH: loop header
LB: loop body
LE: loop exit
PB: predicated region body
PF: predicated region fallthrough
CT: control target
= control target key end

     0   :  { %vm432_vm0 = vcmask 1043456   ;;  %vm36_vm1 = vcmask 31744   ;;  %s22117_s14 = smov 2   ;;  %s28645_s0 = inlined_call_operand.vmem [shape: f32[128,4], index: 0, kind: input, shape index: {}]   ;;  %s28646_s1 = inlined_call_operand.vmem [shape: f32[4,2,8,8,2], index: 1, kind: input, shape index: {}]   ;;  %s28647_s2 = inlined_call_operand.vmem [shape: f32[4,8], index: 2, kind: input, shape index: {}]   ;;  %s28648_s3 = inlined_call_operand.vmem [shape: f32[1,8], index: 3, kind: input, shape index: {}]   ;;  %s28649_s4 = inlined_call_operand.vmem [shape: f32[36,8], index: 4, kind: input, shape index: {}]   ;;  %s28650_s5 = inlined_call_operand.vmem [shape: f32[1,8], index: 5, kind: input, shape index: {}]   ;;  %s28651_s6 = inlined_call_operand.vmem [shape: f32[1,8], index: 6, kind: input, shape index: {}]   ;;  %s28652_s7 = inlined_call_operand.vmem [shape: f32[72,8], index: 7, kind: input, shape index: {}]   ;;  %s28653_s8 = inlined_call_operand.vmem [shape: f32[1,8], index: 8, kind: input, shape index: {}]   ;;  %s28654_s9 = inlined_call_operand.vmem [shape: f32[1,8], index: 9, kind: input, shape index: {}]   ;;  %s28655_s10 = inlined_call_operand.hbm [shape: f32[16,256], index: 10, kind: output, shape index: {}]  }
   0x1   :  { %v376_v0 = vld [vmem:[%s28647_s2] sm:$0xf]  ;;  %v361_v2 = vld [vmem:[%s28645_s0 + $0x8] sm:$0xff]  ;;  %v362_v4 = vld [vmem:[%s28645_s0 + $0x10] sm:$0xff] }
   0x2   :  { %v360_v1 = vld [vmem:[%s28645_s0] sm:$0xff]  ;;  %19051 = vmatprep.subr.msk.mxu0 %vm432_vm0, %v376_v0  ;;  %20949 = vmatprep.subr.msk.mxu1 %vm432_vm0, %v376_v0  ;;  %v369_v5 = vld [vmem:[%s28645_s0 + $0x48] sm:$0xff]  ;;  %v370_v6 = vld [vmem:[%s28645_s0 + $0x50] sm:$0xff] }
   0x3   :  { %19053 = vmatprep.mubr.msk.f32.mxu0 %vm36_vm1, %v360_v1  ;;  %v368_v3 = vld [vmem:[%s28645_s0 + $0x40] sm:$0xff]  ;;  %19052 = vmatpush3.msk.msra.mxu0 %vm432_vm0, %v376_v0  ;;  %v363_v7 = vld [vmem:[%s28645_s0 + $0x18] sm:$0xff]  ;;  %v16591_v12 = vld [vmem:[%s28646_s1 + $0x108] sm:$0xff] }
   0x4   :  { %19054 = vmatmul.mubr.msk.f32.vlgmr.msra.gmra.mrb[0].mxu0 %vm36_vm1, %v361_v2  ;;  %20950 = vmatpush3.msk.msra.mxu1 %vm432_vm0, %v376_v0  ;;  %v364_v8 = vld [vmem:[%s28645_s0 + $0x20] sm:$0xff]  ;;  %v371_v10 = vld [vmem:[%s28645_s0 + $0x58] sm:$0xff]  ;;  %v365_v13 = vld [vmem:[%s28645_s0 + $0x28] sm:$0xff] }
   0x5   :  { %19065 = vmatprep.mubr.msk.f32.mxu1 %vm36_vm1, %v368_v3  ;;  %19056 = vmatprep.mubr.msk.f32.mxu0 %vm36_vm1, %v362_v4  ;;  %v16606_v9 = vld [vmem:[%s28646_s1 + $0x180] sm:$0xff]  ;;  %v366_v14 = vld [vmem:[%s28645_s0 + $0x30] sm:$0xff]  ;;  %v373_v15 = vld [vmem:[%s28645_s0 + $0x68] sm:$0xff] }
   0x6   :  { %19066 = vmatmul.mubr.msk.f32.vlgmr.msra.gmra.mrb[0].mxu1 %vm36_vm1, %v369_v5  ;;  %1116 = vrot.lane.b32.xlu1 %v16606_v9, %s22117_s14  ;;  %v372_v11 = vld [vmem:[%s28645_s0 + $0x60] sm:$0xff]  ;;  %v374_v16 = vld [vmem:[%s28645_s0 + $0x70] sm:$0xff]  ;;  %v367_v18 = vld [vmem:[%s28645_s0 + $0x38] sm:$0xff] }
   0x7   :  { %19068 = vmatprep.mubr.msk.f32.mxu1 %vm36_vm1, %v370_v6  ;;  %v16592_v17 = vld [vmem:[%s28646_s1 + $0x110] sm:$0xff]  ;;  %v16590_v19 = vld [vmem:[%s28646_s1 + $0x100] sm:$0xff] }
   0x8   :  { %19057 = vmatmul.mubr.msk.f32.gmra.mrb[2].mxu0 %vm36_vm1, %v363_v7 }
   0x9   :  { %19059 = vmatprep.mubr.msk.f32.mxu0 %vm36_vm1, %v364_v8 }
   0xa   :  { %19069 = vmatmul.mubr.msk.f32.gmra.mrb[2].mxu1 %vm36_vm1, %v371_v10  ;;  %956 = vrot.lane.b32.xlu1 %v16591_v12, %s22117_s14 }
   0xb   :  { %19071 = vmatprep.mubr.msk.f32.mxu1 %vm36_vm1, %v372_v11 }
   0xc   :  { %19060 = vmatmul.mubr.msk.f32.gmra.mrb[4].mxu0 %vm36_vm1, %v365_v13 }
   0xd   :  { %19062 = vmatprep.mubr.msk.f32.mxu0 %vm36_vm1, %v366_v14 }
   0xe   :  { %15 = vsyncpa [#allocation5], 0  ;;  %19072 = vmatmul.mubr.msk.f32.gmra.mrb[4].mxu1 %vm36_vm1, %v373_v15  ;;  %954 = vrot.lane.b32.xlu0 %v16590_v19, %s22117_s14  ;;  %v375_v20 = vld [vmem:[%s28645_s0 + $0x78] sm:$0xff]  ;;  %v16607_v21 = vld [vmem:[%s28646_s1 + $0x188] sm:$0xff]  ;;  %vm38_vm2 = vcmask 25600   ;;  %v28656_v38 = vmov 0.0  }
   0xf   :  { %19074 = vmatprep.mubr.msk.f32.mxu1 %vm36_vm1, %v374_v16  ;;  %958 = vrot.lane.b32.xlu1 %v16592_v17, %s22117_s14  ;;  %v16608_v22 = vld [vmem:[%s28646_s1 + $0x190] sm:$0xff]  ;;  %v16593_v23 = vld [vmem:[%s28646_s1 + $0x118] sm:$0xff]  ;;  %v16594_v24 = vld [vmem:[%s28646_s1 + $0x120] sm:$0xff]  ;;  %123 = vst.msk [vmem:[#allocation2 + $0x2a8] sm:$0x3] %vm38_vm2, %v28656_v38  ;;  %s22120_s30 = smov 122  }
  0x10   :  { %19063 = vmatmul.mubr.msk.f32.gmra.mrb[6].mxu0 %vm36_vm1, %v367_v18  ;;  %v16609_v25 = vld [vmem:[%s28646_s1 + $0x198] sm:$0xff]  ;;  %v16610_v26 = vld [vmem:[%s28646_s1 + $0x1a0] sm:$0xff]  ;;  %v16595_v27 = vld [vmem:[%s28646_s1 + $0x128] sm:$0xff]  ;;  %122 = vst.msk [vmem:[#allocation2 + $0x2a0] sm:$0xff] %vm36_vm1, %v28656_v38  ;;  %s22121_s26 = smov 126   ;;  %vm661_vm3 = vcmask 15360  }
  0x11   :  { %v16596_v28 = vld [vmem:[%s28646_s1 + $0x130] sm:$0xff]  ;;  %v16611_v29 = vld [vmem:[%s28646_s1 + $0x1a8] sm:$0xff]  ;;  %v16598_v31 = vld [vmem:[%s28646_s1 + $0x140] sm:$0xff]  ;;  %40 = vst.msk [vmem:[#allocation2 + $0x10] sm:$0xff] %vm36_vm1, %v28656_v38  ;;  %vm198_vm4 = vcmask 64512   ;;  %vm200_vm5 = vcmask 58368  }
  0x12   :  { %19075 = vmatmul.mubr.msk.f32.gmra.mrb[6].mxu1 %vm36_vm1, %v375_v20  ;;  %v16612_v30 = vld [vmem:[%s28646_s1 + $0x1b0] sm:$0xff]  ;;  %v16614_v32 = vld [vmem:[%s28646_s1 + $0x1c0] sm:$0xff]  ;;  %v16599_v33 = vld [vmem:[%s28646_s1 + $0x148] sm:$0xff]  ;;  %41 = vst.msk [vmem:[#allocation2 + $0x18] sm:$0x3] %vm38_vm2, %v28656_v38  ;;  %s22124_s29 = smov 24  }
  0x13   :  { %1118 = vrot.lane.b32.xlu1 %v16607_v21, %s22117_s14  ;;  %v16600_v34 = vld [vmem:[%s28646_s1 + $0x150] sm:$0xff]  ;;  %v16615_v35 = vld [vmem:[%s28646_s1 + $0x1c8] sm:$0xff]  ;;  %v16601_v37 = vld [vmem:[%s28646_s1 + $0x158] sm:$0xff]  ;;  %42 = vst.msk [vmem:[#allocation2 + $0x20] sm:$0xff] %vm36_vm1, %v28656_v38  ;;  %vm16200_vm6 = vcmask 130048   ;;  %vm16217_vm7 = vcmask 195584  }
  0x14   :  { %v16616_v36 = vld [vmem:[%s28646_s1 + $0x1d0] sm:$0xff]  ;;  %43 = vst.msk [vmem:[#allocation2 + $0x28] sm:$0x3] %vm38_vm2, %v28656_v38  ;;  %45 = vst.msk [vmem:[#allocation2 + $0x38] sm:$0x3] %vm38_vm2, %v28656_v38  ;;  %v16602_v51 = vld [vmem:[%s28646_s1 + $0x160] sm:$0xff] }
  0x15   :  { %44 = vst.msk [vmem:[#allocation2 + $0x30] sm:$0xff] %vm36_vm1, %v28656_v38  ;;  %46 = vst.msk [vmem:[#allocation2 + $0x40] sm:$0xff] %vm36_vm1, %v28656_v38  ;;  %v1232_v39 = vld [vmem:[%s28649_s4 + $0x4] sm:$0xf]  ;;  %v22634_v40 = vld [vmem:[%s28648_s3] ss:$0 sm:$0xff] }
  0x16   :  { %47 = vst.msk [vmem:[#allocation2 + $0x48] sm:$0x3] %vm38_vm2, %v28656_v38  ;;  %49 = vst.msk [vmem:[#allocation2 + $0x58] sm:$0x3] %vm38_vm2, %v28656_v38  ;;  %19311 = vmatprep.subr.msk.mxu0 %vm432_vm0, %v1232_v39  ;;  %19077 = vmatprep.subr.msk.mxu1 %vm432_vm0, %v1232_v39  ;;  %s22119_s3 = smov 124   ;;  %v16617_v57 = vld [vmem:[%s28646_s1 + $0x1d8] sm:$0xff] }
  0x17   :  { %1120 = vrot.lane.b32.xlu1 %v16608_v22, %s22117_s14  ;;  %48 = vst.msk [vmem:[#allocation2 + $0x50] sm:$0xff] %vm36_vm1, %v28656_v38  ;;  %50 = vst.msk [vmem:[#allocation2 + $0x60] sm:$0xff] %vm36_vm1, %v28656_v38  ;;  %19312 = vmatpush3.msk.msra.mxu0 %vm432_vm0, %v1232_v39  ;;  %v16618_v2 = vld [vmem:[%s28646_s1 + $0x1e0] sm:$0xff]  ;;  %v16603_v12 = vld [vmem:[%s28646_s1 + $0x168] sm:$0xff]  ;;  %vm16251_vm8 = vcmask 1041409   ;;  %vm16254_vm9 = vcmask 1042434  }
  0x18   :  { %51 = vst.msk [vmem:[#allocation2 + $0x68] sm:$0x3] %vm38_vm2, %v28656_v38  ;;  %53 = vst.msk [vmem:[#allocation2 + $0x78] sm:$0x3] %vm38_vm2, %v28656_v38  ;;  %19078 = vmatpush3.msk.msra.mxu1 %vm432_vm0, %v1232_v39  ;;  %v16604_v14 = vld [vmem:[%s28646_s1 + $0x170] sm:$0xff]  ;;  %v16619_v16 = vld [vmem:[%s28646_s1 + $0x1e8] sm:$0xff] }
  0x19   :  { %52 = vst.msk [vmem:[#allocation2 + $0x70] sm:$0xff] %vm36_vm1, %v28656_v38  ;;  %54 = vst.msk [vmem:[#allocation2 + $0x80] sm:$0xff] %vm36_vm1, %v28656_v38  ;;  %v16620_v19 = vld [vmem:[%s28646_s1 + $0x1f0] sm:$0xff]  ;;  %v16574_v20 = vld [vmem:[%s28646_s1 + $0x80] sm:$0xff]  ;;  %vm16257_vm10 = vcmask 1043459   ;;  %vm16260_vm11 = vcmask 1044484  }
  0x1a   :  { %55 = vst.msk [vmem:[#allocation2 + $0x88] sm:$0x3] %vm38_vm2, %v28656_v38  ;;  %57 = vst.msk [vmem:[#allocation2 + $0x98] sm:$0x3] %vm38_vm2, %v28656_v38  ;;  %v586_v39 = vld [vmem:[%s28646_s1 + $0x28] sm:$0xff]  ;;  %vm16263_vm12 = vcmask 1045509  }
  0x1b   :  { %960 = vrot.lane.b32.xlu1 %v16593_v23, %s22117_s14  ;;  %56 = vst.msk [vmem:[#allocation2 + $0x90] sm:$0xff] %vm36_vm1, %v28656_v38  ;;  %60 = vst.msk [vmem:[#allocation2 + $0xb0] sm:$0xff] %vm36_vm1, %v28656_v38  ;;  %v16575_v23 = vld [vmem:[%s28646_s1 + $0x88] sm:$0xff]  ;;  %vm16266_vm13 = vcmask 1046534   ;;  %vm16269_vm14 = vcmask 1047559   ;;  %s22125_s11 = smov 32  }
  0x1c   :  { %61 = vst.msk [vmem:[#allocation2 + $0xb8] sm:$0x3] %vm38_vm2, %v28656_v38  ;;  %63 = vst.msk [vmem:[#allocation2 + $0xc8] sm:$0x3] %vm38_vm2, %v28656_v38  ;;  %vm16521_vm15 = vcmask 261120   ;;  %s22128_s12 = smov [#allocation4]  }
  0x1d   :  { %62 = vst.msk [vmem:[#allocation2 + $0xc0] sm:$0xff] %vm36_vm1, %v28656_v38  ;;  %64 = vst.msk [vmem:[#allocation2 + $0xd0] sm:$0xff] %vm36_vm1, %v28656_v38  ;;  %s16545_s13 = sshll.u32 %s22128_s12, 4  ;;  %s16546_s13 = int_to_ptr.vmem [resolvable:$true] %s16545_s13 }
  0x1e   :  { %65 = vst.msk [vmem:[#allocation2 + $0xd8] sm:$0x3] %vm38_vm2, %v28656_v38  ;;  %67 = vst.msk [vmem:[#allocation2 + $0xe8] sm:$0x3] %vm38_vm2, %v28656_v38  ;;  %s22093_s15 = scalar_lea.vmem %s16546_s13, 512  ;;  %p22098_p1 = scmp.lt.s32.totalorder %s16546_s13, %s16546_s13 }
  0x1f   :  { %962 = vrot.lane.b32.xlu1 %v16594_v24, %s22117_s14  ;;  %66 = vst.msk [vmem:[#allocation2 + $0xe0] sm:$0xff] %vm36_vm1, %v28656_v38  ;;  %68 = vst.msk [vmem:[#allocation2 + $0xf0] sm:$0xff] %vm36_vm1, %v28656_v38  ;;  %p22094_p0 = scmp.ne.s32.totalorder %s16546_s13, %s22093_s15  ;;  %p22099_p2 = scmp.lt.s32.totalorder %s22093_s15, %s22093_s15 }
  0x20   :  { %69 = vst.msk [vmem:[#allocation2 + $0xf8] sm:$0x3] %vm38_vm2, %v28656_v38  ;;  %71 = vst.msk [vmem:[#allocation2 + $0x108] sm:$0x3] %vm38_vm2, %v28656_v38 }
  0x21   :  { %70 = vst.msk [vmem:[#allocation2 + $0x100] sm:$0xff] %vm36_vm1, %v28656_v38  ;;  %72 = vst.msk [vmem:[#allocation2 + $0x110] sm:$0xff] %vm36_vm1, %v28656_v38  ;;  %p22100_p3 = por %p22099_p2, %p22098_p1 }
  0x22   :  { %73 = vst.msk [vmem:[#allocation2 + $0x118] sm:$0x3] %vm38_vm2, %v28656_v38  ;;  %75 = vst.msk [vmem:[#allocation2 + $0x128] sm:$0x3] %vm38_vm2, %v28656_v38 }
  0x23   :  { %1122 = vrot.lane.b32.xlu1 %v16609_v25, %s22117_s14  ;;  %74 = vst.msk [vmem:[#allocation2 + $0x120] sm:$0xff] %vm36_vm1, %v28656_v38  ;;  %76 = vst.msk [vmem:[#allocation2 + $0x130] sm:$0xff] %vm36_vm1, %v28656_v38  ;;  %v582_v25 = vld [vmem:[%s28646_s1 + $0x8] sm:$0xff]  ;;  %p22101_p4 = pnand %p22100_p3, %p22094_p0 }
  0x24   :  { %77 = vst.msk [vmem:[#allocation2 + $0x138] sm:$0x3] %vm38_vm2, %v28656_v38  ;;  %81 = vst.msk [vmem:[#allocation2 + $0x158] sm:$0x3] %vm38_vm2, %v28656_v38 }
  0x25   :  { %80 = vst.msk [vmem:[#allocation2 + $0x150] sm:$0xff] %vm36_vm1, %v28656_v38  ;;  %82 = vst.msk [vmem:[#allocation2 + $0x160] sm:$0xff] %vm36_vm1, %v28656_v38 }
  0x26   :  { %83 = vst.msk [vmem:[#allocation2 + $0x168] sm:$0x3] %vm38_vm2, %v28656_v38  ;;  %85 = vst.msk [vmem:[#allocation2 + $0x178] sm:$0x3] %vm38_vm2, %v28656_v38 }
  0x27   :  { %1124 = vrot.lane.b32.xlu1 %v16610_v26, %s22117_s14  ;;  %84 = vst.msk [vmem:[#allocation2 + $0x170] sm:$0xff] %vm36_vm1, %v28656_v38  ;;  %86 = vst.msk [vmem:[#allocation2 + $0x180] sm:$0xff] %vm36_vm1, %v28656_v38 }
  0x28   :  { %87 = vst.msk [vmem:[#allocation2 + $0x188] sm:$0x3] %vm38_vm2, %v28656_v38  ;;  %89 = vst.msk [vmem:[#allocation2 + $0x198] sm:$0x3] %vm38_vm2, %v28656_v38 }
  0x29   :  { %88 = vst.msk [vmem:[#allocation2 + $0x190] sm:$0xff] %vm36_vm1, %v28656_v38  ;;  %90 = vst.msk [vmem:[#allocation2 + $0x1a0] sm:$0xff] %vm36_vm1, %v28656_v38 }
  0x2a   :  { %91 = vst.msk [vmem:[#allocation2 + $0x1a8] sm:$0x3] %vm38_vm2, %v28656_v38  ;;  %93 = vst.msk [vmem:[#allocation2 + $0x1b8] sm:$0x3] %vm38_vm2, %v28656_v38 }
  0x2b   :  { %964 = vrot.lane.b32.xlu1 %v16595_v27, %s22117_s14  ;;  %92 = vst.msk [vmem:[#allocation2 + $0x1b0] sm:$0xff] %vm36_vm1, %v28656_v38  ;;  %94 = vst.msk [vmem:[#allocation2 + $0x1c0] sm:$0xff] %vm36_vm1, %v28656_v38  ;;  %v16576_v27 = vld [vmem:[%s28646_s1 + $0x90] sm:$0xff] }
  0x2c   :  { %95 = vst.msk [vmem:[#allocation2 + $0x1c8] sm:$0x3] %vm38_vm2, %v28656_v38  ;;  %97 = vst.msk [vmem:[#allocation2 + $0x1d8] sm:$0x3] %vm38_vm2, %v28656_v38 }
  0x2d   :  { %96 = vst.msk [vmem:[#allocation2 + $0x1d0] sm:$0xff] %vm36_vm1, %v28656_v38  ;;  %100 = vst.msk [vmem:[#allocation2 + $0x1f0] sm:$0xff] %vm36_vm1, %v28656_v38 }
  0x2e   :  { %101 = vst.msk [vmem:[#allocation2 + $0x1f8] sm:$0x3] %vm38_vm2, %v28656_v38  ;;  %103 = vst.msk [vmem:[#allocation2 + $0x208] sm:$0x3] %vm38_vm2, %v28656_v38 }
  0x2f   :  { %966 = vrot.lane.b32.xlu1 %v16596_v28, %s22117_s14  ;;  %102 = vst.msk [vmem:[#allocation2 + $0x200] sm:$0xff] %vm36_vm1, %v28656_v38  ;;  %104 = vst.msk [vmem:[#allocation2 + $0x210] sm:$0xff] %vm36_vm1, %v28656_v38 }
  0x30   :  { %105 = vst.msk [vmem:[#allocation2 + $0x218] sm:$0x3] %vm38_vm2, %v28656_v38  ;;  %107 = vst.msk [vmem:[#allocation2 + $0x228] sm:$0x3] %vm38_vm2, %v28656_v38 }
  0x31   :  { %106 = vst.msk [vmem:[#allocation2 + $0x220] sm:$0xff] %vm36_vm1, %v28656_v38  ;;  %108 = vst.msk [vmem:[#allocation2 + $0x230] sm:$0xff] %vm36_vm1, %v28656_v38 }
  0x32   :  { %109 = vst.msk [vmem:[#allocation2 + $0x238] sm:$0x3] %vm38_vm2, %v28656_v38  ;;  %111 = vst.msk [vmem:[#allocation2 + $0x248] sm:$0x3] %vm38_vm2, %v28656_v38 }
  0x33   :  { %1126 = vrot.lane.b32.xlu1 %v16611_v29, %s22117_s14  ;;  %110 = vst.msk [vmem:[#allocation2 + $0x240] sm:$0xff] %vm36_vm1, %v28656_v38  ;;  %112 = vst.msk [vmem:[#allocation2 + $0x250] sm:$0xff] %vm36_vm1, %v28656_v38  ;;  %v16577_v29 = vld [vmem:[%s28646_s1 + $0x98] sm:$0xff] }
  0x34   :  { %113 = vst.msk [vmem:[#allocation2 + $0x258] sm:$0x3] %vm38_vm2, %v28656_v38  ;;  %115 = vst.msk [vmem:[#allocation2 + $0x268] sm:$0x3] %vm38_vm2, %v28656_v38 }
  0x35   :  { %114 = vst.msk [vmem:[#allocation2 + $0x260] sm:$0xff] %vm36_vm1, %v28656_v38  ;;  %116 = vst.msk [vmem:[#allocation2 + $0x270] sm:$0xff] %vm36_vm1, %v28656_v38 }
  0x36   :  { %117 = vst.msk [vmem:[#allocation2 + $0x278] sm:$0x3] %vm38_vm2, %v28656_v38  ;;  %119 = vst.msk [vmem:[#allocation2 + $0x288] sm:$0x3] %vm38_vm2, %v28656_v38 }
  0x37   :  { %1128 = vrot.lane.b32.xlu1 %v16612_v30, %s22117_s14  ;;  %118 = vst.msk [vmem:[#allocation2 + $0x280] sm:$0xff] %vm36_vm1, %v28656_v38  ;;  %120 = vst.msk [vmem:[#allocation2 + $0x290] sm:$0xff] %vm36_vm1, %v28656_v38 }
  0x38   :  { %121 = vst.msk [vmem:[#allocation2 + $0x298] sm:$0x3] %vm38_vm2, %v28656_v38  ;;  %125 = vst.msk [vmem:[#allocation2 + $0x2b8] sm:$0x3] %vm38_vm2, %v28656_v38 }
  0x39   :  { %124 = vst.msk [vmem:[#allocation2 + $0x2b0] sm:$0xff] %vm36_vm1, %v28656_v38  ;;  %126 = vst.msk [vmem:[#allocation2 + $0x2c0] sm:$0xff] %vm36_vm1, %v28656_v38 }
  0x3a   :  { %127 = vst.msk [vmem:[#allocation2 + $0x2c8] sm:$0x3] %vm38_vm2, %v28656_v38  ;;  %129 = vst.msk [vmem:[#allocation2 + $0x2d8] sm:$0x3] %vm38_vm2, %v28656_v38 }
  0x3b   :  { %970 = vrot.lane.b32.xlu1 %v16598_v31, %s22117_s14  ;;  %128 = vst.msk [vmem:[#allocation2 + $0x2d0] sm:$0xff] %vm36_vm1, %v28656_v38  ;;  %130 = vst.msk [vmem:[#allocation2 + $0x2e0] sm:$0xff] %vm36_vm1, %v28656_v38 }
  0x3c   :  { %131 = vst.msk [vmem:[#allocation2 + $0x2e8] sm:$0x3] %vm38_vm2, %v28656_v38  ;;  %133 = vst.msk [vmem:[#allocation2 + $0x2f8] sm:$0x3] %vm38_vm2, %v28656_v38 }
  0x3d   :  { %132 = vst.msk [vmem:[#allocation2 + $0x2f0] sm:$0xff] %vm36_vm1, %v28656_v38  ;;  %134 = vst.msk [vmem:[#allocation2 + $0x300] sm:$0xff] %vm36_vm1, %v28656_v38 }
  0x3e   :  { %135 = vst.msk [vmem:[#allocation2 + $0x308] sm:$0x3] %vm38_vm2, %v28656_v38  ;;  %139 = vst.msk [vmem:[#allocation2 + $0x328] sm:$0x3] %vm38_vm2, %v28656_v38  ;;  %v22694_v5 = vld [vmem:[#allocation2 + $0x281] sm:$0xff] }
  0x3f   :  { %1132 = vrot.lane.b32.xlu1 %v16614_v32, %s22117_s14  ;;  %138 = vst.msk [vmem:[#allocation2 + $0x320] sm:$0xff] %vm36_vm1, %v28656_v38  ;;  %140 = vst.msk [vmem:[#allocation2 + $0x330] sm:$0xff] %vm36_vm1, %v28656_v38  ;;  %19079 = vmatprep.mubr.msk.f32.mxu1 %vm36_vm1, %v22694_v5  ;;  %v584_v32 = vld [vmem:[%s28646_s1 + $0x18] sm:$0xff] }
  0x40   :  { %141 = vst.msk [vmem:[#allocation2 + $0x338] sm:$0x3] %vm38_vm2, %v28656_v38  ;;  %143 = vst.msk [vmem:[#allocation2 + $0x348] sm:$0x3] %vm38_vm2, %v28656_v38 }
  0x41   :  { %142 = vst.msk [vmem:[#allocation2 + $0x340] sm:$0xff] %vm36_vm1, %v28656_v38  ;;  %144 = vst.msk [vmem:[#allocation2 + $0x350] sm:$0xff] %vm36_vm1, %v28656_v38 }
  0x42   :  { %145 = vst.msk [vmem:[#allocation2 + $0x358] sm:$0x3] %vm38_vm2, %v28656_v38  ;;  %147 = vst.msk [vmem:[#allocation2 + $0x368] sm:$0x3] %vm38_vm2, %v28656_v38 }
  0x43   :  { %972 = vrot.lane.b32.xlu1 %v16599_v33, %s22117_s14  ;;  %146 = vst.msk [vmem:[#allocation2 + $0x360] sm:$0xff] %vm36_vm1, %v28656_v38  ;;  %148 = vst.msk [vmem:[#allocation2 + $0x370] sm:$0xff] %vm36_vm1, %v28656_v38  ;;  %v16578_v33 = vld [vmem:[%s28646_s1 + $0xa0] sm:$0xff] }
  0x44   :  { %149 = vst.msk [vmem:[#allocation2 + $0x378] sm:$0x3] %vm38_vm2, %v28656_v38  ;;  %151 = vst.msk [vmem:[#allocation2 + $0x388] sm:$0x3] %vm38_vm2, %v28656_v38 }
  0x45   :  { %150 = vst.msk [vmem:[#allocation2 + $0x380] sm:$0xff] %vm36_vm1, %v28656_v38  ;;  %152 = vst.msk [vmem:[#allocation2 + $0x390] sm:$0xff] %vm36_vm1, %v28656_v38 }
  0x46   :  { %153 = vst.msk [vmem:[#allocation2 + $0x398] sm:$0x3] %vm38_vm2, %v28656_v38  ;;  %155 = vst.msk [vmem:[#allocation2 + $0x3a8] sm:$0x3] %vm38_vm2, %v28656_v38 }
  0x47   :  { %974 = vrot.lane.b32.xlu1 %v16600_v34, %s22117_s14  ;;  %154 = vst.msk [vmem:[#allocation2 + $0x3a0] sm:$0xff] %vm36_vm1, %v28656_v38  ;;  %158 = vst.msk [vmem:[#allocation2 + $0x3c0] sm:$0xff] %vm36_vm1, %v28656_v38 }
  0x48   :  { %159 = vst.msk [vmem:[#allocation2 + $0x3c8] sm:$0x3] %vm38_vm2, %v28656_v38  ;;  %161 = vst.msk [vmem:[#allocation2 + $0x3d8] sm:$0x3] %vm38_vm2, %v28656_v38 }
  0x49   :  { %160 = vst.msk [vmem:[#allocation2 + $0x3d0] sm:$0xff] %vm36_vm1, %v28656_v38  ;;  %162 = vst.msk [vmem:[#allocation2 + $0x3e0] sm:$0xff] %vm36_vm1, %v28656_v38 }
  0x4a   :  { %163 = vst.msk [vmem:[#allocation2 + $0x3e8] sm:$0x3] %vm38_vm2, %v28656_v38  ;;  %165 = vst.msk [vmem:[#allocation2 + $0x3f8] sm:$0x3] %vm38_vm2, %v28656_v38 }
  0x4b   :  { %1134 = vrot.lane.b32.xlu1 %v16615_v35, %s22117_s14  ;;  %164 = vst.msk [vmem:[#allocation2 + $0x3f0] sm:$0xff] %vm36_vm1, %v28656_v38  ;;  %166 = vst.msk [vmem:[#allocation2 + $0x400] sm:$0xff] %vm36_vm1, %v28656_v38 }
  0x4c   :  { %167 = vst.msk [vmem:[#allocation2 + $0x408] sm:$0x3] %vm38_vm2, %v28656_v38  ;;  %169 = vst.msk [vmem:[#allocation2 + $0x418] sm:$0x3] %vm38_vm2, %v28656_v38 }
  0x4d   :  { %168 = vst.msk [vmem:[#allocation2 + $0x410] sm:$0xff] %vm36_vm1, %v28656_v38  ;;  %170 = vst.msk [vmem:[#allocation2 + $0x420] sm:$0xff] %vm36_vm1, %v28656_v38 }
  0x4e   :  { %171 = vst.msk [vmem:[#allocation2 + $0x428] sm:$0x3] %vm38_vm2, %v28656_v38  ;;  %173 = vst.msk [vmem:[#allocation2 + $0x438] sm:$0x3] %vm38_vm2, %v28656_v38 }
  0x4f   :  { %1136 = vrot.lane.b32.xlu1 %v16616_v36, %s22117_s14  ;;  %172 = vst.msk [vmem:[#allocation2 + $0x430] sm:$0xff] %vm36_vm1, %v28656_v38  ;;  %174 = vst.msk [vmem:[#allocation2 + $0x440] sm:$0xff] %vm36_vm1, %v28656_v38  ;;  %v22639_v42 = vld [vmem:[#allocation2 + $0x3c1] sm:$0xff] }
  0x50   :  { %175 = vst.msk [vmem:[#allocation2 + $0x448] sm:$0x3] %vm38_vm2, %v28656_v38  ;;  %179 = vst.msk [vmem:[#allocation2 + $0x468] sm:$0x3] %vm38_vm2, %v28656_v38  ;;  %19313 = vmatprep.mubr.msk.f32.mxu0 %vm36_vm1, %v22639_v42  ;;  %v16579_v36 = vld [vmem:[%s28646_s1 + $0xa8] sm:$0xff] }
  0x51   :  { %178 = vst.msk [vmem:[#allocation2 + $0x460] sm:$0xff] %vm36_vm1, %v28656_v38  ;;  %180 = vst.msk [vmem:[#allocation2 + $0x470] sm:$0xff] %vm36_vm1, %v28656_v38 }
  0x52   :  { %181 = vst.msk [vmem:[#allocation2 + $0x478] sm:$0x3] %vm38_vm2, %v28656_v38  ;;  %183 = vst.msk [vmem:[#allocation2 + $0x488] sm:$0x3] %vm38_vm2, %v28656_v38 }
  0x53   :  { %976 = vrot.lane.b32.xlu1 %v16601_v37, %s22117_s14  ;;  %182 = vst.msk [vmem:[#allocation2 + $0x480] sm:$0xff] %vm36_vm1, %v28656_v38  ;;  %184 = vst.msk [vmem:[#allocation2 + $0x490] sm:$0xff] %vm36_vm1, %v28656_v38 }
  0x54   :  { %185 = vst.msk [vmem:[#allocation2 + $0x498] sm:$0x3] %vm38_vm2, %v28656_v38  ;;  %187 = vst.msk [vmem:[#allocation2 + $0x4a8] sm:$0x3] %vm38_vm2, %v28656_v38 }
  0x55   :  { %186 = vst.msk [vmem:[#allocation2 + $0x4a0] sm:$0xff] %vm36_vm1, %v28656_v38  ;;  %188 = vst.msk [vmem:[#allocation2 + $0x4b0] sm:$0xff] %vm36_vm1, %v28656_v38 }
  0x56   :  { %189 = vst.msk [vmem:[#allocation2 + $0x4b8] sm:$0x3] %vm38_vm2, %v28656_v38  ;;  %191 = vst.msk [vmem:[#allocation2 + $0x4c8] sm:$0x3] %vm38_vm2, %v28656_v38 }
  0x57   :  { %190 = vst.msk [vmem:[#allocation2 + $0x4c0] sm:$0xff] %vm36_vm1, %v28656_v38  ;;  %192 = vst.msk [vmem:[#allocation2 + $0x4d0] sm:$0xff] %vm36_vm1, %v28656_v38 }
  0x58   :  { %193 = vst.msk [vmem:[#allocation2 + $0x4d8] sm:$0x3] %vm38_vm2, %v28656_v38  ;;  %195 = vst.msk [vmem:[#allocation2 + $0x4e8] sm:$0x3] %vm38_vm2, %v28656_v38 }
  0x59   :  { %194 = vst.msk [vmem:[#allocation2 + $0x4e0] sm:$0xff] %vm36_vm1, %v28656_v38 }
  0x78   :  { %v22636_v41 = vpop.permute.xlu1 %1116 }
  0x7c   :  { %v22656_v50 = vpop.permute.xlu1 %956 }
  0x81   :  { %v22674_v59 = vpop.permute.xlu1 %958 }
  0x85   :  { %v22707_v10 = vpop.permute.xlu1 %1118 }
  0x89   :  { %v22724_v15 = vpop.permute.xlu1 %1120 }
  0x8d   :  { %v22738_v18 = vpop.permute.xlu1 %960 }
  0x91   :  { %v22749_v21 = vpop.permute.xlu1 %962 }
  0x95   :  { %v22763_v24 = vpop.permute.xlu1 %1122 }
  0x99   :  { %v22777_v28 = vpop.permute.xlu1 %1124 }
  0x9d   :  { %v22788_v30 = vpop.permute.xlu1 %964 }
  0xa1   :  { %v22803_v34 = vpop.permute.xlu1 %966 }
  0xa5   :  { %v22818_v37 = vpop.permute.xlu1 %1126 }
  0xd7   :  { %v19055_v43 = vpop.f32.mrb[0].mxu0 }
  0xd8   :  { %v22647_v44 = vadd.f32 %v19055_v43, %v22634_v40  ;;  %v502_v45 = vpop.f32.mrb[1].mxu0  ;;  %v22829_v43 = vpop.permute.xlu1 %1128 }
  0xd9   :  { %v22650_v46 = vadd.f32 %v22634_v40, %v502_v45  ;;  %v19067_v47 = vpop.f32.mrb[0].mxu1  ;;  %v22837_v45 = vld [vmem:[%s28649_s4] sm:$0xf] }
  0xda   :  { %892 = vrot.lane.b32.xlu0 %v22647_v44, %s22119_s3  ;;  %v542_v48 = vpop.f32.mrb[1].mxu1  ;;  %v22662_v54 = vadd.f32 %v19067_v47, %v22634_v40  ;;  %v16581_v47 = vld [vmem:[%s28646_s1 + $0xb8] sm:$0xff]  ;;  %19103 = vmatprep.subr.msk.mxu1 %vm432_vm0, %v22837_v45 }
  0xdb   :  { %1052 = vrot.lane.b32.xlu1 %v22650_v46, %s22120_s30  ;;  %v19058_v49 = vpop.f32.mrb[2].mxu0  ;;  %v22719_v13 = vadd.f32 %v22634_v40, %v542_v48  ;;  %19337 = vmatprep.subr.msk.mxu0 %vm432_vm0, %v22837_v45 }
  0xdc   :  { %v512_v52 = vpop.f32.mrb[3].mxu0  ;;  %v22733_v17 = vadd.f32 %v19058_v49, %v22634_v40  ;;  %v22849_v48 = vpop.permute.xlu1 %970  ;;  %v588_v49 = vld [vmem:[%s28646_s1 + $0x38] sm:$0xff] }
  0xdd   :  { %v19070_v53 = vpop.f32.mrb[2].mxu1  ;;  %v22772_v26 = vadd.f32 %v22634_v40, %v512_v52 }
  0xde   :  { %1054 = vrot.lane.b32.xlu0 %v22647_v44, %s22120_s30  ;;  %v22666_v55 = vpop.f32.mrb[3].mxu1  ;;  %v22752_v22 = vadd.f32 %v19070_v53, %v22634_v40  ;;  %v16583_v53 = vld [vmem:[%s28646_s1 + $0xc8] sm:$0xff] }
  0xdf   :  { %978 = vrot.lane.b32.xlu1 %v16602_v51, %s22117_s14  ;;  %v22669_v56 = vpop.f32.mrb[4].mxu0  ;;  %v22792_v31 = vadd.f32 %v22634_v40, %v22666_v55  ;;  %v16582_v51 = vld [vmem:[%s28646_s1 + $0xc0] sm:$0xff] }
  0xe0   :  { %v522_v58 = vpop.f32.mrb[5].mxu0  ;;  %v22807_v35 = vadd.f32 %v22669_v56, %v22634_v40  ;;  %v22860_v52 = vpop.permute.xlu1 %1132  ;;  %v590_v56 = vld [vmem:[%s28646_s1 + $0x48] sm:$0xff] }
  0xe1   :  { %v22677_v60 = vadd.f32 %v22634_v40, %v522_v58  ;;  %v19073_v61 = vpop.f32.mrb[4].mxu1 }
  0xe2   :  { %908 = vrot.lane.b32.xlu0 %v22662_v54, %s22119_s3  ;;  %v22682_v62 = vadd.f32 %v19073_v61, %v22634_v40  ;;  %v562_v63 = vpop.f32.mrb[5].mxu1  ;;  %v16585_v61 = vld [vmem:[%s28646_s1 + $0xd8] sm:$0xff] }
  0xe3   :  { %1138 = vrot.lane.b32.xlu1 %v16617_v57, %s22117_s14  ;;  %v22686_v0 = vadd.f32 %v22634_v40, %v562_v63  ;;  %v19064_v1 = vpop.f32.mrb[6].mxu0  ;;  %v16584_v57 = vld [vmem:[%s28646_s1 + $0xd0] sm:$0xff] }
  0xe4   :  { %v22692_v3 = vadd.f32 %v19064_v1, %v22634_v40  ;;  %v532_v4 = vpop.f32.mrb[7].mxu0  ;;  %v973_v55 = vpop.permute.xlu1 %972  ;;  %v592_v1 = vld [vmem:[%s28646_s1 + $0x58] sm:$0xff] }
  0xe5   :  { %v22697_v6 = vadd.f32 %v22634_v40, %v532_v4  ;;  %v19076_v7 = vpop.f32.mrb[6].mxu1 }
  0xe6   :  { %1070 = vrot.lane.b32.xlu0 %v22662_v54, %s22120_s30  ;;  %v22704_v8 = vadd.f32 %v19076_v7, %v22634_v40  ;;  %v572_v9 = vpop.f32.mrb[7].mxu1  ;;  %v16587_v7 = vld [vmem:[%s28646_s1 + $0xe8] sm:$0xff] }
  0xe7   :  { %1140 = vrot.lane.b32.xlu1 %v16618_v2, %s22117_s14  ;;  %v22710_v11 = vadd.f32 %v22634_v40, %v572_v9  ;;  %v16580_v40 = vld [vmem:[%s28646_s1 + $0xb0] sm:$0xff]  ;;  %v16586_v2 = vld [vmem:[%s28646_s1 + $0xe0] sm:$0xff]  ;;  %v955_v9 = vpop.permute.xlu0 %954 }
  0xe8   :  { %v22880_v58 = vpop.permute.xlu1 %974 }
  0xea   :  { %890 = vrot.lane.b32.xlu0 %v22650_v46, %s22119_s3 }
  0xeb   :  { %980 = vrot.lane.b32.xlu1 %v16603_v12, %s22117_s14 }
  0xec   :  { %v1135_v63 = vpop.permute.xlu1 %1134 }
  0xee   :  { %906 = vrot.lane.b32.xlu0 %v22719_v13, %s22119_s3 }
  0xef   :  { %982 = vrot.lane.b32.xlu1 %v16604_v14, %s22117_s14  ;;  %v594_v14 = vld [vmem:[%s28646_s1 + $0x68] sm:$0xff] }
  0xf0   :  { %v22900_v4 = vpop.permute.xlu1 %1136 }
  0xf2   :  { %1068 = vrot.lane.b32.xlu0 %v22719_v13, %s22120_s30 }
  0xf3   :  { %1142 = vrot.lane.b32.xlu1 %v16619_v16, %s22117_s14  ;;  %v581_v16 = vld [vmem:[%s28646_s1] sm:$0xff] }
  0xf4   :  { %v22911_v12 = vpop.permute.xlu1 %976 }
  0xf6   :  { %896 = vrot.lane.b32.xlu0 %v22733_v17, %s22119_s3 }
  0xf7   :  { %1144 = vrot.lane.b32.xlu1 %v16620_v19, %s22117_s14 }
  0xfa   :  { %1058 = vrot.lane.b32.xlu0 %v22733_v17, %s22120_s30 }
  0xfb   :  { %792 = vrot.lane.b32.xlu1 %v16574_v20, %s22117_s14  ;;  %v16588_v20 = vld [vmem:[%s28646_s1 + $0xf0] sm:$0xff] }
  0xfe   :  { %912 = vrot.lane.b32.xlu0 %v22752_v22, %s22119_s3 }
  0xff   :  { %794 = vrot.lane.b32.xlu1 %v16575_v23, %s22117_s14 }
 0x102   :  { %1074 = vrot.lane.b32.xlu0 %v22752_v22, %s22120_s30 }
 0x103   :  { %615 = vrot.lane.b32.xlu1 %v582_v25, %s22117_s14 }
 0x106   :  { %894 = vrot.lane.b32.xlu0 %v22772_v26, %s22119_s3 }
 0x107   :  { %796 = vrot.lane.b32.xlu1 %v16576_v27, %s22117_s14 }
 0x10a   :  { %1056 = vrot.lane.b32.xlu0 %v22772_v26, %s22120_s30 }
 0x10b   :  { %798 = vrot.lane.b32.xlu1 %v16577_v29, %s22117_s14 }
 0x10e   :  { %910 = vrot.lane.b32.xlu0 %v22792_v31, %s22119_s3 }
 0x10f   :  { %619 = vrot.lane.b32.xlu1 %v584_v32, %s22117_s14  ;;  %v16589_v32 = vld [vmem:[%s28646_s1 + $0xf8] sm:$0xff] }
 0x112   :  { %1072 = vrot.lane.b32.xlu0 %v22792_v31, %s22120_s30 }
 0x113   :  { %800 = vrot.lane.b32.xlu1 %v16578_v33, %s22117_s14 }
 0x116   :  { %900 = vrot.lane.b32.xlu0 %v22807_v35, %s22119_s3 }
 0x117   :  { %802 = vrot.lane.b32.xlu1 %v16579_v36, %s22117_s14  ;;  %v596_v36 = vld [vmem:[%s28646_s1 + $0x78] sm:$0xff] }
 0x11a   :  { %1062 = vrot.lane.b32.xlu0 %v22807_v35, %s22120_s30 }
 0x11b   :  { %623 = vrot.lane.b32.xlu1 %v586_v39, %s22117_s14 }
 0x11e   :  { %898 = vrot.lane.b32.xlu0 %v22677_v60, %s22119_s3 }
 0x11f   :  { %804 = vrot.lane.b32.xlu1 %v16580_v40, %s22117_s14 }
 0x122   :  { %1060 = vrot.lane.b32.xlu0 %v22677_v60, %s22120_s30 }
 0x123   :  { %806 = vrot.lane.b32.xlu1 %v16581_v47, %s22117_s14  ;;  %v583_v47 = vld [vmem:[%s28646_s1 + $0x10] sm:$0xff] }
 0x126   :  { %914 = vrot.lane.b32.xlu0 %v22686_v0, %s22119_s3 }
 0x127   :  { %627 = vrot.lane.b32.xlu1 %v588_v49, %s22117_s14 }
 0x12a   :  { %1076 = vrot.lane.b32.xlu0 %v22686_v0, %s22120_s30 }
 0x12b   :  { %808 = vrot.lane.b32.xlu1 %v16582_v51, %s22117_s14  ;;  %v16613_v51 = vld [vmem:[%s28646_s1 + $0x1b8] sm:$0xff] }
 0x12e   :  { %902 = vrot.lane.b32.xlu0 %v22697_v6, %s22119_s3 }
 0x12f   :  { %810 = vrot.lane.b32.xlu1 %v16583_v53, %s22117_s14  ;;  %v22969_v53 = vld [vmem:[%s28649_s4 + $0x8] sm:$0xf] }
 0x132   :  { %1064 = vrot.lane.b32.xlu0 %v22697_v6, %s22120_s30 }
 0x133   :  { %631 = vrot.lane.b32.xlu1 %v590_v56, %s22117_s14 }
 0x136   :  { %916 = vrot.lane.b32.xlu0 %v22682_v62, %s22119_s3 }
 0x137   :  { %812 = vrot.lane.b32.xlu1 %v16584_v57, %s22117_s14 }
 0x13a   :  { %1078 = vrot.lane.b32.xlu0 %v22682_v62, %s22120_s30 }
 0x13b   :  { %814 = vrot.lane.b32.xlu1 %v16585_v61, %s22117_s14 }
 0x13e   :  { %918 = vrot.lane.b32.xlu0 %v22710_v11, %s22119_s3 }
 0x13f   :  { %635 = vrot.lane.b32.xlu1 %v592_v1, %s22117_s14 }
 0x142   :  { %1080 = vrot.lane.b32.xlu0 %v22710_v11, %s22120_s30 }
 0x143   :  { %816 = vrot.lane.b32.xlu1 %v16586_v2, %s22117_s14 }
 0x146   :  { %728 = vrot.lane.b32.xlu0 %v22650_v46, %s22121_s26 }
 0x147   :  { %818 = vrot.lane.b32.xlu1 %v16587_v7, %s22117_s14 }
 0x14a   :  { %730 = vrot.lane.b32.xlu0 %v22647_v44, %s22121_s26 }
 0x14b   :  { %639 = vrot.lane.b32.xlu1 %v594_v14, %s22117_s14  ;;  %v16621_v14 = vld [vmem:[%s28646_s1 + $0x1f8] sm:$0xff] }
 0x14c   :  { %v893_v19 = vpop.permute.xlu0 %892 }
 0x14d   :  { %v1003_v23 = vsel %vm661_vm3, %v893_v19, %v22656_v50  ;;  %v1053_v25 = vpop.permute.xlu1 %1052 }
 0x14e   :  { %1020 = vst.msk [vmem:[#allocation2 + $0x2a1] sm:$0xff] %vm36_vm1, %v1003_v23  ;;  %v1164_v27 = vsel %vm661_vm3, %v1053_v25, %v22636_v41  ;;  %613 = vrot.lane.b32.xlu0 %v581_v16, %s22117_s14 }
 0x14f   :  { %1181 = vst.msk [vmem:[#allocation2 + $0x3d1] sm:$0xff] %vm36_vm1, %v1164_v27  ;;  %820 = vrot.lane.b32.xlu1 %v16588_v20, %s22117_s14  ;;  %v16605_v27 = vld [vmem:[%s28646_s1 + $0x178] sm:$0xff] }
 0x150   :  { %v1055_v29 = vpop.permute.xlu0 %1054 }
 0x151   :  { %v1165_v50 = vsel %vm661_vm3, %v1055_v29, %v22707_v10  ;;  %v22938_v33 = vpop.permute.xlu1 %978 }
 0x152   :  { %1182 = vst.msk [vmem:[#allocation2 + $0x3e1] sm:$0xff] %vm36_vm1, %v1165_v50  ;;  %732 = vrot.lane.b32.xlu0 %v22772_v26, %s22121_s26 }
 0x153   :  { %822 = vrot.lane.b32.xlu1 %v16589_v32, %s22117_s14 }
 0x154   :  { %v909_v41 = vpop.permute.xlu0 %908 }
 0x155   :  { %v1011_v39 = vsel %vm661_vm3, %v909_v41, %v973_v55  ;;  %v22948_v40 = vpop.permute.xlu1 %1138  ;;  %v23020_v29 = vld [vmem:[#allocation2 + $0x2a1] sm:$0xff] }
 0x156   :  { %1028 = vst.msk [vmem:[#allocation2 + $0x341] sm:$0xff] %vm36_vm1, %v1011_v39  ;;  %734 = vrot.lane.b32.xlu0 %v22733_v17, %s22121_s26  ;;  %v22953_v10 = vld [vmem:[#allocation2 + $0x3d1] sm:$0xff] }
 0x157   :  { %643 = vrot.lane.b32.xlu1 %v596_v36, %s22117_s14  ;;  %19314 = vmatmul.mubr.msk.f32.vlgmr.msra.gmra.mrb[8].mxu0 %vm36_vm1, %v22953_v10 }
 0x158   :  { %v1071_v49 = vpop.permute.xlu0 %1070  ;;  %19338 = vmatpush3.msk.msra.mxu0 %vm432_vm0, %v22837_v45 }
 0x159   :  { %v1173_v55 = vsel %vm661_vm3, %v1071_v49, %v1135_v63  ;;  %v22972_v56 = vpop.permute.xlu1 %1140  ;;  %v22974_v57 = vld [vmem:[#allocation2 + $0x3e1] sm:$0xff]  ;;  %19363 = vmatprep.subr.msk.mxu0 %vm432_vm0, %v22969_v53  ;;  %v16597_v63 = vld [vmem:[%s28646_s1 + $0x138] sm:$0xff] }
 0x15a   :  { %1190 = vst.msk [vmem:[#allocation2 + $0x481] sm:$0xff] %vm36_vm1, %v1173_v55  ;;  %617 = vrot.lane.b32.xlu0 %v583_v47, %s22117_s14  ;;  %19316 = vmatprep.mubr.msk.f32.mxu0 %vm36_vm1, %v22974_v57 }
 0x15b   :  { %1130 = vrot.lane.b32.xlu1 %v16613_v51, %s22117_s14 }
 0x15c   :  { %v891_v61 = vpop.permute.xlu0 %890 }
 0x15d   :  { %v1002_v1 = vsel %vm661_vm3, %v891_v61, %v955_v9  ;;  %v22987_v2 = vpop.permute.xlu1 %980  ;;  %v585_v9 = vld [vmem:[%s28646_s1 + $0x20] sm:$0xff] }
 0x15e   :  { %1019 = vst.msk [vmem:[#allocation2 + $0x291] sm:$0xff] %vm36_vm1, %v1002_v1  ;;  %736 = vrot.lane.b32.xlu0 %v22677_v60, %s22121_s26 }
 0x15f   :  { %968 = vrot.lane.b32.xlu1 %v16597_v63, %s22117_s14 }
 0x160   :  { %v907_v7 = vpop.permute.xlu0 %906 }
 0x161   :  { %v1010_v16 = vsel %vm661_vm3, %v907_v7, %v22849_v48  ;;  %v22998_v19 = vpop.permute.xlu1 %982 }
 0x162   :  { %1027 = vst.msk [vmem:[#allocation2 + $0x331] sm:$0xff] %vm36_vm1, %v1010_v16  ;;  %738 = vrot.lane.b32.xlu0 %v22807_v35, %s22121_s26 }
 0x163   :  { %1146 = vrot.lane.b32.xlu1 %v16621_v14, %s22117_s14 }
 0x164   :  { %v1069_v20 = vpop.permute.xlu0 %1068 }
 0x165   :  { %v1172_v23 = vsel %vm661_vm3, %v1069_v20, %v22860_v52  ;;  %v23009_v25 = vpop.permute.xlu1 %1142  ;;  %v23011_v48 = vld [vmem:[#allocation2 + $0x291] sm:$0xff] }
 0x166   :  { %1189 = vst.msk [vmem:[#allocation2 + $0x471] sm:$0xff] %vm36_vm1, %v1172_v23  ;;  %621 = vrot.lane.b32.xlu0 %v585_v9, %s22117_s14  ;;  %19080 = vmatmul.mubr.msk.f32.vlgmr.msra.gmra.mrb[8].mxu1 %vm36_vm1, %v23011_v48 }
 0x167   :  { %19082 = vmatprep.mubr.msk.f32.mxu1 %vm36_vm1, %v23020_v29  ;;  %19104 = vmatpush3.msk.msra.mxu1 %vm432_vm0, %v22837_v45  ;;  %v587_v45 = vld [vmem:[%s28646_s1 + $0x30] sm:$0xff] }
 0x168   :  { %v897_v52 = vpop.permute.xlu0 %896  ;;  %984 = vrot.lane.b32.xlu1 %v16605_v27, %s22117_s14  ;;  %19129 = vmatprep.subr.msk.mxu1 %vm432_vm0, %v22969_v53 }
 0x169   :  { %v1005_v32 = vsel %vm661_vm3, %v897_v52, %v22738_v18  ;;  %v23031_v50 = vpop.permute.xlu1 %1144 }
 0x16a   :  { %1022 = vst.msk [vmem:[#allocation2 + $0x2c1] sm:$0xff] %vm36_vm1, %v1005_v32  ;;  %742 = vrot.lane.b32.xlu0 %v22692_v3, %s22121_s26 }
 0x16c   :  { %v1059_v41 = vpop.permute.xlu0 %1058 }
 0x16d   :  { %v1167_v36 = vsel %vm661_vm3, %v1059_v41, %v22763_v24  ;;  %v23041_v39 = vpop.permute.xlu1 %792 }
 0x16e   :  { %1184 = vst.msk [vmem:[#allocation2 + $0x401] sm:$0xff] %vm36_vm1, %v1167_v36  ;;  %625 = vrot.lane.b32.xlu0 %v587_v45, %s22117_s14 }
 0x170   :  { %v913_v18 = vpop.permute.xlu0 %912 }
 0x171   :  { %v1013_v47 = vsel %vm661_vm3, %v913_v18, %v22911_v12  ;;  %v23047_v49 = vpop.permute.xlu1 %794  ;;  %v589_v12 = vld [vmem:[%s28646_s1 + $0x40] sm:$0xff] }
 0x172   :  { %1030 = vst.msk [vmem:[#allocation2 + $0x361] sm:$0xff] %vm36_vm1, %v1013_v47  ;;  %744 = vrot.lane.b32.xlu0 %v22719_v13, %s22121_s26 }
 0x174   :  { %v1075_v51 = vpop.permute.xlu0 %1074 }
 0x175   :  { %v1175_v24 = vsel %vm661_vm3, %v1075_v51, %v22948_v40  ;;  %v616_v55 = vpop.permute.xlu1 %615  ;;  %v23105_v45 = vld [vmem:[#allocation2 + $0x401] sm:$0xff] }
 0x176   :  { %1192 = vst.msk [vmem:[#allocation2 + $0x4a1] sm:$0xff] %vm36_vm1, %v1175_v24  ;;  %v663_v61 = vsel %vm661_vm3, %v22647_v44, %v616_v55  ;;  %746 = vrot.lane.b32.xlu0 %v22662_v54, %s22121_s26 }
 0x177   :  { %680 = vst.msk [vmem:[#allocation2 + $0x21] sm:$0xff] %vm36_vm1, %v663_v61 }
 0x178   :  { %v895_v63 = vpop.permute.xlu0 %894 }
 0x179   :  { %v1004_v1 = vsel %vm661_vm3, %v895_v63, %v22674_v59  ;;  %v23065_v40 = vpop.permute.xlu1 %796 }
 0x17a   :  { %1021 = vst.msk [vmem:[#allocation2 + $0x2b1] sm:$0xff] %vm36_vm1, %v1004_v1  ;;  %629 = vrot.lane.b32.xlu0 %v589_v12, %s22117_s14 }
 0x17c   :  { %v1057_v44 = vpop.permute.xlu0 %1056 }
 0x17d   :  { %v1166_v7 = vsel %vm661_vm3, %v1057_v44, %v22724_v15  ;;  %v23071_v14 = vpop.permute.xlu1 %798  ;;  %v23087_v15 = vld [vmem:[#allocation2 + $0x2c1] sm:$0xff] }
 0x17e   :  { %1183 = vst.msk [vmem:[#allocation2 + $0x3f1] sm:$0xff] %vm36_vm1, %v1166_v7  ;;  %748 = vrot.lane.b32.xlu0 %v22792_v31, %s22121_s26 }
 0x180   :  { %v911_v16 = vpop.permute.xlu0 %910 }
 0x181   :  { %v1012_v59 = vsel %vm661_vm3, %v911_v16, %v22880_v58  ;;  %v620_v9 = vpop.permute.xlu1 %619  ;;  %v23078_v20 = vld [vmem:[#allocation2 + $0x2b1] sm:$0xff] }
 0x182   :  { %1029 = vst.msk [vmem:[#allocation2 + $0x351] sm:$0xff] %vm36_vm1, %v1012_v59  ;;  %v665_v23 = vsel %vm661_vm3, %v22733_v17, %v620_v9  ;;  %750 = vrot.lane.b32.xlu0 %v22752_v22, %s22121_s26  ;;  %19083 = vmatmul.mubr.msk.f32.gmra.mrb[10].mxu1 %vm36_vm1, %v23078_v20  ;;  %v591_v58 = vld [vmem:[%s28646_s1 + $0x50] sm:$0xff] }
 0x183   :  { %682 = vst.msk [vmem:[#allocation2 + $0x41] sm:$0xff] %vm36_vm1, %v665_v23  ;;  %19085 = vmatprep.mubr.msk.f32.mxu1 %vm36_vm1, %v23087_v15 }
 0x184   :  { %v1073_v27 = vpop.permute.xlu0 %1072 }
 0x185   :  { %v1174_v17 = vsel %vm661_vm3, %v1073_v27, %v22900_v4  ;;  %v23097_v52 = vpop.permute.xlu1 %800  ;;  %v23099_v32 = vld [vmem:[#allocation2 + $0x3f1] sm:$0xff] }
 0x186   :  { %1191 = vst.msk [vmem:[#allocation2 + $0x491] sm:$0xff] %vm36_vm1, %v1174_v17  ;;  %633 = vrot.lane.b32.xlu0 %v591_v58, %s22117_s14  ;;  %19317 = vmatmul.mubr.msk.f32.gmra.mrb[10].mxu0 %vm36_vm1, %v23099_v32 }
 0x187   :  { %19319 = vmatprep.mubr.msk.f32.mxu0 %vm36_vm1, %v23105_v45 }
 0x188   :  { %v901_v41 = vpop.permute.xlu0 %900 }
 0x189   :  { %v1007_v4 = vsel %vm661_vm3, %v901_v41, %v22788_v30  ;;  %v23111_v36 = vpop.permute.xlu1 %802 }
 0x18a   :  { %1024 = vst.msk [vmem:[#allocation2 + $0x2e1] sm:$0xff] %vm36_vm1, %v1007_v4  ;;  %752 = vrot.lane.b32.xlu0 %v22686_v0, %s22121_s26  ;;  %v23614_v38 = vld [vmem:[#allocation2 + $0x41] sm:$0xff] }
 0x18b   :  { %28943 = vst [vmem:[#allocation18_spill] sm:$0xff] %v23614_v38 }
 0x18c   :  { %v1063_v18 = vpop.permute.xlu0 %1062 }
 0x18d   :  { %v1169_v47 = vsel %vm661_vm3, %v1063_v18, %v22818_v37  ;;  %v624_v51 = vpop.permute.xlu1 %623 }
 0x18e   :  { %1186 = vst.msk [vmem:[#allocation2 + $0x421] sm:$0xff] %vm36_vm1, %v1169_v47  ;;  %v667_v24 = vsel %vm661_vm3, %v22807_v35, %v624_v51  ;;  %740 = vrot.lane.b32.xlu0 %v22697_v6, %s22121_s26  ;;  %v593_v35 = vld [vmem:[%s28646_s1 + $0x60] sm:$0xff] }
 0x18f   :  { %684 = vst.msk [vmem:[#allocation2 + $0x61] sm:$0xff] %vm36_vm1, %v667_v24  ;;  %v23188_v24 = vld [vmem:[#allocation2 + $0x321] sm:$0xff] }
 0x190   :  { %v899_v30 = vpop.permute.xlu0 %898 }
 0x191   :  { %v1006_v55 = vsel %vm661_vm3, %v899_v30, %v22749_v21  ;;  %v23126_v61 = vpop.permute.xlu1 %804 }
 0x192   :  { %1023 = vst.msk [vmem:[#allocation2 + $0x2d1] sm:$0xff] %vm36_vm1, %v1006_v55  ;;  %754 = vrot.lane.b32.xlu0 %v22682_v62, %s22121_s26 }
 0x194   :  { %v1061_v37 = vpop.permute.xlu0 %1060 }
 0x195   :  { %v1168_v12 = vsel %vm661_vm3, %v1061_v37, %v22777_v28  ;;  %v23136_v63 = vpop.permute.xlu1 %806  ;;  %v23151_v28 = vld [vmem:[#allocation2 + $0x2e1] sm:$0xff]  ;;  %v23207_v37 = vld [vmem:[#allocation2 + $0x331] sm:$0xff] }
 0x196   :  { %1185 = vst.msk [vmem:[#allocation2 + $0x411] sm:$0xff] %vm36_vm1, %v1168_v12  ;;  %637 = vrot.lane.b32.xlu0 %v593_v35, %s22117_s14  ;;  %v23167_v58 = vld [vmem:[#allocation2 + $0x421] sm:$0xff] }
 0x198   :  { %v915_v21 = vpop.permute.xlu0 %914 }
 0x199   :  { %v1014_v1 = vsel %vm661_vm3, %v915_v21, %v22938_v33  ;;  %v628_v44 = vpop.permute.xlu1 %627  ;;  %v23142_v7 = vld [vmem:[#allocation2 + $0x2d1] sm:$0xff]  ;;  %v23211_v21 = vld [vmem:[#allocation2 + $0x461] sm:$0xff] }
 0x19a   :  { %1031 = vst.msk [vmem:[#allocation2 + $0x371] sm:$0xff] %vm36_vm1, %v1014_v1  ;;  %v669_v16 = vsel %vm661_vm3, %v22692_v3, %v628_v44  ;;  %758 = vrot.lane.b32.xlu0 %v22704_v8, %s22121_s26  ;;  %19086 = vmatmul.mubr.msk.f32.gmra.mrb[12].mxu1 %vm36_vm1, %v23142_v7 }
 0x19b   :  { %686 = vst.msk [vmem:[#allocation2 + $0x81] sm:$0xff] %vm36_vm1, %v669_v16  ;;  %19088 = vmatprep.mubr.msk.f32.mxu1 %vm36_vm1, %v23151_v28  ;;  %v23228_v16 = vld [vmem:[#allocation2 + $0x351] sm:$0xff] }
 0x19c   :  { %v1077_v33 = vpop.permute.xlu0 %1076 }
 0x19d   :  { %v1176_v59 = vsel %vm661_vm3, %v1077_v33, %v22972_v56  ;;  %v23158_v9 = vpop.permute.xlu1 %808  ;;  %v23160_v23 = vld [vmem:[#allocation2 + $0x411] sm:$0xff] }
 0x19e   :  { %1193 = vst.msk [vmem:[#allocation2 + $0x4b1] sm:$0xff] %vm36_vm1, %v1176_v59  ;;  %756 = vrot.lane.b32.xlu0 %v22710_v11, %s22121_s26  ;;  %19320 = vmatmul.mubr.msk.f32.gmra.mrb[12].mxu0 %vm36_vm1, %v23160_v23  ;;  %v595_v56 = vld [vmem:[%s28646_s1 + $0x70] sm:$0xff] }
 0x19f   :  { %19322 = vmatprep.mubr.msk.f32.mxu0 %vm36_vm1, %v23167_v58  ;;  %v23237_v59 = vld [vmem:[#allocation2 + $0x471] sm:$0xff] }
 0x1a0   :  { %v903_v27 = vpop.permute.xlu0 %902 }
 0x1a1   :  { %v1008_v17 = vsel %vm661_vm3, %v903_v27, %v22803_v34  ;;  %v23176_v41 = vpop.permute.xlu1 %810 }
 0x1a2   :  { %1025 = vst.msk [vmem:[#allocation2 + $0x2f1] sm:$0xff] %vm36_vm1, %v1008_v17  ;;  %641 = vrot.lane.b32.xlu0 %v595_v56, %s22117_s14  ;;  %v23239_v56 = vld [vmem:[#allocation2 + $0x361] sm:$0xff] }
 0x1a4   :  { %v1065_v4 = vpop.permute.xlu0 %1064 }
 0x1a5   :  { %v1170_v18 = vsel %vm661_vm3, %v1065_v4, %v22829_v43  ;;  %v632_v47 = vpop.permute.xlu1 %631  ;;  %v23254_v4 = vld [vmem:[#allocation2 + $0x371] sm:$0xff] }
 0x1a6   :  { %1187 = vst.msk [vmem:[#allocation2 + $0x431] sm:$0xff] %vm36_vm1, %v1170_v18  ;;  %v671_v51 = vsel %vm661_vm3, %v22662_v54, %v632_v47  ;;  %1066 = vrot.lane.b32.xlu0 %v22692_v3, %s22120_s30  ;;  %v23259_v18 = vld [vmem:[#allocation2 + $0x491] sm:$0xff] }
 0x1a7   :  { %688 = vst.msk [vmem:[#allocation2 + $0xc1] sm:$0xff] %vm36_vm1, %v671_v51 }
 0x1a8   :  { %v917_v34 = vpop.permute.xlu0 %916 }
 0x1a9   :  { %v1015_v30 = vsel %vm661_vm3, %v917_v34, %v22987_v2  ;;  %v23192_v55 = vpop.permute.xlu1 %812  ;;  %v23194_v43 = vld [vmem:[#allocation2 + $0x2f1] sm:$0xff]  ;;  %v1198_v34 = vld [vmem:[#allocation2 + $0x3c0] sm:$0xff] }
 0x1aa   :  { %1032 = vst.msk [vmem:[#allocation2 + $0x381] sm:$0xff] %vm36_vm1, %v1015_v30  ;;  %904 = vrot.lane.b32.xlu0 %v22692_v3, %s22119_s3  ;;  %19089 = vmatmul.mubr.msk.f32.gmra.mrb[14].mxu1 %vm36_vm1, %v23194_v43  ;;  %v23218_v3 = vld [vmem:[#allocation2 + $0x341] sm:$0xff] }
 0x1ab   :  { %19091 = vmatprep.mubr.msk.f32.mxu1 %vm36_vm1, %v23188_v24 }
 0x1ac   :  { %v1079_v54 = vpop.permute.xlu0 %1078 }
 0x1ad   :  { %v1177_v35 = vsel %vm661_vm3, %v1079_v54, %v23009_v25  ;;  %v23205_v2 = vpop.permute.xlu1 %814  ;;  %v23209_v12 = vld [vmem:[#allocation2 + $0x431] sm:$0xff] }
 0x1ae   :  { %1194 = vst.msk [vmem:[#allocation2 + $0x4c1] sm:$0xff] %vm36_vm1, %v1177_v35  ;;  %1082 = vrot.lane.b32.xlu0 %v22704_v8, %s22120_s30  ;;  %19092 = vmatmul.mubr.msk.f32.gmra.mrb[16].mxu1 %vm36_vm1, %v23207_v37 }
 0x1af   :  { %19323 = vmatmul.mubr.msk.f32.gmra.mrb[14].mxu0 %vm36_vm1, %v23209_v12  ;;  %19094 = vmatprep.mubr.msk.f32.mxu1 %vm36_vm1, %v23218_v3 }
 0x1b0   :  { %v919_v25 = vpop.permute.xlu0 %918  ;;  %19325 = vmatprep.mubr.msk.f32.mxu0 %vm36_vm1, %v23211_v21 }
 0x1b1   :  { %v1016_v1 = vsel %vm661_vm3, %v919_v25, %v22998_v19  ;;  %v636_v44 = vpop.permute.xlu1 %635  ;;  %v23246_v19 = vld [vmem:[#allocation2 + $0x481] sm:$0xff]  ;;  %v23280_v25 = vld [vmem:[#allocation2 + $0x4b1] sm:$0xff] }
 0x1b2   :  { %1033 = vst.msk [vmem:[#allocation2 + $0x391] sm:$0xff] %vm36_vm1, %v1016_v1  ;;  %v673_v33 = vsel %vm661_vm3, %v22752_v22, %v636_v44  ;;  %920 = vrot.lane.b32.xlu0 %v22704_v8, %s22119_s3  ;;  %19095 = vmatmul.mubr.msk.f32.gmra.mrb[18].mxu1 %vm36_vm1, %v23228_v16  ;;  %v23261_v47 = vld [vmem:[#allocation2 + $0x381] sm:$0xff] }
 0x1b3   :  { %690 = vst.msk [vmem:[#allocation2 + $0xe1] sm:$0xff] %vm36_vm1, %v673_v33  ;;  %19326 = vmatmul.mubr.msk.f32.gmra.mrb[16].mxu0 %vm36_vm1, %v23237_v59  ;;  %19097 = vmatprep.mubr.msk.f32.mxu1 %vm36_vm1, %v23239_v56 }
 0x1b4   :  { %19328 = vmatprep.mubr.msk.f32.mxu0 %vm36_vm1, %v23246_v19  ;;  %v1081_v22 = vpop.permute.xlu0 %1080 }
 0x1b5   :  { %v1178_v27 = vsel %vm661_vm3, %v1081_v22, %v23031_v50  ;;  %v23252_v17 = vpop.permute.xlu1 %816  ;;  %v23267_v50 = vld [vmem:[#allocation2 + $0x4a1] sm:$0xff]  ;;  %v23291_v22 = vld [vmem:[#allocation2 + $0x3d0] sm:$0xff] }
 0x1b6   :  { %1195 = vst.msk [vmem:[#allocation2 + $0x4d1] sm:$0xff] %vm36_vm1, %v1178_v27  ;;  %19098 = vmatmul.mubr.msk.f32.gmra.mrb[20].mxu1 %vm36_vm1, %v23254_v4  ;;  %v23284_v1 = vld [vmem:[#allocation2 + $0x4c1] sm:$0xff] }
 0x1b7   :  { %19329 = vmatmul.mubr.msk.f32.gmra.mrb[18].mxu0 %vm36_vm1, %v23259_v18  ;;  %19100 = vmatprep.mubr.msk.f32.mxu1 %vm36_vm1, %v23261_v47 }
 0x1b8   :  { %19331 = vmatprep.mubr.msk.f32.mxu0 %vm36_vm1, %v23267_v50  ;;  %v729_v51 = vpop.permute.xlu0 %728 }
 0x1b9   :  { %v840_v30 = vsel %vm661_vm3, %v729_v51, %v23041_v39  ;;  %v23273_v54 = vpop.permute.xlu1 %818  ;;  %v23275_v35 = vld [vmem:[#allocation2 + $0x391] sm:$0xff] }
 0x1ba   :  { %857 = vst.msk [vmem:[#allocation2 + $0x151] sm:$0xff] %vm36_vm1, %v840_v30  ;;  %19101 = vmatmul.mubr.msk.f32.gmra.mrb[22].mxu1 %vm36_vm1, %v23275_v35  ;;  %v23305_v30 = vld [vmem:[%s28649_s4 + $0xc] sm:$0xf] }
 0x1bb   :  { %19332 = vmatmul.mubr.msk.f32.gmra.mrb[20].mxu0 %vm36_vm1, %v23280_v25  ;;  %19105 = vmatprep.mubr.msk.f32.mxu1 %vm36_vm1, %v1198_v34  ;;  %v23300_v34 = vld [vmem:[#allocation2 + $0x3e0] sm:$0xff] }
 0x1bc   :  { %19334 = vmatprep.mubr.msk.f32.mxu0 %vm36_vm1, %v23284_v1  ;;  %v731_v39 = vpop.permute.xlu0 %730 }
 0x1bd   :  { %v841_v44 = vsel %vm661_vm3, %v731_v39, %v23047_v49  ;;  %v640_v33 = vpop.permute.xlu1 %639  ;;  %v23293_v27 = vld [vmem:[#allocation2 + $0x4d1] sm:$0xff] }
 0x1be   :  { %858 = vst.msk [vmem:[#allocation2 + $0x161] sm:$0xff] %vm36_vm1, %v841_v44  ;;  %v675_v51 = vsel %vm661_vm3, %v22682_v62, %v640_v33  ;;  %19106 = vmatmul.mubr.msk.f32.vlgmr.msra.gmra.mrb[8].mxu1 %vm36_vm1, %v23291_v22  ;;  %v23320_v44 = vld [vmem:[#allocation2 + $0x3f0] sm:$0xff]  ;;  %v23327_v33 = vld [vmem:[#allocation2 + $0x400] sm:$0xff] }
 0x1bf   :  { %692 = vst.msk [vmem:[#allocation2 + $0x101] sm:$0xff] %vm36_vm1, %v675_v51  ;;  %19335 = vmatmul.mubr.msk.f32.gmra.mrb[22].mxu0 %vm36_vm1, %v23293_v27  ;;  %19108 = vmatprep.mubr.msk.f32.mxu1 %vm36_vm1, %v23300_v34 }
 0x1c0   :  { %v614_v49 = vpop.permute.xlu0 %613  ;;  %19130 = vmatpush3.msk.msra.mxu1 %vm432_vm0, %v22969_v53  ;;  %19339 = vmatprep.mubr.msk.f32.mxu0 %vm36_vm1, %v22694_v5 }
 0x1c1   :  { %v662_v62 = vsel %vm661_vm3, %v22650_v46, %v614_v49  ;;  %v23318_v39 = vpop.permute.xlu1 %820  ;;  %19155 = vmatprep.subr.msk.mxu1 %vm432_vm0, %v23305_v30  ;;  %v23341_v49 = vld [vmem:[#allocation2 + $0x410] sm:$0xff] }
 0x1c2   :  { %679 = vst.msk [vmem:[#allocation2 + $0x11] sm:$0xff] %vm36_vm1, %v662_v62  ;;  %19109 = vmatmul.mubr.msk.f32.gmra.mrb[10].mxu1 %vm36_vm1, %v23320_v44 }
 0x1c3   :  { %19340 = vmatmul.mubr.msk.f32.vlgmr.msra.gmra.mrb[8].mxu0 %vm36_vm1, %v23011_v48  ;;  %19111 = vmatprep.mubr.msk.f32.mxu1 %vm36_vm1, %v23327_v33  ;;  %v23348_v48 = vld [vmem:[#allocation2 + $0x420] sm:$0xff] }
 0x1c4   :  { %19342 = vmatprep.mubr.msk.f32.mxu0 %vm36_vm1, %v23020_v29  ;;  %19364 = vmatpush3.msk.msra.mxu0 %vm432_vm0, %v22969_v53  ;;  %v733_v46 = vpop.permute.xlu0 %732  ;;  %v1206_v29 = vld [vmem:[#allocation2 + $0x460] sm:$0xff] }
 0x1c5   :  { %v842_v5 = vsel %vm661_vm3, %v733_v46, %v23065_v40  ;;  %v23339_v51 = vpop.permute.xlu1 %822  ;;  %19389 = vmatprep.subr.msk.mxu0 %vm432_vm0, %v23305_v30  ;;  %v23358_v46 = vld [vmem:[#allocation2 + $0x430] sm:$0xff] }
 0x1c6   :  { %859 = vst.msk [vmem:[#allocation2 + $0x171] sm:$0xff] %vm36_vm1, %v842_v5  ;;  %19112 = vmatmul.mubr.msk.f32.gmra.mrb[12].mxu1 %vm36_vm1, %v23341_v49 }
 0x1c7   :  { %19343 = vmatmul.mubr.msk.f32.gmra.mrb[10].mxu0 %vm36_vm1, %v23078_v20  ;;  %19114 = vmatprep.mubr.msk.f32.mxu1 %vm36_vm1, %v23348_v48 }
 0x1c8   :  { %19345 = vmatprep.mubr.msk.f32.mxu0 %vm36_vm1, %v23087_v15  ;;  %v735_v53 = vpop.permute.xlu0 %734  ;;  %v23373_v15 = vld [vmem:[#allocation2 + $0x470] sm:$0xff] }
 0x1c9   :  { %v843_v40 = vsel %vm661_vm3, %v735_v53, %v23071_v14  ;;  %v644_v62 = vpop.permute.xlu1 %643 }
 0x1ca   :  { %860 = vst.msk [vmem:[#allocation2 + $0x181] sm:$0xff] %vm36_vm1, %v843_v40  ;;  %v677_v5 = vsel %vm661_vm3, %v22704_v8, %v644_v62  ;;  %19115 = vmatmul.mubr.msk.f32.gmra.mrb[14].mxu1 %vm36_vm1, %v23358_v46  ;;  %v23378_v8 = vld [vmem:[#allocation2 + $0x480] sm:$0xff]  ;;  %v23403_v62 = vld [vmem:[#allocation2 + $0x4b0] sm:$0xff] }
 0x1cb   :  { %694 = vst.msk [vmem:[#allocation2 + $0x121] sm:$0xff] %vm36_vm1, %v677_v5  ;;  %19346 = vmatmul.mubr.msk.f32.gmra.mrb[12].mxu0 %vm36_vm1, %v23142_v7  ;;  %19117 = vmatprep.mubr.msk.f32.mxu1 %vm36_vm1, %v1206_v29  ;;  %v23388_v29 = vld [vmem:[#allocation2 + $0x490] sm:$0xff]  ;;  %v23393_v40 = vld [vmem:[#allocation2 + $0x4a0] sm:$0xff] }
 0x1cc   :  { %19348 = vmatprep.mubr.msk.f32.mxu0 %vm36_vm1, %v23151_v28  ;;  %v618_v14 = vpop.permute.xlu0 %617  ;;  %v23408_v5 = vld [vmem:[#allocation2 + $0x4c0] sm:$0xff] }
 0x1cd   :  { %v664_v20 = vsel %vm661_vm3, %v22772_v26, %v618_v14 }
 0x1ce   :  { %681 = vst.msk [vmem:[#allocation2 + $0x31] sm:$0xff] %vm36_vm1, %v664_v20  ;;  %19118 = vmatmul.mubr.msk.f32.gmra.mrb[16].mxu1 %vm36_vm1, %v23373_v15  ;;  %v23418_v20 = vld [vmem:[#allocation2 + $0x4d0] sm:$0xff] }
 0x1cf   :  { %19349 = vmatmul.mubr.msk.f32.gmra.mrb[14].mxu0 %vm36_vm1, %v23194_v43  ;;  %19120 = vmatprep.mubr.msk.f32.mxu1 %vm36_vm1, %v23378_v8 }
 0x1d0   :  { %v737_v53 = vpop.permute.xlu0 %736  ;;  %19351 = vmatprep.mubr.msk.f32.mxu0 %vm36_vm1, %v23188_v24 }
 0x1d1   :  { %v844_v26 = vsel %vm661_vm3, %v737_v53, %v23097_v52 }
 0x1d2   :  { %861 = vst.msk [vmem:[#allocation2 + $0x191] sm:$0xff] %vm36_vm1, %v844_v26  ;;  %19121 = vmatmul.mubr.msk.f32.gmra.mrb[18].mxu1 %vm36_vm1, %v23388_v29  ;;  %v3518_v26 = vld [vmem:[#allocation2 + $0x282] sm:$0xff] }
 0x1d3   :  { %19352 = vmatmul.mubr.msk.f32.gmra.mrb[16].mxu0 %vm36_vm1, %v23207_v37  ;;  %19123 = vmatprep.mubr.msk.f32.mxu1 %vm36_vm1, %v23393_v40 }
 0x1d4   :  { %19354 = vmatprep.mubr.msk.f32.mxu0 %vm36_vm1, %v23218_v3  ;;  %v739_v24 = vpop.permute.xlu0 %738 }
 0x1d5   :  { %v845_v52 = vsel %vm661_vm3, %v739_v24, %v23111_v36  ;;  %v23437_v24 = vld [vmem:[%s28649_s4 + $0x10] sm:$0xf] }
 0x1d6   :  { %862 = vst.msk [vmem:[#allocation2 + $0x1a1] sm:$0xff] %vm36_vm1, %v845_v52  ;;  %19124 = vmatmul.mubr.msk.f32.gmra.mrb[20].mxu1 %vm36_vm1, %v23403_v62 }
 0x1d7   :  { %19355 = vmatmul.mubr.msk.f32.gmra.mrb[18].mxu0 %vm36_vm1, %v23228_v16  ;;  %19126 = vmatprep.mubr.msk.f32.mxu1 %vm36_vm1, %v23408_v5 }
 0x1d8   :  { %19357 = vmatprep.mubr.msk.f32.mxu0 %vm36_vm1, %v23239_v56  ;;  %v622_v14 = vpop.permute.xlu0 %621 }
 0x1d9   :  { %v666_v36 = vsel %vm661_vm3, %v22677_v60, %v622_v14 }
 0x1da   :  { %683 = vst.msk [vmem:[#allocation2 + $0x51] sm:$0xff] %vm36_vm1, %v666_v36  ;;  %19127 = vmatmul.mubr.msk.f32.gmra.mrb[22].mxu1 %vm36_vm1, %v23418_v20  ;;  %v3526_v36 = vld [vmem:[#allocation2 + $0x322] sm:$0xff] }
 0x1db   :  { %19358 = vmatmul.mubr.msk.f32.gmra.mrb[20].mxu0 %vm36_vm1, %v23254_v4  ;;  %19131 = vmatprep.mubr.msk.f32.mxu1 %vm36_vm1, %v22639_v42 }
 0x1dc   :  { %19360 = vmatprep.mubr.msk.f32.mxu0 %vm36_vm1, %v23261_v47  ;;  %v743_v53 = vpop.permute.xlu0 %742 }
 0x1dd   :  { %v847_v60 = vsel %vm661_vm3, %v743_v53, %v23136_v63  ;;  %v23453_v63 = vld [vmem:[#allocation2 + $0x292] sm:$0xff] }
 0x1de   :  { %864 = vst.msk [vmem:[#allocation2 + $0x1c1] sm:$0xff] %vm36_vm1, %v847_v60  ;;  %19132 = vmatmul.mubr.msk.f32.vlgmr.msra.gmra.mrb[8].mxu1 %vm36_vm1, %v22953_v10  ;;  %v23514_v53 = vld [vmem:[#allocation2 + $0x332] sm:$0xff]  ;;  %v23520_v60 = vld [vmem:[#allocation2 + $0x342] sm:$0xff] }
 0x1df   :  { %19361 = vmatmul.mubr.msk.f32.gmra.mrb[22].mxu0 %vm36_vm1, %v23275_v35  ;;  %19134 = vmatprep.mubr.msk.f32.mxu1 %vm36_vm1, %v22974_v57  ;;  %v23459_v57 = vld [vmem:[#allocation2 + $0x2a2] sm:$0xff] }
 0x1e0   :  { %v626_v42 = vpop.permute.xlu0 %625  ;;  %19156 = vmatpush3.msk.msra.mxu1 %vm432_vm0, %v23305_v30  ;;  %19365 = vmatprep.mubr.msk.f32.mxu0 %vm36_vm1, %v3518_v26 }
 0x1e1   :  { %v668_v10 = vsel %vm661_vm3, %v22697_v6, %v626_v42  ;;  %19181 = vmatprep.subr.msk.mxu1 %vm432_vm0, %v23437_v24  ;;  %v23529_v42 = vld [vmem:[#allocation2 + $0x352] sm:$0xff] }
 0x1e2   :  { %685 = vst.msk [vmem:[#allocation2 + $0x71] sm:$0xff] %vm36_vm1, %v668_v10  ;;  %19135 = vmatmul.mubr.msk.f32.gmra.mrb[10].mxu1 %vm36_vm1, %v23099_v32  ;;  %v23535_v10 = vld [vmem:[#allocation2 + $0x362] sm:$0xff] }
 0x1e3   :  { %19366 = vmatmul.mubr.msk.f32.vlgmr.msra.gmra.mrb[8].mxu0 %vm36_vm1, %v23453_v63  ;;  %19137 = vmatprep.mubr.msk.f32.mxu1 %vm36_vm1, %v23105_v45  ;;  %v23472_v45 = vld [vmem:[#allocation2 + $0x2b2] sm:$0xff] }
 0x1e4   :  { %19368 = vmatprep.mubr.msk.f32.mxu0 %vm36_vm1, %v23459_v57  ;;  %19390 = vmatpush3.msk.msra.mxu0 %vm432_vm0, %v23305_v30  ;;  %v745_v6 = vpop.permute.xlu0 %744  ;;  %v23478_v30 = vld [vmem:[#allocation2 + $0x2c2] sm:$0xff] }
 0x1e5   :  { %v848_v32 = vsel %vm661_vm3, %v745_v6, %v23158_v9  ;;  %19415 = vmatprep.subr.msk.mxu0 %vm432_vm0, %v23437_v24 }
 0x1e6   :  { %865 = vst.msk [vmem:[#allocation2 + $0x1f1] sm:$0xff] %vm36_vm1, %v848_v32  ;;  %19138 = vmatmul.mubr.msk.f32.gmra.mrb[12].mxu1 %vm36_vm1, %v23160_v23  ;;  %v23487_v23 = vld [vmem:[#allocation2 + $0x2d2] sm:$0xff] }
 0x1e7   :  { %19369 = vmatmul.mubr.msk.f32.gmra.mrb[10].mxu0 %vm36_vm1, %v23472_v45  ;;  %19140 = vmatprep.mubr.msk.f32.mxu1 %vm36_vm1, %v23167_v58  ;;  %v23491_v58 = vld [vmem:[#allocation2 + $0x2e2] sm:$0xff]  ;;  %v23544_v32 = vld [vmem:[#allocation2 + $0x372] sm:$0xff] }
 0x1e8   :  { %19371 = vmatprep.mubr.msk.f32.mxu0 %vm36_vm1, %v23478_v30  ;;  %v747_v9 = vpop.permute.xlu0 %746  ;;  %28932 = vst [vmem:[#allocation7_spill] sm:$0xff] %v23544_v32 }
 0x1e9   :  { %v849_v52 = vsel %vm661_vm3, %v747_v9, %v23176_v41  ;;  %v23546_v9 = vld [vmem:[#allocation2 + $0x150] sm:$0xff] }
 0x1ea   :  { %866 = vst.msk [vmem:[#allocation2 + $0x201] sm:$0xff] %vm36_vm1, %v849_v52  ;;  %19141 = vmatmul.mubr.msk.f32.gmra.mrb[14].mxu1 %vm36_vm1, %v23209_v12  ;;  %v23502_v12 = vld [vmem:[#allocation2 + $0x2f2] sm:$0xff]  ;;  %28933 = vst [vmem:[#allocation8_spill] sm:$0xff] %v23546_v9  ;;  %v23552_v52 = vld [vmem:[#allocation2 + $0x382] sm:$0xff] }
 0x1eb   :  { %19372 = vmatmul.mubr.msk.f32.gmra.mrb[12].mxu0 %vm36_vm1, %v23487_v23  ;;  %19143 = vmatprep.mubr.msk.f32.mxu1 %vm36_vm1, %v23211_v21  ;;  %28934 = vst [vmem:[#allocation9_spill] sm:$0xff] %v23552_v52 }
 0x1ec   :  { %19374 = vmatprep.mubr.msk.f32.mxu0 %vm36_vm1, %v23491_v58  ;;  %v630_v14 = vpop.permute.xlu0 %629 }
 0x1ed   :  { %v670_v41 = vsel %vm661_vm3, %v22719_v13, %v630_v14 }
 0x1ee   :  { %687 = vst.msk [vmem:[#allocation2 + $0xb1] sm:$0xff] %vm36_vm1, %v670_v41  ;;  %19144 = vmatmul.mubr.msk.f32.gmra.mrb[16].mxu1 %vm36_vm1, %v23237_v59  ;;  %v23558_v41 = vld [vmem:[#allocation2 + $0x160] sm:$0xff] }
 0x1ef   :  { %19375 = vmatmul.mubr.msk.f32.gmra.mrb[14].mxu0 %vm36_vm1, %v23502_v12  ;;  %19146 = vmatprep.mubr.msk.f32.mxu1 %vm36_vm1, %v23246_v19  ;;  %28935 = vst [vmem:[#allocation10_spill] sm:$0xff] %v23558_v41 }
 0x1f0   :  { %v749_v21 = vpop.permute.xlu0 %748  ;;  %19377 = vmatprep.mubr.msk.f32.mxu0 %vm36_vm1, %v3526_v36  ;;  %v23563_v36 = vld [vmem:[#allocation2 + $0x392] sm:$0xff] }
 0x1f1   :  { %v850_v13 = vsel %vm661_vm3, %v749_v21, %v23192_v55  ;;  %28936 = vst [vmem:[#allocation11_spill] sm:$0xff] %v23563_v36  ;;  %v23565_v21 = vld [vmem:[#allocation2 + $0x170] sm:$0xff] }
 0x1f2   :  { %867 = vst.msk [vmem:[#allocation2 + $0x211] sm:$0xff] %vm36_vm1, %v850_v13  ;;  %19147 = vmatmul.mubr.msk.f32.gmra.mrb[18].mxu1 %vm36_vm1, %v23259_v18  ;;  %28937 = vst [vmem:[#allocation12_spill] sm:$0xff] %v23565_v21  ;;  %v23570_v13 = vld [vmem:[%s28649_s4 + $0x14] sm:$0xf] }
 0x1f3   :  { %19378 = vmatmul.mubr.msk.f32.gmra.mrb[16].mxu0 %vm36_vm1, %v23514_v53  ;;  %19149 = vmatprep.mubr.msk.f32.mxu1 %vm36_vm1, %v23267_v50 }
 0x1f4   :  { %19380 = vmatprep.mubr.msk.f32.mxu0 %vm36_vm1, %v23520_v60  ;;  %v751_v26 = vpop.permute.xlu0 %750 }
 0x1f5   :  { %v851_v55 = vsel %vm661_vm3, %v751_v26, %v23205_v2 }
 0x1f6   :  { %868 = vst.msk [vmem:[#allocation2 + $0x221] sm:$0xff] %vm36_vm1, %v851_v55  ;;  %19150 = vmatmul.mubr.msk.f32.gmra.mrb[20].mxu1 %vm36_vm1, %v23280_v25 }
 0x1f7   :  { %19381 = vmatmul.mubr.msk.f32.gmra.mrb[18].mxu0 %vm36_vm1, %v23529_v42  ;;  %19152 = vmatprep.mubr.msk.f32.mxu1 %vm36_vm1, %v23284_v1 }
 0x1f8   :  { %19383 = vmatprep.mubr.msk.f32.mxu0 %vm36_vm1, %v23535_v10  ;;  %v634_v6 = vpop.permute.xlu0 %633 }
 0x1f9   :  { %v672_v2 = vsel %vm661_vm3, %v22792_v31, %v634_v6  ;;  %v23584_v6 = vld [vmem:[#allocation2 + $0x180] sm:$0xff] }
 0x1fa   :  { %689 = vst.msk [vmem:[#allocation2 + $0xd1] sm:$0xff] %vm36_vm1, %v672_v2  ;;  %19153 = vmatmul.mubr.msk.f32.gmra.mrb[22].mxu1 %vm36_vm1, %v23293_v27  ;;  %28939 = vst [vmem:[#allocation14_spill] sm:$0xff] %v23584_v6  ;;  %v23591_v2 = vld [vmem:[#allocation2 + $0x21] sm:$0xff] }
 0x1fb   :  { %19384 = vmatmul.mubr.msk.f32.gmra.mrb[20].mxu0 %vm36_vm1, %v23544_v32  ;;  %19157 = vmatprep.mubr.msk.f32.mxu1 %vm36_vm1, %v23546_v9  ;;  %28940 = vst [vmem:[#allocation15_spill] sm:$0xff] %v23591_v2 }
 0x1fc   :  { %19386 = vmatprep.mubr.msk.f32.mxu0 %vm36_vm1, %v23552_v52  ;;  %v753_v31 = vpop.permute.xlu0 %752 }
 0x1fd   :  { %v852_v14 = vsel %vm661_vm3, %v753_v31, %v23252_v17  ;;  %v23576_v17 = vld [vmem:[#allocation2 + $0x11] sm:$0xff] }
 0x1fe   :  { %869 = vst.msk [vmem:[#allocation2 + $0x231] sm:$0xff] %vm36_vm1, %v852_v14  ;;  %19158 = vmatmul.mubr.msk.f32.vlgmr.msra.gmra.mrb[8].mxu1 %vm36_vm1, %v23558_v41  ;;  %28938 = vst [vmem:[#allocation13_spill] sm:$0xff] %v23576_v17  ;;  %v23593_v31 = vld [vmem:[#allocation2 + $0x190] sm:$0xff] }
 0x1ff   :  { %19387 = vmatmul.mubr.msk.f32.gmra.mrb[22].mxu0 %vm36_vm1, %v23563_v36  ;;  %19160 = vmatprep.mubr.msk.f32.mxu1 %vm36_vm1, %v23565_v21  ;;  %28941 = vst [vmem:[#allocation16_spill] sm:$0xff] %v23593_v31  ;;  %v23650_v21 = vld [vmem:[#allocation2 + $0x200] sm:$0xff]  ;;  %v23658_v41 = vld [vmem:[#allocation2 + $0x210] sm:$0xff] }
 0x200   :  { %19391 = vmatprep.mubr.msk.f32.mxu0 %vm36_vm1, %v23576_v17  ;;  %v741_v26 = vpop.permute.xlu0 %740  ;;  %19182 = vmatpush3.msk.msra.mxu1 %vm432_vm0, %v23437_v24  ;;  %28950 = vst [vmem:[#allocation25_spill] sm:$0xff] %v23650_v21  ;;  %28952 = vst [vmem:[#allocation27_spill] sm:$0xff] %v23658_v41 }
 0x201   :  { %v846_v55 = vsel %vm661_vm3, %v741_v26, %v23126_v61  ;;  %19207 = vmatprep.subr.msk.mxu1 %vm432_vm0, %v23570_v13  ;;  %v23599_v61 = vld [vmem:[#allocation2 + $0x31] sm:$0xff] }
 0x202   :  { %863 = vst.msk [vmem:[#allocation2 + $0x1b1] sm:$0xff] %vm36_vm1, %v846_v55  ;;  %19161 = vmatmul.mubr.msk.f32.gmra.mrb[10].mxu1 %vm36_vm1, %v23584_v6  ;;  %v23607_v55 = vld [vmem:[#allocation2 + $0x1a0] sm:$0xff]  ;;  %v23637_v6 = vld [vmem:[#allocation2 + $0x71] sm:$0xff] }
 0x203   :  { %19392 = vmatmul.mubr.msk.f32.vlgmr.msra.gmra.mrb[8].mxu0 %vm36_vm1, %v23591_v2  ;;  %19163 = vmatprep.mubr.msk.f32.mxu1 %vm36_vm1, %v23593_v31  ;;  %28942 = vst [vmem:[#allocation17_spill] sm:$0xff] %v23607_v55  ;;  %28947 = vst [vmem:[#allocation22_spill] sm:$0xff] %v23637_v6  ;;  %v23675_v9 = vld [vmem:[#allocation2 + $0xd1] sm:$0xff] }
 0x204   :  { %19394 = vmatprep.mubr.msk.f32.mxu0 %vm36_vm1, %v23599_v61  ;;  %19416 = vmatpush3.msk.msra.mxu0 %vm432_vm0, %v23437_v24  ;;  %v755_v14 = vpop.permute.xlu0 %754  ;;  %v23618_v24 = vld [vmem:[#allocation2 + $0x51] sm:$0xff]  ;;  %28955 = vst [vmem:[#allocation30_spill] sm:$0xff] %v23675_v9 }
 0x205   :  { %v853_v26 = vsel %vm661_vm3, %v755_v14, %v23273_v54  ;;  %19441 = vmatprep.subr.msk.mxu0 %vm432_vm0, %v23570_v13  ;;  %v23677_v36 = vld [vmem:[#allocation2 + $0x230] sm:$0xff] }
 0x206   :  { %870 = vst.msk [vmem:[#allocation2 + $0x241] sm:$0xff] %vm36_vm1, %v853_v26  ;;  %19164 = vmatmul.mubr.msk.f32.gmra.mrb[12].mxu1 %vm36_vm1, %v23607_v55  ;;  %v23629_v26 = vld [vmem:[#allocation2 + $0x61] sm:$0xff]  ;;  %28956 = vst [vmem:[#allocation31_spill] sm:$0xff] %v23677_v36 }
 0x207   :  { %19395 = vmatmul.mubr.msk.f32.gmra.mrb[10].mxu0 %vm36_vm1, %v23614_v38  ;;  %28945 = vst [vmem:[#allocation20_spill] sm:$0xff] %v23629_v26  ;;  %v23631_v55 = vld [vmem:[#allocation2 + $0x1c0] sm:$0xff] }
 0x208   :  { %19397 = vmatprep.mubr.msk.f32.mxu0 %vm36_vm1, %v23618_v24  ;;  %v638_v54 = vpop.permute.xlu0 %637  ;;  %28946 = vst [vmem:[#allocation21_spill] sm:$0xff] %v23631_v55 }
 0x209   :  { %v674_v14 = vsel %vm661_vm3, %v22686_v0, %v638_v54  ;;  %v23624_v31 = vld [vmem:[#allocation2 + $0x1b0] sm:$0xff] }
 0x20a   :  { %28944 = vst [vmem:[#allocation19_spill] sm:$0xff] %v23624_v31  ;;  %691 = vst.msk [vmem:[#allocation2 + $0xf1] sm:$0xff] %vm36_vm1, %v674_v14  ;;  %19166 = vmatprep.mubr.msk.f32.mxu1 %vm36_vm1, %v23624_v31  ;;  %v23639_v0 = vld [vmem:[#allocation2 + $0x1f0] sm:$0xff]  ;;  %v23648_v31 = vld [vmem:[#allocation2 + $0x81] sm:$0xff] }
 0x20b   :  { %19398 = vmatmul.mubr.msk.f32.gmra.mrb[12].mxu0 %vm36_vm1, %v23629_v26  ;;  %19167 = vmatmul.mubr.msk.f32.gmra.mrb[14].mxu1 %vm36_vm1, %v23631_v55  ;;  %28948 = vst [vmem:[#allocation23_spill] sm:$0xff] %v23639_v0  ;;  %28949 = vst [vmem:[#allocation24_spill] sm:$0xff] %v23648_v31  ;;  %v23656_v55 = vld [vmem:[#allocation2 + $0xb1] sm:$0xff] }
 0x20c   :  { %19400 = vmatprep.mubr.msk.f32.mxu0 %vm36_vm1, %v23637_v6  ;;  %v759_v54 = vpop.permute.xlu0 %758  ;;  %19169 = vmatprep.mubr.msk.f32.mxu1 %vm36_vm1, %v23639_v0  ;;  %28951 = vst [vmem:[#allocation26_spill] sm:$0xff] %v23656_v55  ;;  %v23667_v0 = vld [vmem:[#allocation2 + $0xc1] sm:$0xff] }
 0x20d   :  { %v855_v14 = vsel %vm661_vm3, %v759_v54, %v23339_v51  ;;  %v1131_v54 = vpop.permute.xlu1 %1130  ;;  %28953 = vst [vmem:[#allocation28_spill] sm:$0xff] %v23667_v0 }
 0x20e   :  { %872 = vst.msk [vmem:[#allocation2 + $0x261] sm:$0xff] %vm36_vm1, %v855_v14 }
 0x20f   :  { %19401 = vmatmul.mubr.msk.f32.gmra.mrb[14].mxu0 %vm36_vm1, %v23648_v31  ;;  %19170 = vmatmul.mubr.msk.f32.gmra.mrb[16].mxu1 %vm36_vm1, %v23650_v21  ;;  %v23669_v21 = vld [vmem:[#allocation2 + $0x220] sm:$0xff] }
 0x210   :  { %19403 = vmatprep.mubr.msk.f32.mxu0 %vm36_vm1, %v23656_v55  ;;  %v757_v51 = vpop.permute.xlu0 %756  ;;  %19172 = vmatprep.mubr.msk.f32.mxu1 %vm36_vm1, %v23658_v41  ;;  %28954 = vst [vmem:[#allocation29_spill] sm:$0xff] %v23669_v21  ;;  %v23688_v41 = vld [vmem:[#allocation2 + $0x240] sm:$0xff] }
 0x211   :  { %v854_v14 = vsel %vm661_vm3, %v757_v51, %v23318_v39  ;;  %28958 = vst [vmem:[#allocation33_spill] sm:$0xff] %v23688_v41  ;;  %v23694_v52 = vld [vmem:[#allocation2 + $0xf1] sm:$0xff] }
 0x212   :  { %871 = vst.msk [vmem:[#allocation2 + $0x251] sm:$0xff] %vm36_vm1, %v854_v14  ;;  %v23686_v14 = vld [vmem:[#allocation2 + $0xe1] sm:$0xff]  ;;  %28959 = vst [vmem:[#allocation34_spill] sm:$0xff] %v23694_v52 }
 0x213   :  { %19404 = vmatmul.mubr.msk.f32.gmra.mrb[16].mxu0 %vm36_vm1, %v23667_v0  ;;  %19173 = vmatmul.mubr.msk.f32.gmra.mrb[18].mxu1 %vm36_vm1, %v23669_v21  ;;  %28957 = vst [vmem:[#allocation32_spill] sm:$0xff] %v23686_v14  ;;  %v969_v21 = vpop.permute.xlu1 %968 }
 0x214   :  { %19406 = vmatprep.mubr.msk.f32.mxu0 %vm36_vm1, %v23675_v9  ;;  %v642_v39 = vpop.permute.xlu0 %641  ;;  %19175 = vmatprep.mubr.msk.f32.mxu1 %vm36_vm1, %v23677_v36 }
 0x215   :  { %v676_v51 = vsel %vm661_vm3, %v22710_v11, %v642_v39  ;;  %v23706_v32 = vld [vmem:[#allocation2 + $0x260] sm:$0xff] }
 0x216   :  { %693 = vst.msk [vmem:[#allocation2 + $0x111] sm:$0xff] %vm36_vm1, %v676_v51  ;;  %v23704_v51 = vld [vmem:[#allocation2 + $0x101] sm:$0xff]  ;;  %28962 = vst [vmem:[#allocation37_spill] sm:$0xff] %v23706_v32 }
 0x217   :  { %19407 = vmatmul.mubr.msk.f32.gmra.mrb[18].mxu0 %vm36_vm1, %v23686_v14  ;;  %19176 = vmatmul.mubr.msk.f32.gmra.mrb[20].mxu1 %vm36_vm1, %v23688_v41  ;;  %28961 = vst [vmem:[#allocation36_spill] sm:$0xff] %v23704_v51 }
 0x218   :  { %19409 = vmatprep.mubr.msk.f32.mxu0 %vm36_vm1, %v23694_v52  ;;  %v1067_v36 = vpop.permute.xlu0 %1066 }
 0x219   :  { %v1171_v11 = vsel %vm661_vm3, %v1067_v36, %v1131_v54  ;;  %v23699_v39 = vld [vmem:[#allocation2 + $0x250] sm:$0xff]  ;;  %v1147_v36 = vpop.permute.xlu1 %1146 }
 0x21a   :  { %28960 = vst [vmem:[#allocation35_spill] sm:$0xff] %v23699_v39  ;;  %1188 = vst.msk [vmem:[#allocation2 + $0x441] sm:$0xff] %vm36_vm1, %v1171_v11  ;;  %19178 = vmatprep.mubr.msk.f32.mxu1 %vm36_vm1, %v23699_v39  ;;  %v23720_v39 = vld [vmem:[#allocation2 + $0x121] sm:$0xff] }
 0x21b   :  { %19410 = vmatmul.mubr.msk.f32.gmra.mrb[20].mxu0 %vm36_vm1, %v23704_v51  ;;  %19179 = vmatmul.mubr.msk.f32.gmra.mrb[22].mxu1 %vm36_vm1, %v23706_v32  ;;  %28964 = vst [vmem:[#allocation39_spill] sm:$0xff] %v23720_v39  ;;  %v23726_v32 = vld [vmem:[#allocation2 + $0x151] sm:$0xff] }
 0x21c   :  { %v905_v41 = vpop.permute.xlu0 %904  ;;  %19183 = vmatprep.mubr.msk.f32.mxu1 %vm36_vm1, %v23576_v17 }
 0x21d   :  { %v1009_v54 = vsel %vm661_vm3, %v905_v41, %v969_v21  ;;  %v23715_v11 = vld [vmem:[#allocation2 + $0x111] sm:$0xff]  ;;  %v985_v17 = vpop.permute.xlu1 %984 }
 0x21e   :  { %28963 = vst [vmem:[#allocation38_spill] sm:$0xff] %v23715_v11  ;;  %1026 = vst.msk [vmem:[#allocation2 + $0x301] sm:$0xff] %vm36_vm1, %v1009_v54  ;;  %19412 = vmatprep.mubr.msk.f32.mxu0 %vm36_vm1, %v23715_v11  ;;  %v23731_v41 = vld [vmem:[%s28649_s4 + $0x18] sm:$0xf] }
 0x21f   :  { %19184 = vmatmul.mubr.msk.f32.vlgmr.msra.gmra.mrb[8].mxu1 %vm36_vm1, %v23591_v2  ;;  %19413 = vmatmul.mubr.msk.f32.gmra.mrb[22].mxu0 %vm36_vm1, %v23720_v39  ;;  %v23741_v2 = vld [vmem:[#allocation2 + $0x161] sm:$0xff] }
 0x220   :  { %v1083_v21 = vpop.permute.xlu0 %1082  ;;  %19186 = vmatprep.mubr.msk.f32.mxu1 %vm36_vm1, %v23599_v61  ;;  %19417 = vmatprep.mubr.msk.f32.mxu0 %vm36_vm1, %v23726_v32 }
 0x221   :  { %v1179_v54 = vsel %vm661_vm3, %v1083_v21, %v1147_v36  ;;  %19208 = vmatpush3.msk.msra.mxu1 %vm432_vm0, %v23570_v13  ;;  %v23753_v21 = vld [vmem:[#allocation2 + $0x171] sm:$0xff] }
 0x222   :  { %1196 = vst.msk [vmem:[#allocation2 + $0x4e1] sm:$0xff] %vm36_vm1, %v1179_v54  ;;  %19233 = vmatprep.subr.msk.mxu1 %vm432_vm0, %v23731_v41  ;;  %28965 = vst [vmem:[#allocation40_spill] sm:$0xff] %v23753_v21 }
 0x223   :  { %19187 = vmatmul.mubr.msk.f32.gmra.mrb[10].mxu1 %vm36_vm1, %v23614_v38  ;;  %19418 = vmatmul.mubr.msk.f32.vlgmr.msra.gmra.mrb[8].mxu0 %vm36_vm1, %v23741_v2  ;;  %v23761_v38 = vld [vmem:[#allocation2 + $0x181] sm:$0xff] }
 0x224   :  { %19442 = vmatpush3.msk.msra.mxu0 %vm432_vm0, %v23570_v13  ;;  %v921_v36 = vpop.permute.xlu0 %920  ;;  %19189 = vmatprep.mubr.msk.f32.mxu1 %vm36_vm1, %v23618_v24  ;;  %v23767_v13 = vld [vmem:[#allocation2 + $0x191] sm:$0xff] }
 0x225   :  { %v1017_v54 = vsel %vm661_vm3, %v921_v36, %v985_v17  ;;  %19420 = vmatprep.mubr.msk.f32.mxu0 %vm36_vm1, %v23753_v21  ;;  %19467 = vmatprep.subr.msk.mxu0 %vm432_vm0, %v23731_v41  ;;  %v23773_v17 = vld [vmem:[#allocation2 + $0x1a1] sm:$0xff]  ;;  %v23779_v36 = vld [vmem:[#allocation2 + $0x1b1] sm:$0xff] }
 0x226   :  { %1034 = vst.msk [vmem:[#allocation2 + $0x3a1] sm:$0xff] %vm36_vm1, %v1017_v54  ;;  %v23785_v54 = vld [vmem:[#allocation2 + $0x1c1] sm:$0xff] }
 0x227   :  { %19190 = vmatmul.mubr.msk.f32.gmra.mrb[12].mxu1 %vm36_vm1, %v23629_v26  ;;  %19421 = vmatmul.mubr.msk.f32.gmra.mrb[10].mxu0 %vm36_vm1, %v23761_v38  ;;  %v23850_v26 = vld [vmem:[#allocation2 + $0x22] sm:$0xff] }
 0x228   :  { %19192 = vmatprep.mubr.msk.f32.mxu1 %vm36_vm1, %v23637_v6  ;;  %19423 = vmatprep.mubr.msk.f32.mxu0 %vm36_vm1, %v23767_v13  ;;  %v2786_v6 = vld [vmem:[%s28649_s4 + $0x1c] sm:$0xf]  ;;  %28967 = vst [vmem:[#allocation42_spill] sm:$0xff] %v23850_v26 }
 0x22b   :  { %19193 = vmatmul.mubr.msk.f32.gmra.mrb[14].mxu1 %vm36_vm1, %v23648_v31  ;;  %19424 = vmatmul.mubr.msk.f32.gmra.mrb[12].mxu0 %vm36_vm1, %v23773_v17  ;;  %v23791_v31 = vld [vmem:[#allocation2 + $0x1f1] sm:$0xff] }
 0x22c   :  { %19195 = vmatprep.mubr.msk.f32.mxu1 %vm36_vm1, %v23656_v55  ;;  %19426 = vmatprep.mubr.msk.f32.mxu0 %vm36_vm1, %v23779_v36  ;;  %v23797_v55 = vld [vmem:[#allocation2 + $0x201] sm:$0xff] }
 0x22f   :  { %19196 = vmatmul.mubr.msk.f32.gmra.mrb[16].mxu1 %vm36_vm1, %v23667_v0  ;;  %19427 = vmatmul.mubr.msk.f32.gmra.mrb[14].mxu0 %vm36_vm1, %v23785_v54  ;;  %v23803_v0 = vld [vmem:[#allocation2 + $0x211] sm:$0xff] }
 0x230   :  { %19198 = vmatprep.mubr.msk.f32.mxu1 %vm36_vm1, %v23675_v9  ;;  %19429 = vmatprep.mubr.msk.f32.mxu0 %vm36_vm1, %v23791_v31  ;;  %v23809_v9 = vld [vmem:[#allocation2 + $0x221] sm:$0xff] }
 0x233   :  { %19199 = vmatmul.mubr.msk.f32.gmra.mrb[18].mxu1 %vm36_vm1, %v23686_v14  ;;  %19430 = vmatmul.mubr.msk.f32.gmra.mrb[16].mxu0 %vm36_vm1, %v23797_v55  ;;  %v23815_v14 = vld [vmem:[#allocation2 + $0x231] sm:$0xff] }
 0x234   :  { %19201 = vmatprep.mubr.msk.f32.mxu1 %vm36_vm1, %v23694_v52  ;;  %19432 = vmatprep.mubr.msk.f32.mxu0 %vm36_vm1, %v23803_v0  ;;  %v23821_v52 = vld [vmem:[#allocation2 + $0x241] sm:$0xff] }
 0x237   :  { %19202 = vmatmul.mubr.msk.f32.gmra.mrb[20].mxu1 %vm36_vm1, %v23704_v51  ;;  %19433 = vmatmul.mubr.msk.f32.gmra.mrb[18].mxu0 %vm36_vm1, %v23809_v9  ;;  %v23827_v51 = vld [vmem:[#allocation2 + $0x251] sm:$0xff] }
 0x238   :  { %19204 = vmatprep.mubr.msk.f32.mxu1 %vm36_vm1, %v23715_v11  ;;  %19435 = vmatprep.mubr.msk.f32.mxu0 %vm36_vm1, %v23815_v14  ;;  %v23833_v11 = vld [vmem:[#allocation2 + $0x261] sm:$0xff] }
 0x23b   :  { %19205 = vmatmul.mubr.msk.f32.gmra.mrb[22].mxu1 %vm36_vm1, %v23720_v39  ;;  %19436 = vmatmul.mubr.msk.f32.gmra.mrb[20].mxu0 %vm36_vm1, %v23821_v52  ;;  %v23839_v39 = vld [vmem:[#allocation2 + $0x12] sm:$0xff] }
 0x23c   :  { %19209 = vmatprep.mubr.msk.f32.mxu1 %vm36_vm1, %v23726_v32  ;;  %19438 = vmatprep.mubr.msk.f32.mxu0 %vm36_vm1, %v23827_v51  ;;  %28966 = vst [vmem:[#allocation41_spill] sm:$0xff] %v23839_v39 }
 0x23f   :  { %19210 = vmatmul.mubr.msk.f32.vlgmr.msra.gmra.mrb[8].mxu1 %vm36_vm1, %v23741_v2  ;;  %19439 = vmatmul.mubr.msk.f32.gmra.mrb[22].mxu0 %vm36_vm1, %v23833_v11 }
 0x240   :  { %19212 = vmatprep.mubr.msk.f32.mxu1 %vm36_vm1, %v23753_v21  ;;  %19443 = vmatprep.mubr.msk.f32.mxu0 %vm36_vm1, %v23839_v39  ;;  %v23861_v39 = vld [vmem:[#allocation2 + $0x32] sm:$0xff]  ;;  %v23866_v21 = vld [vmem:[#allocation2 + $0x42] sm:$0xff] }
 0x241   :  { %19234 = vmatpush3.msk.msra.mxu1 %vm432_vm0, %v23731_v41  ;;  %28968 = vst [vmem:[#allocation43_spill] sm:$0xff] %v23861_v39  ;;  %28969 = vst [vmem:[#allocation44_spill] sm:$0xff] %v23866_v21 }
 0x242   :  { %19259 = vmatprep.subr.msk.mxu1 %vm432_vm0, %v2786_v6 }
 0x243   :  { %19213 = vmatmul.mubr.msk.f32.gmra.mrb[10].mxu1 %vm36_vm1, %v23761_v38  ;;  %19444 = vmatmul.mubr.msk.f32.vlgmr.msra.gmra.mrb[8].mxu0 %vm36_vm1, %v23850_v26  ;;  %v23872_v26 = vld [vmem:[#allocation2 + $0x52] sm:$0xff] }
 0x244   :  { %19468 = vmatpush3.msk.msra.mxu0 %vm432_vm0, %v23731_v41  ;;  %19215 = vmatprep.mubr.msk.f32.mxu1 %vm36_vm1, %v23767_v13  ;;  %28970 = vst [vmem:[#allocation45_spill] sm:$0xff] %v23872_v26  ;;  %v23878_v41 = vld [vmem:[#allocation2 + $0x62] sm:$0xff] }
 0x245   :  { %19446 = vmatprep.mubr.msk.f32.mxu0 %vm36_vm1, %v23861_v39  ;;  %19493 = vmatprep.subr.msk.mxu0 %vm432_vm0, %v2786_v6  ;;  %28971 = vst [vmem:[#allocation46_spill] sm:$0xff] %v23878_v41  ;;  %v23884_v39 = vld [vmem:[#allocation2 + $0x72] sm:$0xff] }
 0x246   :  { %28972 = vst [vmem:[#allocation47_spill] sm:$0xff] %v23884_v39 }
 0x247   :  { %19216 = vmatmul.mubr.msk.f32.gmra.mrb[12].mxu1 %vm36_vm1, %v23773_v17  ;;  %19447 = vmatmul.mubr.msk.f32.gmra.mrb[10].mxu0 %vm36_vm1, %v23866_v21  ;;  %v23890_v21 = vld [vmem:[#allocation2 + $0x82] sm:$0xff] }
 0x248   :  { %19218 = vmatprep.mubr.msk.f32.mxu1 %vm36_vm1, %v23779_v36  ;;  %19449 = vmatprep.mubr.msk.f32.mxu0 %vm36_vm1, %v23872_v26  ;;  %28973 = vst [vmem:[#allocation48_spill] sm:$0xff] %v23890_v21  ;;  %v23896_v26 = vld [vmem:[#allocation2 + $0xb2] sm:$0xff] }
 0x249   :  { %28974 = vst [vmem:[#allocation49_spill] sm:$0xff] %v23896_v26 }
 0x24b   :  { %19219 = vmatmul.mubr.msk.f32.gmra.mrb[14].mxu1 %vm36_vm1, %v23785_v54  ;;  %19450 = vmatmul.mubr.msk.f32.gmra.mrb[12].mxu0 %vm36_vm1, %v23878_v41  ;;  %v23902_v41 = vld [vmem:[#allocation2 + $0xc2] sm:$0xff] }
 0x24c   :  { %19221 = vmatprep.mubr.msk.f32.mxu1 %vm36_vm1, %v23791_v31  ;;  %19452 = vmatprep.mubr.msk.f32.mxu0 %vm36_vm1, %v23884_v39  ;;  %28975 = vst [vmem:[#allocation50_spill] sm:$0xff] %v23902_v41  ;;  %v23908_v39 = vld [vmem:[#allocation2 + $0xd2] sm:$0xff] }
 0x24d   :  { %28976 = vst [vmem:[#allocation51_spill] sm:$0xff] %v23908_v39 }
 0x24f   :  { %19222 = vmatmul.mubr.msk.f32.gmra.mrb[16].mxu1 %vm36_vm1, %v23797_v55  ;;  %19453 = vmatmul.mubr.msk.f32.gmra.mrb[14].mxu0 %vm36_vm1, %v23890_v21  ;;  %v23914_v21 = vld [vmem:[#allocation2 + $0xe2] sm:$0xff] }
 0x250   :  { %19224 = vmatprep.mubr.msk.f32.mxu1 %vm36_vm1, %v23803_v0  ;;  %19455 = vmatprep.mubr.msk.f32.mxu0 %vm36_vm1, %v23896_v26  ;;  %28977 = vst [vmem:[#allocation52_spill] sm:$0xff] %v23914_v21  ;;  %v23920_v26 = vld [vmem:[#allocation2 + $0xf2] sm:$0xff] }
 0x251   :  { %28978 = vst [vmem:[#allocation53_spill] sm:$0xff] %v23920_v26 }
 0x253   :  { %19225 = vmatmul.mubr.msk.f32.gmra.mrb[18].mxu1 %vm36_vm1, %v23809_v9  ;;  %19456 = vmatmul.mubr.msk.f32.gmra.mrb[16].mxu0 %vm36_vm1, %v23902_v41  ;;  %v23926_v41 = vld [vmem:[#allocation2 + $0x102] sm:$0xff] }
 0x254   :  { %19227 = vmatprep.mubr.msk.f32.mxu1 %vm36_vm1, %v23815_v14  ;;  %19458 = vmatprep.mubr.msk.f32.mxu0 %vm36_vm1, %v23908_v39  ;;  %28979 = vst [vmem:[#allocation54_spill] sm:$0xff] %v23926_v41  ;;  %v23932_v39 = vld [vmem:[#allocation2 + $0x112] sm:$0xff] }
 0x257   :  { %19228 = vmatmul.mubr.msk.f32.gmra.mrb[20].mxu1 %vm36_vm1, %v23821_v52  ;;  %19459 = vmatmul.mubr.msk.f32.gmra.mrb[18].mxu0 %vm36_vm1, %v23914_v21  ;;  %v23938_v21 = vld [vmem:[#allocation2 + $0x122] sm:$0xff] }
 0x258   :  { %19230 = vmatprep.mubr.msk.f32.mxu1 %vm36_vm1, %v23827_v51  ;;  %19461 = vmatprep.mubr.msk.f32.mxu0 %vm36_vm1, %v23920_v26  ;;  %v23944_v26 = vld [vmem:[#allocation2 + $0x291] sm:$0xff] }
 0x25b   :  { %19231 = vmatmul.mubr.msk.f32.gmra.mrb[22].mxu1 %vm36_vm1, %v23833_v11  ;;  %19462 = vmatmul.mubr.msk.f32.gmra.mrb[20].mxu0 %vm36_vm1, %v23926_v41  ;;  %v3015_v41 = vld [vmem:[%s28649_s4 + $0x20] sm:$0xf] }
 0x25c   :  { %19235 = vmatprep.mubr.msk.f32.mxu1 %vm36_vm1, %v23291_v22  ;;  %19464 = vmatprep.mubr.msk.f32.mxu0 %vm36_vm1, %v23932_v39  ;;  %v23954_v22 = vld [vmem:[#allocation2 + $0x2a1] sm:$0xff] }
 0x25f   :  { %19236 = vmatmul.mubr.msk.f32.vlgmr.msra.gmra.mrb[8].mxu1 %vm36_vm1, %v23300_v34  ;;  %19465 = vmatmul.mubr.msk.f32.gmra.mrb[22].mxu0 %vm36_vm1, %v23938_v21  ;;  %v23964_v34 = vld [vmem:[#allocation2 + $0x2b1] sm:$0xff] }
 0x260   :  { %19238 = vmatprep.mubr.msk.f32.mxu1 %vm36_vm1, %v23320_v44  ;;  %19469 = vmatprep.mubr.msk.f32.mxu0 %vm36_vm1, %v23944_v26  ;;  %v23969_v44 = vld [vmem:[#allocation2 + $0x2c1] sm:$0xff] }
 0x261   :  { %19260 = vmatpush3.msk.msra.mxu1 %vm432_vm0, %v2786_v6 }
 0x262   :  { %19285 = vmatprep.subr.msk.mxu1 %vm432_vm0, %v3015_v41 }
 0x263   :  { %19239 = vmatmul.mubr.msk.f32.gmra.mrb[10].mxu1 %vm36_vm1, %v23327_v33  ;;  %19470 = vmatmul.mubr.msk.f32.vlgmr.msra.gmra.mrb[8].mxu0 %vm36_vm1, %v23954_v22  ;;  %v23979_v33 = vld [vmem:[#allocation2 + $0x440] sm:$0xff] }
 0x264   :  { %19494 = vmatpush3.msk.msra.mxu0 %vm432_vm0, %v2786_v6  ;;  %19241 = vmatprep.mubr.msk.f32.mxu1 %vm36_vm1, %v23341_v49  ;;  %v23989_v49 = vld [vmem:[#allocation2 + $0x301] sm:$0xff]  ;;  %v24078_v6 = vld [vmem:[#allocation2 + $0x431] sm:$0xff] }
 0x265   :  { %19472 = vmatprep.mubr.msk.f32.mxu0 %vm36_vm1, %v23964_v34  ;;  %19519 = vmatprep.subr.msk.mxu0 %vm432_vm0, %v3015_v41 }
 0x267   :  { %19242 = vmatmul.mubr.msk.f32.gmra.mrb[12].mxu1 %vm36_vm1, %v23348_v48  ;;  %19473 = vmatmul.mubr.msk.f32.gmra.mrb[10].mxu0 %vm36_vm1, %v23969_v44  ;;  %v24031_v48 = vld [vmem:[#allocation2 + $0x3d1] sm:$0xff] }
 0x268   :  { %19244 = vmatprep.mubr.msk.f32.mxu1 %vm36_vm1, %v23358_v46  ;;  %19475 = vmatprep.mubr.msk.f32.mxu0 %vm36_vm1, %v23142_v7  ;;  %v24015_v7 = vld [vmem:[#allocation2 + $0x4e0] sm:$0xff] }
 0x269   :  { %v24038_v46 = vld [vmem:[#allocation2 + $0x3e1] sm:$0xff] }
 0x26b   :  { %19245 = vmatmul.mubr.msk.f32.gmra.mrb[14].mxu1 %vm36_vm1, %v23979_v33  ;;  %19476 = vmatmul.mubr.msk.f32.gmra.mrb[12].mxu0 %vm36_vm1, %v23151_v28  ;;  %v24025_v28 = vld [vmem:[#allocation2 + $0x3a1] sm:$0xff] }
 0x26c   :  { %19247 = vmatprep.mubr.msk.f32.mxu1 %vm36_vm1, %v23373_v15  ;;  %19478 = vmatprep.mubr.msk.f32.mxu0 %vm36_vm1, %v23194_v43  ;;  %v21992_v15 = vld [vmem:[%s28649_s4 + $0x4] sm:$0xf] }
 0x26f   :  { %19248 = vmatmul.mubr.msk.f32.gmra.mrb[16].mxu1 %vm36_vm1, %v23378_v8  ;;  %19479 = vmatmul.mubr.msk.f32.gmra.mrb[14].mxu0 %vm36_vm1, %v23989_v49  ;;  %v24049_v8 = vld [vmem:[#allocation2 + $0x2d1] sm:$0xff] }
 0x270   :  { %19250 = vmatprep.mubr.msk.f32.mxu1 %vm36_vm1, %v23388_v29  ;;  %19481 = vmatprep.mubr.msk.f32.mxu0 %vm36_vm1, %v23207_v37  ;;  %v24053_v29 = vld [vmem:[#allocation2 + $0x3f1] sm:$0xff] }
 0x273   :  { %19251 = vmatmul.mubr.msk.f32.gmra.mrb[18].mxu1 %vm36_vm1, %v23393_v40  ;;  %19482 = vmatmul.mubr.msk.f32.gmra.mrb[16].mxu0 %vm36_vm1, %v23218_v3  ;;  %v24058_v40 = vld [vmem:[#allocation2 + $0x401] sm:$0xff] }
 0x274   :  { %19253 = vmatprep.mubr.msk.f32.mxu1 %vm36_vm1, %v23403_v62  ;;  %19484 = vmatprep.mubr.msk.f32.mxu0 %vm36_vm1, %v23228_v16  ;;  %v24060_v62 = vld [vmem:[#allocation2 + $0x2e1] sm:$0xff] }
 0x277   :  { %19254 = vmatmul.mubr.msk.f32.gmra.mrb[20].mxu1 %vm36_vm1, %v23408_v5  ;;  %19485 = vmatmul.mubr.msk.f32.gmra.mrb[18].mxu0 %vm36_vm1, %v23239_v56  ;;  %v24066_v5 = vld [vmem:[#allocation2 + $0x411] sm:$0xff] }
 0x278   :  { %19256 = vmatprep.mubr.msk.f32.mxu1 %vm36_vm1, %v23418_v20  ;;  %19487 = vmatprep.mubr.msk.f32.mxu0 %vm36_vm1, %v23254_v4  ;;  %v24072_v20 = vld [vmem:[#allocation2 + $0x421] sm:$0xff] }
 0x27b   :  { %19257 = vmatmul.mubr.msk.f32.gmra.mrb[22].mxu1 %vm36_vm1, %v24015_v7  ;;  %19488 = vmatmul.mubr.msk.f32.gmra.mrb[20].mxu0 %vm36_vm1, %v23261_v47 }
 0x27c   :  { %19261 = vmatprep.mubr.msk.f32.mxu1 %vm36_vm1, %v23944_v26  ;;  %19490 = vmatprep.mubr.msk.f32.mxu0 %vm36_vm1, %v23275_v35 }
 0x27f   :  { %19262 = vmatmul.mubr.msk.f32.vlgmr.msra.gmra.mrb[8].mxu1 %vm36_vm1, %v23954_v22  ;;  %19491 = vmatmul.mubr.msk.f32.gmra.mrb[22].mxu0 %vm36_vm1, %v24025_v28 }
 0x280   :  { %19264 = vmatprep.mubr.msk.f32.mxu1 %vm36_vm1, %v23964_v34  ;;  %19495 = vmatprep.mubr.msk.f32.mxu0 %vm36_vm1, %v24031_v48 }
 0x281   :  { %19286 = vmatpush3.msk.msra.mxu1 %vm432_vm0, %v3015_v41 }
 0x282   :  { %19545 = vmatprep.subr.msk.mxu1 %vm432_vm0, %v21992_v15 }
 0x283   :  { %19265 = vmatmul.mubr.msk.f32.gmra.mrb[10].mxu1 %vm36_vm1, %v23969_v44  ;;  %19496 = vmatmul.mubr.msk.f32.vlgmr.msra.gmra.mrb[8].mxu0 %vm36_vm1, %v24038_v46 }
 0x284   :  { %19520 = vmatpush3.msk.msra.mxu0 %vm432_vm0, %v3015_v41  ;;  %19267 = vmatprep.mubr.msk.f32.mxu1 %vm36_vm1, %v24049_v8  ;;  %v28999_v41 = vld [vmem:[#allocation10_spill] sm:$0xff] }
 0x285   :  { %19498 = vmatprep.mubr.msk.f32.mxu0 %vm36_vm1, %v24053_v29  ;;  %19779 = vmatprep.subr.msk.mxu0 %vm432_vm0, %v21992_v15 }
 0x287   :  { %19268 = vmatmul.mubr.msk.f32.gmra.mrb[12].mxu1 %vm36_vm1, %v24060_v62  ;;  %19499 = vmatmul.mubr.msk.f32.gmra.mrb[10].mxu0 %vm36_vm1, %v24058_v40 }
 0x288   :  { %19270 = vmatprep.mubr.msk.f32.mxu1 %vm36_vm1, %v23194_v43  ;;  %19501 = vmatprep.mubr.msk.f32.mxu0 %vm36_vm1, %v24066_v5  ;;  %v24084_v43 = vld [vmem:[#allocation2 + $0x441] sm:$0xff] }
 0x28b   :  { %19271 = vmatmul.mubr.msk.f32.gmra.mrb[14].mxu1 %vm36_vm1, %v23989_v49  ;;  %19502 = vmatmul.mubr.msk.f32.gmra.mrb[12].mxu0 %vm36_vm1, %v24072_v20 }
 0x28c   :  { %19273 = vmatprep.mubr.msk.f32.mxu1 %vm36_vm1, %v23207_v37  ;;  %19504 = vmatprep.mubr.msk.f32.mxu0 %vm36_vm1, %v24078_v6  ;;  %v24118_v37 = vld [vmem:[#allocation2 + $0x4e1] sm:$0xff] }
 0x28f   :  { %19274 = vmatmul.mubr.msk.f32.gmra.mrb[16].mxu1 %vm36_vm1, %v23218_v3  ;;  %19505 = vmatmul.mubr.msk.f32.gmra.mrb[14].mxu0 %vm36_vm1, %v24084_v43  ;;  %v21995_v3 = vld [vmem:[%s28649_s4] sm:$0xf] }
 0x290   :  { %19276 = vmatprep.mubr.msk.f32.mxu1 %vm36_vm1, %v23228_v16  ;;  %19507 = vmatprep.mubr.msk.f32.mxu0 %vm36_vm1, %v23237_v59  ;;  %v24155_v16 = vld [vmem:[#allocation2 + $0x471] sm:$0xff]  ;;  %v24161_v59 = vld [vmem:[#allocation2 + $0x302] sm:$0xff] }
 0x293   :  { %19277 = vmatmul.mubr.msk.f32.gmra.mrb[18].mxu1 %vm36_vm1, %v23239_v56  ;;  %19508 = vmatmul.mubr.msk.f32.gmra.mrb[16].mxu0 %vm36_vm1, %v23246_v19  ;;  %v28980_v56 = vld [vmem:[#allocation7_spill] sm:$0xff] }
 0x294   :  { %19279 = vmatprep.mubr.msk.f32.mxu1 %vm36_vm1, %v23254_v4  ;;  %19510 = vmatprep.mubr.msk.f32.mxu0 %vm36_vm1, %v23259_v18  ;;  %v28982_v4 = vld [vmem:[#allocation11_spill] sm:$0xff] }
 0x297   :  { %19280 = vmatmul.mubr.msk.f32.gmra.mrb[20].mxu1 %vm36_vm1, %v23261_v47  ;;  %19511 = vmatmul.mubr.msk.f32.gmra.mrb[18].mxu0 %vm36_vm1, %v23267_v50  ;;  %v24195_v47 = vld [vmem:[#allocation2 + $0x3a2] sm:$0xff] }
 0x298   :  { %19282 = vmatprep.mubr.msk.f32.mxu1 %vm36_vm1, %v23275_v35  ;;  %19513 = vmatprep.mubr.msk.f32.mxu0 %vm36_vm1, %v23280_v25  ;;  %v21997_v35 = vld [vmem:[%s28649_s4 + $0x8] sm:$0xf] }
 0x29b   :  { %19283 = vmatmul.mubr.msk.f32.gmra.mrb[22].mxu1 %vm36_vm1, %v24025_v28  ;;  %19514 = vmatmul.mubr.msk.f32.gmra.mrb[20].mxu0 %vm36_vm1, %v23284_v1 }
 0x29c   :  { %19287 = vmatprep.mubr.msk.f32.mxu1 %vm36_vm1, %v24031_v48  ;;  %19516 = vmatprep.mubr.msk.f32.mxu0 %vm36_vm1, %v23293_v27 }
 0x29f   :  { %19288 = vmatmul.mubr.msk.f32.vlgmr.msra.gmra.mrb[8].mxu1 %vm36_vm1, %v24038_v46  ;;  %19517 = vmatmul.mubr.msk.f32.gmra.mrb[22].mxu0 %vm36_vm1, %v24118_v37 }
 0x2a0   :  { %19290 = vmatprep.mubr.msk.f32.mxu1 %vm36_vm1, %v24053_v29  ;;  %19521 = vmatprep.mubr.msk.f32.mxu0 %vm36_vm1, %v23453_v63  ;;  %v28988_v63 = vld [vmem:[#allocation22_spill] sm:$0xff] }
 0x2a1   :  { %19546 = vmatpush3.msk.msra.mxu1 %vm432_vm0, %v21992_v15 }
 0x2a2   :  { %19571 = vmatprep.subr.msk.mxu1 %vm432_vm0, %v21995_v3 }
 0x2a3   :  { %19291 = vmatmul.mubr.msk.f32.gmra.mrb[10].mxu1 %vm36_vm1, %v24058_v40  ;;  %19522 = vmatmul.mubr.msk.f32.vlgmr.msra.gmra.mrb[8].mxu0 %vm36_vm1, %v23459_v57  ;;  %v28989_v57 = vld [vmem:[#allocation24_spill] sm:$0xff] }
 0x2a4   :  { %19780 = vmatpush3.msk.msra.mxu0 %vm432_vm0, %v21992_v15  ;;  %19293 = vmatprep.mubr.msk.f32.mxu1 %vm36_vm1, %v24066_v5  ;;  %v29000_v15 = vld [vmem:[#allocation12_spill] sm:$0xff] }
 0x2a5   :  { %19524 = vmatprep.mubr.msk.f32.mxu0 %vm36_vm1, %v23472_v45  ;;  %19805 = vmatprep.subr.msk.mxu0 %vm432_vm0, %v21995_v3  ;;  %v28990_v45 = vld [vmem:[#allocation26_spill] sm:$0xff] }
 0x2a7   :  { %19294 = vmatmul.mubr.msk.f32.gmra.mrb[12].mxu1 %vm36_vm1, %v24072_v20  ;;  %19525 = vmatmul.mubr.msk.f32.gmra.mrb[10].mxu0 %vm36_vm1, %v23478_v30  ;;  %v28991_v30 = vld [vmem:[#allocation28_spill] sm:$0xff] }
 0x2a8   :  { %19296 = vmatprep.mubr.msk.f32.mxu1 %vm36_vm1, %v24078_v6  ;;  %19527 = vmatprep.mubr.msk.f32.mxu0 %vm36_vm1, %v23487_v23  ;;  %v28992_v23 = vld [vmem:[#allocation30_spill] sm:$0xff] }
 0x2ab   :  { %19297 = vmatmul.mubr.msk.f32.gmra.mrb[14].mxu1 %vm36_vm1, %v24084_v43  ;;  %19528 = vmatmul.mubr.msk.f32.gmra.mrb[12].mxu0 %vm36_vm1, %v23491_v58  ;;  %v28993_v58 = vld [vmem:[#allocation32_spill] sm:$0xff] }
 0x2ac   :  { %19299 = vmatprep.mubr.msk.f32.mxu1 %vm36_vm1, %v24155_v16  ;;  %19530 = vmatprep.mubr.msk.f32.mxu0 %vm36_vm1, %v23502_v12  ;;  %v28994_v12 = vld [vmem:[#allocation34_spill] sm:$0xff] }
 0x2af   :  { %19300 = vmatmul.mubr.msk.f32.gmra.mrb[16].mxu1 %vm36_vm1, %v23246_v19  ;;  %19531 = vmatmul.mubr.msk.f32.gmra.mrb[14].mxu0 %vm36_vm1, %v24161_v59  ;;  %v28981_v19 = vld [vmem:[#allocation9_spill] sm:$0xff] }
 0x2b0   :  { %19302 = vmatprep.mubr.msk.f32.mxu1 %vm36_vm1, %v23259_v18  ;;  %19533 = vmatprep.mubr.msk.f32.mxu0 %vm36_vm1, %v23514_v53  ;;  %v28983_v18 = vld [vmem:[#allocation13_spill] sm:$0xff]  ;;  %v28995_v53 = vld [vmem:[#allocation36_spill] sm:$0xff] }
 0x2b3   :  { %19303 = vmatmul.mubr.msk.f32.gmra.mrb[18].mxu1 %vm36_vm1, %v23267_v50  ;;  %19534 = vmatmul.mubr.msk.f32.gmra.mrb[16].mxu0 %vm36_vm1, %v23520_v60  ;;  %v28984_v50 = vld [vmem:[#allocation15_spill] sm:$0xff]  ;;  %v28996_v60 = vld [vmem:[#allocation38_spill] sm:$0xff] }
 0x2b4   :  { %19305 = vmatprep.mubr.msk.f32.mxu1 %vm36_vm1, %v23280_v25  ;;  %19536 = vmatprep.mubr.msk.f32.mxu0 %vm36_vm1, %v23529_v42  ;;  %v28985_v25 = vld [vmem:[#allocation18_spill] sm:$0xff]  ;;  %v28997_v42 = vld [vmem:[#allocation39_spill] sm:$0xff] }
 0x2b7   :  { %19306 = vmatmul.mubr.msk.f32.gmra.mrb[20].mxu1 %vm36_vm1, %v23284_v1  ;;  %19537 = vmatmul.mubr.msk.f32.gmra.mrb[18].mxu0 %vm36_vm1, %v23535_v10  ;;  %v28986_v1 = vld [vmem:[#allocation40_spill] sm:$0xff] }
 0x2b8   :  { %19308 = vmatprep.mubr.msk.f32.mxu1 %vm36_vm1, %v23293_v27  ;;  %19539 = vmatprep.mubr.msk.f32.mxu0 %vm36_vm1, %v28980_v56  ;;  %v28987_v27 = vld [vmem:[#allocation20_spill] sm:$0xff]  ;;  %v29001_v56 = vld [vmem:[#allocation14_spill] sm:$0xff] }
 0x2b9   :  { %v28998_v10 = vld [vmem:[#allocation8_spill] sm:$0xff] }
 0x2bb   :  { %19309 = vmatmul.mubr.msk.f32.gmra.mrb[22].mxu1 %vm36_vm1, %v24118_v37  ;;  %19540 = vmatmul.mubr.msk.f32.gmra.mrb[20].mxu0 %vm36_vm1, %v28981_v19  ;;  %v29002_v19 = vld [vmem:[#allocation16_spill] sm:$0xff] }
 0x2bc   :  { %19542 = vmatprep.mubr.msk.f32.mxu0 %vm36_vm1, %v28982_v4  ;;  %19547 = vmatprep.mubr.msk.f32.mxu1 %vm36_vm1, %v28983_v18  ;;  %v29003_v4 = vld [vmem:[#allocation17_spill] sm:$0xff] }
 0x2bf   :  { %19543 = vmatmul.mubr.msk.f32.gmra.mrb[22].mxu0 %vm36_vm1, %v24195_v47  ;;  %19548 = vmatmul.mubr.msk.f32.vlgmr.msra.gmra.mrb[24].mxu1 %vm36_vm1, %v28984_v50 }
 0x2c0   :  { %19550 = vmatprep.mubr.msk.f32.mxu1 %vm36_vm1, %v23599_v61  ;;  %19781 = vmatprep.mubr.msk.f32.mxu0 %vm36_vm1, %v23726_v32 }
 0x2c1   :  { %19572 = vmatpush3.msk.msra.mxu1 %vm432_vm0, %v21995_v3 }
 0x2c2   :  { %19597 = vmatprep.subr.msk.mxu1 %vm432_vm0, %v21997_v35 }
 0x2c3   :  { %19551 = vmatmul.mubr.msk.f32.gmra.mrb[26].mxu1 %vm36_vm1, %v28985_v25  ;;  %19782 = vmatmul.mubr.msk.f32.vlgmr.msra.gmra.mrb[24].mxu0 %vm36_vm1, %v23741_v2 }
 0x2c4   :  { %19806 = vmatpush3.msk.msra.mxu0 %vm432_vm0, %v21995_v3  ;;  %19553 = vmatprep.mubr.msk.f32.mxu1 %vm36_vm1, %v23618_v24  ;;  %v24280_v3 = vld [vmem:[%s28649_s4 + $0xc] sm:$0xf] }
 0x2c5   :  { %19784 = vmatprep.mubr.msk.f32.mxu0 %vm36_vm1, %v28986_v1  ;;  %19831 = vmatprep.subr.msk.mxu0 %vm432_vm0, %v21997_v35 }
 0x2c7   :  { %19554 = vmatmul.mubr.msk.f32.gmra.mrb[28].mxu1 %vm36_vm1, %v28987_v27  ;;  %19785 = vmatmul.mubr.msk.f32.gmra.mrb[26].mxu0 %vm36_vm1, %v23761_v38 }
 0x2c8   :  { %19556 = vmatprep.mubr.msk.f32.mxu1 %vm36_vm1, %v28988_v63  ;;  %19787 = vmatprep.mubr.msk.f32.mxu0 %vm36_vm1, %v23767_v13 }
 0x2cb   :  { %19557 = vmatmul.mubr.msk.f32.gmra.mrb[30].mxu1 %vm36_vm1, %v28989_v57  ;;  %19788 = vmatmul.mubr.msk.f32.gmra.mrb[28].mxu0 %vm36_vm1, %v23773_v17 }
 0x2cc   :  { %19559 = vmatprep.mubr.msk.f32.mxu1 %vm36_vm1, %v28990_v45  ;;  %19790 = vmatprep.mubr.msk.f32.mxu0 %vm36_vm1, %v23779_v36 }
 0x2cf   :  { %19560 = vmatmul.mubr.msk.f32.gmra.mrb[32].mxu1 %vm36_vm1, %v28991_v30  ;;  %19791 = vmatmul.mubr.msk.f32.gmra.mrb[30].mxu0 %vm36_vm1, %v23785_v54 }
 0x2d0   :  { %19562 = vmatprep.mubr.msk.f32.mxu1 %vm36_vm1, %v28992_v23  ;;  %19793 = vmatprep.mubr.msk.f32.mxu0 %vm36_vm1, %v23791_v31 }
 0x2d3   :  { %19563 = vmatmul.mubr.msk.f32.gmra.mrb[34].mxu1 %vm36_vm1, %v28993_v58  ;;  %19794 = vmatmul.mubr.msk.f32.gmra.mrb[32].mxu0 %vm36_vm1, %v23797_v55 }
 0x2d4   :  { %19565 = vmatprep.mubr.msk.f32.mxu1 %vm36_vm1, %v28994_v12  ;;  %19796 = vmatprep.mubr.msk.f32.mxu0 %vm36_vm1, %v23803_v0 }
 0x2d7   :  { %19566 = vmatmul.mubr.msk.f32.gmra.mrb[36].mxu1 %vm36_vm1, %v28995_v53  ;;  %19797 = vmatmul.mubr.msk.f32.gmra.mrb[34].mxu0 %vm36_vm1, %v23809_v9 }
 0x2d8   :  { %19568 = vmatprep.mubr.msk.f32.mxu1 %vm36_vm1, %v28996_v60  ;;  %19799 = vmatprep.mubr.msk.f32.mxu0 %vm36_vm1, %v23815_v14 }
 0x2db   :  { %19569 = vmatmul.mubr.msk.f32.gmra.mrb[38].mxu1 %vm36_vm1, %v28997_v42  ;;  %19800 = vmatmul.mubr.msk.f32.gmra.mrb[36].mxu0 %vm36_vm1, %v23821_v52 }
 0x2dc   :  { %19573 = vmatprep.mubr.msk.f32.mxu1 %vm36_vm1, %v28998_v10  ;;  %19802 = vmatprep.mubr.msk.f32.mxu0 %vm36_vm1, %v23827_v51  ;;  %v29014_v10 = vld [vmem:[#allocation37_spill] sm:$0xff] }
 0x2df   :  { %19574 = vmatmul.mubr.msk.f32.vlgmr.msra.gmra.mrb[24].mxu1 %vm36_vm1, %v28999_v41  ;;  %19803 = vmatmul.mubr.msk.f32.gmra.mrb[38].mxu0 %vm36_vm1, %v23833_v11  ;;  %v22010_v41 = vld [vmem:[#allocation2 + $0x480] sm:$0xff] }
 0x2e0   :  { %19576 = vmatprep.mubr.msk.f32.mxu1 %vm36_vm1, %v29000_v15  ;;  %19807 = vmatprep.mubr.msk.f32.mxu0 %vm36_vm1, %v28983_v18  ;;  %v29004_v18 = vld [vmem:[#allocation19_spill] sm:$0xff]  ;;  %v22011_v15 = vld [vmem:[#allocation2 + $0x490] sm:$0xff] }
 0x2e1   :  { %19598 = vmatpush3.msk.msra.mxu1 %vm432_vm0, %v21997_v35 }
 0x2e2   :  { %19623 = vmatprep.subr.msk.mxu1 %vm432_vm0, %v24280_v3 }
 0x2e3   :  { %19577 = vmatmul.mubr.msk.f32.gmra.mrb[26].mxu1 %vm36_vm1, %v29001_v56  ;;  %19808 = vmatmul.mubr.msk.f32.vlgmr.msra.gmra.mrb[24].mxu0 %vm36_vm1, %v28984_v50  ;;  %v29005_v50 = vld [vmem:[#allocation21_spill] sm:$0xff]  ;;  %v22014_v56 = vld [vmem:[#allocation2 + $0x341] sm:$0xff] }
 0x2e4   :  { %19832 = vmatpush3.msk.msra.mxu0 %vm432_vm0, %v21997_v35  ;;  %19579 = vmatprep.mubr.msk.f32.mxu1 %vm36_vm1, %v29002_v19  ;;  %v29007_v35 = vld [vmem:[#allocation25_spill] sm:$0xff] }
 0x2e5   :  { %19810 = vmatprep.mubr.msk.f32.mxu0 %vm36_vm1, %v23599_v61  ;;  %19857 = vmatprep.subr.msk.mxu0 %vm432_vm0, %v24280_v3  ;;  %v29006_v61 = vld [vmem:[#allocation23_spill] sm:$0xff]  ;;  %v22015_v19 = vld [vmem:[#allocation2 + $0x4b0] sm:$0xff] }
 0x2e7   :  { %19580 = vmatmul.mubr.msk.f32.gmra.mrb[28].mxu1 %vm36_vm1, %v29003_v4  ;;  %19811 = vmatmul.mubr.msk.f32.gmra.mrb[26].mxu0 %vm36_vm1, %v28985_v25  ;;  %v29008_v25 = vld [vmem:[#allocation27_spill] sm:$0xff]  ;;  %v22016_v4 = vld [vmem:[#allocation2 + $0x351] sm:$0xff] }
 0x2e8   :  { %19582 = vmatprep.mubr.msk.f32.mxu1 %vm36_vm1, %v29004_v18  ;;  %19813 = vmatprep.mubr.msk.f32.mxu0 %vm36_vm1, %v23618_v24  ;;  %v29009_v24 = vmov 0.0   ;;  %v22017_v18 = vld [vmem:[#allocation2 + $0x4c0] sm:$0xff] }
 0x2e9   :  { %204 = vst.msk [vmem:[#allocation3 + $0x20] sm:$0xff] %vm198_vm4, %v29009_v24  ;;  %202 = vst.msk [vmem:[#allocation3 + $0x10] sm:$0xff] %vm198_vm4, %v29009_v24 }
 0x2ea   :  { %205 = vst.msk [vmem:[#allocation3 + $0x28] sm:$0x3] %vm200_vm5, %v29009_v24  ;;  %203 = vst.msk [vmem:[#allocation3 + $0x18] sm:$0x3] %vm200_vm5, %v29009_v24 }
 0x2eb   :  { %19583 = vmatmul.mubr.msk.f32.gmra.mrb[30].mxu1 %vm36_vm1, %v29005_v50  ;;  %19814 = vmatmul.mubr.msk.f32.gmra.mrb[28].mxu0 %vm36_vm1, %v28987_v27  ;;  %206 = vst.msk [vmem:[#allocation3 + $0x30] sm:$0xff] %vm198_vm4, %v29009_v24  ;;  %208 = vst.msk [vmem:[#allocation3 + $0x40] sm:$0xff] %vm198_vm4, %v29009_v24  ;;  %v29010_v27 = vld [vmem:[#allocation29_spill] sm:$0xff]  ;;  %v22018_v50 = vld [vmem:[#allocation2 + $0x361] sm:$0xff] }
 0x2ec   :  { %19585 = vmatprep.mubr.msk.f32.mxu1 %vm36_vm1, %v29006_v61  ;;  %19816 = vmatprep.mubr.msk.f32.mxu0 %vm36_vm1, %v28988_v63  ;;  %207 = vst.msk [vmem:[#allocation3 + $0x38] sm:$0x3] %vm200_vm5, %v29009_v24  ;;  %209 = vst.msk [vmem:[#allocation3 + $0x48] sm:$0x3] %vm200_vm5, %v29009_v24  ;;  %v29011_v63 = vld [vmem:[#allocation31_spill] sm:$0xff]  ;;  %v22019_v61 = vld [vmem:[#allocation2 + $0x4d0] sm:$0xff] }
 0x2ed   :  { %210 = vst.msk [vmem:[#allocation3 + $0x50] sm:$0xff] %vm198_vm4, %v29009_v24  ;;  %212 = vst.msk [vmem:[#allocation3 + $0x60] sm:$0xff] %vm198_vm4, %v29009_v24 }
 0x2ee   :  { %211 = vst.msk [vmem:[#allocation3 + $0x58] sm:$0x3] %vm200_vm5, %v29009_v24  ;;  %213 = vst.msk [vmem:[#allocation3 + $0x68] sm:$0x3] %vm200_vm5, %v29009_v24 }
 0x2ef   :  { %19586 = vmatmul.mubr.msk.f32.gmra.mrb[32].mxu1 %vm36_vm1, %v29007_v35  ;;  %19817 = vmatmul.mubr.msk.f32.gmra.mrb[30].mxu0 %vm36_vm1, %v28989_v57  ;;  %214 = vst.msk [vmem:[#allocation3 + $0x70] sm:$0xff] %vm198_vm4, %v29009_v24  ;;  %216 = vst.msk [vmem:[#allocation3 + $0x80] sm:$0xff] %vm198_vm4, %v29009_v24  ;;  %v29012_v57 = vld [vmem:[#allocation33_spill] sm:$0xff] }
 0x2f0   :  { %19588 = vmatprep.mubr.msk.f32.mxu1 %vm36_vm1, %v29008_v25  ;;  %19819 = vmatprep.mubr.msk.f32.mxu0 %vm36_vm1, %v28990_v45  ;;  %215 = vst.msk [vmem:[#allocation3 + $0x78] sm:$0x3] %vm200_vm5, %v29009_v24  ;;  %217 = vst.msk [vmem:[#allocation3 + $0x88] sm:$0x3] %vm200_vm5, %v29009_v24  ;;  %v29013_v45 = vld [vmem:[#allocation35_spill] sm:$0xff]  ;;  %v22020_v35 = vld [vmem:[#allocation2 + $0x371] sm:$0xff] }
 0x2f1   :  { %218 = vst.msk [vmem:[#allocation3 + $0x90] sm:$0xff] %vm198_vm4, %v29009_v24  ;;  %222 = vst.msk [vmem:[#allocation3 + $0xb0] sm:$0xff] %vm198_vm4, %v29009_v24  ;;  %v22021_v25 = vld [vmem:[#allocation2 + $0x381] sm:$0xff] }
 0x2f2   :  { %219 = vst.msk [vmem:[#allocation3 + $0x98] sm:$0x3] %vm200_vm5, %v29009_v24  ;;  %223 = vst.msk [vmem:[#allocation3 + $0xb8] sm:$0x3] %vm200_vm5, %v29009_v24 }
 0x2f3   :  { %224 = vst.msk [vmem:[#allocation3 + $0xc0] sm:$0xff] %vm198_vm4, %v29009_v24  ;;  %226 = vst.msk [vmem:[#allocation3 + $0xd0] sm:$0xff] %vm198_vm4, %v29009_v24  ;;  %19589 = vmatmul.mubr.msk.f32.gmra.mrb[34].mxu1 %vm36_vm1, %v29010_v27  ;;  %19820 = vmatmul.mubr.msk.f32.gmra.mrb[32].mxu0 %vm36_vm1, %v28991_v30  ;;  %v29015_v30 = vld [vmem:[#allocation41_spill] sm:$0xff] }
 0x2f4   :  { %225 = vst.msk [vmem:[#allocation3 + $0xc8] sm:$0x3] %vm200_vm5, %v29009_v24  ;;  %227 = vst.msk [vmem:[#allocation3 + $0xd8] sm:$0x3] %vm200_vm5, %v29009_v24  ;;  %19591 = vmatprep.mubr.msk.f32.mxu1 %vm36_vm1, %v29011_v63  ;;  %19822 = vmatprep.mubr.msk.f32.mxu0 %vm36_vm1, %v28992_v23  ;;  %v29018_v23 = vld [vmem:[#allocation44_spill] sm:$0xff]  ;;  %v22037_v27 = vld [vmem:[#allocation2 + $0x2f2] sm:$0xff] }
 0x2f5   :  { %228 = vst.msk [vmem:[#allocation3 + $0xe0] sm:$0xff] %vm198_vm4, %v29009_v24  ;;  %230 = vst.msk [vmem:[#allocation3 + $0xf0] sm:$0xff] %vm198_vm4, %v29009_v24 }
 0x2f6   :  { %229 = vst.msk [vmem:[#allocation3 + $0xe8] sm:$0x3] %vm200_vm5, %v29009_v24  ;;  %231 = vst.msk [vmem:[#allocation3 + $0xf8] sm:$0x3] %vm200_vm5, %v29009_v24 }
 0x2f7   :  { %232 = vst.msk [vmem:[#allocation3 + $0x100] sm:$0xff] %vm198_vm4, %v29009_v24  ;;  %234 = vst.msk [vmem:[#allocation3 + $0x110] sm:$0xff] %vm198_vm4, %v29009_v24  ;;  %19592 = vmatmul.mubr.msk.f32.gmra.mrb[36].mxu1 %vm36_vm1, %v29012_v57  ;;  %19823 = vmatmul.mubr.msk.f32.gmra.mrb[34].mxu0 %vm36_vm1, %v28993_v58  ;;  %v29021_v58 = vld [vmem:[#allocation47_spill] sm:$0xff]  ;;  %v22040_v57 = vld [vmem:[#allocation2 + $0x352] sm:$0xff] }
 0x2f8   :  { %233 = vst.msk [vmem:[#allocation3 + $0x108] sm:$0x3] %vm200_vm5, %v29009_v24  ;;  %235 = vst.msk [vmem:[#allocation3 + $0x118] sm:$0x3] %vm200_vm5, %v29009_v24  ;;  %19594 = vmatprep.mubr.msk.f32.mxu1 %vm36_vm1, %v29013_v45  ;;  %19825 = vmatprep.mubr.msk.f32.mxu0 %vm36_vm1, %v28994_v12  ;;  %v22006_v12 = vld [vmem:[#allocation2 + $0x420] sm:$0xff] }
 0x2f9   :  { %236 = vst.msk [vmem:[#allocation3 + $0x120] sm:$0xff] %vm198_vm4, %v29009_v24  ;;  %238 = vst.msk [vmem:[#allocation3 + $0x130] sm:$0xff] %vm198_vm4, %v29009_v24 }
 0x2fa   :  { %237 = vst.msk [vmem:[#allocation3 + $0x128] sm:$0x3] %vm200_vm5, %v29009_v24  ;;  %239 = vst.msk [vmem:[#allocation3 + $0x138] sm:$0x3] %vm200_vm5, %v29009_v24 }
 0x2fb   :  { %242 = vst.msk [vmem:[#allocation3 + $0x150] sm:$0xff] %vm198_vm4, %v29009_v24  ;;  %244 = vst.msk [vmem:[#allocation3 + $0x160] sm:$0xff] %vm198_vm4, %v29009_v24  ;;  %19595 = vmatmul.mubr.msk.f32.gmra.mrb[38].mxu1 %vm36_vm1, %v29014_v10  ;;  %19826 = vmatmul.mubr.msk.f32.gmra.mrb[36].mxu0 %vm36_vm1, %v28995_v53  ;;  %v22007_v53 = vld [vmem:[#allocation2 + $0x430] sm:$0xff] }
 0x2fc   :  { %243 = vst.msk [vmem:[#allocation3 + $0x158] sm:$0x3] %vm200_vm5, %v29009_v24  ;;  %245 = vst.msk [vmem:[#allocation3 + $0x168] sm:$0x3] %vm200_vm5, %v29009_v24  ;;  %19599 = vmatprep.mubr.msk.f32.mxu1 %vm36_vm1, %v23726_v32  ;;  %19828 = vmatprep.mubr.msk.f32.mxu0 %vm36_vm1, %v28996_v60  ;;  %v21999_v32 = vld [vmem:[%s28649_s4 + $0x10] sm:$0xf] }
 0x2fd   :  { %246 = vst.msk [vmem:[#allocation3 + $0x170] sm:$0xff] %vm198_vm4, %v29009_v24  ;;  %248 = vst.msk [vmem:[#allocation3 + $0x180] sm:$0xff] %vm198_vm4, %v29009_v24  ;;  %v22008_v60 = vld [vmem:[#allocation2 + $0x470] sm:$0xff] }
 0x2fe   :  { %247 = vst.msk [vmem:[#allocation3 + $0x178] sm:$0x3] %vm200_vm5, %v29009_v24  ;;  %249 = vst.msk [vmem:[#allocation3 + $0x188] sm:$0x3] %vm200_vm5, %v29009_v24 }
 0x2ff   :  { %250 = vst.msk [vmem:[#allocation3 + $0x190] sm:$0xff] %vm198_vm4, %v29009_v24  ;;  %252 = vst.msk [vmem:[#allocation3 + $0x1a0] sm:$0xff] %vm198_vm4, %v29009_v24  ;;  %19600 = vmatmul.mubr.msk.f32.vlgmr.msra.gmra.mrb[24].mxu1 %vm36_vm1, %v23741_v2  ;;  %19829 = vmatmul.mubr.msk.f32.gmra.mrb[38].mxu0 %vm36_vm1, %v28997_v42  ;;  %v29016_v2 = vld [vmem:[#allocation42_spill] sm:$0xff] }
 0x300   :  { %251 = vst.msk [vmem:[#allocation3 + $0x198] sm:$0x3] %vm200_vm5, %v29009_v24  ;;  %253 = vst.msk [vmem:[#allocation3 + $0x1a8] sm:$0x3] %vm200_vm5, %v29009_v24  ;;  %19602 = vmatprep.mubr.msk.f32.mxu1 %vm36_vm1, %v28986_v1  ;;  %19833 = vmatprep.mubr.msk.f32.mxu0 %vm36_vm1, %v29015_v30  ;;  %v29017_v1 = vld [vmem:[#allocation43_spill] sm:$0xff]  ;;  %v22009_v42 = vld [vmem:[#allocation2 + $0x2f1] sm:$0xff] }
 0x301   :  { %254 = vst.msk [vmem:[#allocation3 + $0x1b0] sm:$0xff] %vm198_vm4, %v29009_v24  ;;  %256 = vst.msk [vmem:[#allocation3 + $0x1c0] sm:$0xff] %vm198_vm4, %v29009_v24  ;;  %19624 = vmatpush3.msk.msra.mxu1 %vm432_vm0, %v24280_v3 }
 0x302   :  { %255 = vst.msk [vmem:[#allocation3 + $0x1b8] sm:$0x3] %vm200_vm5, %v29009_v24  ;;  %257 = vst.msk [vmem:[#allocation3 + $0x1c8] sm:$0x3] %vm200_vm5, %v29009_v24  ;;  %19649 = vmatprep.subr.msk.mxu1 %vm432_vm0, %v21999_v32 }
 0x303   :  { %258 = vst.msk [vmem:[#allocation3 + $0x1d0] sm:$0xff] %vm198_vm4, %v29009_v24  ;;  %262 = vst.msk [vmem:[#allocation3 + $0x1f0] sm:$0xff] %vm198_vm4, %v29009_v24  ;;  %19603 = vmatmul.mubr.msk.f32.gmra.mrb[26].mxu1 %vm36_vm1, %v23761_v38  ;;  %19834 = vmatmul.mubr.msk.f32.vlgmr.msra.gmra.mrb[24].mxu0 %vm36_vm1, %v29016_v2  ;;  %v29019_v38 = vld [vmem:[#allocation45_spill] sm:$0xff] }
 0x304   :  { %259 = vst.msk [vmem:[#allocation3 + $0x1d8] sm:$0x3] %vm200_vm5, %v29009_v24  ;;  %263 = vst.msk [vmem:[#allocation3 + $0x1f8] sm:$0x3] %vm200_vm5, %v29009_v24  ;;  %19858 = vmatpush3.msk.msra.mxu0 %vm432_vm0, %v24280_v3  ;;  %19605 = vmatprep.mubr.msk.f32.mxu1 %vm36_vm1, %v23767_v13  ;;  %v29020_v13 = vld [vmem:[#allocation46_spill] sm:$0xff] }
 0x305   :  { %264 = vst.msk [vmem:[#allocation3 + $0x200] sm:$0xff] %vm198_vm4, %v29009_v24  ;;  %266 = vst.msk [vmem:[#allocation3 + $0x210] sm:$0xff] %vm198_vm4, %v29009_v24  ;;  %19836 = vmatprep.mubr.msk.f32.mxu0 %vm36_vm1, %v29017_v1  ;;  %19883 = vmatprep.subr.msk.mxu0 %vm432_vm0, %v21999_v32  ;;  %v22012_v3 = vld [vmem:[#allocation2 + $0x331] sm:$0xff] }
 0x306   :  { %265 = vst.msk [vmem:[#allocation3 + $0x208] sm:$0x3] %vm200_vm5, %v29009_v24  ;;  %267 = vst.msk [vmem:[#allocation3 + $0x218] sm:$0x3] %vm200_vm5, %v29009_v24 }
 0x307   :  { %268 = vst.msk [vmem:[#allocation3 + $0x220] sm:$0xff] %vm198_vm4, %v29009_v24  ;;  %270 = vst.msk [vmem:[#allocation3 + $0x230] sm:$0xff] %vm198_vm4, %v29009_v24  ;;  %19606 = vmatmul.mubr.msk.f32.gmra.mrb[28].mxu1 %vm36_vm1, %v23773_v17  ;;  %19837 = vmatmul.mubr.msk.f32.gmra.mrb[26].mxu0 %vm36_vm1, %v29018_v23  ;;  %v29022_v17 = vld [vmem:[#allocation48_spill] sm:$0xff] }
 0x308   :  { %269 = vst.msk [vmem:[#allocation3 + $0x228] sm:$0x3] %vm200_vm5, %v29009_v24  ;;  %271 = vst.msk [vmem:[#allocation3 + $0x238] sm:$0x3] %vm200_vm5, %v29009_v24  ;;  %19608 = vmatprep.mubr.msk.f32.mxu1 %vm36_vm1, %v23779_v36  ;;  %19839 = vmatprep.mubr.msk.f32.mxu0 %vm36_vm1, %v29019_v38  ;;  %v29023_v36 = vld [vmem:[#allocation49_spill] sm:$0xff]  ;;  %v22041_v23 = vld [vmem:[#allocation2 + $0x362] sm:$0xff] }
 0x309   :  { %272 = vst.msk [vmem:[#allocation3 + $0x240] sm:$0xff] %vm198_vm4, %v29009_v24  ;;  %274 = vst.msk [vmem:[#allocation3 + $0x250] sm:$0xff] %vm198_vm4, %v29009_v24 }
 0x30a   :  { %273 = vst.msk [vmem:[#allocation3 + $0x248] sm:$0x3] %vm200_vm5, %v29009_v24  ;;  %275 = vst.msk [vmem:[#allocation3 + $0x258] sm:$0x3] %vm200_vm5, %v29009_v24 }
 0x30b   :  { %276 = vst.msk [vmem:[#allocation3 + $0x260] sm:$0xff] %vm198_vm4, %v29009_v24  ;;  %278 = vst.msk [vmem:[#allocation3 + $0x270] sm:$0xff] %vm198_vm4, %v29009_v24  ;;  %19609 = vmatmul.mubr.msk.f32.gmra.mrb[30].mxu1 %vm36_vm1, %v23785_v54  ;;  %19840 = vmatmul.mubr.msk.f32.gmra.mrb[28].mxu0 %vm36_vm1, %v29020_v13  ;;  %v29024_v54 = vld [vmem:[#allocation50_spill] sm:$0xff] }
 0x30c   :  { %277 = vst.msk [vmem:[#allocation3 + $0x268] sm:$0x3] %vm200_vm5, %v29009_v24  ;;  %279 = vst.msk [vmem:[#allocation3 + $0x278] sm:$0x3] %vm200_vm5, %v29009_v24  ;;  %19611 = vmatprep.mubr.msk.f32.mxu1 %vm36_vm1, %v23791_v31  ;;  %19842 = vmatprep.mubr.msk.f32.mxu0 %vm36_vm1, %v29021_v58  ;;  %v29025_v31 = vld [vmem:[#allocation51_spill] sm:$0xff]  ;;  %v22042_v58 = vld [vmem:[#allocation2 + $0x372] sm:$0xff] }
 0x30d   :  { %280 = vst.msk [vmem:[#allocation3 + $0x280] sm:$0xff] %vm198_vm4, %v29009_v24  ;;  %282 = vst.msk [vmem:[#allocation3 + $0x290] sm:$0xff] %vm198_vm4, %v29009_v24 }
 0x30e   :  { %281 = vst.msk [vmem:[#allocation3 + $0x288] sm:$0x3] %vm200_vm5, %v29009_v24  ;;  %283 = vst.msk [vmem:[#allocation3 + $0x298] sm:$0x3] %vm200_vm5, %v29009_v24 }
 0x30f   :  { %284 = vst.msk [vmem:[#allocation3 + $0x2a0] sm:$0xff] %vm198_vm4, %v29009_v24  ;;  %286 = vst.msk [vmem:[#allocation3 + $0x2b0] sm:$0xff] %vm198_vm4, %v29009_v24  ;;  %19612 = vmatmul.mubr.msk.f32.gmra.mrb[32].mxu1 %vm36_vm1, %v23797_v55  ;;  %19843 = vmatmul.mubr.msk.f32.gmra.mrb[30].mxu0 %vm36_vm1, %v29022_v17  ;;  %v29026_v55 = vld [vmem:[#allocation52_spill] sm:$0xff] }
 0x310   :  { %285 = vst.msk [vmem:[#allocation3 + $0x2a8] sm:$0x3] %vm200_vm5, %v29009_v24  ;;  %287 = vst.msk [vmem:[#allocation3 + $0x2b8] sm:$0x3] %vm200_vm5, %v29009_v24  ;;  %19614 = vmatprep.mubr.msk.f32.mxu1 %vm36_vm1, %v23803_v0  ;;  %19845 = vmatprep.mubr.msk.f32.mxu0 %vm36_vm1, %v29023_v36  ;;  %v29027_v0 = vld [vmem:[#allocation53_spill] sm:$0xff] }
 0x311   :  { %288 = vst.msk [vmem:[#allocation3 + $0x2c0] sm:$0xff] %vm198_vm4, %v29009_v24  ;;  %290 = vst.msk [vmem:[#allocation3 + $0x2d0] sm:$0xff] %vm198_vm4, %v29009_v24 }
 0x312   :  { %289 = vst.msk [vmem:[#allocation3 + $0x2c8] sm:$0x3] %vm200_vm5, %v29009_v24  ;;  %291 = vst.msk [vmem:[#allocation3 + $0x2d8] sm:$0x3] %vm200_vm5, %v29009_v24 }
 0x313   :  { %292 = vst.msk [vmem:[#allocation3 + $0x2e0] sm:$0xff] %vm198_vm4, %v29009_v24  ;;  %294 = vst.msk [vmem:[#allocation3 + $0x2f0] sm:$0xff] %vm198_vm4, %v29009_v24  ;;  %19615 = vmatmul.mubr.msk.f32.gmra.mrb[34].mxu1 %vm36_vm1, %v23809_v9  ;;  %19846 = vmatmul.mubr.msk.f32.gmra.mrb[32].mxu0 %vm36_vm1, %v29024_v54  ;;  %v29028_v9 = vld [vmem:[#allocation54_spill] sm:$0xff] }
 0x314   :  { %293 = vst.msk [vmem:[#allocation3 + $0x2e8] sm:$0x3] %vm200_vm5, %v29009_v24  ;;  %295 = vst.msk [vmem:[#allocation3 + $0x2f8] sm:$0x3] %vm200_vm5, %v29009_v24  ;;  %19617 = vmatprep.mubr.msk.f32.mxu1 %vm36_vm1, %v23815_v14  ;;  %19848 = vmatprep.mubr.msk.f32.mxu0 %vm36_vm1, %v29025_v31  ;;  %v22000_v14 = vld [vmem:[#allocation2 + $0x3d0] sm:$0xff] }
 0x315   :  { %296 = vst.msk [vmem:[#allocation3 + $0x300] sm:$0xff] %vm198_vm4, %v29009_v24  ;;  %300 = vst.msk [vmem:[#allocation3 + $0x320] sm:$0xff] %vm198_vm4, %v29009_v24 }
 0x316   :  { %297 = vst.msk [vmem:[#allocation3 + $0x308] sm:$0x3] %vm200_vm5, %v29009_v24  ;;  %301 = vst.msk [vmem:[#allocation3 + $0x328] sm:$0x3] %vm200_vm5, %v29009_v24 }
 0x317   :  { %302 = vst.msk [vmem:[#allocation3 + $0x330] sm:$0xff] %vm198_vm4, %v29009_v24  ;;  %304 = vst.msk [vmem:[#allocation3 + $0x340] sm:$0xff] %vm198_vm4, %v29009_v24  ;;  %19618 = vmatmul.mubr.msk.f32.gmra.mrb[36].mxu1 %vm36_vm1, %v23821_v52  ;;  %19849 = vmatmul.mubr.msk.f32.gmra.mrb[34].mxu0 %vm36_vm1, %v29026_v55  ;;  %v22001_v52 = vld [vmem:[#allocation2 + $0x3e0] sm:$0xff] }
 0x318   :  { %303 = vst.msk [vmem:[#allocation3 + $0x338] sm:$0x3] %vm200_vm5, %v29009_v24  ;;  %305 = vst.msk [vmem:[#allocation3 + $0x348] sm:$0x3] %vm200_vm5, %v29009_v24  ;;  %19620 = vmatprep.mubr.msk.f32.mxu1 %vm36_vm1, %v23827_v51  ;;  %19851 = vmatprep.mubr.msk.f32.mxu0 %vm36_vm1, %v29027_v0  ;;  %v22002_v51 = vld [vmem:[#allocation2 + $0x3f0] sm:$0xff] }
 0x319   :  { %306 = vst.msk [vmem:[#allocation3 + $0x350] sm:$0xff] %vm198_vm4, %v29009_v24  ;;  %308 = vst.msk [vmem:[#allocation3 + $0x360] sm:$0xff] %vm198_vm4, %v29009_v24 }
 0x31a   :  { %307 = vst.msk [vmem:[#allocation3 + $0x358] sm:$0x3] %vm200_vm5, %v29009_v24  ;;  %309 = vst.msk [vmem:[#allocation3 + $0x368] sm:$0x3] %vm200_vm5, %v29009_v24 }
 0x31b   :  { %310 = vst.msk [vmem:[#allocation3 + $0x370] sm:$0xff] %vm198_vm4, %v29009_v24  ;;  %312 = vst.msk [vmem:[#allocation3 + $0x380] sm:$0xff] %vm198_vm4, %v29009_v24  ;;  %19621 = vmatmul.mubr.msk.f32.gmra.mrb[38].mxu1 %vm36_vm1, %v23833_v11  ;;  %19852 = vmatmul.mubr.msk.f32.gmra.mrb[36].mxu0 %vm36_vm1, %v29028_v9  ;;  %v22003_v11 = vld [vmem:[%s28649_s4 + $0x14] sm:$0xf] }
 0x31c   :  { %311 = vst.msk [vmem:[#allocation3 + $0x378] sm:$0x3] %vm200_vm5, %v29009_v24  ;;  %313 = vst.msk [vmem:[#allocation3 + $0x388] sm:$0x3] %vm200_vm5, %v29009_v24  ;;  %19625 = vmatprep.mubr.msk.f32.mxu1 %vm36_vm1, %v22000_v14  ;;  %19854 = vmatprep.mubr.msk.f32.mxu0 %vm36_vm1, %v23932_v39  ;;  %v22004_v39 = vld [vmem:[#allocation2 + $0x400] sm:$0xff] }
 0x31d   :  { %314 = vst.msk [vmem:[#allocation3 + $0x390] sm:$0xff] %vm198_vm4, %v29009_v24  ;;  %316 = vst.msk [vmem:[#allocation3 + $0x3a0] sm:$0xff] %vm198_vm4, %v29009_v24 }
 0x31e   :  { %315 = vst.msk [vmem:[#allocation3 + $0x398] sm:$0x3] %vm200_vm5, %v29009_v24  ;;  %317 = vst.msk [vmem:[#allocation3 + $0x3a8] sm:$0x3] %vm200_vm5, %v29009_v24 }
 0x31f   :  { %320 = vst.msk [vmem:[#allocation3 + $0x3c0] sm:$0xff] %vm198_vm4, %v29009_v24  ;;  %322 = vst.msk [vmem:[#allocation3 + $0x3d0] sm:$0xff] %vm198_vm4, %v29009_v24  ;;  %19626 = vmatmul.mubr.msk.f32.vlgmr.msra.gmra.mrb[24].mxu1 %vm36_vm1, %v22001_v52  ;;  %19855 = vmatmul.mubr.msk.f32.gmra.mrb[38].mxu0 %vm36_vm1, %v23938_v21  ;;  %v22005_v21 = vld [vmem:[#allocation2 + $0x410] sm:$0xff]  ;;  %v22043_v52 = vld [vmem:[#allocation2 + $0x382] sm:$0xff] }
 0x320   :  { %321 = vst.msk [vmem:[#allocation3 + $0x3c8] sm:$0x3] %vm200_vm5, %v29009_v24  ;;  %323 = vst.msk [vmem:[#allocation3 + $0x3d8] sm:$0x3] %vm200_vm5, %v29009_v24  ;;  %19628 = vmatprep.mubr.msk.f32.mxu1 %vm36_vm1, %v22002_v51  ;;  %19859 = vmatprep.mubr.msk.f32.mxu0 %vm36_vm1, %v23944_v26  ;;  %v5772_v51 = vld [vmem:[#allocation2 + $0x160] sm:$0xff] }
 0x321   :  { %324 = vst.msk [vmem:[#allocation3 + $0x3e0] sm:$0xff] %vm198_vm4, %v29009_v24  ;;  %326 = vst.msk [vmem:[#allocation3 + $0x3f0] sm:$0xff] %vm198_vm4, %v29009_v24  ;;  %19650 = vmatpush3.msk.msra.mxu1 %vm432_vm0, %v21999_v32 }
 0x322   :  { %325 = vst.msk [vmem:[#allocation3 + $0x3e8] sm:$0x3] %vm200_vm5, %v29009_v24  ;;  %327 = vst.msk [vmem:[#allocation3 + $0x3f8] sm:$0x3] %vm200_vm5, %v29009_v24  ;;  %19675 = vmatprep.subr.msk.mxu1 %vm432_vm0, %v22003_v11 }
 0x323   :  { %328 = vst.msk [vmem:[#allocation3 + $0x400] sm:$0xff] %vm198_vm4, %v29009_v24  ;;  %330 = vst.msk [vmem:[#allocation3 + $0x410] sm:$0xff] %vm198_vm4, %v29009_v24  ;;  %19629 = vmatmul.mubr.msk.f32.gmra.mrb[26].mxu1 %vm36_vm1, %v22004_v39  ;;  %19860 = vmatmul.mubr.msk.f32.vlgmr.msra.gmra.mrb[24].mxu0 %vm36_vm1, %v23954_v22 }
 0x324   :  { %329 = vst.msk [vmem:[#allocation3 + $0x408] sm:$0x3] %vm200_vm5, %v29009_v24  ;;  %331 = vst.msk [vmem:[#allocation3 + $0x418] sm:$0x3] %vm200_vm5, %v29009_v24  ;;  %19884 = vmatpush3.msk.msra.mxu0 %vm432_vm0, %v21999_v32  ;;  %19631 = vmatprep.mubr.msk.f32.mxu1 %vm36_vm1, %v22005_v21  ;;  %v22044_v21 = vld [vmem:[#allocation2 + $0x392] sm:$0xff] }
 0x325   :  { %332 = vst.msk [vmem:[#allocation3 + $0x420] sm:$0xff] %vm198_vm4, %v29009_v24  ;;  %334 = vst.msk [vmem:[#allocation3 + $0x430] sm:$0xff] %vm198_vm4, %v29009_v24  ;;  %19862 = vmatprep.mubr.msk.f32.mxu0 %vm36_vm1, %v23964_v34  ;;  %19909 = vmatprep.subr.msk.mxu0 %vm432_vm0, %v22003_v11 }
 0x326   :  { %333 = vst.msk [vmem:[#allocation3 + $0x428] sm:$0x3] %vm200_vm5, %v29009_v24  ;;  %335 = vst.msk [vmem:[#allocation3 + $0x438] sm:$0x3] %vm200_vm5, %v29009_v24 }
 0x327   :  { %336 = vst.msk [vmem:[#allocation3 + $0x440] sm:$0xff] %vm198_vm4, %v29009_v24  ;;  %340 = vst.msk [vmem:[#allocation3 + $0x460] sm:$0xff] %vm198_vm4, %v29009_v24  ;;  %19632 = vmatmul.mubr.msk.f32.gmra.mrb[28].mxu1 %vm36_vm1, %v22006_v12  ;;  %19863 = vmatmul.mubr.msk.f32.gmra.mrb[26].mxu0 %vm36_vm1, %v23969_v44 }
 0x328   :  { %337 = vst.msk [vmem:[#allocation3 + $0x448] sm:$0x3] %vm200_vm5, %v29009_v24  ;;  %341 = vst.msk [vmem:[#allocation3 + $0x468] sm:$0x3] %vm200_vm5, %v29009_v24  ;;  %19634 = vmatprep.mubr.msk.f32.mxu1 %vm36_vm1, %v22007_v53  ;;  %19865 = vmatprep.mubr.msk.f32.mxu0 %vm36_vm1, %v24049_v8 }
 0x329   :  { %342 = vst.msk [vmem:[#allocation3 + $0x470] sm:$0xff] %vm198_vm4, %v29009_v24  ;;  %344 = vst.msk [vmem:[#allocation3 + $0x480] sm:$0xff] %vm198_vm4, %v29009_v24 }
 0x32a   :  { %343 = vst.msk [vmem:[#allocation3 + $0x478] sm:$0x3] %vm200_vm5, %v29009_v24  ;;  %345 = vst.msk [vmem:[#allocation3 + $0x488] sm:$0x3] %vm200_vm5, %v29009_v24 }
 0x32b   :  { %346 = vst.msk [vmem:[#allocation3 + $0x490] sm:$0xff] %vm198_vm4, %v29009_v24  ;;  %348 = vst.msk [vmem:[#allocation3 + $0x4a0] sm:$0xff] %vm198_vm4, %v29009_v24  ;;  %19635 = vmatmul.mubr.msk.f32.gmra.mrb[30].mxu1 %vm36_vm1, %v23979_v33  ;;  %19866 = vmatmul.mubr.msk.f32.gmra.mrb[28].mxu0 %vm36_vm1, %v24060_v62  ;;  %v22013_v33 = vld [vmem:[#allocation2 + $0x4a0] sm:$0xff] }
 0x32c   :  { %347 = vst.msk [vmem:[#allocation3 + $0x498] sm:$0x3] %vm200_vm5, %v29009_v24  ;;  %349 = vst.msk [vmem:[#allocation3 + $0x4a8] sm:$0x3] %vm200_vm5, %v29009_v24  ;;  %19637 = vmatprep.mubr.msk.f32.mxu1 %vm36_vm1, %v22008_v60  ;;  %19868 = vmatprep.mubr.msk.f32.mxu0 %vm36_vm1, %v22009_v42 }
 0x32d   :  { %350 = vst.msk [vmem:[#allocation3 + $0x4b0] sm:$0xff] %vm198_vm4, %v29009_v24  ;;  %352 = vst.msk [vmem:[#allocation3 + $0x4c0] sm:$0xff] %vm198_vm4, %v29009_v24 }
 0x32e   :  { %351 = vst.msk [vmem:[#allocation3 + $0x4b8] sm:$0x3] %vm200_vm5, %v29009_v24  ;;  %353 = vst.msk [vmem:[#allocation3 + $0x4c8] sm:$0x3] %vm200_vm5, %v29009_v24 }
 0x32f   :  { %354 = vst.msk [vmem:[#allocation3 + $0x4d0] sm:$0xff] %vm198_vm4, %v29009_v24  ;;  %356 = vst.msk [vmem:[#allocation3 + $0x4e0] sm:$0xff] %vm198_vm4, %v29009_v24  ;;  %19638 = vmatmul.mubr.msk.f32.gmra.mrb[32].mxu1 %vm36_vm1, %v22010_v41  ;;  %19869 = vmatmul.mubr.msk.f32.gmra.mrb[30].mxu0 %vm36_vm1, %v23989_v49 }
 0x330   :  { %355 = vst.msk [vmem:[#allocation3 + $0x4d8] sm:$0x3] %vm200_vm5, %v29009_v24  ;;  %357 = vst.msk [vmem:[#allocation3 + $0x4e8] sm:$0x3] %vm200_vm5, %v29009_v24  ;;  %19640 = vmatprep.mubr.msk.f32.mxu1 %vm36_vm1, %v22011_v15  ;;  %19871 = vmatprep.mubr.msk.f32.mxu0 %vm36_vm1, %v22012_v3  ;;  %v22022_v24 = vld [vmem:[#allocation2 + $0x391] sm:$0xff] }
 0x331   :  { %v5773_v15 = vld [vmem:[#allocation2 + $0x170] sm:$0xff] }
 0x333   :  { %19641 = vmatmul.mubr.msk.f32.gmra.mrb[34].mxu1 %vm36_vm1, %v22013_v33  ;;  %19872 = vmatmul.mubr.msk.f32.gmra.mrb[32].mxu0 %vm36_vm1, %v22014_v56 }
 0x334   :  { %19643 = vmatprep.mubr.msk.f32.mxu1 %vm36_vm1, %v22015_v19  ;;  %19874 = vmatprep.mubr.msk.f32.mxu0 %vm36_vm1, %v22016_v4 }
 0x337   :  { %19644 = vmatmul.mubr.msk.f32.gmra.mrb[36].mxu1 %vm36_vm1, %v22017_v18  ;;  %19875 = vmatmul.mubr.msk.f32.gmra.mrb[34].mxu0 %vm36_vm1, %v22018_v50  ;;  %v24915_v18 = vld [vmem:[#allocation2 + $0x21] sm:$0xff] }
 0x338   :  { %19646 = vmatprep.mubr.msk.f32.mxu1 %vm36_vm1, %v22019_v61  ;;  %19877 = vmatprep.mubr.msk.f32.mxu0 %vm36_vm1, %v22020_v35 }
 0x33b   :  { %19647 = vmatmul.mubr.msk.f32.gmra.mrb[38].mxu1 %vm36_vm1, %v24015_v7  ;;  %19878 = vmatmul.mubr.msk.f32.gmra.mrb[36].mxu0 %vm36_vm1, %v22021_v25  ;;  %v22028_v7 = vld [vmem:[#allocation2 + $0x4c1] sm:$0xff] }
 0x33c   :  { %19651 = vmatprep.mubr.msk.f32.mxu1 %vm36_vm1, %v23944_v26  ;;  %19880 = vmatprep.mubr.msk.f32.mxu0 %vm36_vm1, %v22022_v24  ;;  %v22023_v26 = vld [vmem:[%s28649_s4 + $0x18] sm:$0xf] }
 0x33f   :  { %19652 = vmatmul.mubr.msk.f32.vlgmr.msra.gmra.mrb[24].mxu1 %vm36_vm1, %v23954_v22  ;;  %19881 = vmatmul.mubr.msk.f32.gmra.mrb[38].mxu0 %vm36_vm1, %v24025_v28  ;;  %v22024_v22 = vld [vmem:[#allocation2 + $0x481] sm:$0xff] }
 0x340   :  { %19654 = vmatprep.mubr.msk.f32.mxu1 %vm36_vm1, %v23964_v34  ;;  %19885 = vmatprep.mubr.msk.f32.mxu0 %vm36_vm1, %v24031_v48  ;;  %v22025_v34 = vld [vmem:[#allocation2 + $0x491] sm:$0xff] }
 0x341   :  { %19676 = vmatpush3.msk.msra.mxu1 %vm432_vm0, %v22003_v11 }
 0x342   :  { %19701 = vmatprep.subr.msk.mxu1 %vm432_vm0, %v22023_v26 }
 0x343   :  { %19655 = vmatmul.mubr.msk.f32.gmra.mrb[26].mxu1 %vm36_vm1, %v23969_v44  ;;  %19886 = vmatmul.mubr.msk.f32.vlgmr.msra.gmra.mrb[24].mxu0 %vm36_vm1, %v24038_v46  ;;  %v22026_v44 = vld [vmem:[#allocation2 + $0x4a1] sm:$0xff] }
 0x344   :  { %19910 = vmatpush3.msk.msra.mxu0 %vm432_vm0, %v22003_v11  ;;  %19657 = vmatprep.mubr.msk.f32.mxu1 %vm36_vm1, %v24049_v8  ;;  %v22029_v8 = vld [vmem:[#allocation2 + $0x4d1] sm:$0xff] }
 0x345   :  { %19888 = vmatprep.mubr.msk.f32.mxu0 %vm36_vm1, %v24053_v29  ;;  %19935 = vmatprep.subr.msk.mxu0 %vm432_vm0, %v22023_v26 }
 0x347   :  { %19658 = vmatmul.mubr.msk.f32.gmra.mrb[28].mxu1 %vm36_vm1, %v24060_v62  ;;  %19889 = vmatmul.mubr.msk.f32.gmra.mrb[26].mxu0 %vm36_vm1, %v24058_v40  ;;  %v22030_v62 = vld [vmem:[#allocation2 + $0x292] sm:$0xff] }
 0x348   :  { %19660 = vmatprep.mubr.msk.f32.mxu1 %vm36_vm1, %v22009_v42  ;;  %19891 = vmatprep.mubr.msk.f32.mxu0 %vm36_vm1, %v24066_v5 }
 0x34b   :  { %19661 = vmatmul.mubr.msk.f32.gmra.mrb[30].mxu1 %vm36_vm1, %v23989_v49  ;;  %19892 = vmatmul.mubr.msk.f32.gmra.mrb[28].mxu0 %vm36_vm1, %v24072_v20  ;;  %v22027_v49 = vld [vmem:[#allocation2 + $0x4b1] sm:$0xff] }
 0x34c   :  { %19663 = vmatprep.mubr.msk.f32.mxu1 %vm36_vm1, %v22012_v3  ;;  %19894 = vmatprep.mubr.msk.f32.mxu0 %vm36_vm1, %v24078_v6 }
 0x34f   :  { %19664 = vmatmul.mubr.msk.f32.gmra.mrb[32].mxu1 %vm36_vm1, %v22014_v56  ;;  %19895 = vmatmul.mubr.msk.f32.gmra.mrb[30].mxu0 %vm36_vm1, %v24084_v43 }
 0x350   :  { %19666 = vmatprep.mubr.msk.f32.mxu1 %vm36_vm1, %v22016_v4  ;;  %19897 = vmatprep.mubr.msk.f32.mxu0 %vm36_vm1, %v24155_v16  ;;  %v5774_v4 = vld [vmem:[#allocation2 + $0x180] sm:$0xff] }
 0x353   :  { %19667 = vmatmul.mubr.msk.f32.gmra.mrb[34].mxu1 %vm36_vm1, %v22018_v50  ;;  %19898 = vmatmul.mubr.msk.f32.gmra.mrb[32].mxu0 %vm36_vm1, %v22024_v22 }
 0x354   :  { %19669 = vmatprep.mubr.msk.f32.mxu1 %vm36_vm1, %v22020_v35  ;;  %19900 = vmatprep.mubr.msk.f32.mxu0 %vm36_vm1, %v22025_v34 }
 0x357   :  { %19670 = vmatmul.mubr.msk.f32.gmra.mrb[36].mxu1 %vm36_vm1, %v22021_v25  ;;  %19901 = vmatmul.mubr.msk.f32.gmra.mrb[34].mxu0 %vm36_vm1, %v22026_v44 }
 0x358   :  { %19672 = vmatprep.mubr.msk.f32.mxu1 %vm36_vm1, %v22022_v24  ;;  %19903 = vmatprep.mubr.msk.f32.mxu0 %vm36_vm1, %v22027_v49 }
 0x35b   :  { %19673 = vmatmul.mubr.msk.f32.gmra.mrb[38].mxu1 %vm36_vm1, %v24025_v28  ;;  %19904 = vmatmul.mubr.msk.f32.gmra.mrb[36].mxu0 %vm36_vm1, %v22028_v7  ;;  %v24821_v28 = vld [vmem:[%s28649_s4 + $0x1c] sm:$0xf] }
 0x35c   :  { %19677 = vmatprep.mubr.msk.f32.mxu1 %vm36_vm1, %v24031_v48  ;;  %19906 = vmatprep.mubr.msk.f32.mxu0 %vm36_vm1, %v22029_v8  ;;  %v22032_v48 = vld [vmem:[#allocation2 + $0x2a2] sm:$0xff] }
 0x35f   :  { %19678 = vmatmul.mubr.msk.f32.vlgmr.msra.gmra.mrb[24].mxu1 %vm36_vm1, %v24038_v46  ;;  %19907 = vmatmul.mubr.msk.f32.gmra.mrb[38].mxu0 %vm36_vm1, %v24118_v37  ;;  %v22033_v46 = vld [vmem:[#allocation2 + $0x2b2] sm:$0xff] }
 0x360   :  { %19680 = vmatprep.mubr.msk.f32.mxu1 %vm36_vm1, %v24053_v29  ;;  %19911 = vmatprep.mubr.msk.f32.mxu0 %vm36_vm1, %v22030_v62  ;;  %v22034_v29 = vld [vmem:[#allocation2 + $0x2c2] sm:$0xff] }
 0x361   :  { %19702 = vmatpush3.msk.msra.mxu1 %vm432_vm0, %v22023_v26 }
 0x362   :  { %19727 = vmatprep.subr.msk.mxu1 %vm432_vm0, %v24821_v28 }
 0x363   :  { %19681 = vmatmul.mubr.msk.f32.gmra.mrb[26].mxu1 %vm36_vm1, %v24058_v40  ;;  %19912 = vmatmul.mubr.msk.f32.vlgmr.msra.gmra.mrb[24].mxu0 %vm36_vm1, %v22032_v48  ;;  %v22035_v40 = vld [vmem:[#allocation2 + $0x2d2] sm:$0xff] }
 0x364   :  { %19936 = vmatpush3.msk.msra.mxu0 %vm432_vm0, %v22023_v26  ;;  %19683 = vmatprep.mubr.msk.f32.mxu1 %vm36_vm1, %v24066_v5  ;;  %v22036_v5 = vld [vmem:[#allocation2 + $0x2e2] sm:$0xff] }
 0x365   :  { %19914 = vmatprep.mubr.msk.f32.mxu0 %vm36_vm1, %v22033_v46  ;;  %19961 = vmatprep.subr.msk.mxu0 %vm432_vm0, %v24821_v28  ;;  %v5776_v46 = vld [vmem:[#allocation2 + $0x1a0] sm:$0xff] }
 0x367   :  { %19684 = vmatmul.mubr.msk.f32.gmra.mrb[28].mxu1 %vm36_vm1, %v24072_v20  ;;  %19915 = vmatmul.mubr.msk.f32.gmra.mrb[26].mxu0 %vm36_vm1, %v22034_v29  ;;  %v22038_v20 = vld [vmem:[#allocation2 + $0x332] sm:$0xff] }
 0x368   :  { %19686 = vmatprep.mubr.msk.f32.mxu1 %vm36_vm1, %v24078_v6  ;;  %19917 = vmatprep.mubr.msk.f32.mxu0 %vm36_vm1, %v22035_v40 }
 0x36b   :  { %19687 = vmatmul.mubr.msk.f32.gmra.mrb[30].mxu1 %vm36_vm1, %v24084_v43  ;;  %19918 = vmatmul.mubr.msk.f32.gmra.mrb[28].mxu0 %vm36_vm1, %v22036_v5  ;;  %v24957_v5 = vld [vmem:[#allocation2 + $0x41] sm:$0xff] }
 0x36c   :  { %19689 = vmatprep.mubr.msk.f32.mxu1 %vm36_vm1, %v24155_v16  ;;  %19920 = vmatprep.mubr.msk.f32.mxu0 %vm36_vm1, %v22037_v27  ;;  %v22039_v16 = vld [vmem:[#allocation2 + $0x342] sm:$0xff] }
 0x36f   :  { %19690 = vmatmul.mubr.msk.f32.gmra.mrb[32].mxu1 %vm36_vm1, %v22024_v22  ;;  %19921 = vmatmul.mubr.msk.f32.gmra.mrb[30].mxu0 %vm36_vm1, %v24161_v59 }
 0x370   :  { %19692 = vmatprep.mubr.msk.f32.mxu1 %vm36_vm1, %v22025_v34  ;;  %19923 = vmatprep.mubr.msk.f32.mxu0 %vm36_vm1, %v22038_v20  ;;  %v5775_v34 = vld [vmem:[#allocation2 + $0x190] sm:$0xff] }
 0x372   :  { %v24851_v6 = vpop.f32.mrb[8].mxu1 }
 0x373   :  { %v7930_v43 = vsel %vm198_vm4, %v24851_v6, 0.0  ;;  %v24855_v63 = vpop.f32.mrb[9].mxu1  ;;  %19693 = vmatmul.mubr.msk.f32.gmra.mrb[34].mxu1 %vm36_vm1, %v22026_v44  ;;  %19924 = vmatmul.mubr.msk.f32.gmra.mrb[32].mxu0 %vm36_vm1, %v22039_v16  ;;  %v24934_v44 = vld [vmem:[#allocation2 + $0x31] sm:$0xff] }
 0x374   :  { %v7929_v59 = vsel %vm198_vm4, %v24855_v63, 0.0  ;;  %19695 = vmatprep.mubr.msk.f32.mxu1 %vm36_vm1, %v22027_v49  ;;  %19926 = vmatprep.mubr.msk.f32.mxu0 %vm36_vm1, %v22040_v57  ;;  %v24939_v49 = vld [vmem:[%s28649_s4 + $0x20] sm:$0xf]  ;;  %v5777_v57 = vld [vmem:[#allocation2 + $0x1b0] sm:$0xff] }
 0x375   :  { %v7931_v45 = vadd.f32 %v7930_v43, %v7929_v59 }
 0x376   :  { %v24863_v10 = vpop.f32.mrb[10].mxu1  ;;  %v24865_v30 = vpop.f32.mrb[8].mxu0 }
 0x377   :  { %29029 = vst [vmem:[#allocation7_spill] sm:$0xff] %v24865_v30  ;;  %v7968_v32 = vsel %vm198_vm4, %v24865_v30, 0.0  ;;  %v24869_v2 = vpop.f32.mrb[11].mxu1  ;;  %v24871_v1 = vpop.f32.mrb[9].mxu0  ;;  %19696 = vmatmul.mubr.msk.f32.gmra.mrb[36].mxu1 %vm36_vm1, %v22028_v7  ;;  %19927 = vmatmul.mubr.msk.f32.gmra.mrb[34].mxu0 %vm36_vm1, %v22041_v23  ;;  %v7934_v54 = vsel %vm198_vm4, %v24863_v10, 0.0 }
 0x378   :  { %29030 = vst [vmem:[#allocation9_spill] sm:$0xff] %v24871_v1  ;;  %v7932_v38 = vsel %vm198_vm4, %v24869_v2, 0.0  ;;  %v7967_v13 = vsel %vm198_vm4, %v24871_v1, 0.0  ;;  %19698 = vmatprep.mubr.msk.f32.mxu1 %vm36_vm1, %v22029_v8  ;;  %19929 = vmatprep.mubr.msk.f32.mxu0 %vm36_vm1, %v22042_v58  ;;  %v5778_v58 = vld [vmem:[#allocation2 + $0x1c0] sm:$0xff] }
 0x379   :  { %v7933_v17 = vadd.f32 %v7932_v38, %v7931_v45  ;;  %v7969_v36 = vadd.f32 %v7968_v32, %v7967_v13  ;;  %v24971_v45 = vld [vmem:[#allocation2 + $0x51] sm:$0xff] }
 0x37a   :  { %v24883_v31 = vpop.f32.mrb[12].mxu1  ;;  %v24885_v55 = vpop.f32.mrb[10].mxu0 }
 0x37b   :  { %v24887_v0 = vpop.f32.mrb[13].mxu1  ;;  %v7935_v9 = vadd.f32 %v7934_v54, %v7933_v17  ;;  %v24889_v14 = vpop.f32.mrb[11].mxu0  ;;  %19699 = vmatmul.mubr.msk.f32.gmra.mrb[38].mxu1 %vm36_vm1, %v24118_v37  ;;  %19930 = vmatmul.mubr.msk.f32.gmra.mrb[36].mxu0 %vm36_vm1, %v22043_v52  ;;  %v7938_v37 = vsel %vm198_vm4, %v24883_v31, 0.0  ;;  %v7972_v60 = vsel %vm198_vm4, %v24885_v55, 0.0  ;;  %v24980_v17 = vld [vmem:[#allocation2 + $0x61] sm:$0xff] }
 0x37c   :  { %29031 = vst [vmem:[#allocation11_spill] sm:$0xff] %v24889_v14  ;;  %v7936_v11 = vsel %vm198_vm4, %v24887_v0, 0.0  ;;  %v7970_v39 = vsel %vm198_vm4, %v24889_v14, 0.0  ;;  %19703 = vmatprep.mubr.msk.f32.mxu1 %vm36_vm1, %v5772_v51  ;;  %19932 = vmatprep.mubr.msk.f32.mxu0 %vm36_vm1, %v22044_v21 }
 0x37d   :  { %v7937_v12 = vadd.f32 %v7936_v11, %v7935_v9  ;;  %v7971_v53 = vadd.f32 %v7970_v39, %v7969_v36  ;;  %v5779_v9 = vld [vmem:[#allocation2 + $0x1d0] sm:$0xff] }
 0x37e   :  { %v24904_v42 = vpop.f32.mrb[14].mxu1  ;;  %v24906_v41 = vpop.f32.mrb[12].mxu0 }
 0x37f   :  { %v24908_v3 = vpop.f32.mrb[15].mxu1  ;;  %v7939_v33 = vadd.f32 %v7938_v37, %v7937_v12  ;;  %v24910_v56 = vpop.f32.mrb[13].mxu0  ;;  %v7973_v19 = vadd.f32 %v7972_v60, %v7971_v53  ;;  %19704 = vmatmul.mubr.msk.f32.vlgmr.msra.gmra.mrb[24].mxu1 %vm36_vm1, %v5773_v15  ;;  %19933 = vmatmul.mubr.msk.f32.gmra.mrb[38].mxu0 %vm36_vm1, %v24195_v47  ;;  %v7942_v47 = vsel %vm198_vm4, %v24904_v42, 0.0  ;;  %v7976_v24 = vsel %vm198_vm4, %v24906_v41, 0.0  ;;  %v24997_v53 = vld [vmem:[#allocation2 + $0x71] sm:$0xff] }
 0x380   :  { %v7940_v50 = vsel %vm198_vm4, %v24908_v3, 0.0  ;;  %v7974_v61 = vsel %vm198_vm4, %v24910_v56, 0.0  ;;  %19706 = vmatprep.mubr.msk.f32.mxu1 %vm36_vm1, %v5774_v4  ;;  %19937 = vmatprep.mubr.msk.f32.mxu0 %vm36_vm1, %v24915_v18  ;;  %v25006_v4 = vld [vmem:[#allocation2 + $0x81] sm:$0xff] }
 0x381   :  { %v7941_v35 = vadd.f32 %v7940_v50, %v7939_v33  ;;  %v7975_v25 = vadd.f32 %v7974_v61, %v7973_v19  ;;  %19728 = vmatpush3.msk.msra.mxu1 %vm432_vm0, %v24821_v28  ;;  %v5780_v19 = vld [vmem:[#allocation2 + $0x200] sm:$0xff] }
 0x382   :  { %v24930_v26 = vpop.f32.mrb[16].mxu1  ;;  %v24932_v22 = vpop.f32.mrb[14].mxu0  ;;  %19753 = vmatprep.subr.msk.mxu1 %vm432_vm0, %v24939_v49 }
 0x383   :  { %v24943_v7 = vpop.f32.mrb[17].mxu1  ;;  %v7943_v8 = vadd.f32 %v7942_v47, %v7941_v35  ;;  %v24945_v62 = vpop.f32.mrb[15].mxu0  ;;  %v7977_v48 = vadd.f32 %v7976_v24, %v7975_v25  ;;  %19707 = vmatmul.mubr.msk.f32.gmra.mrb[26].mxu1 %vm36_vm1, %v5775_v34  ;;  %19938 = vmatmul.mubr.msk.f32.vlgmr.msra.gmra.mrb[24].mxu0 %vm36_vm1, %v24934_v44  ;;  %v7946_v43 = vsel %vm198_vm4, %v24930_v26, 0.0  ;;  %v7980_v16 = vsel %vm198_vm4, %v24932_v22, 0.0  ;;  %v25015_v35 = vld [vmem:[#allocation2 + $0x91] sm:$0xff] }
 0x384   :  { %v7944_v29 = vsel %vm198_vm4, %v24943_v7, 0.0  ;;  %v7978_v40 = vsel %vm198_vm4, %v24945_v62, 0.0  ;;  %19962 = vmatpush3.msk.msra.mxu0 %vm432_vm0, %v24821_v28  ;;  %19709 = vmatprep.mubr.msk.f32.mxu1 %vm36_vm1, %v5776_v46  ;;  %v5781_v46 = vld [vmem:[#allocation2 + $0x210] sm:$0xff] }
 0x385   :  { %v7945_v27 = vadd.f32 %v7944_v29, %v7943_v8  ;;  %v7979_v20 = vadd.f32 %v7978_v40, %v7977_v48  ;;  %19940 = vmatprep.mubr.msk.f32.mxu0 %vm36_vm1, %v24957_v5  ;;  %19987 = vmatprep.subr.msk.mxu0 %vm432_vm0, %v24939_v49 }
 0x386   :  { %v24967_v59 = vpop.f32.mrb[18].mxu1  ;;  %v24969_v28 = vpop.f32.mrb[16].mxu0 }
 0x387   :  { %29032 = vst [vmem:[#allocation13_spill] sm:$0xff] %v24967_v59  ;;  %v24973_v32 = vpop.f32.mrb[19].mxu1  ;;  %v7947_v23 = vadd.f32 %v7946_v43, %v7945_v27  ;;  %v24975_v38 = vpop.f32.mrb[17].mxu0  ;;  %v7981_v13 = vadd.f32 %v7980_v16, %v7979_v20  ;;  %19710 = vmatmul.mubr.msk.f32.gmra.mrb[28].mxu1 %vm36_vm1, %v5777_v57  ;;  %19941 = vmatmul.mubr.msk.f32.gmra.mrb[26].mxu0 %vm36_vm1, %v24971_v45  ;;  %v7950_v11 = vsel %vm198_vm4, %v24967_v59, 0.0  ;;  %v7984_v39 = vsel %vm198_vm4, %v24969_v28, 0.0  ;;  %v5782_v43 = vld [vmem:[#allocation2 + $0x220] sm:$0xff] }
 0x388   :  { %v7948_v36 = vsel %vm198_vm4, %v24973_v32, 0.0  ;;  %v7982_v54 = vsel %vm198_vm4, %v24975_v38, 0.0  ;;  %19712 = vmatprep.mubr.msk.f32.mxu1 %vm36_vm1, %v5778_v58  ;;  %19943 = vmatprep.mubr.msk.f32.mxu0 %vm36_vm1, %v24980_v17  ;;  %v25032_v16 = vld [vmem:[#allocation2 + $0xc1] sm:$0xff] }
 0x389   :  { %v7949_v52 = vadd.f32 %v7948_v36, %v7947_v23  ;;  %v7983_v51 = vadd.f32 %v7982_v54, %v7981_v13 }
 0x38a   :  { %v24993_v21 = vpop.f32.mrb[20].mxu1  ;;  %v24995_v12 = vpop.f32.mrb[18].mxu0 }
 0x38b   :  { %29033 = vst [vmem:[#allocation15_spill] sm:$0xff] %v24993_v21  ;;  %v24999_v37 = vpop.f32.mrb[21].mxu1  ;;  %v7951_v60 = vadd.f32 %v7950_v11, %v7949_v52  ;;  %v25001_v15 = vpop.f32.mrb[19].mxu0  ;;  %v7985_v33 = vadd.f32 %v7984_v39, %v7983_v51  ;;  %19713 = vmatmul.mubr.msk.f32.gmra.mrb[30].mxu1 %vm36_vm1, %v5779_v9  ;;  %19944 = vmatmul.mubr.msk.f32.gmra.mrb[28].mxu0 %vm36_vm1, %v24997_v53  ;;  %v7954_v24 = vsel %vm198_vm4, %v24993_v21, 0.0  ;;  %v7988_v34 = vsel %vm198_vm4, %v24995_v12, 0.0  ;;  %v5783_v52 = vld [vmem:[#allocation2 + $0x230] sm:$0xff] }
 0x38c   :  { %29034 = vst [vmem:[#allocation18_spill] sm:$0xff] %v24999_v37  ;;  %v7952_v50 = vsel %vm198_vm4, %v24999_v37, 0.0  ;;  %v7986_v61 = vsel %vm198_vm4, %v25001_v15, 0.0  ;;  %19715 = vmatprep.mubr.msk.f32.mxu1 %vm36_vm1, %v5780_v19  ;;  %19946 = vmatprep.mubr.msk.f32.mxu0 %vm36_vm1, %v25006_v4  ;;  %v25047_v51 = vld [vmem:[#allocation2 + $0xd1] sm:$0xff]  ;;  %v25054_v19 = vld [vmem:[#allocation2 + $0xe1] sm:$0xff] }
 0x38d   :  { %v7953_v25 = vadd.f32 %v7952_v50, %v7951_v60  ;;  %v7987_v47 = vadd.f32 %v7986_v61, %v7985_v33  ;;  %v5784_v33 = vld [vmem:[#allocation2 + $0x240] sm:$0xff] }
 0x38e   :  { %v25021_v8 = vpop.f32.mrb[22].mxu1  ;;  %v25023_v48 = vpop.f32.mrb[20].mxu0 }
 0x38f   :  { %29035 = vst [vmem:[#allocation40_spill] sm:$0xff] %v25021_v8  ;;  %v25025_v29 = vpop.f32.mrb[23].mxu1  ;;  %v7955_v40 = vadd.f32 %v7954_v24, %v7953_v25  ;;  %v25027_v27 = vpop.f32.mrb[21].mxu0  ;;  %v7989_v20 = vadd.f32 %v7988_v34, %v7987_v47  ;;  %19716 = vmatmul.mubr.msk.f32.gmra.mrb[32].mxu1 %vm36_vm1, %v5781_v46  ;;  %19947 = vmatmul.mubr.msk.f32.gmra.mrb[30].mxu0 %vm36_vm1, %v25015_v35  ;;  %v7958_v36 = vsel %vm198_vm4, %v25021_v8, 0.0  ;;  %v7992_v54 = vsel %vm198_vm4, %v25023_v48, 0.0  ;;  %v5785_v24 = vld [vmem:[#allocation2 + $0x250] sm:$0xff] }
 0x390   :  { %29036 = vst [vmem:[#allocation20_spill] sm:$0xff] %v25025_v29  ;;  %v7956_v57 = vsel %vm198_vm4, %v25025_v29, 0.0  ;;  %v7990_v23 = vsel %vm198_vm4, %v25027_v27, 0.0  ;;  %19718 = vmatprep.mubr.msk.f32.mxu1 %vm36_vm1, %v5782_v43  ;;  %19949 = vmatprep.mubr.msk.f32.mxu0 %vm36_vm1, %v25032_v16  ;;  %v6009_v34 = vld [vmem:[#allocation2 + $0xf1] sm:$0xff]  ;;  %v6010_v43 = vld [vmem:[#allocation2 + $0x101] sm:$0xff] }
 0x391   :  { %v7957_v13 = vadd.f32 %v7956_v57, %v7955_v40  ;;  %v7991_v58 = vadd.f32 %v7990_v23, %v7989_v20  ;;  %v5786_v20 = vld [vmem:[#allocation2 + $0x260] sm:$0xff]  ;;  %v5787_v57 = vld [vmem:[#allocation2 + $0x270] sm:$0xff] }
 0x392   :  { %v25045_v9 = vpop.f32.mrb[22].mxu0 }
 0x393   :  { %v7959_v11 = vadd.f32 %v7958_v36, %v7957_v13  ;;  %v25049_v39 = vpop.f32.mrb[23].mxu0  ;;  %v7993_v60 = vadd.f32 %v7992_v54, %v7991_v58  ;;  %19719 = vmatmul.mubr.msk.f32.gmra.mrb[34].mxu1 %vm36_vm1, %v5783_v52  ;;  %19950 = vmatmul.mubr.msk.f32.gmra.mrb[32].mxu0 %vm36_vm1, %v25047_v51  ;;  %v7996_v47 = vsel %vm198_vm4, %v25045_v9, 0.0  ;;  %v6011_v58 = vld [vmem:[#allocation2 + $0x111] sm:$0xff]  ;;  %v6012_v52 = vld [vmem:[#allocation2 + $0x121] sm:$0xff] }
 0x394   :  { %v7994_v50 = vsel %vm198_vm4, %v25049_v39, 0.0  ;;  %19721 = vmatprep.mubr.msk.f32.mxu1 %vm36_vm1, %v5784_v33  ;;  %19952 = vmatprep.mubr.msk.f32.mxu0 %vm36_vm1, %v25054_v19 }
 0x395   :  { %v7960_v61 = vrot.slane %v7959_v11, 4  ;;  %v7995_v25 = vadd.f32 %v7994_v50, %v7993_v60 }
 0x397   :  { %v7961_v46 = vadd.f32 %v7960_v61, %v7959_v11  ;;  %v7997_v40 = vadd.f32 %v7996_v47, %v7995_v25  ;;  %19722 = vmatmul.mubr.msk.f32.gmra.mrb[36].mxu1 %vm36_vm1, %v5785_v24  ;;  %19953 = vmatmul.mubr.msk.f32.gmra.mrb[34].mxu0 %vm36_vm1, %v6009_v34  ;;  %v6013_v11 = vld [vmem:[#allocation2 + $0x131] sm:$0xff]  ;;  %v6223_v61 = vld [vmem:[#allocation2 + $0x161] sm:$0xff] }
 0x398   :  { %19724 = vmatprep.mubr.msk.f32.mxu1 %vm36_vm1, %v5786_v20  ;;  %19955 = vmatprep.mubr.msk.f32.mxu0 %vm36_vm1, %v6010_v43  ;;  %v6238_v20 = vld [vmem:[#allocation2 + $0x271] sm:$0xff] }
 0x399   :  { %v7962_v23 = vrot.slane %v7961_v46, 2  ;;  %v7998_v13 = vrot.slane %v7997_v40, 4 }
 0x39b   :  { %v7963_v36 = vadd.f32 %v7962_v23, %v7961_v46  ;;  %v7999_v54 = vadd.f32 %v7998_v13, %v7997_v40  ;;  %19725 = vmatmul.mubr.msk.f32.gmra.mrb[38].mxu1 %vm36_vm1, %v5787_v57  ;;  %19956 = vmatmul.mubr.msk.f32.gmra.mrb[36].mxu0 %vm36_vm1, %v6011_v58  ;;  %v6226_v46 = vld [vmem:[#allocation2 + $0x191] sm:$0xff]  ;;  %v7706_v23 = vld [vmem:[#allocation2 + $0x42] sm:$0xff] }
 0x39c   :  { %19729 = vmatprep.mubr.msk.f32.mxu1 %vm36_vm1, %v24915_v18  ;;  %19958 = vmatprep.mubr.msk.f32.mxu0 %vm36_vm1, %v6012_v52  ;;  %v6224_v18 = vld [vmem:[#allocation2 + $0x171] sm:$0xff] }
 0x39d   :  { %v8000_v60 = vrot.slane %v7999_v54, 2  ;;  %v7964_v33 = vrot.slane %v7963_v36, 1  ;;  %v6234_v40 = vld [vmem:[#allocation2 + $0x231] sm:$0xff] }
 0x39e   :  { %v7705_v57 = vld [vmem:[#allocation2 + $0x32] sm:$0xff] }
 0x39f   :  { %v8001_v50 = vadd.f32 %v8000_v60, %v7999_v54  ;;  %19730 = vmatmul.mubr.msk.f32.vlgmr.msra.gmra.mrb[24].mxu1 %vm36_vm1, %v24934_v44  ;;  %19959 = vmatmul.mubr.msk.f32.gmra.mrb[38].mxu0 %vm36_vm1, %v6013_v11  ;;  %v7965_v47 = vadd.f32 %v7964_v33, %v7963_v36  ;;  %v6225_v44 = vld [vmem:[#allocation2 + $0x181] sm:$0xff]  ;;  %v7707_v13 = vld [vmem:[#allocation2 + $0x52] sm:$0xff] }
 0x3a0   :  { %19732 = vmatprep.mubr.msk.f32.mxu1 %vm36_vm1, %v24957_v5  ;;  %19963 = vmatprep.mubr.msk.f32.mxu0 %vm36_vm1, %v6223_v61  ;;  %v7709_v36 = vld [vmem:[#allocation2 + $0x72] sm:$0xff]  ;;  %v7710_v54 = vld [vmem:[#allocation2 + $0x82] sm:$0xff] }
 0x3a1   :  { %v8002_v25 = vrot.slane %v8001_v50, 1  ;;  %19754 = vmatpush3.msk.msra.mxu1 %vm432_vm0, %v24939_v49  ;;  %v7713_v60 = vld [vmem:[#allocation2 + $0xd2] sm:$0xff]  ;;  %v7714_v33 = vld [vmem:[#allocation2 + $0xe2] sm:$0xff] }
 0x3a3   :  { %v8003_v24 = vadd.f32 %v8002_v25, %v8001_v50  ;;  %19733 = vmatmul.mubr.msk.f32.gmra.mrb[26].mxu1 %vm36_vm1, %v24971_v45  ;;  %19964 = vmatmul.mubr.msk.f32.vlgmr.msra.gmra.mrb[24].mxu0 %vm36_vm1, %v6224_v18  ;;  %v6227_v45 = vld [vmem:[#allocation2 + $0x1a1] sm:$0xff]  ;;  %v7715_v50 = vld [vmem:[#allocation2 + $0xf2] sm:$0xff] }
 0x3a4   :  { %19988 = vmatpush3.msk.msra.mxu0 %vm432_vm0, %v24939_v49  ;;  %19735 = vmatprep.mubr.msk.f32.mxu1 %vm36_vm1, %v24980_v17  ;;  %v6228_v49 = vld [vmem:[#allocation2 + $0x1b1] sm:$0xff]  ;;  %v6229_v17 = vld [vmem:[#allocation2 + $0x1c1] sm:$0xff]  ;;  %vm16524_vm0 = vcmask 523264  }
 0x3a5   :  { %v25087_v5 = vadd.f32 %v8003_v24, %v7965_v47  ;;  %19966 = vmatprep.mubr.msk.f32.mxu0 %vm36_vm1, %v6225_v44  ;;  %v7717_v25 = vld [vmem:[#allocation2 + $0x112] sm:$0xff] }
 0x3a6   :  { %v7719_v47 = vld [vmem:[#allocation2 + $0x132] sm:$0xff] }
 0x3a7   :  { %19736 = vmatmul.mubr.msk.f32.gmra.mrb[28].mxu1 %vm36_vm1, %v24997_v53  ;;  %19967 = vmatmul.mubr.msk.f32.gmra.mrb[26].mxu0 %vm36_vm1, %v6226_v46  ;;  %v6230_v53 = vld [vmem:[#allocation2 + $0x1d1] sm:$0xff] }
 0x3a8   :  { %19738 = vmatprep.mubr.msk.f32.mxu1 %vm36_vm1, %v25006_v4  ;;  %19969 = vmatprep.mubr.msk.f32.mxu0 %vm36_vm1, %v6227_v45  ;;  %v6231_v4 = vld [vmem:[#allocation2 + $0x201] sm:$0xff] }
 0x3ab   :  { %19739 = vmatmul.mubr.msk.f32.gmra.mrb[30].mxu1 %vm36_vm1, %v25015_v35  ;;  %19970 = vmatmul.mubr.msk.f32.gmra.mrb[28].mxu0 %vm36_vm1, %v6228_v49  ;;  %v6232_v35 = vld [vmem:[#allocation2 + $0x211] sm:$0xff] }
 0x3ac   :  { %19741 = vmatprep.mubr.msk.f32.mxu1 %vm36_vm1, %v25032_v16  ;;  %19972 = vmatprep.mubr.msk.f32.mxu0 %vm36_vm1, %v6229_v17  ;;  %v6233_v16 = vld [vmem:[#allocation2 + $0x221] sm:$0xff] }
 0x3af   :  { %19742 = vmatmul.mubr.msk.f32.gmra.mrb[32].mxu1 %vm36_vm1, %v25047_v51  ;;  %19973 = vmatmul.mubr.msk.f32.gmra.mrb[30].mxu0 %vm36_vm1, %v6230_v53  ;;  %v6235_v51 = vld [vmem:[#allocation2 + $0x241] sm:$0xff] }
 0x3b0   :  { %19744 = vmatprep.mubr.msk.f32.mxu1 %vm36_vm1, %v25054_v19  ;;  %19975 = vmatprep.mubr.msk.f32.mxu0 %vm36_vm1, %v6231_v4  ;;  %v6236_v19 = vld [vmem:[#allocation2 + $0x251] sm:$0xff] }
 0x3b3   :  { %19745 = vmatmul.mubr.msk.f32.gmra.mrb[34].mxu1 %vm36_vm1, %v6009_v34  ;;  %19976 = vmatmul.mubr.msk.f32.gmra.mrb[32].mxu0 %vm36_vm1, %v6232_v35  ;;  %v6237_v34 = vld [vmem:[#allocation2 + $0x261] sm:$0xff] }
 0x3b4   :  { %19747 = vmatprep.mubr.msk.f32.mxu1 %vm36_vm1, %v6010_v43  ;;  %19978 = vmatprep.mubr.msk.f32.mxu0 %vm36_vm1, %v6233_v16  ;;  %v7704_v43 = vld [vmem:[#allocation2 + $0x22] sm:$0xff] }
 0x3b7   :  { %19748 = vmatmul.mubr.msk.f32.gmra.mrb[36].mxu1 %vm36_vm1, %v6011_v58  ;;  %19979 = vmatmul.mubr.msk.f32.gmra.mrb[34].mxu0 %vm36_vm1, %v6234_v40  ;;  %v7708_v58 = vld [vmem:[#allocation2 + $0x62] sm:$0xff] }
 0x3b8   :  { %19750 = vmatprep.mubr.msk.f32.mxu1 %vm36_vm1, %v6012_v52  ;;  %19981 = vmatprep.mubr.msk.f32.mxu0 %vm36_vm1, %v6235_v51  ;;  %v7711_v52 = vld [vmem:[#allocation2 + $0x92] sm:$0xff] }
 0x3bb   :  { %19751 = vmatmul.mubr.msk.f32.gmra.mrb[38].mxu1 %vm36_vm1, %v6013_v11  ;;  %19982 = vmatmul.mubr.msk.f32.gmra.mrb[36].mxu0 %vm36_vm1, %v6236_v19  ;;  %v7712_v11 = vld [vmem:[#allocation2 + $0xc2] sm:$0xff] }
 0x3bc   :  { %19755 = vmatprep.mubr.msk.f32.mxu1 %vm36_vm1, %v6223_v61  ;;  %19984 = vmatprep.mubr.msk.f32.mxu0 %vm36_vm1, %v6237_v34  ;;  %v7716_v61 = vld [vmem:[#allocation2 + $0x102] sm:$0xff] }
 0x3bf   :  { %19756 = vmatmul.mubr.msk.f32.vlgmr.msra.gmra.mrb[24].mxu1 %vm36_vm1, %v6224_v18  ;;  %19985 = vmatmul.mubr.msk.f32.gmra.mrb[38].mxu0 %vm36_vm1, %v6238_v20  ;;  %v7718_v18 = vld [vmem:[#allocation2 + $0x122] sm:$0xff] }
 0x3c0   :  { %19758 = vmatprep.mubr.msk.f32.mxu1 %vm36_vm1, %v6225_v44  ;;  %19989 = vmatprep.mubr.msk.f32.mxu0 %vm36_vm1, %v7704_v43 }
 0x3c3   :  { %19759 = vmatmul.mubr.msk.f32.gmra.mrb[26].mxu1 %vm36_vm1, %v6226_v46  ;;  %19990 = vmatmul.mubr.msk.f32.vlgmr.msra.gmra.mrb[24].mxu0 %vm36_vm1, %v7705_v57 }
 0x3c4   :  { %19761 = vmatprep.mubr.msk.f32.mxu1 %vm36_vm1, %v6227_v45  ;;  %19992 = vmatprep.mubr.msk.f32.mxu0 %vm36_vm1, %v7706_v23 }
 0x3c7   :  { %19762 = vmatmul.mubr.msk.f32.gmra.mrb[28].mxu1 %vm36_vm1, %v6228_v49  ;;  %19993 = vmatmul.mubr.msk.f32.gmra.mrb[26].mxu0 %vm36_vm1, %v7707_v13 }
 0x3c8   :  { %19764 = vmatprep.mubr.msk.f32.mxu1 %vm36_vm1, %v6229_v17  ;;  %19995 = vmatprep.mubr.msk.f32.mxu0 %vm36_vm1, %v7708_v58 }
 0x3cb   :  { %19765 = vmatmul.mubr.msk.f32.gmra.mrb[30].mxu1 %vm36_vm1, %v6230_v53  ;;  %19996 = vmatmul.mubr.msk.f32.gmra.mrb[28].mxu0 %vm36_vm1, %v7709_v36 }
 0x3cc   :  { %19767 = vmatprep.mubr.msk.f32.mxu1 %vm36_vm1, %v6231_v4  ;;  %19998 = vmatprep.mubr.msk.f32.mxu0 %vm36_vm1, %v7710_v54 }
 0x3cf   :  { %19768 = vmatmul.mubr.msk.f32.gmra.mrb[32].mxu1 %vm36_vm1, %v6232_v35  ;;  %19999 = vmatmul.mubr.msk.f32.gmra.mrb[30].mxu0 %vm36_vm1, %v7711_v52 }
 0x3d0   :  { %19770 = vmatprep.mubr.msk.f32.mxu1 %vm36_vm1, %v6233_v16  ;;  %20001 = vmatprep.mubr.msk.f32.mxu0 %vm36_vm1, %v7712_v11 }
 0x3d3   :  { %19771 = vmatmul.mubr.msk.f32.gmra.mrb[34].mxu1 %vm36_vm1, %v6234_v40  ;;  %20002 = vmatmul.mubr.msk.f32.gmra.mrb[32].mxu0 %vm36_vm1, %v7713_v60 }
 0x3d4   :  { %19773 = vmatprep.mubr.msk.f32.mxu1 %vm36_vm1, %v6235_v51  ;;  %20004 = vmatprep.mubr.msk.f32.mxu0 %vm36_vm1, %v7714_v33 }
 0x3d7   :  { %19774 = vmatmul.mubr.msk.f32.gmra.mrb[36].mxu1 %vm36_vm1, %v6236_v19  ;;  %20005 = vmatmul.mubr.msk.f32.gmra.mrb[34].mxu0 %vm36_vm1, %v7715_v50 }
 0x3d8   :  { %19776 = vmatprep.mubr.msk.f32.mxu1 %vm36_vm1, %v6237_v34  ;;  %20007 = vmatprep.mubr.msk.f32.mxu0 %vm36_vm1, %v7716_v61 }
 0x3db   :  { %19777 = vmatmul.mubr.msk.f32.gmra.mrb[38].mxu1 %vm36_vm1, %v6238_v20  ;;  %20008 = vmatmul.mubr.msk.f32.gmra.mrb[36].mxu0 %vm36_vm1, %v7717_v25 }
 0x3dc   :  { %20010 = vmatprep.mubr.msk.f32.mxu0 %vm36_vm1, %v7718_v18 }
 0x3df   :  { %20011 = vmatmul.mubr.msk.f32.gmra.mrb[38].mxu0 %vm36_vm1, %v7719_v47  ;;  %vm16527_vm1 = vcmask 785408  }
 0x492   :  { %v25152_v24 = vpop.f32.mrb[24].mxu1 }
 0x493   :  { %29037 = vst [vmem:[#allocation22_spill] sm:$0xff] %v25152_v24  ;;  %v8006_v44 = vsel %vm198_vm4, %v25152_v24, 0.0  ;;  %v25156_v46 = vpop.f32.mrb[25].mxu1 }
 0x494   :  { %v8005_v45 = vsel %vm198_vm4, %v25156_v46, 0.0 }
 0x495   :  { %v8007_v49 = vadd.f32 %v8006_v44, %v8005_v45 }
 0x496   :  { %v25160_v17 = vpop.f32.mrb[26].mxu1  ;;  %v25162_v53 = vpop.f32.mrb[24].mxu0 }
 0x497   :  { %29038 = vst [vmem:[#allocation24_spill] sm:$0xff] %v25162_v53  ;;  %v8044_v4 = vsel %vm198_vm4, %v25162_v53, 0.0  ;;  %v25166_v35 = vpop.f32.mrb[27].mxu1  ;;  %v25168_v16 = vpop.f32.mrb[25].mxu0  ;;  %v8010_v20 = vsel %vm198_vm4, %v25160_v17, 0.0 }
 0x498   :  { %29039 = vst [vmem:[#allocation26_spill] sm:$0xff] %v25166_v35  ;;  %29040 = vst [vmem:[#allocation28_spill] sm:$0xff] %v25168_v16  ;;  %v8008_v40 = vsel %vm198_vm4, %v25166_v35, 0.0  ;;  %v8043_v51 = vsel %vm198_vm4, %v25168_v16, 0.0 }
 0x499   :  { %v8009_v19 = vadd.f32 %v8008_v40, %v8007_v49  ;;  %v8045_v34 = vadd.f32 %v8044_v4, %v8043_v51 }
 0x49a   :  { %v25176_v43 = vpop.f32.mrb[28].mxu1  ;;  %v25178_v57 = vpop.f32.mrb[26].mxu0 }
 0x49b   :  { %29041 = vst [vmem:[#allocation30_spill] sm:$0xff] %v25178_v57  ;;  %v25180_v23 = vpop.f32.mrb[29].mxu1  ;;  %v8011_v13 = vadd.f32 %v8010_v20, %v8009_v19  ;;  %v25182_v58 = vpop.f32.mrb[27].mxu0  ;;  %v8014_v60 = vsel %vm198_vm4, %v25176_v43, 0.0  ;;  %v8048_v33 = vsel %vm198_vm4, %v25178_v57, 0.0 }
 0x49c   :  { %29042 = vst [vmem:[#allocation32_spill] sm:$0xff] %v25182_v58  ;;  %v8012_v36 = vsel %vm198_vm4, %v25180_v23, 0.0  ;;  %v8046_v54 = vsel %vm198_vm4, %v25182_v58, 0.0 }
 0x49d   :  { %v8013_v52 = vadd.f32 %v8012_v36, %v8011_v13  ;;  %v8047_v11 = vadd.f32 %v8046_v54, %v8045_v34 }
 0x49e   :  { %v25192_v50 = vpop.f32.mrb[30].mxu1  ;;  %v25194_v61 = vpop.f32.mrb[28].mxu0 }
 0x49f   :  { %29043 = vst [vmem:[#allocation34_spill] sm:$0xff] %v25192_v50  ;;  %29044 = vst [vmem:[#allocation36_spill] sm:$0xff] %v25194_v61  ;;  %v25196_v25 = vpop.f32.mrb[31].mxu1  ;;  %v8015_v18 = vadd.f32 %v8014_v60, %v8013_v52  ;;  %v25198_v47 = vpop.f32.mrb[29].mxu0  ;;  %v8049_v44 = vadd.f32 %v8048_v33, %v8047_v11  ;;  %v8018_v51 = vsel %vm198_vm4, %v25192_v50, 0.0  ;;  %v8052_v19 = vsel %vm198_vm4, %v25194_v61, 0.0 }
 0x4a0   :  { %29045 = vst [vmem:[#allocation38_spill] sm:$0xff] %v25198_v47  ;;  %v8016_v45 = vsel %vm198_vm4, %v25196_v25, 0.0  ;;  %v8050_v49 = vsel %vm198_vm4, %v25198_v47, 0.0 }
 0x4a1   :  { %v8017_v4 = vadd.f32 %v8016_v45, %v8015_v18  ;;  %v8051_v40 = vadd.f32 %v8050_v49, %v8049_v44 }
 0x4a2   :  { %v25208_v34 = vpop.f32.mrb[32].mxu1  ;;  %v25210_v20 = vpop.f32.mrb[30].mxu0 }
 0x4a3   :  { %29046 = vst [vmem:[#allocation39_spill] sm:$0xff] %v25208_v34  ;;  %29047 = vst [vmem:[#allocation8_spill] sm:$0xff] %v25210_v20  ;;  %v25212_v13 = vpop.f32.mrb[33].mxu1  ;;  %v8019_v36 = vadd.f32 %v8018_v51, %v8017_v4  ;;  %v25214_v54 = vpop.f32.mrb[31].mxu0  ;;  %v8053_v52 = vadd.f32 %v8052_v19, %v8051_v40  ;;  %v8022_v44 = vsel %vm198_vm4, %v25208_v34, 0.0  ;;  %v8056_v45 = vsel %vm198_vm4, %v25210_v20, 0.0 }
 0x4a4   :  { %29048 = vst [vmem:[#allocation10_spill] sm:$0xff] %v25212_v13  ;;  %29049 = vst [vmem:[#allocation12_spill] sm:$0xff] %v25214_v54  ;;  %v8020_v11 = vsel %vm198_vm4, %v25212_v13, 0.0  ;;  %v8054_v60 = vsel %vm198_vm4, %v25214_v54, 0.0 }
 0x4a5   :  { %v8021_v33 = vadd.f32 %v8020_v11, %v8019_v36  ;;  %v8055_v18 = vadd.f32 %v8054_v60, %v8053_v52 }
 0x4a6   :  { %v25224_v49 = vpop.f32.mrb[34].mxu1  ;;  %v25226_v4 = vpop.f32.mrb[32].mxu0 }
 0x4a7   :  { %29050 = vst [vmem:[#allocation14_spill] sm:$0xff] %v25224_v49  ;;  %29051 = vst [vmem:[#allocation16_spill] sm:$0xff] %v25226_v4  ;;  %v25228_v51 = vpop.f32.mrb[35].mxu1  ;;  %v8023_v40 = vadd.f32 %v8022_v44, %v8021_v33  ;;  %v25230_v19 = vpop.f32.mrb[33].mxu0  ;;  %v8057_v61 = vadd.f32 %v8056_v45, %v8055_v18  ;;  %v8026_v20 = vsel %vm198_vm4, %v25224_v49, 0.0  ;;  %v8060_v54 = vsel %vm198_vm4, %v25226_v4, 0.0 }
 0x4a8   :  { %29052 = vst [vmem:[#allocation17_spill] sm:$0xff] %v25228_v51  ;;  %29053 = vst [vmem:[#allocation19_spill] sm:$0xff] %v25230_v19  ;;  %v8024_v36 = vsel %vm198_vm4, %v25228_v51, 0.0  ;;  %v8058_v52 = vsel %vm198_vm4, %v25230_v19, 0.0 }
 0x4a9   :  { %v8025_v11 = vadd.f32 %v8024_v36, %v8023_v40  ;;  %v8059_v60 = vadd.f32 %v8058_v52, %v8057_v61 }
 0x4aa   :  { %v25240_v47 = vpop.f32.mrb[36].mxu1  ;;  %v25242_v33 = vpop.f32.mrb[34].mxu0 }
 0x4ab   :  { %29054 = vst [vmem:[#allocation21_spill] sm:$0xff] %v25240_v47  ;;  %29055 = vst [vmem:[#allocation23_spill] sm:$0xff] %v25242_v33  ;;  %v25244_v44 = vpop.f32.mrb[37].mxu1  ;;  %v8027_v18 = vadd.f32 %v8026_v20, %v8025_v11  ;;  %v25246_v45 = vpop.f32.mrb[35].mxu0  ;;  %v8061_v57 = vadd.f32 %v8060_v54, %v8059_v60  ;;  %v8030_v4 = vsel %vm198_vm4, %v25240_v47, 0.0  ;;  %v8064_v19 = vsel %vm198_vm4, %v25242_v33, 0.0 }
 0x4ac   :  { %29056 = vst [vmem:[#allocation25_spill] sm:$0xff] %v25244_v44  ;;  %29057 = vst [vmem:[#allocation27_spill] sm:$0xff] %v25246_v45  ;;  %v8028_v40 = vsel %vm198_vm4, %v25244_v44, 0.0  ;;  %v8062_v61 = vsel %vm198_vm4, %v25246_v45, 0.0 }
 0x4ad   :  { %v8029_v36 = vadd.f32 %v8028_v40, %v8027_v18  ;;  %v8063_v52 = vadd.f32 %v8062_v61, %v8061_v57 }
 0x4ae   :  { %v25256_v58 = vpop.f32.mrb[38].mxu1  ;;  %v25258_v20 = vpop.f32.mrb[36].mxu0 }
 0x4af   :  { %29058 = vst [vmem:[#allocation29_spill] sm:$0xff] %v25256_v58  ;;  %29059 = vst [vmem:[#allocation31_spill] sm:$0xff] %v25258_v20  ;;  %v25260_v11 = vpop.f32.mrb[39].mxu1  ;;  %v8031_v54 = vadd.f32 %v8030_v4, %v8029_v36  ;;  %v25262_v60 = vpop.f32.mrb[37].mxu0  ;;  %v8065_v53 = vadd.f32 %v8064_v19, %v8063_v52  ;;  %v8034_v33 = vsel %vm198_vm4, %v25256_v58, 0.0  ;;  %v8068_v45 = vsel %vm198_vm4, %v25258_v20, 0.0 }
 0x4b0   :  { %29060 = vst [vmem:[#allocation33_spill] sm:$0xff] %v25260_v11  ;;  %29061 = vst [vmem:[#allocation35_spill] sm:$0xff] %v25262_v60  ;;  %v8032_v18 = vsel %vm198_vm4, %v25260_v11, 0.0  ;;  %v8066_v57 = vsel %vm198_vm4, %v25262_v60, 0.0 }
 0x4b1   :  { %v8033_v40 = vadd.f32 %v8032_v18, %v8031_v54  ;;  %v8067_v61 = vadd.f32 %v8066_v57, %v8065_v53 }
 0x4b2   :  { %v25272_v47 = vpop.f32.mrb[38].mxu0 }
 0x4b3   :  { %29062 = vst [vmem:[#allocation37_spill] sm:$0xff] %v25272_v47  ;;  %v8035_v4 = vadd.f32 %v8034_v33, %v8033_v40  ;;  %v25274_v36 = vpop.f32.mrb[39].mxu0  ;;  %v8069_v19 = vadd.f32 %v8068_v45, %v8067_v61  ;;  %v8072_v53 = vsel %vm198_vm4, %v25272_v47, 0.0 }
 0x4b4   :  { %29063 = vst [vmem:[#allocation41_spill] sm:$0xff] %v25274_v36  ;;  %v8070_v52 = vsel %vm198_vm4, %v25274_v36, 0.0 }
 0x4b5   :  { %v8036_v11 = vrot.slane %v8035_v4, 4  ;;  %v8071_v16 = vadd.f32 %v8070_v52, %v8069_v19 }
 0x4b7   :  { %v8037_v54 = vadd.f32 %v8036_v11, %v8035_v4  ;;  %v8073_v18 = vadd.f32 %v8072_v53, %v8071_v16 }
 0x4b9   :  { %v8038_v57 = vrot.slane %v8037_v54, 2  ;;  %v8074_v60 = vrot.slane %v8073_v18, 4 }
 0x4bb   :  { %v8039_v58 = vadd.f32 %v8038_v57, %v8037_v54  ;;  %v8075_v20 = vadd.f32 %v8074_v60, %v8073_v18 }
 0x4bd   :  { %v8040_v44 = vrot.slane %v8039_v58, 1  ;;  %v8076_v49 = vrot.slane %v8075_v20, 2 }
 0x4bf   :  { %v8041_v33 = vadd.f32 %v8040_v44, %v8039_v58  ;;  %v8077_v40 = vadd.f32 %v8076_v49, %v8075_v20 }
 0x4c1   :  { %v8042_v45 = vadd.f32 %v8041_v33, %v25087_v5  ;;  %v8078_v61 = vrot.slane %v8077_v40, 1 }
 0x4c3   :  { %v8079_v51 = vadd.f32 %v8078_v61, %v8077_v40 }
 0x4c5   :  { %v8080_v36 = vadd.f32 %v8079_v51, %v8042_v45 }
 0x4c7   :  { %v25281_v34 = vmul.f32 0.001953125, %v8080_v36 }
 0x4c9   :  { %v8082_v19 = vsub.f32 %v24855_v63, %v25281_v34  ;;  %v8083_v16 = vsub.f32 %v24851_v6, %v25281_v34  ;;  %v8084_v11 = vsub.f32 %v24869_v2, %v25281_v34  ;;  %v8085_v58 = vsub.f32 %v24863_v10, %v25281_v34 }
 0x4ca   :  { %v8086_v5 = vsub.f32 %v24887_v0, %v25281_v34  ;;  %v8087_v20 = vsub.f32 %v24883_v31, %v25281_v34  ;;  %v8088_v53 = vsub.f32 %v24908_v3, %v25281_v34  ;;  %v8089_v33 = vsub.f32 %v24904_v42, %v25281_v34 }
 0x4cb   :  { %v8098_v49 = vmul.f32 %v8082_v19, %v8082_v19  ;;  %v8099_v44 = vmul.f32 %v8083_v16, %v8083_v16  ;;  %v8100_v51 = vmul.f32 %v8084_v11, %v8084_v11  ;;  %v8101_v60 = vmul.f32 %v8085_v58, %v8085_v58 }
 0x4cc   :  { %v8102_v54 = vmul.f32 %v8086_v5, %v8086_v5  ;;  %v8103_v40 = vmul.f32 %v8087_v20, %v8087_v20  ;;  %v8090_v61 = vsub.f32 %v24943_v7, %v25281_v34  ;;  %v8152_v16 = vsub.f32 %v24871_v1, %v25281_v34 }
 0x4cd   :  { %v8114_v4 = vsel %vm198_vm4, %v8098_v49, 0.0  ;;  %v8115_v36 = vsel %vm198_vm4, %v8099_v44, 0.0  ;;  %v8117_v18 = vsel %vm198_vm4, %v8100_v51, 0.0  ;;  %v8119_v45 = vsel %vm198_vm4, %v8101_v60, 0.0 }
 0x4ce   :  { %v8116_v52 = vadd.f32 %v8115_v36, %v8114_v4  ;;  %v8091_v11 = vsub.f32 %v24930_v26, %v25281_v34  ;;  %v8104_v58 = vmul.f32 %v8088_v53, %v8088_v53  ;;  %v8121_v49 = vsel %vm198_vm4, %v8102_v54, 0.0 }
 0x4cf   :  { %v8153_v44 = vsub.f32 %v24865_v30, %v25281_v34  ;;  %v8092_v5 = vsub.f32 %v24973_v32, %v25281_v34  ;;  %v8093_v51 = vsub.f32 %v24967_v59, %v25281_v34  ;;  %v8094_v20 = vsub.f32 %v24999_v37, %v25281_v34 }
 0x4d0   :  { %v8118_v57 = vadd.f32 %v8117_v18, %v8116_v52  ;;  %v8095_v4 = vsub.f32 %v24993_v21, %v25281_v34  ;;  %v8105_v36 = vmul.f32 %v8089_v33, %v8089_v33  ;;  %v8123_v52 = vsel %vm198_vm4, %v8103_v40, 0.0 }
 0x4d1   :  { %v8154_v53 = vsub.f32 %v24889_v14, %v25281_v34  ;;  %v8096_v54 = vsub.f32 %v25025_v29, %v25281_v34  ;;  %v8097_v18 = vsub.f32 %v25021_v8, %v25281_v34  ;;  %v8106_v30 = vmul.f32 %v8090_v61, %v8090_v61 }
 0x4d2   :  { %v8120_v19 = vadd.f32 %v8119_v45, %v8118_v57  ;;  %v8168_v45 = vmul.f32 %v8152_v16, %v8152_v16  ;;  %v8169_v33 = vmul.f32 %v8153_v44, %v8153_v44  ;;  %v8107_v1 = vmul.f32 %v8091_v11, %v8091_v11 }
 0x4d3   :  { %v8108_v40 = vmul.f32 %v8092_v5, %v8092_v5  ;;  %v8109_v21 = vmul.f32 %v8093_v51, %v8093_v51  ;;  %v8110_v14 = vmul.f32 %v8094_v20, %v8094_v20  ;;  %v8127_v59 = vsel %vm198_vm4, %v8105_v36, 0.0 }
 0x4d4   :  { %v8122_v60 = vadd.f32 %v8121_v49, %v8120_v19  ;;  %v8125_v19 = vsel %vm198_vm4, %v8104_v58, 0.0  ;;  %v8155_v49 = vsub.f32 %v24885_v55, %v25281_v34  ;;  %v8156_v29 = vsub.f32 %v24910_v56, %v25281_v34 }
 0x4d5   :  { %v8170_v8 = vmul.f32 %v8154_v53, %v8154_v53  ;;  %v8112_v16 = vmul.f32 %v8096_v54, %v8096_v54  ;;  %v8184_v58 = vsel %vm198_vm4, %v8168_v45, 0.0  ;;  %v8157_v11 = vsub.f32 %v24906_v41, %v25281_v34 }
 0x4d6   :  { %v8124_v57 = vadd.f32 %v8123_v52, %v8122_v60  ;;  %v8111_v60 = vmul.f32 %v8095_v4, %v8095_v4  ;;  %v8129_v52 = vsel %vm198_vm4, %v8106_v30, 0.0  ;;  %v8171_v44 = vmul.f32 %v8155_v49, %v8155_v49 }
 0x4d7   :  { %v8185_v5 = vsel %vm198_vm4, %v8169_v33, 0.0  ;;  %v8113_v51 = vmul.f32 %v8097_v18, %v8097_v18  ;;  %v8131_v36 = vsel %vm198_vm4, %v8107_v1, 0.0  ;;  %v8133_v53 = vsel %vm198_vm4, %v8108_v40, 0.0 }
 0x4d8   :  { %v8126_v37 = vadd.f32 %v8125_v19, %v8124_v57  ;;  %v8186_v57 = vadd.f32 %v8185_v5, %v8184_v58  ;;  %v8187_v4 = vsel %vm198_vm4, %v8170_v8, 0.0  ;;  %v8135_v54 = vsel %vm198_vm4, %v8109_v21, 0.0 }
 0x4d9   :  { %v8137_v45 = vsel %vm198_vm4, %v8110_v14, 0.0  ;;  %v8139_v18 = vsel %vm198_vm4, %v8111_v60, 0.0  ;;  %v8159_v1 = vsub.f32 %v24932_v22, %v25281_v34  ;;  %v8173_v49 = vmul.f32 %v8157_v11, %v8157_v11 }
 0x4da   :  { %v8128_v61 = vadd.f32 %v8127_v59, %v8126_v37  ;;  %v8158_v59 = vsub.f32 %v24945_v62, %v25281_v34  ;;  %v8172_v37 = vmul.f32 %v8156_v29, %v8156_v29  ;;  %v8188_v19 = vadd.f32 %v8187_v4, %v8186_v57 }
 0x4db   :  { %v8189_v33 = vsel %vm198_vm4, %v8171_v44, 0.0  ;;  %v8143_v29 = vsel %vm198_vm4, %v8113_v51, 0.0  ;;  %v8160_v21 = vsub.f32 %v24975_v38, %v25281_v34  ;;  %v8161_v14 = vsub.f32 %v24969_v28, %v25281_v34 }
 0x4dc   :  { %v8130_v20 = vadd.f32 %v8129_v52, %v8128_v61  ;;  %v8141_v61 = vsel %vm198_vm4, %v8112_v16, 0.0  ;;  %v8190_v8 = vadd.f32 %v8189_v33, %v8188_v19  ;;  %v8174_v58 = vmul.f32 %v8158_v59, %v8158_v59 }
 0x4dd   :  { %v8191_v60 = vsel %vm198_vm4, %v8172_v37, 0.0  ;;  %v8162_v11 = vsub.f32 %v25001_v15, %v25281_v34  ;;  %v8222_v16 = vsub.f32 %v25156_v46, %v25281_v34  ;;  %v8163_v5 = vsub.f32 %v24995_v12, %v25281_v34 }
 0x4de   :  { %v8132_v30 = vadd.f32 %v8131_v36, %v8130_v20  ;;  %v8192_v44 = vadd.f32 %v8191_v60, %v8190_v8  ;;  %v8175_v51 = vmul.f32 %v8159_v1, %v8159_v1  ;;  %v8193_v20 = vsel %vm198_vm4, %v8173_v49, 0.0 }
 0x4df   :  { %v8223_v36 = vsub.f32 %v25152_v24, %v25281_v34  ;;  %v8165_v59 = vsub.f32 %v25023_v48, %v25281_v34  ;;  %v8166_v4 = vsub.f32 %v25049_v39, %v25281_v34  ;;  %v8224_v19 = vsub.f32 %v25166_v35, %v25281_v34 }
 0x4e0   :  { %v8134_v40 = vadd.f32 %v8133_v53, %v8132_v30  ;;  %v8164_v53 = vsub.f32 %v25027_v27, %v25281_v34  ;;  %v8194_v37 = vadd.f32 %v8193_v20, %v8192_v44  ;;  %v8176_v30 = vmul.f32 %v8160_v21, %v8160_v21 }
 0x4e1   :  { %v8238_v33 = vmul.f32 %v8222_v16, %v8222_v16  ;;  %v8197_v8 = vsel %vm198_vm4, %v8175_v51, 0.0  ;;  %v8225_v60 = vsub.f32 %v25160_v17, %v25281_v34  ;;  %v8178_v21 = vmul.f32 %v8162_v11, %v8162_v11 }
 0x4e2   :  { %v8136_v52 = vadd.f32 %v8135_v54, %v8134_v40  ;;  %v8195_v54 = vsel %vm198_vm4, %v8174_v58, 0.0  ;;  %v8177_v40 = vmul.f32 %v8161_v14, %v8161_v14  ;;  %v8179_v20 = vmul.f32 %v8163_v5, %v8163_v5 }
 0x4e3   :  { %v8196_v49 = vadd.f32 %v8195_v54, %v8194_v37  ;;  %v8180_v24 = vmul.f32 %v8164_v53, %v8164_v53  ;;  %v8199_v35 = vsel %vm198_vm4, %v8176_v30, 0.0  ;;  %v8181_v16 = vmul.f32 %v8165_v59, %v8165_v59 }
 0x4e4   :  { %v8138_v57 = vadd.f32 %v8137_v45, %v8136_v52  ;;  %v8167_v45 = vsub.f32 %v25045_v9, %v25281_v34  ;;  %v8239_v52 = vmul.f32 %v8223_v36, %v8223_v36  ;;  %v8254_v51 = vsel %vm198_vm4, %v8238_v33, 0.0 }
 0x4e5   :  { %v8198_v58 = vadd.f32 %v8197_v8, %v8196_v49  ;;  %v8201_v54 = vsel %vm198_vm4, %v8177_v40, 0.0  ;;  %v8241_v11 = vmul.f32 %v8225_v60, %v8225_v60  ;;  %v8182_v36 = vmul.f32 %v8166_v4, %v8166_v4 }
 0x4e6   :  { %v8140_v1 = vadd.f32 %v8139_v18, %v8138_v57  ;;  %v8226_v18 = vsub.f32 %v25180_v23, %v25281_v34  ;;  %v8240_v57 = vmul.f32 %v8224_v19, %v8224_v19  ;;  %v8255_v5 = vsel %vm198_vm4, %v8239_v52, 0.0 }
 0x4e7   :  { %v8200_v14 = vadd.f32 %v8199_v35, %v8198_v58  ;;  %v8183_v53 = vmul.f32 %v8167_v45, %v8167_v45  ;;  %v8203_v49 = vsel %vm198_vm4, %v8178_v21, 0.0  ;;  %v8205_v40 = vsel %vm198_vm4, %v8179_v20, 0.0  ;;  %v25401_v20 = vld [vmem:[#allocation3 + $0x281] sm:$0xff] }
 0x4e8   :  { %v8142_v44 = vadd.f32 %v8141_v61, %v8140_v1  ;;  %v8227_v61 = vsub.f32 %v25176_v43, %v25281_v34  ;;  %v8256_v1 = vadd.f32 %v8255_v5, %v8254_v51  ;;  %v8242_v35 = vmul.f32 %v8226_v18, %v8226_v18  ;;  %29064 = vst [vmem:[#allocation42_spill] sm:$0xff] %v25401_v20 }
 0x4e9   :  { %v8202_v30 = vadd.f32 %v8201_v54, %v8200_v14  ;;  %v8257_v59 = vsel %vm198_vm4, %v8240_v57, 0.0  ;;  %v8207_v60 = vsel %vm198_vm4, %v8180_v24, 0.0  ;;  %v8229_v4 = vsub.f32 %v25192_v50, %v25281_v34  ;;  %v29065_v14 = vld [vmem:[#allocation39_spill] sm:$0xff]  ;;  %20015 = vmatprep.mubr.msk.f32.mxu1 %vm198_vm4, %v25401_v20 }
 0x4ea   :  { %v8144_v37 = vadd.f32 %v8143_v29, %v8142_v44  ;;  %v8228_v29 = vsub.f32 %v25196_v25, %v25281_v34  ;;  %v8258_v8 = vadd.f32 %v8257_v59, %v8256_v1  ;;  %v8243_v45 = vmul.f32 %v8227_v61, %v8227_v61  ;;  %v8677_v44 = vld [vmem:[%s28652_s7 + $0x8] sm:$0xff]  ;;  %v29068_v59 = vld [vmem:[#allocation14_spill] sm:$0xff] }
 0x4eb   :  { %v8204_v33 = vadd.f32 %v8203_v49, %v8202_v30  ;;  %v8259_v52 = vsel %vm198_vm4, %v8241_v11, 0.0  ;;  %v8209_v58 = vsel %vm198_vm4, %v8181_v16, 0.0  ;;  %v8211_v18 = vsel %vm198_vm4, %v8182_v36, 0.0  ;;  %20013 = vmatprep.subr.mxu1 %v8677_v44  ;;  %20247 = vmatprep.subr.mxu0 %v8677_v44  ;;  %v25411_v16 = vld [vmem:[%s28652_s7] sm:$0xff]  ;;  %v29067_v30 = vld [vmem:[#allocation17_spill] sm:$0xff] }
 0x4ec   :  { %v8145_v19 = vrot.slane %v8144_v37, 4  ;;  %v8260_v57 = vadd.f32 %v8259_v52, %v8258_v8  ;;  %v8230_v24 = vsub.f32 %v25212_v13, %v25281_v34  ;;  %v8231_v51 = vsub.f32 %v29065_v14, %v25281_v34  ;;  %20014 = vmatpush3.msra.mxu1 %v8677_v44  ;;  %29066 = vst [vmem:[#allocation43_spill] sm:$0xff] %v25411_v16  ;;  %v9064_v11 = vld [vmem:[#allocation3 + $0x3c1] sm:$0xff] }
 0x4ed   :  { %v8206_v21 = vadd.f32 %v8205_v40, %v8204_v33  ;;  %v8244_v54 = vmul.f32 %v8228_v29, %v8228_v29  ;;  %v8261_v61 = vsel %vm198_vm4, %v8242_v35, 0.0  ;;  %v8232_v1 = vsub.f32 %v29067_v30, %v25281_v34  ;;  %20248 = vmatpush3.msra.mxu0 %v8677_v44  ;;  %v29069_v29 = vld [vmem:[#allocation25_spill] sm:$0xff]  ;;  %20039 = vmatprep.subr.mxu1 %v25411_v16 }
 0x4ee   :  { %v8146_v5 = vadd.f32 %v8145_v19, %v8144_v37  ;;  %v8262_v49 = vadd.f32 %v8261_v61, %v8260_v57  ;;  %v8233_v33 = vsub.f32 %v29068_v59, %v25281_v34  ;;  %v8234_v35 = vsub.f32 %v29069_v29, %v25281_v34  ;;  %20249 = vmatprep.mubr.msk.f32.mxu0 %vm198_vm4, %v9064_v11  ;;  %v29071_v44 = vld [vmem:[#allocation21_spill] sm:$0xff]  ;;  %v29072_v61 = vld [vmem:[#allocation24_spill] sm:$0xff] }
 0x4ef   :  { %v8208_v36 = vadd.f32 %v8207_v60, %v8206_v21  ;;  %v8245_v40 = vmul.f32 %v8229_v4, %v8229_v4  ;;  %v8263_v8 = vsel %vm198_vm4, %v8243_v45, 0.0  ;;  %v8213_v37 = vsel %vm198_vm4, %v8183_v53, 0.0  ;;  %v29070_v60 = vld [vmem:[#allocation28_spill] sm:$0xff]  ;;  %20273 = vmatprep.subr.mxu0 %v25411_v16 }
 0x4f0   :  { %v8264_v19 = vadd.f32 %v8263_v8, %v8262_v49  ;;  %v8292_v21 = vsub.f32 %v29070_v60, %v25281_v34  ;;  %v8235_v57 = vsub.f32 %v29071_v44, %v25281_v34  ;;  %v8246_v4 = vmul.f32 %v8230_v24, %v8230_v24  ;;  %v29074_v60 = vld [vmem:[#allocation29_spill] sm:$0xff]  ;;  %v29075_v24 = vld [vmem:[#allocation32_spill] sm:$0xff] }
 0x4f1   :  { %v8210_v52 = vadd.f32 %v8209_v58, %v8208_v36  ;;  %v8265_v45 = vsel %vm198_vm4, %v8244_v54, 0.0  ;;  %v8293_v20 = vsub.f32 %v29072_v61, %v25281_v34  ;;  %v8147_v53 = vrot.slane %v8146_v5, 2  ;;  %v29073_v36 = vld [vmem:[#allocation33_spill] sm:$0xff] }
 0x4f2   :  { %v8236_v49 = vsub.f32 %v29073_v36, %v25281_v34  ;;  %v8266_v8 = vadd.f32 %v8265_v45, %v8264_v19  ;;  %v8237_v11 = vsub.f32 %v29074_v60, %v25281_v34  ;;  %v8247_v29 = vmul.f32 %v8231_v51, %v8231_v51 }
 0x4f3   :  { %v8212_v58 = vadd.f32 %v8211_v18, %v8210_v52  ;;  %v8267_v44 = vsel %vm198_vm4, %v8245_v40, 0.0  ;;  %v8294_v54 = vsub.f32 %v29075_v24, %v25281_v34  ;;  %v8248_v30 = vmul.f32 %v8232_v1, %v8232_v1  ;;  %v29076_v52 = vld [vmem:[#allocation30_spill] sm:$0xff] }
 0x4f4   :  { %v8268_v61 = vadd.f32 %v8267_v44, %v8266_v8  ;;  %v8308_v14 = vmul.f32 %v8292_v21, %v8292_v21  ;;  %v8249_v16 = vmul.f32 %v8233_v33, %v8233_v33  ;;  %v8269_v18 = vsel %vm198_vm4, %v8246_v4, 0.0  ;;  %v29077_v24 = vld [vmem:[#allocation38_spill] sm:$0xff] }
 0x4f5   :  { %v8214_v59 = vadd.f32 %v8213_v37, %v8212_v58  ;;  %v8295_v36 = vsub.f32 %v29076_v52, %v25281_v34  ;;  %v8309_v19 = vmul.f32 %v8293_v20, %v8293_v20  ;;  %v8148_v45 = vadd.f32 %v8147_v53, %v8146_v5  ;;  %v29078_v20 = vld [vmem:[#allocation36_spill] sm:$0xff] }
 0x4f6   :  { %v8250_v60 = vmul.f32 %v8234_v35, %v8234_v35  ;;  %v8270_v51 = vadd.f32 %v8269_v18, %v8268_v61  ;;  %v8251_v50 = vmul.f32 %v8235_v57, %v8235_v57  ;;  %v8271_v40 = vsel %vm198_vm4, %v8247_v29, 0.0 }
 0x4f7   :  { %v8215_v13 = vrot.slane %v8214_v59, 4  ;;  %v8296_v37 = vsub.f32 %v29077_v24, %v25281_v34  ;;  %v8310_v1 = vmul.f32 %v8294_v54, %v8294_v54  ;;  %v8252_v21 = vmul.f32 %v8236_v49, %v8236_v49 }
 0x4f8   :  { %v8272_v33 = vadd.f32 %v8271_v40, %v8270_v51  ;;  %v8324_v4 = vsel %vm198_vm4, %v8308_v14, 0.0  ;;  %v8273_v58 = vsel %vm198_vm4, %v8248_v30, 0.0  ;;  %v8297_v5 = vsub.f32 %v29078_v20, %v25281_v34 }
 0x4f9   :  { %v8216_v44 = vadd.f32 %v8215_v13, %v8214_v59  ;;  %v8311_v53 = vmul.f32 %v8295_v36, %v8295_v36  ;;  %v8325_v35 = vsel %vm198_vm4, %v8309_v19, 0.0  ;;  %v8149_v57 = vrot.slane %v8148_v45, 1  ;;  %v29079_v13 = vld [vmem:[#allocation12_spill] sm:$0xff] }
 0x4fa   :  { %v8274_v29 = vadd.f32 %v8273_v58, %v8272_v33  ;;  %v8326_v8 = vadd.f32 %v8325_v35, %v8324_v4  ;;  %v8275_v18 = vsel %vm198_vm4, %v8249_v16, 0.0  ;;  %v8298_v59 = vsub.f32 %v29079_v13, %v25281_v34  ;;  %v29080_v19 = vld [vmem:[#allocation8_spill] sm:$0xff] }
 0x4fb   :  { %v8217_v61 = vrot.slane %v8216_v44, 2  ;;  %v8312_v49 = vmul.f32 %v8296_v37, %v8296_v37  ;;  %v8327_v14 = vsel %vm198_vm4, %v8310_v1, 0.0  ;;  %v8253_v30 = vmul.f32 %v8237_v11, %v8237_v11  ;;  %v29081_v1 = vld [vmem:[#allocation19_spill] sm:$0xff] }
 0x4fc   :  { %v8276_v51 = vadd.f32 %v8275_v18, %v8274_v29  ;;  %v8328_v40 = vadd.f32 %v8327_v14, %v8326_v8  ;;  %v8277_v36 = vsel %vm198_vm4, %v8250_v60, 0.0  ;;  %v8299_v20 = vsub.f32 %v29080_v19, %v25281_v34 }
 0x4fd   :  { %v8218_v54 = vadd.f32 %v8217_v61, %v8216_v44  ;;  %v8313_v24 = vmul.f32 %v8297_v5, %v8297_v5  ;;  %v8329_v33 = vsel %vm198_vm4, %v8311_v53, 0.0  ;;  %v8150_v4 = vadd.f32 %v8149_v57, %v8148_v45  ;;  %v29082_v5 = vld [vmem:[#allocation16_spill] sm:$0xff] }
 0x4fe   :  { %v8278_v58 = vadd.f32 %v8277_v36, %v8276_v51  ;;  %v8330_v35 = vadd.f32 %v8329_v33, %v8328_v40  ;;  %v8279_v37 = vsel %vm198_vm4, %v8251_v50, 0.0  ;;  %v8300_v44 = vsub.f32 %v29081_v1, %v25281_v34 }
 0x4ff   :  { %v8219_v16 = vrot.slane %v8218_v54, 1  ;;  %v8314_v11 = vmul.f32 %v8298_v59, %v8298_v59  ;;  %v8331_v61 = vsel %vm198_vm4, %v8312_v49, 0.0  ;;  %v8281_v18 = vsel %vm198_vm4, %v8252_v21, 0.0  ;;  %v29083_v59 = vld [vmem:[#allocation27_spill] sm:$0xff] }
 0x500   :  { %v8280_v60 = vadd.f32 %v8279_v37, %v8278_v58  ;;  %v8332_v8 = vadd.f32 %v8331_v61, %v8330_v35  ;;  %v8301_v53 = vsub.f32 %v29082_v5, %v25281_v34  ;;  %v8315_v45 = vmul.f32 %v8299_v20, %v8299_v20  ;;  %v29084_v21 = vld [vmem:[#allocation23_spill] sm:$0xff] }
 0x501   :  { %v8220_v29 = vadd.f32 %v8219_v16, %v8218_v54  ;;  %v8333_v57 = vsel %vm198_vm4, %v8313_v24, 0.0  ;;  %v8283_v40 = vsel %vm198_vm4, %v8253_v30, 0.0  ;;  %v8302_v36 = vsub.f32 %v29083_v59, %v25281_v34  ;;  %v29085_v37 = vld [vmem:[#allocation35_spill] sm:$0xff] }
 0x502   :  { %v8282_v51 = vadd.f32 %v8281_v18, %v8280_v60  ;;  %v8334_v50 = vadd.f32 %v8333_v57, %v8332_v8  ;;  %v8316_v49 = vmul.f32 %v8300_v44, %v8300_v44  ;;  %v8335_v54 = vsel %vm198_vm4, %v8314_v11, 0.0  ;;  %v29086_v11 = vld [vmem:[#allocation31_spill] sm:$0xff] }
 0x503   :  { %v8221_v14 = vadd.f32 %v8220_v29, %v8150_v4  ;;  %v8303_v58 = vsub.f32 %v29084_v21, %v25281_v34  ;;  %v8317_v35 = vmul.f32 %v8301_v53, %v8301_v53  ;;  %v8337_v20 = vsel %vm198_vm4, %v8315_v45, 0.0  ;;  %v29087_v45 = vld [vmem:[#allocation41_spill] sm:$0xff] }
 0x504   :  { %v8284_v33 = vadd.f32 %v8283_v40, %v8282_v51  ;;  %v8336_v16 = vadd.f32 %v8335_v54, %v8334_v50  ;;  %v8304_v61 = vsub.f32 %v29085_v37, %v25281_v34  ;;  %v8318_v30 = vmul.f32 %v8302_v36, %v8302_v36 }
 0x505   :  { %v8339_v29 = vsel %vm198_vm4, %v8316_v49, 0.0  ;;  %v8305_v8 = vsub.f32 %v29086_v11, %v25281_v34  ;;  %v8319_v18 = vmul.f32 %v8303_v58, %v8303_v58  ;;  %v8341_v57 = vsel %vm198_vm4, %v8317_v35, 0.0 }
 0x506   :  { %v8285_v24 = vrot.slane %v8284_v33, 4  ;;  %v8338_v4 = vadd.f32 %v8337_v20, %v8336_v16  ;;  %v8306_v50 = vsub.f32 %v29087_v45, %v25281_v34  ;;  %v8320_v40 = vmul.f32 %v8304_v61, %v8304_v61 }
 0x507   :  { %v8343_v54 = vsel %vm198_vm4, %v8318_v30, 0.0  ;;  %v8307_v49 = vsub.f32 %v25272_v47, %v25281_v34  ;;  %v8345_v20 = vsel %vm198_vm4, %v8319_v18, 0.0 }
 0x508   :  { %v8286_v60 = vadd.f32 %v8285_v24, %v8284_v33  ;;  %v8340_v44 = vadd.f32 %v8339_v29, %v8338_v4  ;;  %v8321_v33 = vmul.f32 %v8305_v8, %v8305_v8  ;;  %v8322_v4 = vmul.f32 %v8306_v50, %v8306_v50 }
 0x509   :  { %v8347_v35 = vsel %vm198_vm4, %v8320_v40, 0.0 }
 0x50a   :  { %v8287_v51 = vrot.slane %v8286_v60, 2  ;;  %v8342_v53 = vadd.f32 %v8341_v57, %v8340_v44  ;;  %v8323_v57 = vmul.f32 %v8307_v49, %v8307_v49  ;;  %v8349_v61 = vsel %vm198_vm4, %v8321_v33, 0.0 }
 0x50b   :  { %v8371_v49 = vlaneseq }
 0x50c   :  { %v8288_v16 = vadd.f32 %v8287_v51, %v8286_v60  ;;  %v8344_v36 = vadd.f32 %v8343_v54, %v8342_v53  ;;  %v8351_v60 = vsel %vm198_vm4, %v8322_v4, 0.0  ;;  %v8353_v53 = vsel %vm198_vm4, %v8323_v57, 0.0 }
 0x50d   :  { %v8372_v33 = vshrl.u32 %v8371_v49, 7  ;;  %v29096_v49 = vld [vmem:[#allocation11_spill] sm:$0xff] }
 0x50e   :  { %v8289_v24 = vrot.slane %v8288_v16, 1  ;;  %v8346_v58 = vadd.f32 %v8345_v20, %v8344_v36 }
 0x510   :  { %v8290_v29 = vadd.f32 %v8289_v24, %v8288_v16  ;;  %v8348_v44 = vadd.f32 %v8347_v35, %v8346_v58  ;;  %v25493_v58 = vsub.s32 0, %v8372_v33 }
 0x512   :  { %v8291_v11 = vadd.f32 %v8290_v29, %v8221_v14  ;;  %v8350_v30 = vadd.f32 %v8349_v61, %v8348_v44  ;;  %v8363_v14 = vld [vmem:[%s28650_s5] sm:$0x1]  ;;  %29088 = vst [vmem:[#allocation44_spill] sm:$0xff] %v25493_v58  ;;  %s22126_s5 = smov 64  }
 0x514   :  { %v8352_v51 = vadd.f32 %v8351_v60, %v8350_v30 }
 0x516   :  { %v8354_v8 = vadd.f32 %v8353_v53, %v8352_v51  ;;  %v29089_v53 = vld [vmem:[#allocation13_spill] sm:$0xff] }
 0x518   :  { %v8355_v54 = vrot.slane %v8354_v8, 4 }
 0x51a   :  { %v8356_v18 = vadd.f32 %v8355_v54, %v8354_v8  ;;  %v29090_v8 = vld [vmem:[#allocation18_spill] sm:$0xff] }
 0x51c   :  { %v8357_v47 = vrot.slane %v8356_v18, 2 }
 0x51e   :  { %v8358_v36 = vadd.f32 %v8357_v47, %v8356_v18  ;;  %v8367_v47 = vld [vmem:[%s28651_s6] sm:$0x1]  ;;  %s22127_s6 = smov 96  }
 0x520   :  { %v8359_v50 = vrot.slane %v8358_v36, 1 }
 0x522   :  { %v8360_v20 = vadd.f32 %v8359_v50, %v8358_v36 }
 0x524   :  { %v8361_v40 = vadd.f32 %v8360_v20, %v8291_v11  ;;  %v29094_v20 = vld [vmem:[#allocation9_spill] sm:$0xff] }
 0x526   :  { %v8362_v16 = vmul.f32 0.001953125, %v8361_v40 }
 0x528   :  { %v8364_v24 = vadd.f32 1e-05, %v8362_v16  ;;  %v29095_v16 = vld [vmem:[#allocation7_spill] sm:$0xff] }
 0x52a   :  { %21988 = vrsqrt.f32 %v8364_v24 }
 0x534   :  { %v21989_v4 = vpop.eup %21988 }
 0x535   :  { %v8366_v35 = vmul.f32 %v21989_v4, %v8363_v14 }
 0x537   :  { %v8368_v29 = vmul.f32 %v8366_v35, %v25281_v34  ;;  %v25500_v11 = vrot.slane %v8366_v35, %v25493_v58 }
 0x539   :  { %v8369_v44 = vsub.f32 %v8367_v47, %v8368_v29  ;;  %v8540_v57 = vmul.f32 %v25500_v11, %v29087_v45  ;;  %v25506_v61 = vmul.f32 %v25500_v11, %v24855_v63  ;;  %v25510_v30 = vmul.f32 %v24851_v6, %v25500_v11 }
 0x53a   :  { %v25514_v60 = vmul.f32 %v25500_v11, %v24869_v2  ;;  %v25518_v34 = vmul.f32 %v24863_v10, %v25500_v11  ;;  %v25522_v51 = vmul.f32 %v25500_v11, %v24887_v0  ;;  %v25526_v63 = vmul.f32 %v24883_v31, %v25500_v11 }
 0x53b   :  { %v25529_v45 = vrot.slane %v8369_v44, %v25493_v58  ;;  %v25533_v6 = vmul.f32 %v25500_v11, %v24908_v3  ;;  %v25537_v2 = vmul.f32 %v24904_v42, %v25500_v11  ;;  %v25541_v10 = vmul.f32 %v25500_v11, %v24943_v7  ;;  %v29091_v7 = vld [vmem:[#allocation15_spill] sm:$0xff]  ;;  %v29112_v58 = vld [vmem:[#allocation28_spill] sm:$0xff] }
 0x53c   :  { %v25545_v0 = vmul.f32 %v24930_v26, %v25500_v11  ;;  %v25549_v31 = vmul.f32 %v25500_v11, %v24973_v32  ;;  %v25553_v3 = vmul.f32 %v29089_v53, %v25500_v11  ;;  %v25557_v42 = vmul.f32 %v25500_v11, %v29090_v8  ;;  %v29092_v26 = vld [vmem:[#allocation20_spill] sm:$0xff]  ;;  %v29098_v53 = vld [vmem:[#allocation26_spill] sm:$0xff] }
 0x53d   :  { %v8556_v54 = vadd.f32 %v8540_v57, %v25529_v45  ;;  %v25562_v18 = vmul.f32 %v29091_v7, %v25500_v11  ;;  %v25566_v36 = vmul.f32 %v25500_v11, %v29092_v26  ;;  %v29093_v32 = vld [vmem:[#allocation40_spill] sm:$0xff]  ;;  %v25574_v40 = vmul.f32 %v25500_v11, %v29094_v20  ;;  %v29097_v57 = vld [vmem:[#allocation22_spill] sm:$0xff]  ;;  %v29102_v20 = vld [vmem:[#allocation17_spill] sm:$0xff] }
 0x53e   :  { %v25570_v50 = vmul.f32 %v29093_v32, %v25500_v11  ;;  %v25578_v24 = vmul.f32 %v29095_v16, %v25500_v11  ;;  %v25582_v33 = vmul.f32 %v25500_v11, %v29096_v49  ;;  %v25586_v14 = vmul.f32 %v24885_v55, %v25500_v11  ;;  %v29100_v26 = vld [vmem:[#allocation10_spill] sm:$0xff]  ;;  %v29101_v32 = vld [vmem:[#allocation39_spill] sm:$0xff]  ;;  %v29105_v49 = vld [vmem:[#allocation25_spill] sm:$0xff] }
 0x53f   :  { %v8572_v4 = vmax.f32 %v8556_v54, 0.0  ;;  %v25590_v35 = vmul.f32 %v25500_v11, %v24910_v56  ;;  %v25594_v47 = vmul.f32 %v24906_v41, %v25500_v11  ;;  %v25598_v29 = vmul.f32 %v25500_v11, %v24945_v62  ;;  %v29099_v54 = vld [vmem:[#allocation34_spill] sm:$0xff] }
 0x540   :  { %v25602_v44 = vmul.f32 %v24932_v22, %v25500_v11  ;;  %v25606_v55 = vmul.f32 %v25500_v11, %v24975_v38  ;;  %v25610_v56 = vmul.f32 %v24969_v28, %v25500_v11  ;;  %v25614_v41 = vmul.f32 %v25500_v11, %v25001_v15  ;;  %v29103_v16 = vld [vmem:[#allocation14_spill] sm:$0xff] }
 0x541   :  { %8640 = vst.msk [vmem:[#allocation3 + $0x4d1] sm:$0xff] %vm198_vm4, %v8572_v4  ;;  %v25619_v62 = vmul.f32 %v24995_v12, %v25500_v11  ;;  %v25623_v22 = vmul.f32 %v25500_v11, %v25027_v27  ;;  %v25627_v38 = vmul.f32 %v25023_v48, %v25500_v11  ;;  %v25631_v28 = vmul.f32 %v25500_v11, %v25049_v39 }
 0x542   :  { %v25635_v15 = vmul.f32 %v25045_v9, %v25500_v11  ;;  %v25639_v12 = vmul.f32 %v25500_v11, %v25156_v46  ;;  %v25643_v27 = vmul.f32 %v29097_v57, %v25500_v11  ;;  %v25647_v48 = vmul.f32 %v25500_v11, %v29098_v53  ;;  %v29107_v57 = vld [vmem:[#allocation21_spill] sm:$0xff] }
 0x543   :  { %v25651_v39 = vmul.f32 %v25160_v17, %v25500_v11  ;;  %v25655_v9 = vmul.f32 %v25500_v11, %v25180_v23  ;;  %v25659_v46 = vmul.f32 %v25176_v43, %v25500_v11  ;;  %v25663_v8 = vmul.f32 %v25500_v11, %v25196_v25 }
 0x544   :  { %v25667_v7 = vmul.f32 %v29099_v54, %v25500_v11  ;;  %v25671_v17 = vmul.f32 %v25500_v11, %v29100_v26  ;;  %v25675_v23 = vmul.f32 %v29101_v32, %v25500_v11  ;;  %v25679_v43 = vmul.f32 %v25500_v11, %v29102_v20  ;;  %v29108_v54 = vld [vmem:[#allocation33_spill] sm:$0xff] }
 0x545   :  { %v25683_v25 = vmul.f32 %v29103_v16, %v25500_v11  ;;  %v25687_v4 = vmul.f32 %v25500_v11, %v29105_v49  ;;  %v25691_v53 = vmul.f32 %v29107_v57, %v25500_v11  ;;  %v25695_v26 = vmul.f32 %v25500_v11, %v29108_v54  ;;  %v29110_v32 = vld [vmem:[#allocation29_spill] sm:$0xff] }
 0x546   :  { %v25699_v20 = vmul.f32 %v29110_v32, %v25500_v11  ;;  %v25703_v16 = vmul.f32 %v25500_v11, %v29112_v58  ;;  %v25715_v54 = vmul.f32 %v29076_v52, %v25500_v11  ;;  %v25735_v52 = vmul.f32 %v25500_v11, %v29081_v1 }
 0x547   :  { %29104 = vst [vmem:[#allocation45_spill] sm:$0xff] %v25683_v25  ;;  %29106 = vst [vmem:[#allocation46_spill] sm:$0xff] %v25687_v4  ;;  %v29113_v25 = vld [vmem:[#allocation24_spill] sm:$0xff] }
 0x548   :  { %29109 = vst [vmem:[#allocation47_spill] sm:$0xff] %v25695_v26  ;;  %29111 = vst [vmem:[#allocation48_spill] sm:$0xff] %v25699_v20  ;;  %v25707_v49 = vmul.f32 %v29113_v25, %v25500_v11  ;;  %v29114_v4 = vld [vmem:[#allocation32_spill] sm:$0xff]  ;;  %v29115_v26 = vld [vmem:[#allocation38_spill] sm:$0xff]  ;;  %v25727_v25 = vmul.f32 %v25500_v11, %v29079_v13  ;;  %v25747_v13 = vmul.f32 %v29084_v21, %v25500_v11 }
 0x549   :  { %v25711_v57 = vmul.f32 %v25500_v11, %v29114_v4  ;;  %v25719_v32 = vmul.f32 %v25500_v11, %v29115_v26  ;;  %v29117_v20 = vld [vmem:[#allocation36_spill] sm:$0xff]  ;;  %v25731_v4 = vmul.f32 %v29080_v19, %v25500_v11  ;;  %29121 = vst [vmem:[#allocation53_spill] sm:$0xff] %v25735_v52  ;;  %v25739_v26 = vmul.f32 %v29082_v5, %v25500_v11  ;;  %v29128_v52 = vld [vmem:[#allocation37_spill] sm:$0xff] }
 0x54a   :  { %v25723_v58 = vmul.f32 %v29117_v20, %v25500_v11  ;;  %29119 = vst [vmem:[#allocation51_spill] sm:$0xff] %v25727_v25  ;;  %v25743_v20 = vmul.f32 %v25500_v11, %v29083_v59  ;;  %29124 = vst [vmem:[#allocation12_spill] sm:$0xff] %v25747_v13  ;;  %v25751_v19 = vmul.f32 %v25500_v11, %v29085_v37 }
 0x54b   :  { %29116 = vst [vmem:[#allocation49_spill] sm:$0xff] %v25719_v32  ;;  %29120 = vst [vmem:[#allocation52_spill] sm:$0xff] %v25731_v4  ;;  %v29126_v4 = vld [vmem:[#allocation31_spill] sm:$0xff]  ;;  %v25759_v5 = vmul.f32 %v29128_v52, %v25500_v11  ;;  %v8398_v59 = vadd.f32 %v25529_v45, %v25506_v61  ;;  %v8400_v21 = vadd.f32 %v25529_v45, %v25514_v60 }
 0x54c   :  { %29118 = vst [vmem:[#allocation50_spill] sm:$0xff] %v25723_v58  ;;  %29122 = vst [vmem:[#allocation54_spill] sm:$0xff] %v25739_v26  ;;  %v25755_v1 = vmul.f32 %v29126_v4, %v25500_v11  ;;  %v8401_v37 = vadd.f32 %v25529_v45, %v25518_v34  ;;  %v8402_v4 = vadd.f32 %v25529_v45, %v25522_v51 }
 0x54d   :  { %29123 = vst [vmem:[#allocation30_spill] sm:$0xff] %v25743_v20  ;;  %29125 = vst [vmem:[#allocation8_spill] sm:$0xff] %v25751_v19  ;;  %v8399_v20 = vadd.f32 %v25529_v45, %v25510_v30  ;;  %v8404_v11 = vadd.f32 %v25529_v45, %v25533_v6  ;;  %v8405_v61 = vadd.f32 %v25529_v45, %v25537_v2  ;;  %v8414_v52 = vmax.f32 %v8398_v59, 0.0 }
 0x54e   :  { %29127 = vst [vmem:[#allocation19_spill] sm:$0xff] %v25755_v1  ;;  %29129 = vst [vmem:[#allocation16_spill] sm:$0xff] %v25759_v5  ;;  %v8403_v1 = vadd.f32 %v25529_v45, %v25526_v63  ;;  %v8406_v30 = vadd.f32 %v25529_v45, %v25541_v10  ;;  %v8407_v60 = vadd.f32 %v25529_v45, %v25545_v0  ;;  %v8416_v5 = vmax.f32 %v8400_v21, 0.0 }
 0x54f   :  { %v8408_v34 = vadd.f32 %v25529_v45, %v25549_v31  ;;  %v8409_v51 = vadd.f32 %v25529_v45, %v25553_v3  ;;  %v8410_v63 = vadd.f32 %v25529_v45, %v25557_v42  ;;  %v8411_v6 = vadd.f32 %v25529_v45, %v25562_v18  ;;  %8575 = vst.msk [vmem:[#allocation3 + $0x11] sm:$0xff] %vm198_vm4, %v8414_v52 }
 0x550   :  { %v8412_v2 = vadd.f32 %v25529_v45, %v25566_v36  ;;  %v8413_v10 = vadd.f32 %v25529_v45, %v25570_v50  ;;  %v8415_v0 = vmax.f32 %v8399_v20, 0.0  ;;  %v8417_v19 = vmax.f32 %v8401_v37, 0.0  ;;  %8577 = vst.msk [vmem:[#allocation3 + $0x31] sm:$0xff] %vm198_vm4, %v8416_v5 }
 0x551   :  { %v8418_v31 = vmax.f32 %v8402_v4, 0.0  ;;  %v8419_v13 = vmax.f32 %v8403_v1, 0.0  ;;  %v8420_v26 = vmax.f32 %v8404_v11, 0.0  ;;  %v8421_v3 = vmax.f32 %v8405_v61, 0.0 }
 0x552   :  { %v8422_v25 = vmax.f32 %v8406_v30, 0.0  ;;  %v8423_v58 = vmax.f32 %v8407_v60, 0.0  ;;  %v8424_v42 = vmax.f32 %v8408_v34, 0.0  ;;  %v8425_v32 = vmax.f32 %v8409_v51, 0.0  ;;  %8576 = vst.msk [vmem:[#allocation3 + $0x21] sm:$0xff] %vm198_vm4, %v8415_v0  ;;  %8578 = vst.msk [vmem:[#allocation3 + $0x41] sm:$0xff] %vm198_vm4, %v8417_v19 }
 0x553   :  { %v8426_v18 = vmax.f32 %v8410_v63, 0.0  ;;  %v8427_v36 = vmax.f32 %v8411_v6, 0.0  ;;  %v8428_v50 = vmax.f32 %v8412_v2, 0.0  ;;  %v8429_v20 = vmax.f32 %v8413_v10, 0.0  ;;  %8579 = vst.msk [vmem:[#allocation3 + $0x51] sm:$0xff] %vm198_vm4, %v8418_v31  ;;  %8580 = vst.msk [vmem:[#allocation3 + $0x61] sm:$0xff] %vm198_vm4, %v8419_v13 }
 0x554   :  { %8581 = vst.msk [vmem:[#allocation3 + $0x71] sm:$0xff] %vm198_vm4, %v8420_v26  ;;  %8582 = vst.msk [vmem:[#allocation3 + $0x81] sm:$0xff] %vm198_vm4, %v8421_v3  ;;  %v8446_v1 = vadd.f32 %v25574_v40, %v25529_v45  ;;  %v8447_v5 = vadd.f32 %v25578_v24, %v25529_v45  ;;  %v8448_v19 = vadd.f32 %v25582_v33, %v25529_v45  ;;  %v29130_v2 = vld [vmem:[#allocation45_spill] sm:$0xff]  ;;  %v29131_v10 = vld [vmem:[#allocation46_spill] sm:$0xff] }
 0x555   :  { %v8449_v59 = vadd.f32 %v25586_v14, %v25529_v45  ;;  %8583 = vst.msk [vmem:[#allocation3 + $0xb1] sm:$0xff] %vm198_vm4, %v8422_v25  ;;  %8584 = vst.msk [vmem:[#allocation3 + $0xc1] sm:$0xff] %vm198_vm4, %v8423_v58  ;;  %v8450_v40 = vadd.f32 %v25590_v35, %v25529_v45  ;;  %v8451_v24 = vadd.f32 %v25594_v47, %v25529_v45  ;;  %v29132_v31 = vld [vmem:[#allocation47_spill] sm:$0xff] }
 0x556   :  { %8585 = vst.msk [vmem:[#allocation3 + $0xd1] sm:$0xff] %vm198_vm4, %v8424_v42  ;;  %8586 = vst.msk [vmem:[#allocation3 + $0xe1] sm:$0xff] %vm198_vm4, %v8425_v32  ;;  %v8452_v33 = vadd.f32 %v25598_v29, %v25529_v45  ;;  %v8453_v14 = vadd.f32 %v25602_v44, %v25529_v45  ;;  %v8454_v35 = vadd.f32 %v25606_v55, %v25529_v45  ;;  %v8462_v26 = vmax.f32 %v8446_v1, 0.0 }
 0x557   :  { %8587 = vst.msk [vmem:[#allocation3 + $0xf1] sm:$0xff] %vm198_vm4, %v8426_v18  ;;  %8588 = vst.msk [vmem:[#allocation3 + $0x101] sm:$0xff] %vm198_vm4, %v8427_v36  ;;  %v8455_v47 = vadd.f32 %v25610_v56, %v25529_v45  ;;  %v8456_v29 = vadd.f32 %v25614_v41, %v25529_v45  ;;  %v8457_v44 = vadd.f32 %v25619_v62, %v25529_v45  ;;  %v8463_v56 = vmax.f32 %v8447_v5, 0.0 }
 0x558   :  { %8589 = vst.msk [vmem:[#allocation3 + $0x111] sm:$0xff] %vm198_vm4, %v8428_v50  ;;  %8590 = vst.msk [vmem:[#allocation3 + $0x121] sm:$0xff] %vm198_vm4, %v8429_v20  ;;  %v8458_v32 = vadd.f32 %v25623_v22, %v25529_v45  ;;  %v8459_v58 = vadd.f32 %v25627_v38, %v25529_v45  ;;  %v8460_v25 = vadd.f32 %v25631_v28, %v25529_v45  ;;  %v8464_v13 = vmax.f32 %v8448_v19, 0.0 }
 0x559   :  { %v8461_v55 = vadd.f32 %v25635_v15, %v25529_v45  ;;  %v8465_v21 = vmax.f32 %v8449_v59, 0.0  ;;  %v8466_v41 = vmax.f32 %v8450_v40, 0.0  ;;  %v8467_v37 = vmax.f32 %v8451_v24, 0.0  ;;  %8592 = vst.msk [vmem:[#allocation3 + $0x151] sm:$0xff] %vm198_vm4, %v8462_v26  ;;  %8593 = vst.msk [vmem:[#allocation3 + $0x161] sm:$0xff] %vm198_vm4, %v8463_v56  ;;  %v29137_v26 = vld [vmem:[#allocation52_spill] sm:$0xff] }
 0x55a   :  { %v8468_v4 = vmax.f32 %v8452_v33, 0.0  ;;  %v8469_v62 = vmax.f32 %v8453_v14, 0.0  ;;  %v8470_v11 = vmax.f32 %v8454_v35, 0.0  ;;  %v8471_v61 = vmax.f32 %v8455_v47, 0.0  ;;  %8594 = vst.msk [vmem:[#allocation3 + $0x171] sm:$0xff] %vm198_vm4, %v8464_v13  ;;  %v29138_v56 = vld [vmem:[#allocation53_spill] sm:$0xff] }
 0x55b   :  { %v8472_v22 = vmax.f32 %v8456_v29, 0.0  ;;  %v8473_v30 = vmax.f32 %v8457_v44, 0.0  ;;  %8595 = vst.msk [vmem:[#allocation3 + $0x181] sm:$0xff] %vm198_vm4, %v8465_v21  ;;  %v8474_v38 = vmax.f32 %v8458_v32, 0.0  ;;  %v8475_v28 = vmax.f32 %v8459_v58, 0.0  ;;  %8596 = vst.msk [vmem:[#allocation3 + $0x191] sm:$0xff] %vm198_vm4, %v8466_v41 }
 0x55c   :  { %v8476_v15 = vmax.f32 %v8460_v25, 0.0  ;;  %v8477_v60 = vmax.f32 %v8461_v55, 0.0  ;;  %8597 = vst.msk [vmem:[#allocation3 + $0x1a1] sm:$0xff] %vm198_vm4, %v8467_v37  ;;  %8598 = vst.msk [vmem:[#allocation3 + $0x1b1] sm:$0xff] %vm198_vm4, %v8468_v4  ;;  %v8494_v34 = vadd.f32 %v25639_v12, %v25529_v45  ;;  %v8495_v51 = vadd.f32 %v25643_v27, %v25529_v45  ;;  %v29134_v58 = vld [vmem:[#allocation49_spill] sm:$0xff]  ;;  %v29135_v25 = vld [vmem:[#allocation50_spill] sm:$0xff] }
 0x55d   :  { %8599 = vst.msk [vmem:[#allocation3 + $0x1c1] sm:$0xff] %vm198_vm4, %v8469_v62  ;;  %v8496_v63 = vadd.f32 %v25647_v48, %v25529_v45  ;;  %v8497_v6 = vadd.f32 %v25651_v39, %v25529_v45  ;;  %8600 = vst.msk [vmem:[#allocation3 + $0x1f1] sm:$0xff] %vm198_vm4, %v8470_v11  ;;  %v8498_v12 = vadd.f32 %v25655_v9, %v25529_v45  ;;  %v29136_v55 = vld [vmem:[#allocation51_spill] sm:$0xff]  ;;  %v29139_v21 = vld [vmem:[#allocation54_spill] sm:$0xff] }
 0x55e   :  { %8601 = vst.msk [vmem:[#allocation3 + $0x201] sm:$0xff] %vm198_vm4, %v8471_v61  ;;  %8602 = vst.msk [vmem:[#allocation3 + $0x211] sm:$0xff] %vm198_vm4, %v8472_v22  ;;  %v8499_v27 = vadd.f32 %v25659_v46, %v25529_v45  ;;  %v8500_v48 = vadd.f32 %v25663_v8, %v25529_v45  ;;  %v8501_v39 = vadd.f32 %v25667_v7, %v25529_v45  ;;  %v8510_v18 = vmax.f32 %v8494_v34, 0.0  ;;  %v29140_v37 = vld [vmem:[#allocation30_spill] sm:$0xff]  ;;  %v29141_v62 = vld [vmem:[#allocation12_spill] sm:$0xff] }
 0x55f   :  { %8603 = vst.msk [vmem:[#allocation3 + $0x221] sm:$0xff] %vm198_vm4, %v8473_v30  ;;  %8604 = vst.msk [vmem:[#allocation3 + $0x231] sm:$0xff] %vm198_vm4, %v8474_v38  ;;  %v8502_v9 = vadd.f32 %v25671_v17, %v25529_v45  ;;  %v8503_v46 = vadd.f32 %v25675_v23, %v25529_v45  ;;  %v8504_v8 = vadd.f32 %v25679_v43, %v25529_v45  ;;  %v29133_v17 = vld [vmem:[#allocation48_spill] sm:$0xff]  ;;  %v8511_v23 = vmax.f32 %v8495_v51, 0.0  ;;  %v29143_v30 = vld [vmem:[#allocation19_spill] sm:$0xff] }
 0x560   :  { %8605 = vst.msk [vmem:[#allocation3 + $0x241] sm:$0xff] %vm198_vm4, %v8475_v28  ;;  %8606 = vst.msk [vmem:[#allocation3 + $0x251] sm:$0xff] %vm198_vm4, %v8476_v15  ;;  %v8505_v7 = vadd.f32 %v29130_v2, %v25529_v45  ;;  %v8506_v52 = vadd.f32 %v29131_v10, %v25529_v45  ;;  %v8507_v0 = vadd.f32 %v25691_v53, %v25529_v45  ;;  %v8512_v36 = vmax.f32 %v8496_v63, 0.0  ;;  %v29142_v61 = vld [vmem:[#allocation8_spill] sm:$0xff] }
 0x561   :  { %8607 = vst.msk [vmem:[#allocation3 + $0x261] sm:$0xff] %vm198_vm4, %v8477_v60  ;;  %v8508_v3 = vadd.f32 %v29132_v31, %v25529_v45  ;;  %v8509_v42 = vadd.f32 %v29133_v17, %v25529_v45  ;;  %v8513_v50 = vmax.f32 %v8497_v6, 0.0  ;;  %v8514_v43 = vmax.f32 %v8498_v12, 0.0  ;;  %8609 = vst.msk [vmem:[#allocation3 + $0x291] sm:$0xff] %vm198_vm4, %v8510_v18  ;;  %v29144_v28 = vld [vmem:[#allocation16_spill] sm:$0xff]  ;;  %v25938_v12 = vld [vmem:[%s28652_s7 + $0x10] sm:$0xff] }
 0x562   :  { %v8515_v20 = vmax.f32 %v8499_v27, 0.0  ;;  %v8516_v1 = vmax.f32 %v8500_v48, 0.0  ;;  %v8517_v5 = vmax.f32 %v8501_v39, 0.0  ;;  %v8518_v19 = vmax.f32 %v8502_v9, 0.0  ;;  %8610 = vst.msk [vmem:[#allocation3 + $0x2a1] sm:$0xff] %vm198_vm4, %v8511_v23  ;;  %8611 = vst.msk [vmem:[#allocation3 + $0x2b1] sm:$0xff] %vm198_vm4, %v8512_v36 }
 0x563   :  { %v8519_v59 = vmax.f32 %v8503_v46, 0.0  ;;  %v8520_v40 = vmax.f32 %v8504_v8, 0.0  ;;  %v8521_v24 = vmax.f32 %v8505_v7, 0.0  ;;  %8612 = vst.msk [vmem:[#allocation3 + $0x2c1] sm:$0xff] %vm198_vm4, %v8513_v50  ;;  %v8522_v53 = vmax.f32 %v8506_v52, 0.0  ;;  %8613 = vst.msk [vmem:[#allocation3 + $0x2d1] sm:$0xff] %vm198_vm4, %v8514_v43 }
 0x564   :  { %v8523_v33 = vmax.f32 %v8507_v0, 0.0  ;;  %v8524_v14 = vmax.f32 %v8508_v3, 0.0  ;;  %v8525_v35 = vmax.f32 %v8509_v42, 0.0  ;;  %8614 = vst.msk [vmem:[#allocation3 + $0x2e1] sm:$0xff] %vm198_vm4, %v8515_v20  ;;  %8615 = vst.msk [vmem:[#allocation3 + $0x2f1] sm:$0xff] %vm198_vm4, %v8516_v1  ;;  %v8542_v47 = vadd.f32 %v25703_v16, %v25529_v45  ;;  %v29146_v31 = vld [vmem:[#allocation43_spill] sm:$0xff] }
 0x565   :  { %8616 = vst.msk [vmem:[#allocation3 + $0x301] sm:$0xff] %vm198_vm4, %v8517_v5  ;;  %v8543_v29 = vadd.f32 %v25707_v49, %v25529_v45  ;;  %v8544_v44 = vadd.f32 %v25711_v57, %v25529_v45  ;;  %v8545_v32 = vadd.f32 %v25715_v54, %v25529_v45  ;;  %8617 = vst.msk [vmem:[#allocation3 + $0x331] sm:$0xff] %vm198_vm4, %v8518_v19  ;;  %v25997_v20 = vld [vmem:[#allocation3 + $0x321] sm:$0xff] }
 0x566   :  { %8618 = vst.msk [vmem:[#allocation3 + $0x341] sm:$0xff] %vm198_vm4, %v8519_v59  ;;  %8619 = vst.msk [vmem:[#allocation3 + $0x351] sm:$0xff] %vm198_vm4, %v8520_v40  ;;  %v8546_v16 = vadd.f32 %v29134_v58, %v25529_v45  ;;  %v8547_v49 = vadd.f32 %v29135_v25, %v25529_v45  ;;  %v8548_v57 = vadd.f32 %v29136_v55, %v25529_v45  ;;  %v8558_v60 = vmax.f32 %v8542_v47, 0.0  ;;  %v26017_v40 = vld [vmem:[#allocation3 + $0x461] sm:$0xff] }
 0x567   :  { %8620 = vst.msk [vmem:[#allocation3 + $0x361] sm:$0xff] %vm198_vm4, %v8521_v24  ;;  %v8549_v54 = vadd.f32 %v29137_v26, %v25529_v45  ;;  %8621 = vst.msk [vmem:[#allocation3 + $0x371] sm:$0xff] %vm198_vm4, %v8522_v53  ;;  %v8550_v13 = vadd.f32 %v29138_v56, %v25529_v45  ;;  %v8551_v41 = vadd.f32 %v29139_v21, %v25529_v45  ;;  %v8559_v34 = vmax.f32 %v8543_v29, 0.0  ;;  %v26081_v26 = vld [vmem:[%s28652_s7 + $0x18] sm:$0xff] }
 0x568   :  { %8622 = vst.msk [vmem:[#allocation3 + $0x381] sm:$0xff] %vm198_vm4, %v8523_v33  ;;  %8623 = vst.msk [vmem:[#allocation3 + $0x391] sm:$0xff] %vm198_vm4, %v8524_v14  ;;  %v8552_v4 = vadd.f32 %v29140_v37, %v25529_v45  ;;  %v8553_v11 = vadd.f32 %v29141_v62, %v25529_v45  ;;  %v8554_v22 = vadd.f32 %v29142_v61, %v25529_v45  ;;  %v8560_v51 = vmax.f32 %v8544_v44, 0.0  ;;  %v25941_v46 = vld [vmem:[#allocation3 + $0x291] sm:$0xff]  ;;  %v8651_v62 = vld [vmem:[#allocation3 + $0x460] sm:$0xff] }
 0x569   :  { %8624 = vst.msk [vmem:[#allocation3 + $0x3a1] sm:$0xff] %vm198_vm4, %v8525_v35  ;;  %v8555_v38 = vadd.f32 %v29143_v30, %v25529_v45  ;;  %v8557_v15 = vadd.f32 %v29144_v28, %v25529_v45  ;;  %v8561_v63 = vmax.f32 %v8545_v32, 0.0  ;;  %v8562_v6 = vmax.f32 %v8546_v16, 0.0  ;;  %29145 = vst [vmem:[#allocation27_spill] sm:$0xff] %v25938_v12  ;;  %v25943_v8 = vld [vmem:[#allocation3 + $0x2a1] sm:$0xff]  ;;  %20016 = vmatmul.mubr.msk.f32.vlgmr.msra.gmra.mrb[40].mxu1 %vm198_vm4, %v25941_v46  ;;  %v25965_v3 = vld [vmem:[#allocation3 + $0x2b1] sm:$0xff] }
 0x56a   :  { %v8563_v27 = vmax.f32 %v8547_v49, 0.0  ;;  %v8564_v48 = vmax.f32 %v8548_v57, 0.0  ;;  %v8565_v39 = vmax.f32 %v8549_v54, 0.0  ;;  %v8566_v9 = vmax.f32 %v8550_v13, 0.0  ;;  %8626 = vst.msk [vmem:[#allocation3 + $0x3d1] sm:$0xff] %vm198_vm4, %v8558_v60  ;;  %8627 = vst.msk [vmem:[#allocation3 + $0x3e1] sm:$0xff] %vm198_vm4, %v8559_v34  ;;  %20040 = vmatpush3.msra.mxu1 %v29146_v31  ;;  %20018 = vmatprep.mubr.msk.f32.mxu1 %vm198_vm4, %v25943_v8 }
 0x56b   :  { %v8567_v45 = vmax.f32 %v8551_v41, 0.0  ;;  %v8568_v2 = vmax.f32 %v8552_v4, 0.0  ;;  %v8569_v7 = vmax.f32 %v8553_v11, 0.0  ;;  %v8570_v10 = vmax.f32 %v8554_v22, 0.0  ;;  %8628 = vst.msk [vmem:[#allocation3 + $0x3f1] sm:$0xff] %vm198_vm4, %v8560_v51  ;;  %8629 = vst.msk [vmem:[#allocation3 + $0x401] sm:$0xff] %vm198_vm4, %v8561_v63  ;;  %20065 = vmatprep.subr.mxu1 %v25938_v12 }
 0x56c   :  { %8630 = vst.msk [vmem:[#allocation3 + $0x411] sm:$0xff] %vm198_vm4, %v8562_v6  ;;  %v8571_v52 = vmax.f32 %v8555_v38, 0.0  ;;  %v8573_v0 = vmax.f32 %v8557_v15, 0.0  ;;  %8631 = vst.msk [vmem:[#allocation3 + $0x421] sm:$0xff] %vm198_vm4, %v8563_v27  ;;  %v25969_v17 = vld [vmem:[#allocation3 + $0x2c1] sm:$0xff]  ;;  %v25982_v23 = vld [vmem:[#allocation3 + $0x2d1] sm:$0xff] }
 0x56d   :  { %8632 = vst.msk [vmem:[#allocation3 + $0x431] sm:$0xff] %vm198_vm4, %v8564_v48  ;;  %8633 = vst.msk [vmem:[#allocation3 + $0x441] sm:$0xff] %vm198_vm4, %v8565_v39  ;;  %20019 = vmatmul.mubr.msk.f32.gmra.mrb[42].mxu1 %vm198_vm4, %v25965_v3  ;;  %v25986_v36 = vld [vmem:[#allocation3 + $0x2e1] sm:$0xff]  ;;  %v26001_v1 = vld [vmem:[#allocation3 + $0x2f1] sm:$0xff] }
 0x56e   :  { %8634 = vst.msk [vmem:[#allocation3 + $0x471] sm:$0xff] %vm198_vm4, %v8566_v9  ;;  %8635 = vst.msk [vmem:[#allocation3 + $0x481] sm:$0xff] %vm198_vm4, %v8567_v45  ;;  %20021 = vmatprep.mubr.msk.f32.mxu1 %vm198_vm4, %v25969_v17  ;;  %v26015_v59 = vld [vmem:[#allocation3 + $0x331] sm:$0xff]  ;;  %v26021_v24 = vld [vmem:[#allocation3 + $0x341] sm:$0xff] }
 0x56f   :  { %8636 = vst.msk [vmem:[#allocation3 + $0x491] sm:$0xff] %vm198_vm4, %v8568_v2  ;;  %8637 = vst.msk [vmem:[#allocation3 + $0x4a1] sm:$0xff] %vm198_vm4, %v8569_v7  ;;  %v26031_v33 = vld [vmem:[#allocation3 + $0x351] sm:$0xff]  ;;  %v26035_v14 = vld [vmem:[#allocation3 + $0x361] sm:$0xff] }
 0x570   :  { %8638 = vst.msk [vmem:[#allocation3 + $0x4b1] sm:$0xff] %vm198_vm4, %v8570_v10  ;;  %8639 = vst.msk [vmem:[#allocation3 + $0x4c1] sm:$0xff] %vm198_vm4, %v8571_v52  ;;  %v26047_v29 = vld [vmem:[#allocation3 + $0x371] sm:$0xff]  ;;  %v26051_v44 = vld [vmem:[#allocation3 + $0x381] sm:$0xff] }
 0x571   :  { %8641 = vst.msk [vmem:[#allocation3 + $0x4e1] sm:$0xff] %vm198_vm4, %v8573_v0  ;;  %v25973_v42 = vld [vmem:[#allocation3 + $0x3d1] sm:$0xff]  ;;  %v25977_v18 = vld [vmem:[#allocation3 + $0x3e1] sm:$0xff]  ;;  %20022 = vmatmul.mubr.msk.f32.gmra.mrb[44].mxu1 %vm198_vm4, %v25982_v23  ;;  %29147 = vst [vmem:[#allocation23_spill] sm:$0xff] %v26081_v26 }
 0x572   :  { %20250 = vmatmul.mubr.msk.f32.vlgmr.msra.gmra.mrb[40].mxu0 %vm198_vm4, %v25973_v42  ;;  %v25989_v50 = vld [vmem:[#allocation3 + $0x3f1] sm:$0xff]  ;;  %20024 = vmatprep.mubr.msk.f32.mxu1 %vm198_vm4, %v25986_v36  ;;  %v25995_v43 = vld [vmem:[#allocation3 + $0x401] sm:$0xff] }
 0x573   :  { %20252 = vmatprep.mubr.msk.f32.mxu0 %vm198_vm4, %v25977_v18  ;;  %20274 = vmatpush3.msra.mxu0 %v29146_v31  ;;  %v26005_v5 = vld [vmem:[#allocation3 + $0x411] sm:$0xff]  ;;  %v26011_v19 = vld [vmem:[#allocation3 + $0x421] sm:$0xff] }
 0x574   :  { %20299 = vmatprep.subr.mxu0 %v25938_v12  ;;  %v26023_v53 = vld [vmem:[#allocation3 + $0x431] sm:$0xff]  ;;  %v8643_v16 = vld [vmem:[#allocation3 + $0x3c0] sm:$0xff] }
 0x575   :  { %20025 = vmatmul.mubr.msk.f32.gmra.mrb[46].mxu1 %vm198_vm4, %v26001_v1  ;;  %v26037_v35 = vld [vmem:[#allocation3 + $0x471] sm:$0xff]  ;;  %v26043_v47 = vld [vmem:[#allocation3 + $0x481] sm:$0xff] }
 0x576   :  { %20253 = vmatmul.mubr.msk.f32.gmra.mrb[42].mxu0 %vm198_vm4, %v25989_v50  ;;  %20027 = vmatprep.mubr.msk.f32.mxu1 %vm198_vm4, %v25997_v20  ;;  %v26053_v32 = vld [vmem:[#allocation3 + $0x491] sm:$0xff]  ;;  %v26059_v58 = vld [vmem:[#allocation3 + $0x4a1] sm:$0xff] }
 0x577   :  { %20255 = vmatprep.mubr.msk.f32.mxu0 %vm198_vm4, %v25995_v43  ;;  %v26063_v25 = vld [vmem:[#allocation3 + $0x391] sm:$0xff]  ;;  %v26072_v55 = vld [vmem:[#allocation3 + $0x4c1] sm:$0xff] }
 0x578   :  { %v26067_v49 = vld [vmem:[#allocation3 + $0x4b1] sm:$0xff]  ;;  %v26085_v54 = vld [vmem:[#allocation3 + $0x3e0] sm:$0xff] }
 0x579   :  { %20028 = vmatmul.mubr.msk.f32.gmra.mrb[48].mxu1 %vm198_vm4, %v26015_v59  ;;  %v26076_v57 = vld [vmem:[#allocation3 + $0x3d0] sm:$0xff]  ;;  %v29148_v13 = vld [vmem:[#allocation42_spill] sm:$0xff]  ;;  %v26101_v41 = vld [vmem:[#allocation3 + $0x400] sm:$0xff] }
 0x57a   :  { %20256 = vmatmul.mubr.msk.f32.gmra.mrb[44].mxu0 %vm198_vm4, %v26005_v5  ;;  %20030 = vmatprep.mubr.msk.f32.mxu1 %vm198_vm4, %v26021_v24  ;;  %v26087_v56 = vld [vmem:[#allocation3 + $0x4d1] sm:$0xff]  ;;  %v26114_v4 = vld [vmem:[#allocation3 + $0x420] sm:$0xff] }
 0x57b   :  { %20258 = vmatprep.mubr.msk.f32.mxu0 %vm198_vm4, %v26011_v19  ;;  %v26097_v21 = vld [vmem:[#allocation3 + $0x3f0] sm:$0xff]  ;;  %v26136_v22 = vld [vmem:[#allocation3 + $0x480] sm:$0xff] }
 0x57c   :  { %v26110_v37 = vld [vmem:[#allocation3 + $0x410] sm:$0xff]  ;;  %v26148_v38 = vld [vmem:[#allocation3 + $0x4a0] sm:$0xff] }
 0x57d   :  { %20031 = vmatmul.mubr.msk.f32.gmra.mrb[50].mxu1 %vm198_vm4, %v26031_v33  ;;  %29149 = vst [vmem:[#allocation35_spill] sm:$0xff] %v26110_v37  ;;  %v26123_v11 = vld [vmem:[#allocation3 + $0x430] sm:$0xff]  ;;  %29150 = vst [vmem:[#allocation41_spill] sm:$0xff] %v26148_v38  ;;  %v26160_v15 = vld [vmem:[#allocation3 + $0x4c0] sm:$0xff] }
 0x57e   :  { %20259 = vmatmul.mubr.msk.f32.gmra.mrb[46].mxu0 %vm198_vm4, %v26023_v53  ;;  %20033 = vmatprep.mubr.msk.f32.mxu1 %vm198_vm4, %v26035_v14  ;;  %v26132_v61 = vld [vmem:[#allocation3 + $0x470] sm:$0xff]  ;;  %v22046_v34 = vld [vmem:[#allocation3 + $0x3c1] sm:$0xff] }
 0x57f   :  { %20261 = vmatprep.mubr.msk.f32.mxu0 %vm198_vm4, %v26017_v40  ;;  %v26144_v30 = vld [vmem:[#allocation3 + $0x490] sm:$0xff]  ;;  %v26180_v51 = vld [vmem:[%s28652_s7 + $0x20] sm:$0xff] }
 0x580   :  { %v26156_v28 = vld [vmem:[#allocation3 + $0x4b0] sm:$0xff]  ;;  %29152 = vst [vmem:[#allocation18_spill] sm:$0xff] %v26180_v51  ;;  %v10936_v63 = vld [vmem:[#allocation3 + $0x282] sm:$0xff] }
 0x581   :  { %20034 = vmatmul.mubr.msk.f32.gmra.mrb[52].mxu1 %vm198_vm4, %v26047_v29  ;;  %v26168_v60 = vld [vmem:[#allocation3 + $0x4d0] sm:$0xff]  ;;  %v26199_v27 = vld [vmem:[#allocation3 + $0x2a2] sm:$0xff] }
 0x582   :  { %20262 = vmatmul.mubr.msk.f32.gmra.mrb[48].mxu0 %vm198_vm4, %v26037_v35  ;;  %20036 = vmatprep.mubr.msk.f32.mxu1 %vm198_vm4, %v26051_v44  ;;  %29151 = vst [vmem:[#allocation13_spill] sm:$0xff] %v26168_v60  ;;  %v26193_v6 = vld [vmem:[#allocation3 + $0x292] sm:$0xff]  ;;  %v26213_v39 = vld [vmem:[#allocation3 + $0x2c2] sm:$0xff] }
 0x583   :  { %20264 = vmatprep.mubr.msk.f32.mxu0 %vm198_vm4, %v26043_v47  ;;  %v26207_v48 = vld [vmem:[#allocation3 + $0x2b2] sm:$0xff]  ;;  %v26225_v45 = vld [vmem:[#allocation3 + $0x2e2] sm:$0xff] }
 0x584   :  { %v26219_v9 = vld [vmem:[#allocation3 + $0x2d2] sm:$0xff]  ;;  %29154 = vst [vmem:[#allocation20_spill] sm:$0xff] %v26225_v45  ;;  %v10944_v2 = vld [vmem:[#allocation3 + $0x322] sm:$0xff] }
 0x585   :  { %20037 = vmatmul.mubr.msk.f32.gmra.mrb[54].mxu1 %vm198_vm4, %v26063_v25  ;;  %29153 = vst [vmem:[#allocation15_spill] sm:$0xff] %v26219_v9  ;;  %v26231_v7 = vld [vmem:[#allocation3 + $0x2f2] sm:$0xff]  ;;  %v26246_v52 = vld [vmem:[#allocation3 + $0x342] sm:$0xff] }
 0x586   :  { %20265 = vmatmul.mubr.msk.f32.gmra.mrb[50].mxu0 %vm198_vm4, %v26053_v32  ;;  %20041 = vmatprep.mubr.msk.f32.mxu1 %vm198_vm4, %v8643_v16  ;;  %29155 = vst [vmem:[#allocation40_spill] sm:$0xff] %v26231_v7  ;;  %v26240_v10 = vld [vmem:[#allocation3 + $0x332] sm:$0xff]  ;;  %29157 = vst [vmem:[#allocation7_spill] sm:$0xff] %v26246_v52  ;;  %v26258_v31 = vld [vmem:[#allocation3 + $0x362] sm:$0xff] }
 0x587   :  { %20267 = vmatprep.mubr.msk.f32.mxu0 %vm198_vm4, %v26059_v58  ;;  %29156 = vst [vmem:[#allocation9_spill] sm:$0xff] %v26240_v10  ;;  %v26252_v0 = vld [vmem:[#allocation3 + $0x352] sm:$0xff]  ;;  %29159 = vst [vmem:[#allocation22_spill] sm:$0xff] %v26258_v31  ;;  %v26272_v16 = vld [vmem:[#allocation3 + $0x382] sm:$0xff] }
 0x588   :  { %29158 = vst [vmem:[#allocation11_spill] sm:$0xff] %v26252_v0  ;;  %29162 = vst [vmem:[#allocation10_spill] sm:$0xff] %v26272_v16 }
 0x589   :  { %20042 = vmatmul.mubr.msk.f32.vlgmr.msra.gmra.mrb[40].mxu1 %vm198_vm4, %v26076_v57 }
 0x58a   :  { %20268 = vmatmul.mubr.msk.f32.gmra.mrb[52].mxu0 %vm198_vm4, %v26067_v49  ;;  %20066 = vmatpush3.msra.mxu1 %v25938_v12 }
 0x58b   :  { %20270 = vmatprep.mubr.msk.f32.mxu0 %vm198_vm4, %v26072_v55  ;;  %20044 = vmatprep.mubr.msk.f32.mxu1 %vm198_vm4, %v26085_v54 }
 0x58c   :  { %20091 = vmatprep.subr.mxu1 %v26081_v26 }
 0x58d   :  { %20045 = vmatmul.mubr.msk.f32.gmra.mrb[42].mxu1 %vm198_vm4, %v26097_v21 }
 0x58e   :  { %20271 = vmatmul.mubr.msk.f32.gmra.mrb[54].mxu0 %vm198_vm4, %v26087_v56  ;;  %20047 = vmatprep.mubr.msk.f32.mxu1 %vm198_vm4, %v26101_v41 }
 0x58f   :  { %20275 = vmatprep.mubr.msk.f32.mxu0 %vm198_vm4, %v29148_v13  ;;  %v26276_v13 = vld [vmem:[#allocation3 + $0x160] sm:$0xff] }
 0x590   :  { %29163 = vst [vmem:[#allocation39_spill] sm:$0xff] %v26276_v13 }
 0x591   :  { %20048 = vmatmul.mubr.msk.f32.gmra.mrb[44].mxu1 %vm198_vm4, %v26110_v37 }
 0x592   :  { %20276 = vmatmul.mubr.msk.f32.vlgmr.msra.gmra.mrb[40].mxu0 %vm198_vm4, %v25941_v46  ;;  %20050 = vmatprep.mubr.msk.f32.mxu1 %vm198_vm4, %v26114_v4 }
 0x593   :  { %20278 = vmatprep.mubr.msk.f32.mxu0 %vm198_vm4, %v25943_v8  ;;  %20300 = vmatpush3.msra.mxu0 %v25938_v12  ;;  %v26316_v12 = vld [vmem:[#allocation3 + $0x1a0] sm:$0xff] }
 0x594   :  { %20325 = vmatprep.subr.mxu0 %v26081_v26  ;;  %29172 = vst [vmem:[#allocation32_spill] sm:$0xff] %v26316_v12 }
 0x595   :  { %20051 = vmatmul.mubr.msk.f32.gmra.mrb[46].mxu1 %vm198_vm4, %v26123_v11 }
 0x596   :  { %20279 = vmatmul.mubr.msk.f32.gmra.mrb[42].mxu0 %vm198_vm4, %v25965_v3  ;;  %20053 = vmatprep.mubr.msk.f32.mxu1 %vm198_vm4, %v8651_v62  ;;  %v26281_v62 = vld [vmem:[%s28652_s7 + $0x28] sm:$0xff] }
 0x597   :  { %20281 = vmatprep.mubr.msk.f32.mxu0 %vm198_vm4, %v25969_v17  ;;  %29164 = vst [vmem:[#allocation17_spill] sm:$0xff] %v26281_v62 }
 0x599   :  { %20054 = vmatmul.mubr.msk.f32.gmra.mrb[48].mxu1 %vm198_vm4, %v26132_v61 }
 0x59a   :  { %20282 = vmatmul.mubr.msk.f32.gmra.mrb[44].mxu0 %vm198_vm4, %v25982_v23  ;;  %20056 = vmatprep.mubr.msk.f32.mxu1 %vm198_vm4, %v26136_v22 }
 0x59b   :  { %20284 = vmatprep.mubr.msk.f32.mxu0 %vm198_vm4, %v25986_v36 }
 0x59d   :  { %20057 = vmatmul.mubr.msk.f32.gmra.mrb[50].mxu1 %vm198_vm4, %v26144_v30 }
 0x59e   :  { %20285 = vmatmul.mubr.msk.f32.gmra.mrb[46].mxu0 %vm198_vm4, %v26001_v1  ;;  %20059 = vmatprep.mubr.msk.f32.mxu1 %vm198_vm4, %v26148_v38 }
 0x59f   :  { %20287 = vmatprep.mubr.msk.f32.mxu0 %vm198_vm4, %v25997_v20  ;;  %v26264_v20 = vld [vmem:[#allocation3 + $0x150] sm:$0xff] }
 0x5a0   :  { %29160 = vst [vmem:[#allocation26_spill] sm:$0xff] %v26264_v20 }
 0x5a1   :  { %20060 = vmatmul.mubr.msk.f32.gmra.mrb[52].mxu1 %vm198_vm4, %v26156_v28 }
 0x5a2   :  { %20288 = vmatmul.mubr.msk.f32.gmra.mrb[48].mxu0 %vm198_vm4, %v26015_v59  ;;  %20062 = vmatprep.mubr.msk.f32.mxu1 %vm198_vm4, %v26160_v15 }
 0x5a3   :  { %20290 = vmatprep.mubr.msk.f32.mxu0 %vm198_vm4, %v26021_v24 }
 0x5a5   :  { %20063 = vmatmul.mubr.msk.f32.gmra.mrb[54].mxu1 %vm198_vm4, %v26168_v60 }
 0x5a6   :  { %20291 = vmatmul.mubr.msk.f32.gmra.mrb[50].mxu0 %vm198_vm4, %v26031_v33  ;;  %20067 = vmatprep.mubr.msk.f32.mxu1 %vm198_vm4, %v22046_v34  ;;  %v26285_v34 = vld [vmem:[#allocation3 + $0x170] sm:$0xff] }
 0x5a7   :  { %20293 = vmatprep.mubr.msk.f32.mxu0 %vm198_vm4, %v26035_v14  ;;  %29165 = vst [vmem:[#allocation14_spill] sm:$0xff] %v26285_v34 }
 0x5a9   :  { %20068 = vmatmul.mubr.msk.f32.vlgmr.msra.gmra.mrb[40].mxu1 %vm198_vm4, %v25973_v42 }
 0x5aa   :  { %20294 = vmatmul.mubr.msk.f32.gmra.mrb[52].mxu0 %vm198_vm4, %v26047_v29  ;;  %20092 = vmatpush3.msra.mxu1 %v26081_v26 }
 0x5ab   :  { %20296 = vmatprep.mubr.msk.f32.mxu0 %vm198_vm4, %v26051_v44  ;;  %20070 = vmatprep.mubr.msk.f32.mxu1 %vm198_vm4, %v25977_v18 }
 0x5ac   :  { %20117 = vmatprep.subr.mxu1 %v26180_v51 }
 0x5ad   :  { %20071 = vmatmul.mubr.msk.f32.gmra.mrb[42].mxu1 %vm198_vm4, %v25989_v50 }
 0x5ae   :  { %20297 = vmatmul.mubr.msk.f32.gmra.mrb[54].mxu0 %vm198_vm4, %v26063_v25  ;;  %20073 = vmatprep.mubr.msk.f32.mxu1 %vm198_vm4, %v25995_v43 }
 0x5af   :  { %20301 = vmatprep.mubr.msk.f32.mxu0 %vm198_vm4, %v10936_v63  ;;  %v26287_v63 = vld [vmem:[#allocation3 + $0x392] sm:$0xff] }
 0x5b0   :  { %29166 = vst [vmem:[#allocation25_spill] sm:$0xff] %v26287_v63 }
 0x5b1   :  { %20074 = vmatmul.mubr.msk.f32.gmra.mrb[44].mxu1 %vm198_vm4, %v26005_v5 }
 0x5b2   :  { %20302 = vmatmul.mubr.msk.f32.vlgmr.msra.gmra.mrb[40].mxu0 %vm198_vm4, %v26193_v6  ;;  %20076 = vmatprep.mubr.msk.f32.mxu1 %vm198_vm4, %v26011_v19 }
 0x5b3   :  { %20304 = vmatprep.mubr.msk.f32.mxu0 %vm198_vm4, %v26199_v27  ;;  %20326 = vmatpush3.msra.mxu0 %v26081_v26  ;;  %v26299_v26 = vld [vmem:[#allocation3 + $0x180] sm:$0xff] }
 0x5b4   :  { %20351 = vmatprep.subr.mxu0 %v26180_v51  ;;  %29168 = vst [vmem:[#allocation33_spill] sm:$0xff] %v26299_v26 }
 0x5b5   :  { %20077 = vmatmul.mubr.msk.f32.gmra.mrb[46].mxu1 %vm198_vm4, %v26023_v53 }
 0x5b6   :  { %20305 = vmatmul.mubr.msk.f32.gmra.mrb[42].mxu0 %vm198_vm4, %v26207_v48  ;;  %20079 = vmatprep.mubr.msk.f32.mxu1 %vm198_vm4, %v26017_v40  ;;  %v26266_v40 = vld [vmem:[#allocation3 + $0x372] sm:$0xff] }
 0x5b7   :  { %20307 = vmatprep.mubr.msk.f32.mxu0 %vm198_vm4, %v26213_v39  ;;  %29161 = vst [vmem:[#allocation34_spill] sm:$0xff] %v26266_v40 }
 0x5b9   :  { %20080 = vmatmul.mubr.msk.f32.gmra.mrb[48].mxu1 %vm198_vm4, %v26037_v35 }
 0x5ba   :  { %20308 = vmatmul.mubr.msk.f32.gmra.mrb[44].mxu0 %vm198_vm4, %v26219_v9  ;;  %20082 = vmatprep.mubr.msk.f32.mxu1 %vm198_vm4, %v26043_v47  ;;  %v26414_v9 = vld [vmem:[%s28652_s7 + $0x30] sm:$0xff] }
 0x5bb   :  { %20310 = vmatprep.mubr.msk.f32.mxu0 %vm198_vm4, %v26225_v45  ;;  %v26397_v45 = vld [vmem:[#allocation3 + $0x260] sm:$0xff]  ;;  %29195 = vst [vmem:[#allocation56_spill] sm:$0xff] %v26414_v9 }
 0x5bc   :  { %29192 = vst [vmem:[#allocation43_spill] sm:$0xff] %v26397_v45 }
 0x5bd   :  { %20083 = vmatmul.mubr.msk.f32.gmra.mrb[50].mxu1 %vm198_vm4, %v26053_v32 }
 0x5be   :  { %20311 = vmatmul.mubr.msk.f32.gmra.mrb[46].mxu0 %vm198_vm4, %v26231_v7  ;;  %20085 = vmatprep.mubr.msk.f32.mxu1 %vm198_vm4, %v26059_v58  ;;  %v26387_v7 = vld [vmem:[#allocation3 + $0xe1] sm:$0xff] }
 0x5bf   :  { %20313 = vmatprep.mubr.msk.f32.mxu0 %vm198_vm4, %v10944_v2  ;;  %v26294_v2 = vld [vmem:[#allocation3 + $0x11] sm:$0xff]  ;;  %29190 = vst [vmem:[#allocation19_spill] sm:$0xff] %v26387_v7 }
 0x5c0   :  { %29167 = vst [vmem:[#allocation21_spill] sm:$0xff] %v26294_v2 }
 0x5c1   :  { %20086 = vmatmul.mubr.msk.f32.gmra.mrb[52].mxu1 %vm198_vm4, %v26067_v49 }
 0x5c2   :  { %20314 = vmatmul.mubr.msk.f32.gmra.mrb[48].mxu0 %vm198_vm4, %v26240_v10  ;;  %20088 = vmatprep.mubr.msk.f32.mxu1 %vm198_vm4, %v26072_v55  ;;  %v26381_v10 = vld [vmem:[#allocation3 + $0x240] sm:$0xff] }
 0x5c3   :  { %20316 = vmatprep.mubr.msk.f32.mxu0 %vm198_vm4, %v26246_v52  ;;  %v26371_v52 = vld [vmem:[#allocation3 + $0xc1] sm:$0xff]  ;;  %29188 = vst [vmem:[#allocation12_spill] sm:$0xff] %v26381_v10 }
 0x5c4   :  { %29186 = vst [vmem:[#allocation54_spill] sm:$0xff] %v26371_v52 }
 0x5c5   :  { %20089 = vmatmul.mubr.msk.f32.gmra.mrb[54].mxu1 %vm198_vm4, %v26087_v56 }
 0x5c6   :  { %20317 = vmatmul.mubr.msk.f32.gmra.mrb[50].mxu0 %vm198_vm4, %v26252_v0  ;;  %20093 = vmatprep.mubr.msk.f32.mxu1 %vm198_vm4, %v26264_v20  ;;  %v26305_v20 = vld [vmem:[#allocation3 + $0x21] sm:$0xff] }
 0x5c7   :  { %20319 = vmatprep.mubr.msk.f32.mxu0 %vm198_vm4, %v26258_v31  ;;  %29170 = vst [vmem:[#allocation28_spill] sm:$0xff] %v26305_v20  ;;  %v26355_v31 = vld [vmem:[#allocation3 + $0x81] sm:$0xff] }
 0x5c8   :  { %29182 = vst [vmem:[#allocation50_spill] sm:$0xff] %v26355_v31  ;;  %v26365_v0 = vld [vmem:[#allocation3 + $0x220] sm:$0xff] }
 0x5c9   :  { %20094 = vmatmul.mubr.msk.f32.vlgmr.msra.gmra.mrb[40].mxu1 %vm198_vm4, %v26276_v13  ;;  %v26303_v13 = vld [vmem:[#allocation3 + $0x190] sm:$0xff]  ;;  %29184 = vst [vmem:[#allocation52_spill] sm:$0xff] %v26365_v0 }
 0x5ca   :  { %20320 = vmatmul.mubr.msk.f32.gmra.mrb[52].mxu0 %vm198_vm4, %v26266_v40  ;;  %20118 = vmatpush3.msra.mxu1 %v26180_v51  ;;  %29169 = vst [vmem:[#allocation29_spill] sm:$0xff] %v26303_v13  ;;  %v26349_v40 = vld [vmem:[#allocation3 + $0x200] sm:$0xff] }
 0x5cb   :  { %20322 = vmatprep.mubr.msk.f32.mxu0 %vm198_vm4, %v26272_v16  ;;  %20096 = vmatprep.mubr.msk.f32.mxu1 %vm198_vm4, %v26285_v34  ;;  %v26311_v34 = vld [vmem:[#allocation3 + $0x31] sm:$0xff]  ;;  %v26339_v16 = vld [vmem:[#allocation3 + $0x61] sm:$0xff]  ;;  %29180 = vst [vmem:[#allocation48_spill] sm:$0xff] %v26349_v40 }
 0x5cc   :  { %20143 = vmatprep.subr.mxu1 %v26281_v62  ;;  %29171 = vst [vmem:[#allocation24_spill] sm:$0xff] %v26311_v34  ;;  %29178 = vst [vmem:[#allocation46_spill] sm:$0xff] %v26339_v16 }
 0x5cd   :  { %20097 = vmatmul.mubr.msk.f32.gmra.mrb[42].mxu1 %vm198_vm4, %v26299_v26  ;;  %v26320_v26 = vld [vmem:[#allocation3 + $0x1b0] sm:$0xff] }
 0x5ce   :  { %20323 = vmatmul.mubr.msk.f32.gmra.mrb[54].mxu0 %vm198_vm4, %v26287_v63  ;;  %20099 = vmatprep.mubr.msk.f32.mxu1 %vm198_vm4, %v26303_v13  ;;  %29173 = vst [vmem:[#allocation38_spill] sm:$0xff] %v26320_v26  ;;  %v26323_v13 = vld [vmem:[#allocation3 + $0x41] sm:$0xff]  ;;  %v26329_v63 = vld [vmem:[#allocation3 + $0x51] sm:$0xff] }
 0x5cf   :  { %20327 = vmatprep.mubr.msk.f32.mxu0 %vm198_vm4, %v26294_v2  ;;  %29174 = vst [vmem:[#allocation36_spill] sm:$0xff] %v26323_v13  ;;  %29175 = vst [vmem:[#allocation31_spill] sm:$0xff] %v26329_v63 }
 0x5d1   :  { %20100 = vmatmul.mubr.msk.f32.gmra.mrb[44].mxu1 %vm198_vm4, %v26316_v12  ;;  %v26337_v12 = vld [vmem:[#allocation3 + $0x1f0] sm:$0xff] }
 0x5d2   :  { %20328 = vmatmul.mubr.msk.f32.vlgmr.msra.gmra.mrb[40].mxu0 %vm198_vm4, %v26305_v20  ;;  %20102 = vmatprep.mubr.msk.f32.mxu1 %vm198_vm4, %v26320_v26  ;;  %29177 = vst [vmem:[#allocation45_spill] sm:$0xff] %v26337_v12  ;;  %v26345_v26 = vld [vmem:[#allocation3 + $0x71] sm:$0xff] }
 0x5d3   :  { %20330 = vmatprep.mubr.msk.f32.mxu0 %vm198_vm4, %v26311_v34  ;;  %20352 = vmatpush3.msra.mxu0 %v26180_v51  ;;  %v26333_v51 = vld [vmem:[#allocation3 + $0x1c0] sm:$0xff]  ;;  %29179 = vst [vmem:[#allocation47_spill] sm:$0xff] %v26345_v26 }
 0x5d4   :  { %20377 = vmatprep.subr.mxu0 %v26281_v62  ;;  %29176 = vst [vmem:[#allocation37_spill] sm:$0xff] %v26333_v51 }
 0x5d5   :  { %20103 = vmatmul.mubr.msk.f32.gmra.mrb[46].mxu1 %vm198_vm4, %v26333_v51  ;;  %v26353_v51 = vld [vmem:[#allocation3 + $0x210] sm:$0xff] }
 0x5d6   :  { %20331 = vmatmul.mubr.msk.f32.gmra.mrb[42].mxu0 %vm198_vm4, %v26323_v13  ;;  %20105 = vmatprep.mubr.msk.f32.mxu1 %vm198_vm4, %v26337_v12  ;;  %29181 = vst [vmem:[#allocation49_spill] sm:$0xff] %v26353_v51  ;;  %v26361_v12 = vld [vmem:[#allocation3 + $0xb1] sm:$0xff] }
 0x5d7   :  { %20333 = vmatprep.mubr.msk.f32.mxu0 %vm198_vm4, %v26329_v63  ;;  %29183 = vst [vmem:[#allocation51_spill] sm:$0xff] %v26361_v12 }
 0x5d9   :  { %20106 = vmatmul.mubr.msk.f32.gmra.mrb[48].mxu1 %vm198_vm4, %v26349_v40  ;;  %v26369_v40 = vld [vmem:[#allocation3 + $0x230] sm:$0xff] }
 0x5da   :  { %20334 = vmatmul.mubr.msk.f32.gmra.mrb[44].mxu0 %vm198_vm4, %v26339_v16  ;;  %20108 = vmatprep.mubr.msk.f32.mxu1 %vm198_vm4, %v26353_v51  ;;  %29185 = vst [vmem:[#allocation53_spill] sm:$0xff] %v26369_v40  ;;  %v26377_v51 = vld [vmem:[#allocation3 + $0xd1] sm:$0xff] }
 0x5db   :  { %20336 = vmatprep.mubr.msk.f32.mxu0 %vm198_vm4, %v26345_v26  ;;  %29187 = vst [vmem:[#allocation30_spill] sm:$0xff] %v26377_v51 }
 0x5dd   :  { %20109 = vmatmul.mubr.msk.f32.gmra.mrb[50].mxu1 %vm198_vm4, %v26365_v0  ;;  %v26385_v0 = vld [vmem:[#allocation3 + $0x250] sm:$0xff] }
 0x5de   :  { %20337 = vmatmul.mubr.msk.f32.gmra.mrb[46].mxu0 %vm198_vm4, %v26355_v31  ;;  %20111 = vmatprep.mubr.msk.f32.mxu1 %vm198_vm4, %v26369_v40  ;;  %29189 = vst [vmem:[#allocation8_spill] sm:$0xff] %v26385_v0  ;;  %v26393_v40 = vld [vmem:[#allocation3 + $0xf1] sm:$0xff] }
 0x5df   :  { %20339 = vmatprep.mubr.msk.f32.mxu0 %vm198_vm4, %v26361_v12  ;;  %29191 = vst [vmem:[#allocation16_spill] sm:$0xff] %v26393_v40 }
 0x5e1   :  { %20112 = vmatmul.mubr.msk.f32.gmra.mrb[52].mxu1 %vm198_vm4, %v26381_v10  ;;  %v26401_v10 = vld [vmem:[#allocation3 + $0x101] sm:$0xff] }
 0x5e2   :  { %20340 = vmatmul.mubr.msk.f32.gmra.mrb[48].mxu0 %vm198_vm4, %v26371_v52  ;;  %20114 = vmatprep.mubr.msk.f32.mxu1 %vm198_vm4, %v26385_v0  ;;  %29193 = vst [vmem:[#allocation42_spill] sm:$0xff] %v26401_v10  ;;  %v26407_v0 = vld [vmem:[#allocation3 + $0x111] sm:$0xff] }
 0x5e3   :  { %20342 = vmatprep.mubr.msk.f32.mxu0 %vm198_vm4, %v26377_v51  ;;  %29194 = vst [vmem:[#allocation55_spill] sm:$0xff] %v26407_v0 }
 0x5e5   :  { %20115 = vmatmul.mubr.msk.f32.gmra.mrb[54].mxu1 %vm198_vm4, %v26397_v45  ;;  %v26418_v45 = vld [vmem:[#allocation3 + $0x121] sm:$0xff] }
 0x5e6   :  { %20343 = vmatmul.mubr.msk.f32.gmra.mrb[50].mxu0 %vm198_vm4, %v26387_v7  ;;  %20119 = vmatprep.mubr.msk.f32.mxu1 %vm198_vm4, %v26294_v2  ;;  %29196 = vst [vmem:[#allocation57_spill] sm:$0xff] %v26418_v45  ;;  %v26425_v2 = vld [vmem:[#allocation3 + $0x151] sm:$0xff] }
 0x5e7   :  { %20345 = vmatprep.mubr.msk.f32.mxu0 %vm198_vm4, %v26393_v40  ;;  %29197 = vst [vmem:[#allocation58_spill] sm:$0xff] %v26425_v2 }
 0x5e9   :  { %20120 = vmatmul.mubr.msk.f32.vlgmr.msra.gmra.mrb[40].mxu1 %vm198_vm4, %v26305_v20  ;;  %v26432_v20 = vld [vmem:[#allocation3 + $0x161] sm:$0xff] }
 0x5ea   :  { %20346 = vmatmul.mubr.msk.f32.gmra.mrb[52].mxu0 %vm198_vm4, %v26401_v10  ;;  %20144 = vmatpush3.msra.mxu1 %v26281_v62  ;;  %29198 = vst [vmem:[#allocation59_spill] sm:$0xff] %v26432_v20 }
 0x5eb   :  { %20348 = vmatprep.mubr.msk.f32.mxu0 %vm198_vm4, %v26407_v0  ;;  %20122 = vmatprep.mubr.msk.f32.mxu1 %vm198_vm4, %v26311_v34  ;;  %v26438_v34 = vld [vmem:[#allocation3 + $0x171] sm:$0xff] }
 0x5ec   :  { %20169 = vmatprep.subr.mxu1 %v26414_v9  ;;  %29199 = vst [vmem:[#allocation60_spill] sm:$0xff] %v26438_v34 }
 0x5ed   :  { %20123 = vmatmul.mubr.msk.f32.gmra.mrb[42].mxu1 %vm198_vm4, %v26323_v13  ;;  %v26446_v13 = vld [vmem:[#allocation3 + $0x181] sm:$0xff] }
 0x5ee   :  { %20349 = vmatmul.mubr.msk.f32.gmra.mrb[54].mxu0 %vm198_vm4, %v26418_v45  ;;  %20125 = vmatprep.mubr.msk.f32.mxu1 %vm198_vm4, %v26329_v63  ;;  %v26452_v63 = vld [vmem:[#allocation3 + $0x191] sm:$0xff] }
 0x5ef   :  { %20353 = vmatprep.mubr.msk.f32.mxu0 %vm198_vm4, %v26425_v2 }
 0x5f1   :  { %20126 = vmatmul.mubr.msk.f32.gmra.mrb[44].mxu1 %vm198_vm4, %v26339_v16  ;;  %v26470_v16 = vld [vmem:[#allocation3 + $0x1c1] sm:$0xff] }
 0x5f2   :  { %20354 = vmatmul.mubr.msk.f32.vlgmr.msra.gmra.mrb[40].mxu0 %vm198_vm4, %v26432_v20  ;;  %20128 = vmatprep.mubr.msk.f32.mxu1 %vm198_vm4, %v26345_v26  ;;  %v26464_v26 = vld [vmem:[#allocation3 + $0x1b1] sm:$0xff] }
 0x5f3   :  { %20356 = vmatprep.mubr.msk.f32.mxu0 %vm198_vm4, %v26438_v34  ;;  %20378 = vmatpush3.msra.mxu0 %v26281_v62  ;;  %v26458_v62 = vld [vmem:[#allocation3 + $0x1a1] sm:$0xff] }
 0x5f4   :  { %20403 = vmatprep.subr.mxu0 %v26414_v9 }
 0x5f5   :  { %20129 = vmatmul.mubr.msk.f32.gmra.mrb[46].mxu1 %vm198_vm4, %v26355_v31  ;;  %v26482_v31 = vld [vmem:[#allocation3 + $0x201] sm:$0xff] }
 0x5f6   :  { %20357 = vmatmul.mubr.msk.f32.gmra.mrb[42].mxu0 %vm198_vm4, %v26446_v13  ;;  %20131 = vmatprep.mubr.msk.f32.mxu1 %vm198_vm4, %v26361_v12  ;;  %v26476_v12 = vld [vmem:[#allocation3 + $0x1f1] sm:$0xff] }
 0x5f7   :  { %20359 = vmatprep.mubr.msk.f32.mxu0 %vm198_vm4, %v26452_v63 }
 0x5f9   :  { %20132 = vmatmul.mubr.msk.f32.gmra.mrb[48].mxu1 %vm198_vm4, %v26371_v52  ;;  %v26494_v52 = vld [vmem:[#allocation3 + $0x221] sm:$0xff] }
 0x5fa   :  { %20360 = vmatmul.mubr.msk.f32.gmra.mrb[44].mxu0 %vm198_vm4, %v26458_v62  ;;  %20134 = vmatprep.mubr.msk.f32.mxu1 %vm198_vm4, %v26377_v51  ;;  %v26488_v51 = vld [vmem:[#allocation3 + $0x211] sm:$0xff] }
 0x5fb   :  { %20362 = vmatprep.mubr.msk.f32.mxu0 %vm198_vm4, %v26464_v26 }
 0x5fd   :  { %20135 = vmatmul.mubr.msk.f32.gmra.mrb[50].mxu1 %vm198_vm4, %v26387_v7  ;;  %v26506_v7 = vld [vmem:[#allocation3 + $0x241] sm:$0xff] }
 0x5fe   :  { %20363 = vmatmul.mubr.msk.f32.gmra.mrb[46].mxu0 %vm198_vm4, %v26470_v16  ;;  %20137 = vmatprep.mubr.msk.f32.mxu1 %vm198_vm4, %v26393_v40  ;;  %v26500_v40 = vld [vmem:[#allocation3 + $0x231] sm:$0xff] }
 0x5ff   :  { %20365 = vmatprep.mubr.msk.f32.mxu0 %vm198_vm4, %v26476_v12 }
 0x601   :  { %20138 = vmatmul.mubr.msk.f32.gmra.mrb[52].mxu1 %vm198_vm4, %v26401_v10  ;;  %v26519_v10 = vld [vmem:[%s28652_s7 + $0x38] sm:$0xff] }
 0x602   :  { %20366 = vmatmul.mubr.msk.f32.gmra.mrb[48].mxu0 %vm198_vm4, %v26482_v31  ;;  %20140 = vmatprep.mubr.msk.f32.mxu1 %vm198_vm4, %v26407_v0  ;;  %v26512_v0 = vld [vmem:[#allocation3 + $0x251] sm:$0xff]  ;;  %29200 = vst [vmem:[#allocation61_spill] sm:$0xff] %v26519_v10 }
 0x603   :  { %20368 = vmatprep.mubr.msk.f32.mxu0 %vm198_vm4, %v26488_v51 }
 0x605   :  { %20141 = vmatmul.mubr.msk.f32.gmra.mrb[54].mxu1 %vm198_vm4, %v26418_v45  ;;  %v26523_v45 = vld [vmem:[#allocation3 + $0x261] sm:$0xff] }
 0x606   :  { %20369 = vmatmul.mubr.msk.f32.gmra.mrb[50].mxu0 %vm198_vm4, %v26494_v52  ;;  %20145 = vmatprep.mubr.msk.f32.mxu1 %vm198_vm4, %v26425_v2  ;;  %v26530_v2 = vld [vmem:[#allocation3 + $0x12] sm:$0xff] }
 0x607   :  { %20371 = vmatprep.mubr.msk.f32.mxu0 %vm198_vm4, %v26500_v40  ;;  %29201 = vst [vmem:[#allocation62_spill] sm:$0xff] %v26530_v2 }
 0x609   :  { %20146 = vmatmul.mubr.msk.f32.vlgmr.msra.gmra.mrb[40].mxu1 %vm198_vm4, %v26432_v20  ;;  %v26537_v20 = vld [vmem:[#allocation3 + $0x22] sm:$0xff] }
 0x60a   :  { %20372 = vmatmul.mubr.msk.f32.gmra.mrb[52].mxu0 %vm198_vm4, %v26506_v7  ;;  %20170 = vmatpush3.msra.mxu1 %v26414_v9  ;;  %29202 = vst [vmem:[#allocation63_spill] sm:$0xff] %v26537_v20 }
 0x60b   :  { %20374 = vmatprep.mubr.msk.f32.mxu0 %vm198_vm4, %v26512_v0  ;;  %20148 = vmatprep.mubr.msk.f32.mxu1 %vm198_vm4, %v26438_v34  ;;  %v26543_v34 = vld [vmem:[#allocation3 + $0x32] sm:$0xff] }
 0x60c   :  { %20195 = vmatprep.subr.mxu1 %v26519_v10  ;;  %29203 = vst [vmem:[#allocation64_spill] sm:$0xff] %v26543_v34 }
 0x60d   :  { %20149 = vmatmul.mubr.msk.f32.gmra.mrb[42].mxu1 %vm198_vm4, %v26446_v13 }
 0x60e   :  { %20375 = vmatmul.mubr.msk.f32.gmra.mrb[54].mxu0 %vm198_vm4, %v26523_v45  ;;  %20151 = vmatprep.mubr.msk.f32.mxu1 %vm198_vm4, %v26452_v63 }
 0x60f   :  { %20379 = vmatprep.mubr.msk.f32.mxu0 %vm198_vm4, %v26530_v2  ;;  %v26551_v2 = vld [vmem:[#allocation3 + $0x42] sm:$0xff] }
 0x610   :  { %29204 = vst [vmem:[#allocation65_spill] sm:$0xff] %v26551_v2 }
 0x611   :  { %20152 = vmatmul.mubr.msk.f32.gmra.mrb[44].mxu1 %vm198_vm4, %v26458_v62 }
 0x612   :  { %20380 = vmatmul.mubr.msk.f32.vlgmr.msra.gmra.mrb[40].mxu0 %vm198_vm4, %v26537_v20  ;;  %20154 = vmatprep.mubr.msk.f32.mxu1 %vm198_vm4, %v26464_v26  ;;  %v26557_v20 = vld [vmem:[#allocation3 + $0x52] sm:$0xff] }
 0x613   :  { %20382 = vmatprep.mubr.msk.f32.mxu0 %vm198_vm4, %v26543_v34  ;;  %20404 = vmatpush3.msra.mxu0 %v26414_v9  ;;  %29205 = vst [vmem:[#allocation66_spill] sm:$0xff] %v26557_v20  ;;  %v26563_v9 = vld [vmem:[#allocation3 + $0x62] sm:$0xff]  ;;  %v26569_v34 = vld [vmem:[#allocation3 + $0x72] sm:$0xff] }
 0x614   :  { %20429 = vmatprep.subr.mxu0 %v26519_v10  ;;  %29206 = vst [vmem:[#allocation67_spill] sm:$0xff] %v26563_v9  ;;  %29207 = vst [vmem:[#allocation68_spill] sm:$0xff] %v26569_v34 }
 0x615   :  { %20155 = vmatmul.mubr.msk.f32.gmra.mrb[46].mxu1 %vm198_vm4, %v26470_v16 }
 0x616   :  { %20383 = vmatmul.mubr.msk.f32.gmra.mrb[42].mxu0 %vm198_vm4, %v26551_v2  ;;  %20157 = vmatprep.mubr.msk.f32.mxu1 %vm198_vm4, %v26476_v12  ;;  %v26581_v2 = vld [vmem:[#allocation3 + $0xb2] sm:$0xff] }
 0x617   :  { %20385 = vmatprep.mubr.msk.f32.mxu0 %vm198_vm4, %v26557_v20  ;;  %v26575_v20 = vld [vmem:[#allocation3 + $0x82] sm:$0xff]  ;;  %29209 = vst [vmem:[#allocation70_spill] sm:$0xff] %v26581_v2 }
 0x618   :  { %29208 = vst [vmem:[#allocation69_spill] sm:$0xff] %v26575_v20 }
 0x619   :  { %20158 = vmatmul.mubr.msk.f32.gmra.mrb[48].mxu1 %vm198_vm4, %v26482_v31 }
 0x61a   :  { %20386 = vmatmul.mubr.msk.f32.gmra.mrb[44].mxu0 %vm198_vm4, %v26563_v9  ;;  %20160 = vmatprep.mubr.msk.f32.mxu1 %vm198_vm4, %v26488_v51  ;;  %v26593_v9 = vld [vmem:[#allocation3 + $0xd2] sm:$0xff] }
 0x61b   :  { %20388 = vmatprep.mubr.msk.f32.mxu0 %vm198_vm4, %v26569_v34  ;;  %v26587_v34 = vld [vmem:[#allocation3 + $0xc2] sm:$0xff]  ;;  %29211 = vst [vmem:[#allocation72_spill] sm:$0xff] %v26593_v9 }
 0x61c   :  { %29210 = vst [vmem:[#allocation71_spill] sm:$0xff] %v26587_v34 }
 0x61d   :  { %20161 = vmatmul.mubr.msk.f32.gmra.mrb[50].mxu1 %vm198_vm4, %v26494_v52 }
 0x61e   :  { %20389 = vmatmul.mubr.msk.f32.gmra.mrb[46].mxu0 %vm198_vm4, %v26575_v20  ;;  %20163 = vmatprep.mubr.msk.f32.mxu1 %vm198_vm4, %v26500_v40  ;;  %v26605_v20 = vld [vmem:[#allocation3 + $0xf2] sm:$0xff] }
 0x61f   :  { %20391 = vmatprep.mubr.msk.f32.mxu0 %vm198_vm4, %v26581_v2  ;;  %v26599_v2 = vld [vmem:[#allocation3 + $0xe2] sm:$0xff]  ;;  %29213 = vst [vmem:[#allocation74_spill] sm:$0xff] %v26605_v20 }
 0x620   :  { %29212 = vst [vmem:[#allocation73_spill] sm:$0xff] %v26599_v2 }
 0x621   :  { %20164 = vmatmul.mubr.msk.f32.gmra.mrb[52].mxu1 %vm198_vm4, %v26506_v7 }
 0x622   :  { %20392 = vmatmul.mubr.msk.f32.gmra.mrb[48].mxu0 %vm198_vm4, %v26587_v34  ;;  %20166 = vmatprep.mubr.msk.f32.mxu1 %vm198_vm4, %v26512_v0  ;;  %v26617_v34 = vld [vmem:[#allocation3 + $0x112] sm:$0xff] }
 0x623   :  { %20394 = vmatprep.mubr.msk.f32.mxu0 %vm198_vm4, %v26593_v9  ;;  %v26611_v9 = vld [vmem:[#allocation3 + $0x102] sm:$0xff] }
 0x625   :  { %20167 = vmatmul.mubr.msk.f32.gmra.mrb[54].mxu1 %vm198_vm4, %v26523_v45 }
 0x626   :  { %20395 = vmatmul.mubr.msk.f32.gmra.mrb[50].mxu0 %vm198_vm4, %v26599_v2  ;;  %20171 = vmatprep.mubr.msk.f32.mxu1 %vm198_vm4, %v26076_v57  ;;  %v26628_v2 = vld [vmem:[#allocation3 + $0x122] sm:$0xff] }
 0x627   :  { %20397 = vmatprep.mubr.msk.f32.mxu0 %vm198_vm4, %v26605_v20  ;;  %v26624_v20 = vld [vmem:[%s28652_s7 + $0x40] sm:$0xff] }
 0x629   :  { %20172 = vmatmul.mubr.msk.f32.vlgmr.msra.gmra.mrb[40].mxu1 %vm198_vm4, %v26085_v54 }
 0x62a   :  { %20398 = vmatmul.mubr.msk.f32.gmra.mrb[52].mxu0 %vm198_vm4, %v26611_v9  ;;  %20196 = vmatpush3.msra.mxu1 %v26519_v10 }
 0x62b   :  { %20400 = vmatprep.mubr.msk.f32.mxu0 %vm198_vm4, %v26617_v34  ;;  %20174 = vmatprep.mubr.msk.f32.mxu1 %vm198_vm4, %v26097_v21 }
 0x62c   :  { %20221 = vmatprep.subr.mxu1 %v26624_v20 }
 0x62d   :  { %20175 = vmatmul.mubr.msk.f32.gmra.mrb[42].mxu1 %vm198_vm4, %v26101_v41 }
 0x62e   :  { %20401 = vmatmul.mubr.msk.f32.gmra.mrb[54].mxu0 %vm198_vm4, %v26628_v2  ;;  %20177 = vmatprep.mubr.msk.f32.mxu1 %vm198_vm4, %v26110_v37  ;;  %v26656_v37 = vld [vmem:[#allocation3 + $0x440] sm:$0xff] }
 0x62f   :  { %20405 = vmatprep.mubr.msk.f32.mxu0 %vm198_vm4, %v25941_v46 }
 0x631   :  { %20178 = vmatmul.mubr.msk.f32.gmra.mrb[44].mxu1 %vm198_vm4, %v26114_v4 }
 0x632   :  { %20406 = vmatmul.mubr.msk.f32.vlgmr.msra.gmra.mrb[40].mxu0 %vm198_vm4, %v25943_v8  ;;  %20180 = vmatprep.mubr.msk.f32.mxu1 %vm198_vm4, %v26123_v11 }
 0x633   :  { %20408 = vmatprep.mubr.msk.f32.mxu0 %vm198_vm4, %v25965_v3  ;;  %20430 = vmatpush3.msra.mxu0 %v26519_v10  ;;  %v26668_v10 = vld [vmem:[#allocation3 + $0x301] sm:$0xff] }
 0x634   :  { %20455 = vmatprep.subr.mxu0 %v26624_v20 }
 0x635   :  { %20181 = vmatmul.mubr.msk.f32.gmra.mrb[46].mxu1 %vm198_vm4, %v26656_v37 }
 0x636   :  { %20409 = vmatmul.mubr.msk.f32.gmra.mrb[42].mxu0 %vm198_vm4, %v25969_v17  ;;  %20183 = vmatprep.mubr.msk.f32.mxu1 %vm198_vm4, %v26132_v61 }
 0x637   :  { %20411 = vmatprep.mubr.msk.f32.mxu0 %vm198_vm4, %v25982_v23 }
 0x639   :  { %20184 = vmatmul.mubr.msk.f32.gmra.mrb[48].mxu1 %vm198_vm4, %v26136_v22 }
 0x63a   :  { %20412 = vmatmul.mubr.msk.f32.gmra.mrb[44].mxu0 %vm198_vm4, %v25986_v36  ;;  %20186 = vmatprep.mubr.msk.f32.mxu1 %vm198_vm4, %v26144_v30 }
 0x63b   :  { %20414 = vmatprep.mubr.msk.f32.mxu0 %vm198_vm4, %v26001_v1 }
 0x63d   :  { %20187 = vmatmul.mubr.msk.f32.gmra.mrb[50].mxu1 %vm198_vm4, %v26148_v38  ;;  %v26692_v38 = vld [vmem:[#allocation3 + $0x4e0] sm:$0xff] }
 0x63e   :  { %20415 = vmatmul.mubr.msk.f32.gmra.mrb[46].mxu0 %vm198_vm4, %v26668_v10  ;;  %20189 = vmatprep.mubr.msk.f32.mxu1 %vm198_vm4, %v26156_v28 }
 0x63f   :  { %20417 = vmatprep.mubr.msk.f32.mxu0 %vm198_vm4, %v26015_v59 }
 0x641   :  { %20190 = vmatmul.mubr.msk.f32.gmra.mrb[52].mxu1 %vm198_vm4, %v26160_v15 }
 0x642   :  { %20418 = vmatmul.mubr.msk.f32.gmra.mrb[48].mxu0 %vm198_vm4, %v26021_v24  ;;  %20192 = vmatprep.mubr.msk.f32.mxu1 %vm198_vm4, %v26168_v60  ;;  %v26704_v60 = vld [vmem:[#allocation3 + $0x3a1] sm:$0xff] }
 0x643   :  { %20420 = vmatprep.mubr.msk.f32.mxu0 %vm198_vm4, %v26031_v33 }
 0x645   :  { %20193 = vmatmul.mubr.msk.f32.gmra.mrb[54].mxu1 %vm198_vm4, %v26692_v38 }
 0x646   :  { %20421 = vmatmul.mubr.msk.f32.gmra.mrb[50].mxu0 %vm198_vm4, %v26035_v14  ;;  %20197 = vmatprep.mubr.msk.f32.mxu1 %vm198_vm4, %v25941_v46  ;;  %v22047_v46 = vld [vmem:[%s28652_s7 + $0x8] sm:$0xff] }
 0x647   :  { %20423 = vmatprep.mubr.msk.f32.mxu0 %vm198_vm4, %v26047_v29 }
 0x649   :  { %20198 = vmatmul.mubr.msk.f32.vlgmr.msra.gmra.mrb[40].mxu1 %vm198_vm4, %v25943_v8  ;;  %v26743_v8 = vld [vmem:[#allocation3 + $0x441] sm:$0xff] }
 0x64a   :  { %20424 = vmatmul.mubr.msk.f32.gmra.mrb[52].mxu0 %vm198_vm4, %v26051_v44  ;;  %20222 = vmatpush3.msra.mxu1 %v26624_v20 }
 0x64b   :  { %20426 = vmatprep.mubr.msk.f32.mxu0 %vm198_vm4, %v26063_v25  ;;  %20200 = vmatprep.mubr.msk.f32.mxu1 %vm198_vm4, %v25965_v3  ;;  %v26777_v3 = vld [vmem:[#allocation3 + $0x4e1] sm:$0xff] }
 0x64c   :  { %20481 = vmatprep.subr.mxu1 %v22047_v46 }
 0x64d   :  { %20201 = vmatmul.mubr.msk.f32.gmra.mrb[42].mxu1 %vm198_vm4, %v25969_v17  ;;  %v22048_v17 = vld [vmem:[%s28652_s7] sm:$0xff] }
 0x64e   :  { %20427 = vmatmul.mubr.msk.f32.gmra.mrb[54].mxu0 %vm198_vm4, %v26704_v60  ;;  %20203 = vmatprep.mubr.msk.f32.mxu1 %vm198_vm4, %v25982_v23  ;;  %v29216_v23 = vld [vmem:[#allocation40_spill] sm:$0xff] }
 0x64f   :  { %20431 = vmatprep.mubr.msk.f32.mxu0 %vm198_vm4, %v25973_v42 }
 0x651   :  { %20204 = vmatmul.mubr.msk.f32.gmra.mrb[44].mxu1 %vm198_vm4, %v25986_v36  ;;  %v26814_v36 = vld [vmem:[#allocation3 + $0x302] sm:$0xff] }
 0x652   :  { %20432 = vmatmul.mubr.msk.f32.vlgmr.msra.gmra.mrb[40].mxu0 %vm198_vm4, %v25977_v18  ;;  %20206 = vmatprep.mubr.msk.f32.mxu1 %vm198_vm4, %v26001_v1  ;;  %v29219_v1 = vld [vmem:[#allocation11_spill] sm:$0xff] }
 0x653   :  { %20434 = vmatprep.mubr.msk.f32.mxu0 %vm198_vm4, %v25989_v50  ;;  %20456 = vmatpush3.msra.mxu0 %v26624_v20 }
 0x654   :  { %20715 = vmatprep.subr.mxu0 %v22047_v46 }
 0x655   :  { %20207 = vmatmul.mubr.msk.f32.gmra.mrb[46].mxu1 %vm198_vm4, %v26668_v10 }
 0x656   :  { %20435 = vmatmul.mubr.msk.f32.gmra.mrb[42].mxu0 %vm198_vm4, %v25995_v43  ;;  %20209 = vmatprep.mubr.msk.f32.mxu1 %vm198_vm4, %v26015_v59  ;;  %v29222_v59 = vld [vmem:[#allocation21_spill] sm:$0xff] }
 0x657   :  { %20437 = vmatprep.mubr.msk.f32.mxu0 %vm198_vm4, %v26005_v5 }
 0x659   :  { %20210 = vmatmul.mubr.msk.f32.gmra.mrb[48].mxu1 %vm198_vm4, %v26021_v24  ;;  %v29223_v24 = vld [vmem:[#allocation10_spill] sm:$0xff] }
 0x65a   :  { %20438 = vmatmul.mubr.msk.f32.gmra.mrb[44].mxu0 %vm198_vm4, %v26011_v19  ;;  %20212 = vmatprep.mubr.msk.f32.mxu1 %vm198_vm4, %v26031_v33  ;;  %v29225_v33 = vld [vmem:[#allocation28_spill] sm:$0xff] }
 0x65b   :  { %20440 = vmatprep.mubr.msk.f32.mxu0 %vm198_vm4, %v26023_v53 }
 0x65d   :  { %20213 = vmatmul.mubr.msk.f32.gmra.mrb[50].mxu1 %vm198_vm4, %v26035_v14  ;;  %v26848_v14 = vld [vmem:[#allocation3 + $0x3a2] sm:$0xff] }
 0x65e   :  { %20441 = vmatmul.mubr.msk.f32.gmra.mrb[46].mxu0 %vm198_vm4, %v26743_v8  ;;  %20215 = vmatprep.mubr.msk.f32.mxu1 %vm198_vm4, %v26047_v29  ;;  %v29228_v29 = vld [vmem:[#allocation58_spill] sm:$0xff] }
 0x65f   :  { %20443 = vmatprep.mubr.msk.f32.mxu0 %vm198_vm4, %v26037_v35 }
 0x661   :  { %20216 = vmatmul.mubr.msk.f32.gmra.mrb[52].mxu1 %vm198_vm4, %v26051_v44  ;;  %v29229_v44 = vld [vmem:[#allocation36_spill] sm:$0xff] }
 0x662   :  { %20444 = vmatmul.mubr.msk.f32.gmra.mrb[48].mxu0 %vm198_vm4, %v26043_v47  ;;  %20218 = vmatprep.mubr.msk.f32.mxu1 %vm198_vm4, %v26063_v25  ;;  %v29232_v25 = vld [vmem:[#allocation60_spill] sm:$0xff] }
 0x663   :  { %20446 = vmatprep.mubr.msk.f32.mxu0 %vm198_vm4, %v26053_v32 }
 0x665   :  { %20219 = vmatmul.mubr.msk.f32.gmra.mrb[54].mxu1 %vm198_vm4, %v26704_v60 }
 0x666   :  { %20447 = vmatmul.mubr.msk.f32.gmra.mrb[50].mxu0 %vm198_vm4, %v26059_v58  ;;  %20223 = vmatprep.mubr.msk.f32.mxu1 %vm198_vm4, %v25973_v42  ;;  %v29214_v42 = vld [vmem:[#allocation15_spill] sm:$0xff] }
 0x667   :  { %20449 = vmatprep.mubr.msk.f32.mxu0 %vm198_vm4, %v26067_v49 }
 0x669   :  { %20224 = vmatmul.mubr.msk.f32.vlgmr.msra.gmra.mrb[40].mxu1 %vm198_vm4, %v25977_v18  ;;  %v29215_v18 = vld [vmem:[#allocation20_spill] sm:$0xff] }
 0x66a   :  { %20450 = vmatmul.mubr.msk.f32.gmra.mrb[52].mxu0 %vm198_vm4, %v26072_v55  ;;  %20482 = vmatpush3.msra.mxu1 %v22047_v46 }
 0x66b   :  { %20452 = vmatprep.mubr.msk.f32.mxu0 %vm198_vm4, %v26087_v56  ;;  %20226 = vmatprep.mubr.msk.f32.mxu1 %vm198_vm4, %v25989_v50  ;;  %v29217_v50 = vld [vmem:[#allocation9_spill] sm:$0xff] }
 0x66c   :  { %20507 = vmatprep.subr.mxu1 %v22048_v17 }
 0x66d   :  { %20227 = vmatmul.mubr.msk.f32.gmra.mrb[42].mxu1 %vm198_vm4, %v25995_v43  ;;  %v29218_v43 = vld [vmem:[#allocation7_spill] sm:$0xff] }
 0x66e   :  { %20453 = vmatmul.mubr.msk.f32.gmra.mrb[54].mxu0 %vm198_vm4, %v26777_v3  ;;  %20229 = vmatprep.mubr.msk.f32.mxu1 %vm198_vm4, %v26005_v5  ;;  %v29220_v5 = vld [vmem:[#allocation22_spill] sm:$0xff] }
 0x66f   :  { %20457 = vmatprep.mubr.msk.f32.mxu0 %vm198_vm4, %v26193_v6  ;;  %v29236_v6 = vld [vmem:[#allocation51_spill] sm:$0xff] }
 0x671   :  { %20230 = vmatmul.mubr.msk.f32.gmra.mrb[44].mxu1 %vm198_vm4, %v26011_v19  ;;  %v29221_v19 = vld [vmem:[#allocation34_spill] sm:$0xff] }
 0x672   :  { %20458 = vmatmul.mubr.msk.f32.vlgmr.msra.gmra.mrb[40].mxu0 %vm198_vm4, %v26199_v27  ;;  %20232 = vmatprep.mubr.msk.f32.mxu1 %vm198_vm4, %v26023_v53  ;;  %v29224_v53 = vld [vmem:[#allocation25_spill] sm:$0xff]  ;;  %v29237_v27 = vld [vmem:[#allocation54_spill] sm:$0xff] }
 0x673   :  { %20460 = vmatprep.mubr.msk.f32.mxu0 %vm198_vm4, %v26207_v48  ;;  %20716 = vmatpush3.msra.mxu0 %v22047_v46  ;;  %v29238_v48 = vld [vmem:[#allocation30_spill] sm:$0xff]  ;;  %v29240_v46 = vld [vmem:[#allocation16_spill] sm:$0xff] }
 0x674   :  { %20741 = vmatprep.subr.mxu0 %v22048_v17 }
 0x675   :  { %20233 = vmatmul.mubr.msk.f32.gmra.mrb[46].mxu1 %vm198_vm4, %v26743_v8 }
 0x676   :  { %20461 = vmatmul.mubr.msk.f32.gmra.mrb[42].mxu0 %vm198_vm4, %v26213_v39  ;;  %20235 = vmatprep.mubr.msk.f32.mxu1 %vm198_vm4, %v26037_v35  ;;  %v29226_v35 = vld [vmem:[#allocation24_spill] sm:$0xff]  ;;  %v29239_v39 = vld [vmem:[#allocation19_spill] sm:$0xff] }
 0x677   :  { %20463 = vmatprep.mubr.msk.f32.mxu0 %vm198_vm4, %v29214_v42  ;;  %v29242_v42 = vld [vmem:[#allocation55_spill] sm:$0xff] }
 0x679   :  { %20236 = vmatmul.mubr.msk.f32.gmra.mrb[48].mxu1 %vm198_vm4, %v26043_v47  ;;  %v29227_v47 = vld [vmem:[#allocation27_spill] sm:$0xff] }
 0x67a   :  { %20464 = vmatmul.mubr.msk.f32.gmra.mrb[44].mxu0 %vm198_vm4, %v29215_v18  ;;  %20238 = vmatprep.mubr.msk.f32.mxu1 %vm198_vm4, %v26053_v32  ;;  %v29230_v32 = vld [vmem:[#allocation31_spill] sm:$0xff]  ;;  %v29243_v18 = vld [vmem:[#allocation57_spill] sm:$0xff] }
 0x67b   :  { %20466 = vmatprep.mubr.msk.f32.mxu0 %vm198_vm4, %v29216_v23  ;;  %v29244_v23 = vld [vmem:[#allocation26_spill] sm:$0xff] }
 0x67d   :  { %20239 = vmatmul.mubr.msk.f32.gmra.mrb[50].mxu1 %vm198_vm4, %v26059_v58  ;;  %v29231_v58 = vld [vmem:[#allocation59_spill] sm:$0xff] }
 0x67e   :  { %20467 = vmatmul.mubr.msk.f32.gmra.mrb[46].mxu0 %vm198_vm4, %v26814_v36  ;;  %20241 = vmatprep.mubr.msk.f32.mxu1 %vm198_vm4, %v26067_v49  ;;  %v29233_v49 = vld [vmem:[#allocation46_spill] sm:$0xff] }
 0x67f   :  { %20469 = vmatprep.mubr.msk.f32.mxu0 %vm198_vm4, %v29217_v50  ;;  %v29245_v50 = vld [vmem:[#allocation39_spill] sm:$0xff] }
 0x681   :  { %20242 = vmatmul.mubr.msk.f32.gmra.mrb[52].mxu1 %vm198_vm4, %v26072_v55  ;;  %v29234_v55 = vld [vmem:[#allocation47_spill] sm:$0xff] }
 0x682   :  { %20470 = vmatmul.mubr.msk.f32.gmra.mrb[48].mxu0 %vm198_vm4, %v29218_v43  ;;  %20244 = vmatprep.mubr.msk.f32.mxu1 %vm198_vm4, %v26087_v56  ;;  %v29235_v56 = vld [vmem:[#allocation50_spill] sm:$0xff]  ;;  %v22049_v43 = vld [vmem:[%s28652_s7 + $0x10] sm:$0xff] }
 0x683   :  { %20472 = vmatprep.mubr.msk.f32.mxu0 %vm198_vm4, %v29219_v1  ;;  %v29246_v1 = vld [vmem:[#allocation14_spill] sm:$0xff] }
 0x685   :  { %20245 = vmatmul.mubr.msk.f32.gmra.mrb[54].mxu1 %vm198_vm4, %v26777_v3 }
 0x686   :  { %20473 = vmatmul.mubr.msk.f32.gmra.mrb[50].mxu0 %vm198_vm4, %v29220_v5  ;;  %20483 = vmatprep.mubr.msk.f32.mxu1 %vm198_vm4, %v29222_v59  ;;  %v29247_v5 = vld [vmem:[#allocation23_spill] sm:$0xff] }
 0x687   :  { %20475 = vmatprep.mubr.msk.f32.mxu0 %vm198_vm4, %v29221_v19  ;;  %v29248_v19 = vld [vmem:[#allocation33_spill] sm:$0xff] }
 0x689   :  { %20484 = vmatmul.mubr.msk.f32.vlgmr.msra.gmra.mrb[56].mxu1 %vm198_vm4, %v29225_v33 }
 0x68a   :  { %20476 = vmatmul.mubr.msk.f32.gmra.mrb[52].mxu0 %vm198_vm4, %v29223_v24  ;;  %20508 = vmatpush3.msra.mxu1 %v22048_v17  ;;  %v29249_v24 = vld [vmem:[#allocation29_spill] sm:$0xff] }
 0x68b   :  { %20478 = vmatprep.mubr.msk.f32.mxu0 %vm198_vm4, %v29224_v53  ;;  %20486 = vmatprep.mubr.msk.f32.mxu1 %vm198_vm4, %v29226_v35  ;;  %v29250_v53 = vld [vmem:[#allocation32_spill] sm:$0xff] }
 0x68c   :  { %20533 = vmatprep.subr.mxu1 %v29227_v47 }
 0x68d   :  { %20487 = vmatmul.mubr.msk.f32.gmra.mrb[58].mxu1 %vm198_vm4, %v29229_v44 }
 0x68e   :  { %20479 = vmatmul.mubr.msk.f32.gmra.mrb[54].mxu0 %vm198_vm4, %v26848_v14  ;;  %20489 = vmatprep.mubr.msk.f32.mxu1 %vm198_vm4, %v29230_v32 }
 0x68f   :  { %20717 = vmatprep.mubr.msk.f32.mxu0 %vm198_vm4, %v29228_v29 }
 0x691   :  { %20490 = vmatmul.mubr.msk.f32.gmra.mrb[60].mxu1 %vm198_vm4, %v29233_v49 }
 0x692   :  { %20718 = vmatmul.mubr.msk.f32.vlgmr.msra.gmra.mrb[56].mxu0 %vm198_vm4, %v29231_v58  ;;  %20492 = vmatprep.mubr.msk.f32.mxu1 %vm198_vm4, %v29234_v55 }
 0x693   :  { %20720 = vmatprep.mubr.msk.f32.mxu0 %vm198_vm4, %v29232_v25  ;;  %20742 = vmatpush3.msra.mxu0 %v22048_v17  ;;  %v29241_v17 = vld [vmem:[#allocation42_spill] sm:$0xff] }
 0x694   :  { %20767 = vmatprep.subr.mxu0 %v29227_v47  ;;  %v29251_v47 = vld [vmem:[#allocation38_spill] sm:$0xff] }
 0x695   :  { %20493 = vmatmul.mubr.msk.f32.gmra.mrb[62].mxu1 %vm198_vm4, %v29235_v56 }
 0x696   :  { %20721 = vmatmul.mubr.msk.f32.gmra.mrb[58].mxu0 %vm198_vm4, %v26446_v13  ;;  %20495 = vmatprep.mubr.msk.f32.mxu1 %vm198_vm4, %v29236_v6 }
 0x697   :  { %20723 = vmatprep.mubr.msk.f32.mxu0 %vm198_vm4, %v26452_v63 }
 0x699   :  { %20496 = vmatmul.mubr.msk.f32.gmra.mrb[64].mxu1 %vm198_vm4, %v29237_v27 }
 0x69a   :  { %20724 = vmatmul.mubr.msk.f32.gmra.mrb[60].mxu0 %vm198_vm4, %v26458_v62  ;;  %20498 = vmatprep.mubr.msk.f32.mxu1 %vm198_vm4, %v29238_v48 }
 0x69b   :  { %20726 = vmatprep.mubr.msk.f32.mxu0 %vm198_vm4, %v26464_v26 }
 0x69d   :  { %20499 = vmatmul.mubr.msk.f32.gmra.mrb[66].mxu1 %vm198_vm4, %v29239_v39 }
 0x69e   :  { %20727 = vmatmul.mubr.msk.f32.gmra.mrb[62].mxu0 %vm198_vm4, %v26470_v16  ;;  %20501 = vmatprep.mubr.msk.f32.mxu1 %vm198_vm4, %v29240_v46 }
 0x69f   :  { %20729 = vmatprep.mubr.msk.f32.mxu0 %vm198_vm4, %v26476_v12 }
 0x6a1   :  { %20502 = vmatmul.mubr.msk.f32.gmra.mrb[68].mxu1 %vm198_vm4, %v29241_v17 }
 0x6a2   :  { %20730 = vmatmul.mubr.msk.f32.gmra.mrb[64].mxu0 %vm198_vm4, %v26482_v31  ;;  %20504 = vmatprep.mubr.msk.f32.mxu1 %vm198_vm4, %v29242_v42 }
 0x6a3   :  { %20732 = vmatprep.mubr.msk.f32.mxu0 %vm198_vm4, %v26488_v51 }
 0x6a5   :  { %20505 = vmatmul.mubr.msk.f32.gmra.mrb[70].mxu1 %vm198_vm4, %v29243_v18 }
 0x6a6   :  { %20733 = vmatmul.mubr.msk.f32.gmra.mrb[66].mxu0 %vm198_vm4, %v26494_v52  ;;  %20509 = vmatprep.mubr.msk.f32.mxu1 %vm198_vm4, %v29244_v23  ;;  %v29255_v23 = vld [vmem:[#allocation49_spill] sm:$0xff] }
 0x6a7   :  { %20735 = vmatprep.mubr.msk.f32.mxu0 %vm198_vm4, %v26500_v40 }
 0x6a9   :  { %20510 = vmatmul.mubr.msk.f32.vlgmr.msra.gmra.mrb[56].mxu1 %vm198_vm4, %v29245_v50  ;;  %v22071_v50 = vld [vmem:[#allocation3 + $0x471] sm:$0xff] }
 0x6aa   :  { %20736 = vmatmul.mubr.msk.f32.gmra.mrb[68].mxu0 %vm198_vm4, %v26506_v7  ;;  %20534 = vmatpush3.msra.mxu1 %v22049_v43 }
 0x6ab   :  { %20738 = vmatprep.mubr.msk.f32.mxu0 %vm198_vm4, %v26512_v0  ;;  %20512 = vmatprep.mubr.msk.f32.mxu1 %vm198_vm4, %v29246_v1  ;;  %v22074_v1 = vld [vmem:[#allocation3 + $0x4a1] sm:$0xff] }
 0x6ac   :  { %20559 = vmatprep.subr.mxu1 %v29247_v5 }
 0x6ad   :  { %20513 = vmatmul.mubr.msk.f32.gmra.mrb[58].mxu1 %vm198_vm4, %v29248_v19  ;;  %v22076_v19 = vld [vmem:[#allocation3 + $0x4c1] sm:$0xff] }
 0x6ae   :  { %20739 = vmatmul.mubr.msk.f32.gmra.mrb[70].mxu0 %vm198_vm4, %v26523_v45  ;;  %20515 = vmatprep.mubr.msk.f32.mxu1 %vm198_vm4, %v29249_v24  ;;  %v22077_v24 = vld [vmem:[#allocation3 + $0x4d1] sm:$0xff] }
 0x6af   :  { %20743 = vmatprep.mubr.msk.f32.mxu0 %vm198_vm4, %v29222_v59  ;;  %v29252_v59 = vld [vmem:[#allocation37_spill] sm:$0xff] }
 0x6b1   :  { %20516 = vmatmul.mubr.msk.f32.gmra.mrb[60].mxu1 %vm198_vm4, %v29250_v53  ;;  %v29280_v53 = vld [vmem:[#allocation61_spill] sm:$0xff] }
 0x6b2   :  { %20744 = vmatmul.mubr.msk.f32.vlgmr.msra.gmra.mrb[56].mxu0 %vm198_vm4, %v29225_v33  ;;  %20518 = vmatprep.mubr.msk.f32.mxu1 %vm198_vm4, %v29251_v47  ;;  %v29253_v33 = vld [vmem:[#allocation45_spill] sm:$0xff]  ;;  %v22079_v47 = vld [vmem:[#allocation3 + $0x2a2] sm:$0xff] }
 0x6b3   :  { %20746 = vmatprep.mubr.msk.f32.mxu0 %vm198_vm4, %v29226_v35  ;;  %20768 = vmatpush3.msra.mxu0 %v22049_v43  ;;  %v29254_v35 = vld [vmem:[#allocation48_spill] sm:$0xff]  ;;  %v22073_v43 = vld [vmem:[#allocation3 + $0x491] sm:$0xff] }
 0x6b4   :  { %20793 = vmatprep.subr.mxu0 %v29247_v5 }
 0x6b5   :  { %20519 = vmatmul.mubr.msk.f32.gmra.mrb[62].mxu1 %vm198_vm4, %v29252_v59  ;;  %v22080_v59 = vld [vmem:[#allocation3 + $0x2b2] sm:$0xff] }
 0x6b6   :  { %20747 = vmatmul.mubr.msk.f32.gmra.mrb[58].mxu0 %vm198_vm4, %v29229_v44  ;;  %20521 = vmatprep.mubr.msk.f32.mxu1 %vm198_vm4, %v29253_v33  ;;  %v29256_v44 = vld [vmem:[#allocation52_spill] sm:$0xff] }
 0x6b7   :  { %20749 = vmatprep.mubr.msk.f32.mxu0 %vm198_vm4, %v29230_v32  ;;  %v29257_v32 = vld [vmem:[#allocation53_spill] sm:$0xff]  ;;  %v22081_v33 = vld [vmem:[#allocation3 + $0x2c2] sm:$0xff] }
 0x6b9   :  { %20522 = vmatmul.mubr.msk.f32.gmra.mrb[64].mxu1 %vm198_vm4, %v29254_v35  ;;  %v22082_v35 = vld [vmem:[#allocation3 + $0x2d2] sm:$0xff] }
 0x6ba   :  { %20750 = vmatmul.mubr.msk.f32.gmra.mrb[60].mxu0 %vm198_vm4, %v29233_v49  ;;  %20524 = vmatprep.mubr.msk.f32.mxu1 %vm198_vm4, %v29255_v23  ;;  %v29258_v49 = vld [vmem:[#allocation12_spill] sm:$0xff] }
 0x6bb   :  { %20752 = vmatprep.mubr.msk.f32.mxu0 %vm198_vm4, %v29234_v55  ;;  %v29259_v55 = vld [vmem:[#allocation8_spill] sm:$0xff] }
 0x6bc   :  { %v22083_v23 = vld [vmem:[#allocation3 + $0x2e2] sm:$0xff] }
 0x6bd   :  { %20525 = vmatmul.mubr.msk.f32.gmra.mrb[66].mxu1 %vm198_vm4, %v29256_v44  ;;  %v22084_v44 = vld [vmem:[#allocation3 + $0x2f2] sm:$0xff] }
 0x6be   :  { %20753 = vmatmul.mubr.msk.f32.gmra.mrb[62].mxu0 %vm198_vm4, %v29235_v56  ;;  %20527 = vmatprep.mubr.msk.f32.mxu1 %vm198_vm4, %v29257_v32  ;;  %v29260_v56 = vld [vmem:[#allocation43_spill] sm:$0xff]  ;;  %v22085_v32 = vld [vmem:[#allocation3 + $0x332] sm:$0xff] }
 0x6bf   :  { %20755 = vmatprep.mubr.msk.f32.mxu0 %vm198_vm4, %v29236_v6  ;;  %v29261_v6 = vld [vmem:[#allocation18_spill] sm:$0xff] }
 0x6c1   :  { %20528 = vmatmul.mubr.msk.f32.gmra.mrb[68].mxu1 %vm198_vm4, %v29258_v49 }
 0x6c2   :  { %20756 = vmatmul.mubr.msk.f32.gmra.mrb[64].mxu0 %vm198_vm4, %v29237_v27  ;;  %20530 = vmatprep.mubr.msk.f32.mxu1 %vm198_vm4, %v29259_v55  ;;  %v29264_v27 = vld [vmem:[#allocation64_spill] sm:$0xff] }
 0x6c3   :  { %20758 = vmatprep.mubr.msk.f32.mxu0 %vm198_vm4, %v29238_v48  ;;  %v29270_v48 = vld [vmem:[#allocation70_spill] sm:$0xff] }
 0x6c5   :  { %20531 = vmatmul.mubr.msk.f32.gmra.mrb[70].mxu1 %vm198_vm4, %v29260_v56 }
 0x6c6   :  { %20759 = vmatmul.mubr.msk.f32.gmra.mrb[66].mxu0 %vm198_vm4, %v29239_v39  ;;  %20535 = vmatprep.mubr.msk.f32.mxu1 %vm198_vm4, %v29228_v29  ;;  %v29262_v29 = vld [vmem:[#allocation62_spill] sm:$0xff] }
 0x6c7   :  { %20761 = vmatprep.mubr.msk.f32.mxu0 %vm198_vm4, %v29240_v46  ;;  %v22066_v39 = vld [vmem:[#allocation3 + $0x3f1] sm:$0xff]  ;;  %v22067_v46 = vld [vmem:[#allocation3 + $0x401] sm:$0xff] }
 0x6c9   :  { %20536 = vmatmul.mubr.msk.f32.vlgmr.msra.gmra.mrb[56].mxu1 %vm198_vm4, %v29231_v58  ;;  %v29263_v58 = vld [vmem:[#allocation63_spill] sm:$0xff] }
 0x6ca   :  { %20762 = vmatmul.mubr.msk.f32.gmra.mrb[68].mxu0 %vm198_vm4, %v29241_v17  ;;  %20560 = vmatpush3.msra.mxu1 %v29247_v5  ;;  %v22068_v17 = vld [vmem:[#allocation3 + $0x411] sm:$0xff] }
 0x6cb   :  { %20764 = vmatprep.mubr.msk.f32.mxu0 %vm198_vm4, %v29242_v42  ;;  %20538 = vmatprep.mubr.msk.f32.mxu1 %vm198_vm4, %v29232_v25  ;;  %v29267_v25 = vld [vmem:[#allocation67_spill] sm:$0xff] }
 0x6cc   :  { %20585 = vmatprep.subr.mxu1 %v29261_v6  ;;  %v22069_v42 = vld [vmem:[#allocation3 + $0x421] sm:$0xff] }
 0x6cd   :  { %20539 = vmatmul.mubr.msk.f32.gmra.mrb[58].mxu1 %vm198_vm4, %v26446_v13  ;;  %v29265_v13 = vld [vmem:[#allocation65_spill] sm:$0xff] }
 0x6ce   :  { %20765 = vmatmul.mubr.msk.f32.gmra.mrb[70].mxu0 %vm198_vm4, %v29243_v18  ;;  %20541 = vmatprep.mubr.msk.f32.mxu1 %vm198_vm4, %v26452_v63  ;;  %v29266_v63 = vld [vmem:[#allocation66_spill] sm:$0xff] }
 0x6cf   :  { %20769 = vmatprep.mubr.msk.f32.mxu0 %vm198_vm4, %v29262_v29  ;;  %v22070_v18 = vld [vmem:[#allocation3 + $0x431] sm:$0xff] }
 0x6d0   :  { %v22087_v29 = vld [vmem:[#allocation3 + $0x352] sm:$0xff] }
 0x6d1   :  { %20542 = vmatmul.mubr.msk.f32.gmra.mrb[60].mxu1 %vm198_vm4, %v26458_v62  ;;  %v29268_v62 = vld [vmem:[#allocation68_spill] sm:$0xff] }
 0x6d2   :  { %20770 = vmatmul.mubr.msk.f32.vlgmr.msra.gmra.mrb[56].mxu0 %vm198_vm4, %v29263_v58  ;;  %20544 = vmatprep.mubr.msk.f32.mxu1 %vm198_vm4, %v26464_v26  ;;  %v29269_v26 = vld [vmem:[#allocation69_spill] sm:$0xff] }
 0x6d3   :  { %20772 = vmatprep.mubr.msk.f32.mxu0 %vm198_vm4, %v29264_v27  ;;  %20794 = vmatpush3.msra.mxu0 %v29247_v5  ;;  %v22075_v5 = vld [vmem:[#allocation3 + $0x4b1] sm:$0xff] }
 0x6d4   :  { %20819 = vmatprep.subr.mxu0 %v29261_v6 }
 0x6d5   :  { %20545 = vmatmul.mubr.msk.f32.gmra.mrb[62].mxu1 %vm198_vm4, %v26470_v16  ;;  %v29272_v16 = vld [vmem:[#allocation72_spill] sm:$0xff] }
 0x6d6   :  { %20773 = vmatmul.mubr.msk.f32.gmra.mrb[58].mxu0 %vm198_vm4, %v29265_v13  ;;  %20547 = vmatprep.mubr.msk.f32.mxu1 %vm198_vm4, %v26476_v12  ;;  %v29271_v12 = vld [vmem:[#allocation71_spill] sm:$0xff] }
 0x6d7   :  { %20775 = vmatprep.mubr.msk.f32.mxu0 %vm198_vm4, %v29266_v63 }
 0x6d9   :  { %20548 = vmatmul.mubr.msk.f32.gmra.mrb[64].mxu1 %vm198_vm4, %v26482_v31  ;;  %v29274_v31 = vld [vmem:[#allocation74_spill] sm:$0xff] }
 0x6da   :  { %20776 = vmatmul.mubr.msk.f32.gmra.mrb[60].mxu0 %vm198_vm4, %v29267_v25  ;;  %20550 = vmatprep.mubr.msk.f32.mxu1 %vm198_vm4, %v26488_v51  ;;  %v29273_v51 = vld [vmem:[#allocation73_spill] sm:$0xff] }
 0x6db   :  { %20778 = vmatprep.mubr.msk.f32.mxu0 %vm198_vm4, %v29268_v62 }
 0x6dd   :  { %20551 = vmatmul.mubr.msk.f32.gmra.mrb[66].mxu1 %vm198_vm4, %v26494_v52  ;;  %v22055_v52 = vld [vmem:[#allocation3 + $0x2e1] sm:$0xff] }
 0x6de   :  { %20779 = vmatmul.mubr.msk.f32.gmra.mrb[62].mxu0 %vm198_vm4, %v29269_v26  ;;  %20553 = vmatprep.mubr.msk.f32.mxu1 %vm198_vm4, %v26500_v40  ;;  %v22061_v40 = vld [vmem:[#allocation3 + $0x371] sm:$0xff]  ;;  %v22088_v26 = vld [vmem:[#allocation3 + $0x362] sm:$0xff] }
 0x6df   :  { %20781 = vmatprep.mubr.msk.f32.mxu0 %vm198_vm4, %v29270_v48 }
 0x6e1   :  { %20554 = vmatmul.mubr.msk.f32.gmra.mrb[68].mxu1 %vm198_vm4, %v26506_v7  ;;  %v22052_v7 = vld [vmem:[#allocation3 + $0x2b1] sm:$0xff] }
 0x6e2   :  { %20782 = vmatmul.mubr.msk.f32.gmra.mrb[64].mxu0 %vm198_vm4, %v29271_v12  ;;  %20556 = vmatprep.mubr.msk.f32.mxu1 %vm198_vm4, %v26512_v0  ;;  %v22059_v0 = vld [vmem:[#allocation3 + $0x351] sm:$0xff] }
 0x6e3   :  { %20784 = vmatprep.mubr.msk.f32.mxu0 %vm198_vm4, %v29272_v16  ;;  %v22089_v16 = vld [vmem:[#allocation3 + $0x372] sm:$0xff] }
 0x6e5   :  { %20557 = vmatmul.mubr.msk.f32.gmra.mrb[70].mxu1 %vm198_vm4, %v26523_v45  ;;  %v29275_v45 = vld [vmem:[#allocation17_spill] sm:$0xff] }
 0x6e6   :  { %20785 = vmatmul.mubr.msk.f32.gmra.mrb[66].mxu0 %vm198_vm4, %v29273_v51  ;;  %20561 = vmatprep.mubr.msk.f32.mxu1 %vm198_vm4, %v26076_v57  ;;  %v22050_v57 = vld [vmem:[#allocation3 + $0x291] sm:$0xff] }
 0x6e7   :  { %20787 = vmatprep.mubr.msk.f32.mxu0 %vm198_vm4, %v29274_v31 }
 0x6e9   :  { %20562 = vmatmul.mubr.msk.f32.vlgmr.msra.gmra.mrb[56].mxu1 %vm198_vm4, %v26085_v54  ;;  %v22051_v54 = vld [vmem:[#allocation3 + $0x2a1] sm:$0xff] }
 0x6ea   :  { %20788 = vmatmul.mubr.msk.f32.gmra.mrb[68].mxu0 %vm198_vm4, %v26611_v9  ;;  %20586 = vmatpush3.msra.mxu1 %v29261_v6  ;;  %v29276_v9 = vld [vmem:[#allocation35_spill] sm:$0xff] }
 0x6eb   :  { %20790 = vmatprep.mubr.msk.f32.mxu0 %vm198_vm4, %v26617_v34  ;;  %20564 = vmatprep.mubr.msk.f32.mxu1 %vm198_vm4, %v26097_v21  ;;  %v22053_v21 = vld [vmem:[#allocation3 + $0x2c1] sm:$0xff]  ;;  %v22063_v34 = vld [vmem:[#allocation3 + $0x391] sm:$0xff] }
 0x6ec   :  { %20611 = vmatprep.subr.mxu1 %v29275_v45 }
 0x6ed   :  { %20565 = vmatmul.mubr.msk.f32.gmra.mrb[58].mxu1 %vm198_vm4, %v26101_v41  ;;  %v22054_v41 = vld [vmem:[#allocation3 + $0x2d1] sm:$0xff] }
 0x6ee   :  { %20791 = vmatmul.mubr.msk.f32.gmra.mrb[70].mxu0 %vm198_vm4, %v26628_v2  ;;  %20567 = vmatprep.mubr.msk.f32.mxu1 %vm198_vm4, %v29276_v9  ;;  %v22065_v2 = vld [vmem:[#allocation3 + $0x3e1] sm:$0xff] }
 0x6ef   :  { %20795 = vmatprep.mubr.msk.f32.mxu0 %vm198_vm4, %v22050_v57 }
 0x6f1   :  { %20568 = vmatmul.mubr.msk.f32.gmra.mrb[60].mxu1 %vm198_vm4, %v26114_v4  ;;  %v22056_v4 = vld [vmem:[#allocation3 + $0x2f1] sm:$0xff] }
 0x6f2   :  { %20796 = vmatmul.mubr.msk.f32.vlgmr.msra.gmra.mrb[56].mxu0 %vm198_vm4, %v22051_v54  ;;  %20570 = vmatprep.mubr.msk.f32.mxu1 %vm198_vm4, %v26123_v11  ;;  %v22057_v11 = vld [vmem:[#allocation3 + $0x331] sm:$0xff] }
 0x6f3   :  { %20798 = vmatprep.mubr.msk.f32.mxu0 %vm198_vm4, %v22052_v7  ;;  %20820 = vmatpush3.msra.mxu0 %v29261_v6  ;;  %v22086_v6 = vld [vmem:[#allocation3 + $0x342] sm:$0xff] }
 0x6f4   :  { %20845 = vmatprep.subr.mxu0 %v29275_v45 }
 0x6f5   :  { %20571 = vmatmul.mubr.msk.f32.gmra.mrb[62].mxu1 %vm198_vm4, %v26656_v37  ;;  %v29277_v37 = vld [vmem:[#allocation41_spill] sm:$0xff] }
 0x6f6   :  { %20799 = vmatmul.mubr.msk.f32.gmra.mrb[58].mxu0 %vm198_vm4, %v22053_v21  ;;  %20573 = vmatprep.mubr.msk.f32.mxu1 %vm198_vm4, %v26132_v61  ;;  %v22058_v61 = vld [vmem:[#allocation3 + $0x341] sm:$0xff] }
 0x6f7   :  { %20801 = vmatprep.mubr.msk.f32.mxu0 %vm198_vm4, %v22054_v41 }
 0x6f9   :  { %20574 = vmatmul.mubr.msk.f32.gmra.mrb[64].mxu1 %vm198_vm4, %v26136_v22  ;;  %v29278_v22 = vld [vmem:[#allocation13_spill] sm:$0xff] }
 0x6fa   :  { %20802 = vmatmul.mubr.msk.f32.gmra.mrb[60].mxu0 %vm198_vm4, %v22055_v52  ;;  %20576 = vmatprep.mubr.msk.f32.mxu1 %vm198_vm4, %v26144_v30  ;;  %v22060_v30 = vld [vmem:[#allocation3 + $0x361] sm:$0xff] }
 0x6fb   :  { %20804 = vmatprep.mubr.msk.f32.mxu0 %vm198_vm4, %v22056_v4 }
 0x6fd   :  { %20577 = vmatmul.mubr.msk.f32.gmra.mrb[66].mxu1 %vm198_vm4, %v29277_v37  ;;  %v22091_v37 = vld [vmem:[#allocation3 + $0x392] sm:$0xff] }
 0x6fe   :  { %20805 = vmatmul.mubr.msk.f32.gmra.mrb[62].mxu0 %vm198_vm4, %v26668_v10  ;;  %20579 = vmatprep.mubr.msk.f32.mxu1 %vm198_vm4, %v26156_v28  ;;  %v22062_v28 = vld [vmem:[#allocation3 + $0x381] sm:$0xff] }
 0x6ff   :  { %20807 = vmatprep.mubr.msk.f32.mxu0 %vm198_vm4, %v22057_v11 }
 0x701   :  { %20580 = vmatmul.mubr.msk.f32.gmra.mrb[68].mxu1 %vm198_vm4, %v26160_v15  ;;  %v29279_v15 = vld [vmem:[#allocation56_spill] sm:$0xff] }
 0x702   :  { %20808 = vmatmul.mubr.msk.f32.gmra.mrb[64].mxu0 %vm198_vm4, %v22058_v61  ;;  %20582 = vmatprep.mubr.msk.f32.mxu1 %vm198_vm4, %v29278_v22 }
 0x703   :  { %20810 = vmatprep.mubr.msk.f32.mxu0 %vm198_vm4, %v22059_v0 }
 0x705   :  { %20583 = vmatmul.mubr.msk.f32.gmra.mrb[70].mxu1 %vm198_vm4, %v26692_v38  ;;  %v22064_v38 = vld [vmem:[#allocation3 + $0x3d1] sm:$0xff] }
 0x706   :  { %20811 = vmatmul.mubr.msk.f32.gmra.mrb[66].mxu0 %vm198_vm4, %v22060_v30  ;;  %20587 = vmatprep.mubr.msk.f32.mxu1 %vm198_vm4, %v22050_v57 }
 0x707   :  { %20813 = vmatprep.mubr.msk.f32.mxu0 %vm198_vm4, %v22061_v40 }
 0x709   :  { %20588 = vmatmul.mubr.msk.f32.vlgmr.msra.gmra.mrb[56].mxu1 %vm198_vm4, %v22051_v54  ;;  %v13190_v54 = vld [vmem:[#allocation3 + $0x160] sm:$0xff] }
 0x70a   :  { %20814 = vmatmul.mubr.msk.f32.gmra.mrb[68].mxu0 %vm198_vm4, %v22062_v28  ;;  %20612 = vmatpush3.msra.mxu1 %v29275_v45 }
 0x70b   :  { %20816 = vmatprep.mubr.msk.f32.mxu0 %vm198_vm4, %v22063_v34  ;;  %20590 = vmatprep.mubr.msk.f32.mxu1 %vm198_vm4, %v22052_v7 }
 0x70c   :  { %20637 = vmatprep.subr.mxu1 %v29279_v15 }
 0x70d   :  { %20591 = vmatmul.mubr.msk.f32.gmra.mrb[58].mxu1 %vm198_vm4, %v22053_v21 }
 0x70e   :  { %20817 = vmatmul.mubr.msk.f32.gmra.mrb[70].mxu0 %vm198_vm4, %v26704_v60  ;;  %20593 = vmatprep.mubr.msk.f32.mxu1 %vm198_vm4, %v22054_v41 }
 0x70f   :  { %20821 = vmatprep.mubr.msk.f32.mxu0 %vm198_vm4, %v22064_v38 }
 0x711   :  { %20594 = vmatmul.mubr.msk.f32.gmra.mrb[60].mxu1 %vm198_vm4, %v22055_v52  ;;  %v22090_v52 = vld [vmem:[#allocation3 + $0x382] sm:$0xff] }
 0x712   :  { %20822 = vmatmul.mubr.msk.f32.vlgmr.msra.gmra.mrb[56].mxu0 %vm198_vm4, %v22065_v2  ;;  %20596 = vmatprep.mubr.msk.f32.mxu1 %vm198_vm4, %v22056_v4 }
 0x713   :  { %20824 = vmatprep.mubr.msk.f32.mxu0 %vm198_vm4, %v22066_v39  ;;  %20846 = vmatpush3.msra.mxu0 %v29275_v45 }
 0x714   :  { %20871 = vmatprep.subr.mxu0 %v29279_v15 }
 0x715   :  { %20597 = vmatmul.mubr.msk.f32.gmra.mrb[62].mxu1 %vm198_vm4, %v26668_v10  ;;  %v22072_v10 = vld [vmem:[#allocation3 + $0x481] sm:$0xff] }
 0x716   :  { %20825 = vmatmul.mubr.msk.f32.gmra.mrb[58].mxu0 %vm198_vm4, %v22067_v46  ;;  %20599 = vmatprep.mubr.msk.f32.mxu1 %vm198_vm4, %v22057_v11 }
 0x717   :  { %20827 = vmatprep.mubr.msk.f32.mxu0 %vm198_vm4, %v22068_v17 }
 0x719   :  { %20600 = vmatmul.mubr.msk.f32.gmra.mrb[64].mxu1 %vm198_vm4, %v22058_v61 }
 0x71a   :  { %20828 = vmatmul.mubr.msk.f32.gmra.mrb[60].mxu0 %vm198_vm4, %v22069_v42  ;;  %20602 = vmatprep.mubr.msk.f32.mxu1 %vm198_vm4, %v22059_v0  ;;  %v13191_v0 = vld [vmem:[#allocation3 + $0x170] sm:$0xff] }
 0x71b   :  { %20830 = vmatprep.mubr.msk.f32.mxu0 %vm198_vm4, %v22070_v18 }
 0x71d   :  { %20603 = vmatmul.mubr.msk.f32.gmra.mrb[66].mxu1 %vm198_vm4, %v22060_v30 }
 0x71e   :  { %20831 = vmatmul.mubr.msk.f32.gmra.mrb[62].mxu0 %vm198_vm4, %v26743_v8  ;;  %20605 = vmatprep.mubr.msk.f32.mxu1 %vm198_vm4, %v22061_v40 }
 0x71f   :  { %20833 = vmatprep.mubr.msk.f32.mxu0 %vm198_vm4, %v22071_v50 }
 0x721   :  { %20606 = vmatmul.mubr.msk.f32.gmra.mrb[68].mxu1 %vm198_vm4, %v22062_v28  ;;  %v13192_v28 = vld [vmem:[#allocation3 + $0x180] sm:$0xff] }
 0x722   :  { %20834 = vmatmul.mubr.msk.f32.gmra.mrb[64].mxu0 %vm198_vm4, %v22072_v10  ;;  %20608 = vmatprep.mubr.msk.f32.mxu1 %vm198_vm4, %v22063_v34 }
 0x723   :  { %20836 = vmatprep.mubr.msk.f32.mxu0 %vm198_vm4, %v22073_v43 }
 0x725   :  { %20609 = vmatmul.mubr.msk.f32.gmra.mrb[70].mxu1 %vm198_vm4, %v26704_v60  ;;  %v22078_v60 = vld [vmem:[#allocation3 + $0x292] sm:$0xff] }
 0x726   :  { %20837 = vmatmul.mubr.msk.f32.gmra.mrb[66].mxu0 %vm198_vm4, %v22074_v1  ;;  %20613 = vmatprep.mubr.msk.f32.mxu1 %vm198_vm4, %v22064_v38 }
 0x727   :  { %20839 = vmatprep.mubr.msk.f32.mxu0 %vm198_vm4, %v22075_v5 }
 0x729   :  { %20614 = vmatmul.mubr.msk.f32.vlgmr.msra.gmra.mrb[56].mxu1 %vm198_vm4, %v22065_v2 }
 0x72a   :  { %20840 = vmatmul.mubr.msk.f32.gmra.mrb[68].mxu0 %vm198_vm4, %v22076_v19  ;;  %20638 = vmatpush3.msra.mxu1 %v29279_v15 }
 0x72b   :  { %20842 = vmatprep.mubr.msk.f32.mxu0 %vm198_vm4, %v22077_v24  ;;  %20616 = vmatprep.mubr.msk.f32.mxu1 %vm198_vm4, %v22066_v39 }
 0x72c   :  { %20663 = vmatprep.subr.mxu1 %v29280_v53 }
 0x72d   :  { %20617 = vmatmul.mubr.msk.f32.gmra.mrb[58].mxu1 %vm198_vm4, %v22067_v46  ;;  %v27239_v46 = vld [vmem:[#allocation3 + $0x21] sm:$0xff] }
 0x72e   :  { %20843 = vmatmul.mubr.msk.f32.gmra.mrb[70].mxu0 %vm198_vm4, %v26777_v3  ;;  %20619 = vmatprep.mubr.msk.f32.mxu1 %vm198_vm4, %v22068_v17 }
 0x72f   :  { %20847 = vmatprep.mubr.msk.f32.mxu0 %vm198_vm4, %v22078_v60  ;;  %v27257_v60 = vld [vmem:[#allocation3 + $0x31] sm:$0xff] }
 0x731   :  { %20620 = vmatmul.mubr.msk.f32.gmra.mrb[60].mxu1 %vm198_vm4, %v22069_v42 }
 0x732   :  { %20848 = vmatmul.mubr.msk.f32.vlgmr.msra.gmra.mrb[56].mxu0 %vm198_vm4, %v22079_v47  ;;  %20622 = vmatprep.mubr.msk.f32.mxu1 %vm198_vm4, %v22070_v18 }
 0x733   :  { %20850 = vmatprep.mubr.msk.f32.mxu0 %vm198_vm4, %v22080_v59  ;;  %20872 = vmatpush3.msra.mxu0 %v29279_v15 }
 0x734   :  { %20897 = vmatprep.subr.mxu0 %v29280_v53 }
 0x735   :  { %20623 = vmatmul.mubr.msk.f32.gmra.mrb[62].mxu1 %vm198_vm4, %v26743_v8 }
 0x736   :  { %20851 = vmatmul.mubr.msk.f32.gmra.mrb[58].mxu0 %vm198_vm4, %v22081_v33  ;;  %20625 = vmatprep.mubr.msk.f32.mxu1 %vm198_vm4, %v22071_v50 }
 0x737   :  { %20853 = vmatprep.mubr.msk.f32.mxu0 %vm198_vm4, %v22082_v35  ;;  %v27266_v35 = vld [vmem:[#allocation3 + $0x41] sm:$0xff] }
 0x739   :  { %20626 = vmatmul.mubr.msk.f32.gmra.mrb[64].mxu1 %vm198_vm4, %v22072_v10  ;;  %v13193_v10 = vld [vmem:[#allocation3 + $0x190] sm:$0xff] }
 0x73a   :  { %20854 = vmatmul.mubr.msk.f32.gmra.mrb[60].mxu0 %vm198_vm4, %v22083_v23  ;;  %20628 = vmatprep.mubr.msk.f32.mxu1 %vm198_vm4, %v22073_v43 }
 0x73b   :  { %20856 = vmatprep.mubr.msk.f32.mxu0 %vm198_vm4, %v22084_v44 }
 0x73c   :  { %v27171_v49 = vpop.f32.mrb[40].mxu1 }
 0x73d   :  { %v15348_v8 = vsel %vm198_vm4, %v27171_v49, 0.0  ;;  %v27175_v55 = vpop.f32.mrb[41].mxu1  ;;  %20629 = vmatmul.mubr.msk.f32.gmra.mrb[66].mxu1 %vm198_vm4, %v22074_v1 }
 0x73e   :  { %20857 = vmatmul.mubr.msk.f32.gmra.mrb[62].mxu0 %vm198_vm4, %v26814_v36  ;;  %v15347_v56 = vsel %vm198_vm4, %v27175_v55, 0.0  ;;  %20631 = vmatprep.mubr.msk.f32.mxu1 %vm198_vm4, %v22075_v5  ;;  %v13194_v5 = vld [vmem:[#allocation3 + $0x1a0] sm:$0xff] }
 0x73f   :  { %20859 = vmatprep.mubr.msk.f32.mxu0 %vm198_vm4, %v22085_v32  ;;  %v15349_v36 = vadd.f32 %v15348_v8, %v15347_v56  ;;  %v13195_v56 = vld [vmem:[#allocation3 + $0x1b0] sm:$0xff] }
 0x740   :  { %v27183_v58 = vpop.f32.mrb[42].mxu1 }
 0x741   :  { %v27185_v27 = vpop.f32.mrb[43].mxu1  ;;  %20632 = vmatmul.mubr.msk.f32.gmra.mrb[68].mxu1 %vm198_vm4, %v22076_v19  ;;  %v15352_v51 = vsel %vm198_vm4, %v27183_v58, 0.0 }
 0x742   :  { %20860 = vmatmul.mubr.msk.f32.gmra.mrb[64].mxu0 %vm198_vm4, %v22086_v6  ;;  %v15350_v63 = vsel %vm198_vm4, %v27185_v27, 0.0  ;;  %20634 = vmatprep.mubr.msk.f32.mxu1 %vm198_vm4, %v22077_v24 }
 0x743   :  { %20862 = vmatprep.mubr.msk.f32.mxu0 %vm198_vm4, %v22087_v29  ;;  %v15351_v48 = vadd.f32 %v15350_v63, %v15349_v36  ;;  %v13196_v63 = vld [vmem:[#allocation3 + $0x1c0] sm:$0xff] }
 0x744   :  { %v27203_v31 = vpop.f32.mrb[44].mxu1 }
 0x745   :  { %v27188_v13 = vpop.f32.mrb[40].mxu0  ;;  %v27205_v57 = vpop.f32.mrb[45].mxu1  ;;  %v15353_v9 = vadd.f32 %v15352_v51, %v15351_v48  ;;  %20635 = vmatmul.mubr.msk.f32.gmra.mrb[70].mxu1 %vm198_vm4, %v26777_v3  ;;  %v15356_v3 = vsel %vm198_vm4, %v27203_v31, 0.0 }
 0x746   :  { %29281 = vst [vmem:[#allocation15_spill] sm:$0xff] %v27188_v13  ;;  %v15386_v25 = vsel %vm198_vm4, %v27188_v13, 0.0  ;;  %v27195_v62 = vpop.f32.mrb[41].mxu0  ;;  %20863 = vmatmul.mubr.msk.f32.gmra.mrb[66].mxu0 %vm198_vm4, %v22088_v26  ;;  %v15354_v21 = vsel %vm198_vm4, %v27205_v57, 0.0  ;;  %20639 = vmatprep.mubr.msk.f32.mxu1 %vm198_vm4, %v13190_v54 }
 0x747   :  { %29282 = vst [vmem:[#allocation20_spill] sm:$0xff] %v27195_v62  ;;  %v15385_v12 = vsel %vm198_vm4, %v27195_v62, 0.0  ;;  %20865 = vmatprep.mubr.msk.f32.mxu0 %vm198_vm4, %v22089_v16  ;;  %v15355_v4 = vadd.f32 %v15354_v21, %v15353_v9 }
 0x748   :  { %v15387_v45 = vadd.f32 %v15386_v25, %v15385_v12  ;;  %v27222_v61 = vpop.f32.mrb[46].mxu1  ;;  %v13197_v12 = vld [vmem:[#allocation3 + $0x1d0] sm:$0xff] }
 0x749   :  { %v27209_v7 = vpop.f32.mrb[42].mxu0  ;;  %v27224_v30 = vpop.f32.mrb[47].mxu1  ;;  %v15357_v40 = vadd.f32 %v15356_v3, %v15355_v4  ;;  %20640 = vmatmul.mubr.msk.f32.vlgmr.msra.gmra.mrb[56].mxu1 %vm198_vm4, %v13191_v0  ;;  %v15360_v18 = vsel %vm198_vm4, %v27222_v61, 0.0  ;;  %v13198_v3 = vld [vmem:[#allocation3 + $0x200] sm:$0xff] }
 0x74a   :  { %v27214_v41 = vpop.f32.mrb[43].mxu0  ;;  %20866 = vmatmul.mubr.msk.f32.gmra.mrb[68].mxu0 %vm198_vm4, %v22090_v52  ;;  %v15390_v34 = vsel %vm198_vm4, %v27209_v7, 0.0  ;;  %v15358_v38 = vsel %vm198_vm4, %v27224_v30, 0.0  ;;  %20664 = vmatpush3.msra.mxu1 %v29280_v53 }
 0x74b   :  { %29283 = vst [vmem:[#allocation40_spill] sm:$0xff] %v27214_v41  ;;  %v15388_v11 = vsel %vm198_vm4, %v27214_v41, 0.0  ;;  %20868 = vmatprep.mubr.msk.f32.mxu0 %vm198_vm4, %v22091_v37  ;;  %20642 = vmatprep.mubr.msk.f32.mxu1 %vm198_vm4, %v13192_v28  ;;  %v15359_v17 = vadd.f32 %v15358_v38, %v15357_v40  ;;  %v27311_v40 = vld [vmem:[#allocation3 + $0x71] sm:$0xff] }
 0x74c   :  { %v15389_v22 = vadd.f32 %v15388_v11, %v15387_v45  ;;  %20689 = vmatprep.subr.mxu1 %v26624_v20  ;;  %v27248_v50 = vpop.f32.mrb[48].mxu1  ;;  %v27294_v45 = vld [vmem:[#allocation3 + $0x61] sm:$0xff] }
 0x74d   :  { %v27229_v15 = vpop.f32.mrb[44].mxu0  ;;  %v27250_v1 = vpop.f32.mrb[49].mxu1  ;;  %20643 = vmatmul.mubr.msk.f32.gmra.mrb[58].mxu1 %vm198_vm4, %v13193_v10  ;;  %v15364_v32 = vsel %vm198_vm4, %v27248_v50, 0.0  ;;  %v27328_v10 = vld [vmem:[#allocation3 + $0x91] sm:$0xff] }
 0x74e   :  { %v27235_v2 = vpop.f32.mrb[45].mxu0  ;;  %v15391_v39 = vadd.f32 %v15390_v34, %v15389_v22  ;;  %20869 = vmatmul.mubr.msk.f32.gmra.mrb[70].mxu0 %vm198_vm4, %v26848_v14  ;;  %v15361_v14 = vadd.f32 %v15360_v18, %v15359_v17  ;;  %v15394_v19 = vsel %vm198_vm4, %v27229_v15, 0.0  ;;  %v15362_v47 = vsel %vm198_vm4, %v27250_v1, 0.0  ;;  %20645 = vmatprep.mubr.msk.f32.mxu1 %vm198_vm4, %v13194_v5 }
 0x74f   :  { %v15392_v42 = vsel %vm198_vm4, %v27235_v2, 0.0  ;;  %20873 = vmatprep.mubr.msk.f32.mxu0 %vm198_vm4, %v27239_v46 }
 0x750   :  { %v15393_v43 = vadd.f32 %v15392_v42, %v15391_v39  ;;  %v15363_v23 = vadd.f32 %v15362_v47, %v15361_v14  ;;  %v27275_v8 = vpop.f32.mrb[50].mxu1  ;;  %v27320_v39 = vld [vmem:[#allocation3 + $0x81] sm:$0xff]  ;;  %v13199_v14 = vld [vmem:[#allocation3 + $0x210] sm:$0xff] }
 0x751   :  { %v27255_v24 = vpop.f32.mrb[46].mxu0  ;;  %29284 = vst [vmem:[#allocation9_spill] sm:$0xff] %v27275_v8  ;;  %v27277_v36 = vpop.f32.mrb[51].mxu1  ;;  %20646 = vmatmul.mubr.msk.f32.gmra.mrb[60].mxu1 %vm198_vm4, %v13195_v56  ;;  %v15368_v21 = vsel %vm198_vm4, %v27275_v8, 0.0 }
 0x752   :  { %v27262_v59 = vpop.f32.mrb[47].mxu0  ;;  %v15395_v33 = vadd.f32 %v15394_v19, %v15393_v43  ;;  %20874 = vmatmul.mubr.msk.f32.vlgmr.msra.gmra.mrb[56].mxu0 %vm198_vm4, %v27257_v60  ;;  %v15365_v29 = vadd.f32 %v15364_v32, %v15363_v23  ;;  %v15398_v25 = vsel %vm198_vm4, %v27255_v24, 0.0  ;;  %v15366_v48 = vsel %vm198_vm4, %v27277_v36, 0.0  ;;  %20648 = vmatprep.mubr.msk.f32.mxu1 %vm198_vm4, %v13196_v63 }
 0x753   :  { %v15396_v44 = vsel %vm198_vm4, %v27262_v59, 0.0  ;;  %20876 = vmatprep.mubr.msk.f32.mxu0 %vm198_vm4, %v27266_v35  ;;  %20898 = vmatpush3.msra.mxu0 %v29280_v53  ;;  %v27285_v53 = vld [vmem:[#allocation3 + $0x51] sm:$0xff] }
 0x754   :  { %v15397_v6 = vadd.f32 %v15396_v44, %v15395_v33  ;;  %20923 = vmatprep.subr.mxu0 %v26624_v20  ;;  %v15367_v9 = vadd.f32 %v15366_v48, %v15365_v29  ;;  %v27302_v52 = vpop.f32.mrb[52].mxu1  ;;  %v13200_v33 = vld [vmem:[#allocation3 + $0x220] sm:$0xff] }
 0x755   :  { %v27283_v26 = vpop.f32.mrb[48].mxu0  ;;  %29285 = vst [vmem:[#allocation7_spill] sm:$0xff] %v27302_v52  ;;  %v27304_v11 = vpop.f32.mrb[53].mxu1  ;;  %20649 = vmatmul.mubr.msk.f32.gmra.mrb[62].mxu1 %vm198_vm4, %v13197_v12  ;;  %v15372_v18 = vsel %vm198_vm4, %v27302_v52, 0.0  ;;  %v27346_v29 = vld [vmem:[#allocation3 + $0xc1] sm:$0xff]  ;;  %v13201_v12 = vld [vmem:[#allocation3 + $0x230] sm:$0xff] }
 0x756   :  { %v27290_v16 = vpop.f32.mrb[49].mxu0  ;;  %v15399_v51 = vadd.f32 %v15398_v25, %v15397_v6  ;;  %20877 = vmatmul.mubr.msk.f32.gmra.mrb[58].mxu0 %vm198_vm4, %v27285_v53  ;;  %29286 = vst [vmem:[#allocation11_spill] sm:$0xff] %v27304_v11  ;;  %v15369_v37 = vadd.f32 %v15368_v21, %v15367_v9  ;;  %v15402_v0 = vsel %vm198_vm4, %v27283_v26, 0.0  ;;  %v15370_v28 = vsel %vm198_vm4, %v27304_v11, 0.0  ;;  %20651 = vmatprep.mubr.msk.f32.mxu1 %vm198_vm4, %v13198_v3 }
 0x757   :  { %v15400_v54 = vsel %vm198_vm4, %v27290_v16, 0.0  ;;  %20879 = vmatprep.mubr.msk.f32.mxu0 %vm198_vm4, %v27294_v45 }
 0x758   :  { %v15401_v4 = vadd.f32 %v15400_v54, %v15399_v51  ;;  %v15371_v17 = vadd.f32 %v15370_v28, %v15369_v37  ;;  %v27330_v43 = vpop.f32.mrb[54].mxu1  ;;  %v13202_v54 = vld [vmem:[#allocation3 + $0x240] sm:$0xff]  ;;  %v27359_v37 = vld [vmem:[#allocation3 + $0xd1] sm:$0xff] }
 0x759   :  { %v27309_v22 = vpop.f32.mrb[50].mxu0  ;;  %29287 = vst [vmem:[#allocation22_spill] sm:$0xff] %v27330_v43  ;;  %v27332_v19 = vpop.f32.mrb[55].mxu1  ;;  %20652 = vmatmul.mubr.msk.f32.gmra.mrb[64].mxu1 %vm198_vm4, %v13199_v14  ;;  %v15376_v48 = vsel %vm198_vm4, %v27330_v43, 0.0 }
 0x75a   :  { %v27316_v34 = vpop.f32.mrb[51].mxu0  ;;  %v15403_v38 = vadd.f32 %v15402_v0, %v15401_v4  ;;  %20880 = vmatmul.mubr.msk.f32.gmra.mrb[60].mxu0 %vm198_vm4, %v27311_v40  ;;  %29288 = vst [vmem:[#allocation34_spill] sm:$0xff] %v27332_v19  ;;  %v15373_v47 = vadd.f32 %v15372_v18, %v15371_v17  ;;  %v15406_v23 = vsel %vm198_vm4, %v27309_v22, 0.0  ;;  %v15374_v32 = vsel %vm198_vm4, %v27332_v19, 0.0  ;;  %20654 = vmatprep.mubr.msk.f32.mxu1 %vm198_vm4, %v13200_v33  ;;  %v13427_v33 = vld [vmem:[#allocation3 + $0xf1] sm:$0xff] }
 0x75b   :  { %v15404_v42 = vsel %vm198_vm4, %v27316_v34, 0.0  ;;  %20882 = vmatprep.mubr.msk.f32.mxu0 %vm198_vm4, %v27320_v39 }
 0x75c   :  { %v15405_v5 = vadd.f32 %v15404_v42, %v15403_v38  ;;  %v15375_v63 = vadd.f32 %v15374_v32, %v15373_v47  ;;  %v13426_v38 = vld [vmem:[#allocation3 + $0xe1] sm:$0xff]  ;;  %v13203_v42 = vld [vmem:[#allocation3 + $0x250] sm:$0xff] }
 0x75d   :  { %v27337_v44 = vpop.f32.mrb[52].mxu0  ;;  %20655 = vmatmul.mubr.msk.f32.gmra.mrb[66].mxu1 %vm198_vm4, %v13201_v12  ;;  %v13429_v12 = vld [vmem:[#allocation3 + $0x111] sm:$0xff] }
 0x75e   :  { %v27342_v56 = vpop.f32.mrb[53].mxu0  ;;  %v15407_v6 = vadd.f32 %v15406_v23, %v15405_v5  ;;  %20883 = vmatmul.mubr.msk.f32.gmra.mrb[62].mxu0 %vm198_vm4, %v27328_v10  ;;  %v15377_v9 = vadd.f32 %v15376_v48, %v15375_v63  ;;  %v15410_v21 = vsel %vm198_vm4, %v27337_v44, 0.0  ;;  %20657 = vmatprep.mubr.msk.f32.mxu1 %vm198_vm4, %v13202_v54  ;;  %v13204_v5 = vld [vmem:[#allocation3 + $0x260] sm:$0xff]  ;;  %v13205_v23 = vld [vmem:[#allocation3 + $0x270] sm:$0xff] }
 0x75f   :  { %v15408_v25 = vsel %vm198_vm4, %v27342_v56, 0.0  ;;  %20885 = vmatprep.mubr.msk.f32.mxu0 %vm198_vm4, %v27346_v29  ;;  %v13428_v63 = vld [vmem:[#allocation3 + $0x101] sm:$0xff]  ;;  %v13431_v54 = vld [vmem:[#allocation3 + $0x131] sm:$0xff] }
 0x760   :  { %v15409_v51 = vadd.f32 %v15408_v25, %v15407_v6  ;;  %v15378_v3 = vrot.slane %v15377_v9, 4 }
 0x761   :  { %v27357_v4 = vpop.f32.mrb[54].mxu0  ;;  %20658 = vmatmul.mubr.msk.f32.gmra.mrb[68].mxu1 %vm198_vm4, %v13203_v42 }
 0x762   :  { %v27362_v0 = vpop.f32.mrb[55].mxu0  ;;  %v15411_v28 = vadd.f32 %v15410_v21, %v15409_v51  ;;  %20886 = vmatmul.mubr.msk.f32.gmra.mrb[64].mxu0 %vm198_vm4, %v27359_v37  ;;  %v15379_v18 = vadd.f32 %v15378_v3, %v15377_v9  ;;  %v15414_v47 = vsel %vm198_vm4, %v27357_v4, 0.0  ;;  %20660 = vmatprep.mubr.msk.f32.mxu1 %vm198_vm4, %v13204_v5  ;;  %v13430_v9 = vld [vmem:[#allocation3 + $0x121] sm:$0xff]  ;;  %v13646_v5 = vld [vmem:[#allocation3 + $0x1b1] sm:$0xff] }
 0x763   :  { %v15412_v17 = vsel %vm198_vm4, %v27362_v0, 0.0  ;;  %20888 = vmatprep.mubr.msk.f32.mxu0 %vm198_vm4, %v13426_v38 }
 0x764   :  { %v15413_v14 = vadd.f32 %v15412_v17, %v15411_v28  ;;  %v15380_v32 = vrot.slane %v15379_v18, 2 }
 0x765   :  { %20661 = vmatmul.mubr.msk.f32.gmra.mrb[70].mxu1 %vm198_vm4, %v13205_v23  ;;  %v13655_v23 = vld [vmem:[#allocation3 + $0x261] sm:$0xff] }
 0x766   :  { %v15415_v6 = vadd.f32 %v15414_v47, %v15413_v14  ;;  %20889 = vmatmul.mubr.msk.f32.gmra.mrb[66].mxu0 %vm198_vm4, %v13427_v33  ;;  %v15381_v25 = vadd.f32 %v15380_v32, %v15379_v18  ;;  %20665 = vmatprep.mubr.msk.f32.mxu1 %vm198_vm4, %v27239_v46  ;;  %v13641_v46 = vld [vmem:[#allocation3 + $0x161] sm:$0xff]  ;;  %v13642_v18 = vld [vmem:[#allocation3 + $0x171] sm:$0xff] }
 0x767   :  { %20891 = vmatprep.mubr.msk.f32.mxu0 %vm198_vm4, %v13428_v63  ;;  %v13647_v47 = vld [vmem:[#allocation3 + $0x1c1] sm:$0xff]  ;;  %v13656_v32 = vld [vmem:[#allocation3 + $0x271] sm:$0xff] }
 0x768   :  { %v15416_v48 = vrot.slane %v15415_v6, 4  ;;  %v15382_v21 = vrot.slane %v15381_v25, 1 }
 0x769   :  { %20666 = vmatmul.mubr.msk.f32.vlgmr.msra.gmra.mrb[56].mxu1 %vm198_vm4, %v27257_v60 }
 0x76a   :  { %v15417_v51 = vadd.f32 %v15416_v48, %v15415_v6  ;;  %20892 = vmatmul.mubr.msk.f32.gmra.mrb[68].mxu0 %vm198_vm4, %v13429_v12  ;;  %20690 = vmatpush3.msra.mxu1 %v26624_v20  ;;  %v15383_v17 = vadd.f32 %v15382_v21, %v15381_v25  ;;  %v13643_v20 = vld [vmem:[#allocation3 + $0x181] sm:$0xff]  ;;  %v15125_v48 = vld [vmem:[#allocation3 + $0x52] sm:$0xff] }
 0x76b   :  { %20894 = vmatprep.mubr.msk.f32.mxu0 %vm198_vm4, %v13430_v9  ;;  %20668 = vmatprep.mubr.msk.f32.mxu1 %vm198_vm4, %v27266_v35  ;;  %v22092_v35 = vld [vmem:[%s28652_s7 + $0x40] sm:$0xff] }
 0x76c   :  { %v15418_v3 = vrot.slane %v15417_v51, 2  ;;  %v15122_v6 = vld [vmem:[#allocation3 + $0x22] sm:$0xff] }
 0x76d   :  { %20669 = vmatmul.mubr.msk.f32.gmra.mrb[58].mxu1 %vm198_vm4, %v27285_v53  ;;  %v13644_v53 = vld [vmem:[#allocation3 + $0x191] sm:$0xff]  ;;  %v15124_v25 = vld [vmem:[#allocation3 + $0x42] sm:$0xff] }
 0x76e   :  { %v15419_v28 = vadd.f32 %v15418_v3, %v15417_v51  ;;  %20895 = vmatmul.mubr.msk.f32.gmra.mrb[70].mxu0 %vm198_vm4, %v13431_v54  ;;  %20671 = vmatprep.mubr.msk.f32.mxu1 %vm198_vm4, %v27294_v45  ;;  %v13645_v45 = vld [vmem:[#allocation3 + $0x1a1] sm:$0xff]  ;;  %v15127_v51 = vld [vmem:[#allocation3 + $0x72] sm:$0xff] }
 0x76f   :  { %20899 = vmatprep.mubr.msk.f32.mxu0 %vm198_vm4, %v13641_v46  ;;  %v15130_v21 = vld [vmem:[#allocation3 + $0xc2] sm:$0xff]  ;;  %v15131_v3 = vld [vmem:[#allocation3 + $0xd2] sm:$0xff] }
 0x770   :  { %v15420_v42 = vrot.slane %v15419_v28, 1 }
 0x771   :  { %20672 = vmatmul.mubr.msk.f32.gmra.mrb[60].mxu1 %vm198_vm4, %v27311_v40  ;;  %v13648_v40 = vld [vmem:[#allocation3 + $0x1d1] sm:$0xff] }
 0x772   :  { %v15421_v60 = vadd.f32 %v15420_v42, %v15419_v28  ;;  %20900 = vmatmul.mubr.msk.f32.vlgmr.msra.gmra.mrb[56].mxu0 %vm198_vm4, %v13642_v18  ;;  %20674 = vmatprep.mubr.msk.f32.mxu1 %vm198_vm4, %v27320_v39  ;;  %v13649_v39 = vld [vmem:[#allocation3 + $0x201] sm:$0xff]  ;;  %v15135_v42 = vld [vmem:[#allocation3 + $0x112] sm:$0xff] }
 0x773   :  { %20902 = vmatprep.mubr.msk.f32.mxu0 %vm198_vm4, %v13643_v20  ;;  %20924 = vmatpush3.msra.mxu0 %v22092_v35  ;;  %v15132_v28 = vld [vmem:[#allocation3 + $0xe2] sm:$0xff] }
 0x774   :  { %v27396_v14 = vadd.f32 %v15421_v60, %v15383_v17  ;;  %v15134_v17 = vld [vmem:[#allocation3 + $0x102] sm:$0xff]  ;;  %v15137_v60 = vld [vmem:[#allocation3 + $0x132] sm:$0xff] }
 0x775   :  { %20675 = vmatmul.mubr.msk.f32.gmra.mrb[62].mxu1 %vm198_vm4, %v27328_v10  ;;  %v13650_v10 = vld [vmem:[#allocation3 + $0x211] sm:$0xff] }
 0x776   :  { %20903 = vmatmul.mubr.msk.f32.gmra.mrb[58].mxu0 %vm198_vm4, %v13644_v53  ;;  %20677 = vmatprep.mubr.msk.f32.mxu1 %vm198_vm4, %v27346_v29  ;;  %v13651_v29 = vld [vmem:[#allocation3 + $0x221] sm:$0xff] }
 0x777   :  { %20905 = vmatprep.mubr.msk.f32.mxu0 %vm198_vm4, %v13645_v45 }
 0x779   :  { %20678 = vmatmul.mubr.msk.f32.gmra.mrb[64].mxu1 %vm198_vm4, %v27359_v37  ;;  %v13652_v37 = vld [vmem:[#allocation3 + $0x231] sm:$0xff] }
 0x77a   :  { %20906 = vmatmul.mubr.msk.f32.gmra.mrb[60].mxu0 %vm198_vm4, %v13646_v5  ;;  %20680 = vmatprep.mubr.msk.f32.mxu1 %vm198_vm4, %v13426_v38  ;;  %v13653_v38 = vld [vmem:[#allocation3 + $0x241] sm:$0xff] }
 0x77b   :  { %20908 = vmatprep.mubr.msk.f32.mxu0 %vm198_vm4, %v13647_v47 }
 0x77d   :  { %20681 = vmatmul.mubr.msk.f32.gmra.mrb[66].mxu1 %vm198_vm4, %v13427_v33  ;;  %v13654_v33 = vld [vmem:[#allocation3 + $0x251] sm:$0xff] }
 0x77e   :  { %20909 = vmatmul.mubr.msk.f32.gmra.mrb[62].mxu0 %vm198_vm4, %v13648_v40  ;;  %20683 = vmatprep.mubr.msk.f32.mxu1 %vm198_vm4, %v13428_v63  ;;  %v15123_v63 = vld [vmem:[#allocation3 + $0x32] sm:$0xff] }
 0x77f   :  { %20911 = vmatprep.mubr.msk.f32.mxu0 %vm198_vm4, %v13649_v39 }
 0x781   :  { %20684 = vmatmul.mubr.msk.f32.gmra.mrb[68].mxu1 %vm198_vm4, %v13429_v12  ;;  %v15126_v12 = vld [vmem:[#allocation3 + $0x62] sm:$0xff] }
 0x782   :  { %20912 = vmatmul.mubr.msk.f32.gmra.mrb[64].mxu0 %vm198_vm4, %v13650_v10  ;;  %20686 = vmatprep.mubr.msk.f32.mxu1 %vm198_vm4, %v13430_v9  ;;  %v15128_v9 = vld [vmem:[#allocation3 + $0x82] sm:$0xff] }
 0x783   :  { %20914 = vmatprep.mubr.msk.f32.mxu0 %vm198_vm4, %v13651_v29 }
 0x785   :  { %20687 = vmatmul.mubr.msk.f32.gmra.mrb[70].mxu1 %vm198_vm4, %v13431_v54  ;;  %v15129_v54 = vld [vmem:[#allocation3 + $0x92] sm:$0xff] }
 0x786   :  { %20915 = vmatmul.mubr.msk.f32.gmra.mrb[66].mxu0 %vm198_vm4, %v13652_v37  ;;  %20691 = vmatprep.mubr.msk.f32.mxu1 %vm198_vm4, %v13641_v46  ;;  %v15133_v46 = vld [vmem:[#allocation3 + $0xf2] sm:$0xff] }
 0x787   :  { %20917 = vmatprep.mubr.msk.f32.mxu0 %vm198_vm4, %v13653_v38 }
 0x789   :  { %20692 = vmatmul.mubr.msk.f32.vlgmr.msra.gmra.mrb[56].mxu1 %vm198_vm4, %v13642_v18  ;;  %v15136_v18 = vld [vmem:[#allocation3 + $0x122] sm:$0xff] }
 0x78a   :  { %20918 = vmatmul.mubr.msk.f32.gmra.mrb[68].mxu0 %vm198_vm4, %v13654_v33  ;;  %20694 = vmatprep.mubr.msk.f32.mxu1 %vm198_vm4, %v13643_v20 }
 0x78b   :  { %20920 = vmatprep.mubr.msk.f32.mxu0 %vm198_vm4, %v13655_v23 }
 0x78d   :  { %20695 = vmatmul.mubr.msk.f32.gmra.mrb[58].mxu1 %vm198_vm4, %v13644_v53 }
 0x78e   :  { %20921 = vmatmul.mubr.msk.f32.gmra.mrb[70].mxu0 %vm198_vm4, %v13656_v32  ;;  %20697 = vmatprep.mubr.msk.f32.mxu1 %vm198_vm4, %v13645_v45 }
 0x78f   :  { %20925 = vmatprep.mubr.msk.f32.mxu0 %vm198_vm4, %v15122_v6 }
 0x791   :  { %20698 = vmatmul.mubr.msk.f32.gmra.mrb[60].mxu1 %vm198_vm4, %v13646_v5 }
 0x792   :  { %20926 = vmatmul.mubr.msk.f32.vlgmr.msra.gmra.mrb[56].mxu0 %vm198_vm4, %v15123_v63  ;;  %20700 = vmatprep.mubr.msk.f32.mxu1 %vm198_vm4, %v13647_v47 }
 0x793   :  { %20928 = vmatprep.mubr.msk.f32.mxu0 %vm198_vm4, %v15124_v25 }
 0x795   :  { %20701 = vmatmul.mubr.msk.f32.gmra.mrb[62].mxu1 %vm198_vm4, %v13648_v40 }
 0x796   :  { %20929 = vmatmul.mubr.msk.f32.gmra.mrb[58].mxu0 %vm198_vm4, %v15125_v48  ;;  %20703 = vmatprep.mubr.msk.f32.mxu1 %vm198_vm4, %v13649_v39 }
 0x797   :  { %20931 = vmatprep.mubr.msk.f32.mxu0 %vm198_vm4, %v15126_v12 }
 0x799   :  { %20704 = vmatmul.mubr.msk.f32.gmra.mrb[64].mxu1 %vm198_vm4, %v13650_v10 }
 0x79a   :  { %20932 = vmatmul.mubr.msk.f32.gmra.mrb[60].mxu0 %vm198_vm4, %v15127_v51  ;;  %20706 = vmatprep.mubr.msk.f32.mxu1 %vm198_vm4, %v13651_v29 }
 0x79b   :  { %20934 = vmatprep.mubr.msk.f32.mxu0 %vm198_vm4, %v15128_v9 }
 0x79d   :  { %20707 = vmatmul.mubr.msk.f32.gmra.mrb[66].mxu1 %vm198_vm4, %v13652_v37 }
 0x79e   :  { %20935 = vmatmul.mubr.msk.f32.gmra.mrb[62].mxu0 %vm198_vm4, %v15129_v54  ;;  %20709 = vmatprep.mubr.msk.f32.mxu1 %vm198_vm4, %v13653_v38 }
 0x79f   :  { %20937 = vmatprep.mubr.msk.f32.mxu0 %vm198_vm4, %v15130_v21 }
 0x7a1   :  { %20710 = vmatmul.mubr.msk.f32.gmra.mrb[68].mxu1 %vm198_vm4, %v13654_v33 }
 0x7a2   :  { %20938 = vmatmul.mubr.msk.f32.gmra.mrb[64].mxu0 %vm198_vm4, %v15131_v3  ;;  %20712 = vmatprep.mubr.msk.f32.mxu1 %vm198_vm4, %v13655_v23 }
 0x7a3   :  { %20940 = vmatprep.mubr.msk.f32.mxu0 %vm198_vm4, %v15132_v28 }
 0x7a5   :  { %20713 = vmatmul.mubr.msk.f32.gmra.mrb[70].mxu1 %vm198_vm4, %v13656_v32 }
 0x7a6   :  { %20941 = vmatmul.mubr.msk.f32.gmra.mrb[66].mxu0 %vm198_vm4, %v15133_v46 }
 0x7a7   :  { %20943 = vmatprep.mubr.msk.f32.mxu0 %vm198_vm4, %v15134_v17 }
 0x7aa   :  { %20944 = vmatmul.mubr.msk.f32.gmra.mrb[68].mxu0 %vm198_vm4, %v15135_v42 }
 0x7ab   :  { %20946 = vmatprep.mubr.msk.f32.mxu0 %vm198_vm4, %v15136_v18 }
 0x7ae   :  { %20947 = vmatmul.mubr.msk.f32.gmra.mrb[70].mxu0 %vm198_vm4, %v15137_v60 }
 0x85c   :  { %v27459_v20 = vpop.f32.mrb[56].mxu1 }
 0x85d   :  { %29289 = vst [vmem:[#allocation21_spill] sm:$0xff] %v27459_v20  ;;  %v15424_v35 = vsel %vm198_vm4, %v27459_v20, 0.0  ;;  %v27463_v53 = vpop.f32.mrb[57].mxu1 }
 0x85e   :  { %v15423_v45 = vsel %vm198_vm4, %v27463_v53, 0.0 }
 0x85f   :  { %v15425_v5 = vadd.f32 %v15424_v35, %v15423_v45 }
 0x860   :  { %v27467_v47 = vpop.f32.mrb[58].mxu1 }
 0x861   :  { %v27469_v40 = vpop.f32.mrb[59].mxu1  ;;  %v15428_v23 = vsel %vm198_vm4, %v27467_v47, 0.0 }
 0x862   :  { %29290 = vst [vmem:[#allocation10_spill] sm:$0xff] %v27469_v40  ;;  %v15426_v10 = vsel %vm198_vm4, %v27469_v40, 0.0 }
 0x863   :  { %v15427_v38 = vadd.f32 %v15426_v10, %v15425_v5 }
 0x864   :  { %v27483_v32 = vpop.f32.mrb[60].mxu1 }
 0x865   :  { %v27471_v39 = vpop.f32.mrb[56].mxu0  ;;  %v27485_v63 = vpop.f32.mrb[61].mxu1  ;;  %v15429_v25 = vadd.f32 %v15428_v23, %v15427_v38  ;;  %v15432_v21 = vsel %vm198_vm4, %v27483_v32, 0.0 }
 0x866   :  { %29291 = vst [vmem:[#allocation25_spill] sm:$0xff] %v27471_v39  ;;  %v15462_v29 = vsel %vm198_vm4, %v27471_v39, 0.0  ;;  %v27477_v37 = vpop.f32.mrb[57].mxu0  ;;  %v15430_v12 = vsel %vm198_vm4, %v27485_v63, 0.0 }
 0x867   :  { %29292 = vst [vmem:[#allocation28_spill] sm:$0xff] %v27477_v37  ;;  %v15461_v33 = vsel %vm198_vm4, %v27477_v37, 0.0  ;;  %v15431_v9 = vadd.f32 %v15430_v12, %v15429_v25 }
 0x868   :  { %v15463_v6 = vadd.f32 %v15462_v29, %v15461_v33  ;;  %v27497_v3 = vpop.f32.mrb[62].mxu1 }
 0x869   :  { %v27487_v48 = vpop.f32.mrb[58].mxu0  ;;  %29295 = vst [vmem:[#allocation58_spill] sm:$0xff] %v27497_v3  ;;  %v27499_v46 = vpop.f32.mrb[63].mxu1  ;;  %v15433_v17 = vadd.f32 %v15432_v21, %v15431_v9  ;;  %v15436_v29 = vsel %vm198_vm4, %v27497_v3, 0.0 }
 0x86a   :  { %29293 = vst [vmem:[#allocation24_spill] sm:$0xff] %v27487_v48  ;;  %v27491_v51 = vpop.f32.mrb[59].mxu0  ;;  %v15466_v42 = vsel %vm198_vm4, %v27487_v48, 0.0  ;;  %v15434_v60 = vsel %vm198_vm4, %v27499_v46, 0.0 }
 0x86b   :  { %29294 = vst [vmem:[#allocation27_spill] sm:$0xff] %v27491_v51  ;;  %v15464_v54 = vsel %vm198_vm4, %v27491_v51, 0.0  ;;  %v15435_v5 = vadd.f32 %v15434_v60, %v15433_v17 }
 0x86c   :  { %v15465_v28 = vadd.f32 %v15464_v54, %v15463_v6  ;;  %v27513_v38 = vpop.f32.mrb[64].mxu1 }
 0x86d   :  { %v27503_v18 = vpop.f32.mrb[60].mxu0  ;;  %29298 = vst [vmem:[#allocation59_spill] sm:$0xff] %v27513_v38  ;;  %v27515_v23 = vpop.f32.mrb[65].mxu1  ;;  %v15437_v6 = vadd.f32 %v15436_v29, %v15435_v5 }
 0x86e   :  { %29296 = vst [vmem:[#allocation36_spill] sm:$0xff] %v27503_v18  ;;  %v27507_v35 = vpop.f32.mrb[61].mxu0  ;;  %v15467_v45 = vadd.f32 %v15466_v42, %v15465_v28  ;;  %29299 = vst [vmem:[#allocation60_spill] sm:$0xff] %v27515_v23  ;;  %v15470_v25 = vsel %vm198_vm4, %v27503_v18, 0.0  ;;  %v15438_v9 = vsel %vm198_vm4, %v27515_v23, 0.0  ;;  %v15440_v42 = vsel %vm198_vm4, %v27513_v38, 0.0 }
 0x86f   :  { %29297 = vst [vmem:[#allocation31_spill] sm:$0xff] %v27507_v35  ;;  %v15468_v10 = vsel %vm198_vm4, %v27507_v35, 0.0  ;;  %v15439_v28 = vadd.f32 %v15438_v9, %v15437_v6 }
 0x870   :  { %v15469_v33 = vadd.f32 %v15468_v10, %v15467_v45  ;;  %v27529_v60 = vpop.f32.mrb[66].mxu1 }
 0x871   :  { %v27519_v12 = vpop.f32.mrb[62].mxu0  ;;  %29302 = vst [vmem:[#allocation50_spill] sm:$0xff] %v27529_v60  ;;  %v27531_v5 = vpop.f32.mrb[67].mxu1  ;;  %v15441_v10 = vadd.f32 %v15440_v42, %v15439_v28 }
 0x872   :  { %29300 = vst [vmem:[#allocation46_spill] sm:$0xff] %v27519_v12  ;;  %v27523_v54 = vpop.f32.mrb[63].mxu0  ;;  %v15471_v21 = vadd.f32 %v15470_v25, %v15469_v33  ;;  %29303 = vst [vmem:[#allocation51_spill] sm:$0xff] %v27531_v5  ;;  %v15474_v29 = vsel %vm198_vm4, %v27519_v12, 0.0  ;;  %v15442_v33 = vsel %vm198_vm4, %v27531_v5, 0.0 }
 0x873   :  { %29301 = vst [vmem:[#allocation47_spill] sm:$0xff] %v27523_v54  ;;  %v15472_v17 = vsel %vm198_vm4, %v27523_v54, 0.0  ;;  %v15443_v9 = vadd.f32 %v15442_v33, %v15441_v10 }
 0x874   :  { %v15473_v45 = vadd.f32 %v15472_v17, %v15471_v21  ;;  %v15444_v21 = vsel %vm198_vm4, %v27529_v60, 0.0  ;;  %v27545_v17 = vpop.f32.mrb[68].mxu1 }
 0x875   :  { %v27535_v18 = vpop.f32.mrb[64].mxu0  ;;  %29306 = vst [vmem:[#allocation19_spill] sm:$0xff] %v27545_v17  ;;  %v27547_v42 = vpop.f32.mrb[69].mxu1  ;;  %v15445_v12 = vadd.f32 %v15444_v21, %v15443_v9 }
 0x876   :  { %29304 = vst [vmem:[#allocation54_spill] sm:$0xff] %v27535_v18  ;;  %v27539_v6 = vpop.f32.mrb[65].mxu0  ;;  %v15475_v25 = vadd.f32 %v15474_v29, %v15473_v45  ;;  %29307 = vst [vmem:[#allocation16_spill] sm:$0xff] %v27547_v42  ;;  %v15478_v35 = vsel %vm198_vm4, %v27535_v18, 0.0  ;;  %v15446_v45 = vsel %vm198_vm4, %v27547_v42, 0.0 }
 0x877   :  { %29305 = vst [vmem:[#allocation30_spill] sm:$0xff] %v27539_v6  ;;  %v15476_v54 = vsel %vm198_vm4, %v27539_v6, 0.0  ;;  %v15447_v33 = vadd.f32 %v15446_v45, %v15445_v12 }
 0x878   :  { %v15477_v28 = vadd.f32 %v15476_v54, %v15475_v25  ;;  %v15448_v54 = vsel %vm198_vm4, %v27545_v17, 0.0  ;;  %v27561_v25 = vpop.f32.mrb[70].mxu1 }
 0x879   :  { %v27551_v48 = vpop.f32.mrb[66].mxu0  ;;  %29310 = vst [vmem:[#allocation57_spill] sm:$0xff] %v27561_v25  ;;  %v27563_v21 = vpop.f32.mrb[71].mxu1  ;;  %v15449_v18 = vadd.f32 %v15448_v54, %v15447_v33 }
 0x87a   :  { %29308 = vst [vmem:[#allocation42_spill] sm:$0xff] %v27551_v48  ;;  %v27555_v10 = vpop.f32.mrb[67].mxu0  ;;  %v15479_v29 = vadd.f32 %v15478_v35, %v15477_v28  ;;  %29311 = vst [vmem:[#allocation26_spill] sm:$0xff] %v27563_v21  ;;  %v15482_v51 = vsel %vm198_vm4, %v27551_v48, 0.0  ;;  %v15450_v35 = vsel %vm198_vm4, %v27563_v21, 0.0 }
 0x87b   :  { %29309 = vst [vmem:[#allocation55_spill] sm:$0xff] %v27555_v10  ;;  %v15480_v6 = vsel %vm198_vm4, %v27555_v10, 0.0  ;;  %v15451_v45 = vadd.f32 %v15450_v35, %v15449_v18 }
 0x87c   :  { %v15481_v9 = vadd.f32 %v15480_v6, %v15479_v29  ;;  %v15452_v6 = vsel %vm198_vm4, %v27561_v25, 0.0 }
 0x87d   :  { %v27567_v39 = vpop.f32.mrb[68].mxu0  ;;  %v15453_v33 = vadd.f32 %v15452_v6, %v15451_v45 }
 0x87e   :  { %29312 = vst [vmem:[#allocation39_spill] sm:$0xff] %v27567_v39  ;;  %v27571_v12 = vpop.f32.mrb[69].mxu0  ;;  %v15483_v28 = vadd.f32 %v15482_v51, %v15481_v9  ;;  %v15486_v54 = vsel %vm198_vm4, %v27567_v39, 0.0 }
 0x87f   :  { %29313 = vst [vmem:[#allocation14_spill] sm:$0xff] %v27571_v12  ;;  %v15484_v10 = vsel %vm198_vm4, %v27571_v12, 0.0  ;;  %v15454_v17 = vrot.slane %v15453_v33, 4 }
 0x880   :  { %v15485_v29 = vadd.f32 %v15484_v10, %v15483_v28 }
 0x881   :  { %v27579_v48 = vpop.f32.mrb[70].mxu0  ;;  %v15455_v18 = vadd.f32 %v15454_v17, %v15453_v33 }
 0x882   :  { %29314 = vst [vmem:[#allocation23_spill] sm:$0xff] %v27579_v48  ;;  %v27581_v37 = vpop.f32.mrb[71].mxu0  ;;  %v15487_v21 = vadd.f32 %v15486_v54, %v15485_v29  ;;  %v15490_v35 = vsel %vm198_vm4, %v27579_v48, 0.0 }
 0x883   :  { %29315 = vst [vmem:[#allocation33_spill] sm:$0xff] %v27581_v37  ;;  %v15488_v51 = vsel %vm198_vm4, %v27581_v37, 0.0  ;;  %v15456_v12 = vrot.slane %v15455_v18, 2 }
 0x884   :  { %v15489_v9 = vadd.f32 %v15488_v51, %v15487_v21 }
 0x885   :  { %v15457_v28 = vadd.f32 %v15456_v12, %v15455_v18 }
 0x886   :  { %v15491_v10 = vadd.f32 %v15490_v35, %v15489_v9 }
 0x887   :  { %v15458_v6 = vrot.slane %v15457_v28, 1 }
 0x888   :  { %v15492_v45 = vrot.slane %v15491_v10, 4 }
 0x889   :  { %v15459_v25 = vadd.f32 %v15458_v6, %v15457_v28 }
 0x88a   :  { %v15493_v39 = vadd.f32 %v15492_v45, %v15491_v10 }
 0x88b   :  { %v15460_v60 = vadd.f32 %v15459_v25, %v27396_v14 }
 0x88c   :  { %v15494_v42 = vrot.slane %v15493_v39, 2 }
 0x88e   :  { %v15495_v5 = vadd.f32 %v15494_v42, %v15493_v39 }
 0x890   :  { %v15496_v29 = vrot.slane %v15495_v5, 1 }
 0x892   :  { %v15497_v54 = vadd.f32 %v15496_v29, %v15495_v5 }
 0x894   :  { %v15498_v38 = vadd.f32 %v15497_v54, %v15460_v60 }
 0x896   :  { %v27588_v37 = vmul.f32 0.001953125, %v15498_v38 }
 0x898   :  { %v15500_v17 = vsub.f32 %v27175_v55, %v27588_v37  ;;  %v15501_v21 = vsub.f32 %v27171_v49, %v27588_v37  ;;  %v15502_v12 = vsub.f32 %v27185_v27, %v27588_v37  ;;  %v15503_v33 = vsub.f32 %v27183_v58, %v27588_v37 }
 0x899   :  { %v15504_v39 = vsub.f32 %v27205_v57, %v27588_v37  ;;  %v15505_v38 = vsub.f32 %v27203_v31, %v27588_v37  ;;  %v15506_v9 = vsub.f32 %v27224_v30, %v27588_v37  ;;  %v15507_v45 = vsub.f32 %v27222_v61, %v27588_v37 }
 0x89a   :  { %v15516_v51 = vmul.f32 %v15500_v17, %v15500_v17  ;;  %v15517_v14 = vmul.f32 %v15501_v21, %v15501_v21  ;;  %v15518_v60 = vmul.f32 %v15502_v12, %v15502_v12  ;;  %v15519_v5 = vmul.f32 %v15503_v33, %v15503_v33 }
 0x89b   :  { %v15520_v35 = vmul.f32 %v15504_v39, %v15504_v39  ;;  %v15521_v6 = vmul.f32 %v15505_v38, %v15505_v38  ;;  %v15508_v54 = vsub.f32 %v27250_v1, %v27588_v37  ;;  %v15570_v21 = vsub.f32 %v27195_v62, %v27588_v37 }
 0x89c   :  { %v15532_v42 = vsel %vm198_vm4, %v15516_v51, 0.0  ;;  %v15533_v25 = vsel %vm198_vm4, %v15517_v14, 0.0  ;;  %v15535_v10 = vsel %vm198_vm4, %v15518_v60, 0.0  ;;  %v15537_v29 = vsel %vm198_vm4, %v15519_v5, 0.0 }
 0x89d   :  { %v15534_v18 = vadd.f32 %v15533_v25, %v15532_v42  ;;  %v15509_v12 = vsub.f32 %v27248_v50, %v27588_v37  ;;  %v15522_v33 = vmul.f32 %v15506_v9, %v15506_v9  ;;  %v15539_v51 = vsel %vm198_vm4, %v15520_v35, 0.0 }
 0x89e   :  { %v15571_v14 = vsub.f32 %v27188_v13, %v27588_v37  ;;  %v15510_v39 = vsub.f32 %v27277_v36, %v27588_v37  ;;  %v15511_v60 = vsub.f32 %v27275_v8, %v27588_v37  ;;  %v15512_v38 = vsub.f32 %v27304_v11, %v27588_v37 }
 0x89f   :  { %v15536_v28 = vadd.f32 %v15535_v10, %v15534_v18  ;;  %v15513_v42 = vsub.f32 %v27302_v52, %v27588_v37  ;;  %v15523_v25 = vmul.f32 %v15507_v45, %v15507_v45  ;;  %v15541_v18 = vsel %vm198_vm4, %v15521_v6, 0.0 }
 0x8a0   :  { %v15572_v9 = vsub.f32 %v27214_v41, %v27588_v37  ;;  %v15514_v35 = vsub.f32 %v27332_v19, %v27588_v37  ;;  %v15515_v10 = vsub.f32 %v27330_v43, %v27588_v37  ;;  %v15524_v13 = vmul.f32 %v15508_v54, %v15508_v54 }
 0x8a1   :  { %v15538_v17 = vadd.f32 %v15537_v29, %v15536_v28  ;;  %v15586_v29 = vmul.f32 %v15570_v21, %v15570_v21  ;;  %v15587_v45 = vmul.f32 %v15571_v14, %v15571_v14  ;;  %v15525_v62 = vmul.f32 %v15509_v12, %v15509_v12 }
 0x8a2   :  { %v15526_v6 = vmul.f32 %v15510_v39, %v15510_v39  ;;  %v15527_v52 = vmul.f32 %v15511_v60, %v15511_v60  ;;  %v15528_v41 = vmul.f32 %v15512_v38, %v15512_v38  ;;  %v15545_v8 = vsel %vm198_vm4, %v15523_v25, 0.0 }
 0x8a3   :  { %v15540_v5 = vadd.f32 %v15539_v51, %v15538_v17  ;;  %v15543_v17 = vsel %vm198_vm4, %v15522_v33, 0.0  ;;  %v15573_v51 = vsub.f32 %v27209_v7, %v27588_v37  ;;  %v15574_v19 = vsub.f32 %v27235_v2, %v27588_v37 }
 0x8a4   :  { %v15588_v43 = vmul.f32 %v15572_v9, %v15572_v9  ;;  %v15530_v21 = vmul.f32 %v15514_v35, %v15514_v35  ;;  %v15602_v33 = vsel %vm198_vm4, %v15586_v29, 0.0  ;;  %v15575_v12 = vsub.f32 %v27229_v15, %v27588_v37 }
 0x8a5   :  { %v15542_v28 = vadd.f32 %v15541_v18, %v15540_v5  ;;  %v15529_v5 = vmul.f32 %v15513_v42, %v15513_v42  ;;  %v15547_v18 = vsel %vm198_vm4, %v15524_v13, 0.0  ;;  %v15589_v14 = vmul.f32 %v15573_v51, %v15573_v51 }
 0x8a6   :  { %v15603_v39 = vsel %vm198_vm4, %v15587_v45, 0.0  ;;  %v15531_v60 = vmul.f32 %v15515_v10, %v15515_v10  ;;  %v15549_v25 = vsel %vm198_vm4, %v15525_v62, 0.0  ;;  %v15551_v9 = vsel %vm198_vm4, %v15526_v6, 0.0 }
 0x8a7   :  { %v15544_v11 = vadd.f32 %v15543_v17, %v15542_v28  ;;  %v15604_v28 = vadd.f32 %v15603_v39, %v15602_v33  ;;  %v15605_v42 = vsel %vm198_vm4, %v15588_v43, 0.0  ;;  %v15553_v35 = vsel %vm198_vm4, %v15527_v52, 0.0 }
 0x8a8   :  { %v15555_v29 = vsel %vm198_vm4, %v15528_v41, 0.0  ;;  %v15557_v10 = vsel %vm198_vm4, %v15529_v5, 0.0  ;;  %v15577_v62 = vsub.f32 %v27255_v24, %v27588_v37  ;;  %v15591_v51 = vmul.f32 %v15575_v12, %v15575_v12 }
 0x8a9   :  { %v15546_v54 = vadd.f32 %v15545_v8, %v15544_v11  ;;  %v15576_v8 = vsub.f32 %v27262_v59, %v27588_v37  ;;  %v15590_v11 = vmul.f32 %v15574_v19, %v15574_v19  ;;  %v15606_v17 = vadd.f32 %v15605_v42, %v15604_v28 }
 0x8aa   :  { %v15607_v45 = vsel %vm198_vm4, %v15589_v14, 0.0  ;;  %v15561_v19 = vsel %vm198_vm4, %v15531_v60, 0.0  ;;  %v15578_v52 = vsub.f32 %v27290_v16, %v27588_v37  ;;  %v15579_v41 = vsub.f32 %v27283_v26, %v27588_v37 }
 0x8ab   :  { %v15548_v38 = vadd.f32 %v15547_v18, %v15546_v54  ;;  %v15559_v54 = vsel %vm198_vm4, %v15530_v21, 0.0  ;;  %v15608_v43 = vadd.f32 %v15607_v45, %v15606_v17  ;;  %v15592_v33 = vmul.f32 %v15576_v8, %v15576_v8 }
 0x8ac   :  { %v15609_v5 = vsel %vm198_vm4, %v15590_v11, 0.0  ;;  %v15580_v12 = vsub.f32 %v27316_v34, %v27588_v37  ;;  %v15640_v21 = vsub.f32 %v27463_v53, %v27588_v37  ;;  %v15581_v39 = vsub.f32 %v27309_v22, %v27588_v37 }
 0x8ad   :  { %v15550_v13 = vadd.f32 %v15549_v25, %v15548_v38  ;;  %v15610_v14 = vadd.f32 %v15609_v5, %v15608_v43  ;;  %v15593_v60 = vmul.f32 %v15577_v62, %v15577_v62  ;;  %v15611_v38 = vsel %vm198_vm4, %v15591_v51, 0.0 }
 0x8ae   :  { %v15641_v25 = vsub.f32 %v27459_v20, %v27588_v37  ;;  %v15583_v8 = vsub.f32 %v27337_v44, %v27588_v37  ;;  %v15584_v42 = vsub.f32 %v27362_v0, %v27588_v37  ;;  %v15642_v17 = vsub.f32 %v27469_v40, %v27588_v37 }
 0x8af   :  { %v15552_v6 = vadd.f32 %v15551_v9, %v15550_v13  ;;  %v15582_v9 = vsub.f32 %v27342_v56, %v27588_v37  ;;  %v15612_v11 = vadd.f32 %v15611_v38, %v15610_v14  ;;  %v15594_v13 = vmul.f32 %v15578_v52, %v15578_v52 }
 0x8b0   :  { %v15656_v45 = vmul.f32 %v15640_v21, %v15640_v21  ;;  %v15615_v43 = vsel %vm198_vm4, %v15593_v60, 0.0  ;;  %v15643_v5 = vsub.f32 %v27467_v47, %v27588_v37  ;;  %v15596_v52 = vmul.f32 %v15580_v12, %v15580_v12 }
 0x8b1   :  { %v15554_v18 = vadd.f32 %v15553_v35, %v15552_v6  ;;  %v15613_v35 = vsel %vm198_vm4, %v15592_v33, 0.0  ;;  %v15595_v6 = vmul.f32 %v15579_v41, %v15579_v41  ;;  %v15597_v38 = vmul.f32 %v15581_v39, %v15581_v39 }
 0x8b2   :  { %v15614_v51 = vadd.f32 %v15613_v35, %v15612_v11  ;;  %v15598_v20 = vmul.f32 %v15582_v9, %v15582_v9  ;;  %v15617_v40 = vsel %vm198_vm4, %v15594_v13, 0.0  ;;  %v15599_v21 = vmul.f32 %v15583_v8, %v15583_v8 }
 0x8b3   :  { %v15556_v28 = vadd.f32 %v15555_v29, %v15554_v18  ;;  %v15585_v29 = vsub.f32 %v27357_v4, %v27588_v37  ;;  %v15657_v18 = vmul.f32 %v15641_v25, %v15641_v25  ;;  %v15672_v60 = vsel %vm198_vm4, %v15656_v45, 0.0 }
 0x8b4   :  { %v15616_v33 = vadd.f32 %v15615_v43, %v15614_v51  ;;  %v15619_v35 = vsel %vm198_vm4, %v15595_v6, 0.0  ;;  %v15659_v12 = vmul.f32 %v15643_v5, %v15643_v5  ;;  %v15600_v25 = vmul.f32 %v15584_v42, %v15584_v42 }
 0x8b5   :  { %v15558_v62 = vadd.f32 %v15557_v10, %v15556_v28  ;;  %v15644_v10 = vsub.f32 %v27485_v63, %v27588_v37  ;;  %v15658_v28 = vmul.f32 %v15642_v17, %v15642_v17  ;;  %v15673_v39 = vsel %vm198_vm4, %v15657_v18, 0.0 }
 0x8b6   :  { %v15618_v41 = vadd.f32 %v15617_v40, %v15616_v33  ;;  %v15601_v9 = vmul.f32 %v15585_v29, %v15585_v29  ;;  %v15621_v51 = vsel %vm198_vm4, %v15596_v52, 0.0  ;;  %v15623_v6 = vsel %vm198_vm4, %v15597_v38, 0.0 }
 0x8b7   :  { %v15560_v14 = vadd.f32 %v15559_v54, %v15558_v62  ;;  %v15645_v54 = vsub.f32 %v27483_v32, %v27588_v37  ;;  %v15674_v62 = vadd.f32 %v15673_v39, %v15672_v60  ;;  %v15660_v40 = vmul.f32 %v15644_v10, %v15644_v10 }
 0x8b8   :  { %v15620_v13 = vadd.f32 %v15619_v35, %v15618_v41  ;;  %v15675_v8 = vsel %vm198_vm4, %v15658_v28, 0.0  ;;  %v15625_v5 = vsel %vm198_vm4, %v15598_v20, 0.0  ;;  %v15647_v42 = vsub.f32 %v27497_v3, %v27588_v37 }
 0x8b9   :  { %v15562_v11 = vadd.f32 %v15561_v19, %v15560_v14  ;;  %v15646_v19 = vsub.f32 %v27499_v46, %v27588_v37  ;;  %v15676_v43 = vadd.f32 %v15675_v8, %v15674_v62  ;;  %v15661_v29 = vmul.f32 %v15645_v54, %v15645_v54  ;;  %v29316_v54 = vld [vmem:[#allocation59_spill] sm:$0xff] }
 0x8ba   :  { %v15622_v45 = vadd.f32 %v15621_v51, %v15620_v13  ;;  %v15677_v18 = vsel %vm198_vm4, %v15659_v12, 0.0  ;;  %v15627_v52 = vsel %vm198_vm4, %v15599_v21, 0.0  ;;  %v15629_v33 = vsel %vm198_vm4, %v15600_v25, 0.0  ;;  %v29317_v13 = vld [vmem:[#allocation51_spill] sm:$0xff]  ;;  %v29318_v25 = vld [vmem:[#allocation50_spill] sm:$0xff] }
 0x8bb   :  { %v15563_v17 = vrot.slane %v15562_v11, 4  ;;  %v15678_v10 = vadd.f32 %v15677_v18, %v15676_v43  ;;  %v15631_v28 = vsel %vm198_vm4, %v15601_v9, 0.0  ;;  %v15648_v38 = vsub.f32 %v27515_v23, %v27588_v37 }
 0x8bc   :  { %v15624_v14 = vadd.f32 %v15623_v6, %v15622_v45  ;;  %v15662_v41 = vmul.f32 %v15646_v19, %v15646_v19  ;;  %v15679_v20 = vsel %vm198_vm4, %v15660_v40, 0.0  ;;  %v15649_v39 = vsub.f32 %v29316_v54, %v27588_v37  ;;  %v29319_v19 = vld [vmem:[#allocation16_spill] sm:$0xff]  ;;  %v29321_v6 = vld [vmem:[#allocation19_spill] sm:$0xff] }
 0x8bd   :  { %v15564_v60 = vadd.f32 %v15563_v17, %v15562_v11  ;;  %v15680_v12 = vadd.f32 %v15679_v20, %v15678_v10  ;;  %v15650_v21 = vsub.f32 %v29317_v13, %v27588_v37  ;;  %v15651_v62 = vsub.f32 %v29318_v25, %v27588_v37  ;;  %v29320_v11 = vld [vmem:[#allocation28_spill] sm:$0xff] }
 0x8be   :  { %v15626_v35 = vadd.f32 %v15625_v5, %v15624_v14  ;;  %v15663_v51 = vmul.f32 %v15647_v42, %v15647_v42  ;;  %v15681_v9 = vsel %vm198_vm4, %v15661_v29, 0.0  ;;  %v15652_v45 = vsub.f32 %v29319_v19, %v27588_v37  ;;  %v29322_v14 = vld [vmem:[#allocation25_spill] sm:$0xff]  ;;  %v29323_v29 = vld [vmem:[#allocation26_spill] sm:$0xff] }
 0x8bf   :  { %v15682_v40 = vadd.f32 %v15681_v9, %v15680_v12  ;;  %v15710_v17 = vsub.f32 %v29320_v11, %v27588_v37  ;;  %v15653_v43 = vsub.f32 %v29321_v6, %v27588_v37  ;;  %v15664_v5 = vmul.f32 %v15648_v38, %v15648_v38  ;;  %v29324_v12 = vld [vmem:[#allocation57_spill] sm:$0xff]  ;;  %v29325_v6 = vld [vmem:[#allocation27_spill] sm:$0xff] }
 0x8c0   :  { %v15628_v8 = vadd.f32 %v15627_v52, %v15626_v35  ;;  %v15683_v18 = vsel %vm198_vm4, %v15662_v41, 0.0  ;;  %v15711_v10 = vsub.f32 %v29322_v14, %v27588_v37  ;;  %v15565_v42 = vrot.slane %v15564_v60, 2 }
 0x8c1   :  { %v15654_v52 = vsub.f32 %v29323_v29, %v27588_v37  ;;  %v15684_v35 = vadd.f32 %v15683_v18, %v15682_v40  ;;  %v15655_v9 = vsub.f32 %v29324_v12, %v27588_v37  ;;  %v15665_v19 = vmul.f32 %v15649_v39, %v15649_v39 }
 0x8c2   :  { %v15630_v20 = vadd.f32 %v15629_v33, %v15628_v8  ;;  %v15685_v11 = vsel %vm198_vm4, %v15663_v51, 0.0  ;;  %v15712_v38 = vsub.f32 %v29325_v6, %v27588_v37  ;;  %v15666_v41 = vmul.f32 %v15650_v21, %v15650_v21  ;;  %v29326_v8 = vld [vmem:[#allocation24_spill] sm:$0xff]  ;;  %v29327_v6 = vld [vmem:[#allocation31_spill] sm:$0xff] }
 0x8c3   :  { %v15686_v13 = vadd.f32 %v15685_v11, %v15684_v35  ;;  %v15726_v54 = vmul.f32 %v15710_v17, %v15710_v17  ;;  %v15667_v14 = vmul.f32 %v15651_v62, %v15651_v62  ;;  %v15687_v33 = vsel %vm198_vm4, %v15664_v5, 0.0 }
 0x8c4   :  { %v15632_v25 = vadd.f32 %v15631_v28, %v15630_v20  ;;  %v15713_v29 = vsub.f32 %v29326_v8, %v27588_v37  ;;  %v15727_v40 = vmul.f32 %v15711_v10, %v15711_v10  ;;  %v15566_v18 = vadd.f32 %v15565_v42, %v15564_v60  ;;  %v29328_v10 = vld [vmem:[#allocation36_spill] sm:$0xff] }
 0x8c5   :  { %v15668_v12 = vmul.f32 %v15652_v45, %v15652_v45  ;;  %v15688_v39 = vadd.f32 %v15687_v33, %v15686_v13  ;;  %v15669_v3 = vmul.f32 %v15653_v43, %v15653_v43  ;;  %v15689_v51 = vsel %vm198_vm4, %v15665_v19, 0.0 }
 0x8c6   :  { %v15633_v23 = vrot.slane %v15632_v25, 4  ;;  %v15714_v28 = vsub.f32 %v29327_v6, %v27588_v37  ;;  %v15728_v21 = vmul.f32 %v15712_v38, %v15712_v38  ;;  %v15670_v17 = vmul.f32 %v15654_v52, %v15654_v52 }
 0x8c7   :  { %v15690_v62 = vadd.f32 %v15689_v51, %v15688_v39  ;;  %v15742_v5 = vsel %vm198_vm4, %v15726_v54, 0.0  ;;  %v15691_v20 = vsel %vm198_vm4, %v15666_v41, 0.0  ;;  %v15715_v60 = vsub.f32 %v29328_v10, %v27588_v37 }
 0x8c8   :  { %v15634_v11 = vadd.f32 %v15633_v23, %v15632_v25  ;;  %v15729_v42 = vmul.f32 %v15713_v29, %v15713_v29  ;;  %v15743_v13 = vsel %vm198_vm4, %v15727_v40, 0.0  ;;  %v15567_v45 = vrot.slane %v15566_v18, 1  ;;  %v29329_v23 = vld [vmem:[#allocation47_spill] sm:$0xff]  ;;  %v29330_v40 = vld [vmem:[#allocation46_spill] sm:$0xff] }
 0x8c9   :  { %v15692_v19 = vadd.f32 %v15691_v20, %v15690_v62  ;;  %v15744_v35 = vadd.f32 %v15743_v13, %v15742_v5  ;;  %v15693_v33 = vsel %vm198_vm4, %v15667_v14, 0.0  ;;  %v15716_v25 = vsub.f32 %v29329_v23, %v27588_v37 }
 0x8ca   :  { %v15635_v43 = vrot.slane %v15634_v11, 2  ;;  %v15730_v52 = vmul.f32 %v15714_v28, %v15714_v28  ;;  %v15745_v54 = vsel %vm198_vm4, %v15728_v21, 0.0  ;;  %v15671_v41 = vmul.f32 %v15655_v9, %v15655_v9  ;;  %v29331_v21 = vld [vmem:[#allocation30_spill] sm:$0xff] }
 0x8cb   :  { %v15694_v39 = vadd.f32 %v15693_v33, %v15692_v19  ;;  %v15746_v51 = vadd.f32 %v15745_v54, %v15744_v35  ;;  %v15695_v29 = vsel %vm198_vm4, %v15668_v12, 0.0  ;;  %v15717_v10 = vsub.f32 %v29330_v40, %v27588_v37 }
 0x8cc   :  { %v15636_v38 = vadd.f32 %v15635_v43, %v15634_v11  ;;  %v15731_v6 = vmul.f32 %v15715_v60, %v15715_v60  ;;  %v15747_v62 = vsel %vm198_vm4, %v15729_v42, 0.0  ;;  %v15568_v5 = vadd.f32 %v15567_v45, %v15566_v18  ;;  %v29332_v60 = vld [vmem:[#allocation54_spill] sm:$0xff] }
 0x8cd   :  { %v15696_v20 = vadd.f32 %v15695_v29, %v15694_v39  ;;  %v15748_v13 = vadd.f32 %v15747_v62, %v15746_v51  ;;  %v15697_v28 = vsel %vm198_vm4, %v15669_v3, 0.0  ;;  %v15718_v11 = vsub.f32 %v29331_v21, %v27588_v37 }
 0x8ce   :  { %v15637_v14 = vrot.slane %v15636_v38, 1  ;;  %v15732_v9 = vmul.f32 %v15716_v25, %v15716_v25  ;;  %v15749_v43 = vsel %vm198_vm4, %v15730_v52, 0.0  ;;  %v15699_v33 = vsel %vm198_vm4, %v15670_v17, 0.0  ;;  %v29333_v25 = vld [vmem:[#allocation55_spill] sm:$0xff]  ;;  %v29334_v17 = vld [vmem:[#allocation42_spill] sm:$0xff] }
 0x8cf   :  { %v15698_v12 = vadd.f32 %v15697_v28, %v15696_v20  ;;  %v15750_v35 = vadd.f32 %v15749_v43, %v15748_v13  ;;  %v15719_v42 = vsub.f32 %v29332_v60, %v27588_v37  ;;  %v15733_v18 = vmul.f32 %v15717_v10, %v15717_v10  ;;  %v29335_v28 = vld [vmem:[#allocation14_spill] sm:$0xff] }
 0x8d0   :  { %v15638_v19 = vadd.f32 %v15637_v14, %v15636_v38  ;;  %v15751_v45 = vsel %vm198_vm4, %v15731_v6, 0.0  ;;  %v15701_v51 = vsel %vm198_vm4, %v15671_v41, 0.0  ;;  %v15720_v29 = vsub.f32 %v29333_v25, %v27588_v37 }
 0x8d1   :  { %v15700_v39 = vadd.f32 %v15699_v33, %v15698_v12  ;;  %v15752_v3 = vadd.f32 %v15751_v45, %v15750_v35  ;;  %v15734_v52 = vmul.f32 %v15718_v11, %v15718_v11  ;;  %v15753_v38 = vsel %vm198_vm4, %v15732_v9, 0.0  ;;  %v29336_v9 = vld [vmem:[#allocation39_spill] sm:$0xff] }
 0x8d2   :  { %v15639_v54 = vadd.f32 %v15638_v19, %v15568_v5  ;;  %v15721_v20 = vsub.f32 %v29334_v17, %v27588_v37  ;;  %v15735_v13 = vmul.f32 %v15719_v42, %v15719_v42  ;;  %v15755_v10 = vsel %vm198_vm4, %v15733_v18, 0.0  ;;  %v29337_v18 = vld [vmem:[#allocation33_spill] sm:$0xff] }
 0x8d3   :  { %v15702_v62 = vadd.f32 %v15701_v51, %v15700_v39  ;;  %v15754_v14 = vadd.f32 %v15753_v38, %v15752_v3  ;;  %v15722_v43 = vsub.f32 %v29335_v28, %v27588_v37  ;;  %v15736_v41 = vmul.f32 %v15720_v29, %v15720_v29 }
 0x8d4   :  { %v15757_v19 = vsel %vm198_vm4, %v15734_v52, 0.0  ;;  %v15723_v35 = vsub.f32 %v29336_v9, %v27588_v37  ;;  %v15737_v33 = vmul.f32 %v15721_v20, %v15721_v20  ;;  %v15759_v45 = vsel %vm198_vm4, %v15735_v13, 0.0 }
 0x8d5   :  { %v15703_v6 = vrot.slane %v15702_v62, 4  ;;  %v15756_v5 = vadd.f32 %v15755_v10, %v15754_v14  ;;  %v15724_v3 = vsub.f32 %v29337_v18, %v27588_v37  ;;  %v15738_v51 = vmul.f32 %v15722_v43, %v15722_v43 }
 0x8d6   :  { %v15761_v38 = vsel %vm198_vm4, %v15736_v41, 0.0  ;;  %v15725_v52 = vsub.f32 %v27579_v48, %v27588_v37  ;;  %v15763_v10 = vsel %vm198_vm4, %v15737_v33, 0.0 }
 0x8d7   :  { %v15704_v12 = vadd.f32 %v15703_v6, %v15702_v62  ;;  %v15758_v11 = vadd.f32 %v15757_v19, %v15756_v5  ;;  %v15739_v62 = vmul.f32 %v15723_v35, %v15723_v35  ;;  %v15740_v5 = vmul.f32 %v15724_v3, %v15724_v3 }
 0x8d8   :  { %v15765_v13 = vsel %vm198_vm4, %v15738_v51, 0.0 }
 0x8d9   :  { %v15705_v39 = vrot.slane %v15704_v12, 2  ;;  %v15760_v42 = vadd.f32 %v15759_v45, %v15758_v11  ;;  %v15741_v45 = vmul.f32 %v15725_v52, %v15725_v52  ;;  %v15767_v43 = vsel %vm198_vm4, %v15739_v62, 0.0 }
 0x8db   :  { %v15706_v14 = vadd.f32 %v15705_v39, %v15704_v12  ;;  %v15762_v29 = vadd.f32 %v15761_v38, %v15760_v42  ;;  %v15769_v12 = vsel %vm198_vm4, %v15740_v5, 0.0  ;;  %v15771_v42 = vsel %vm198_vm4, %v15741_v45, 0.0 }
 0x8dd   :  { %v15707_v6 = vrot.slane %v15706_v14, 1  ;;  %v15764_v20 = vadd.f32 %v15763_v10, %v15762_v29 }
 0x8df   :  { %v15708_v19 = vadd.f32 %v15707_v6, %v15706_v14  ;;  %v15766_v11 = vadd.f32 %v15765_v13, %v15764_v20  ;;  %v15785_v20 = vld [vmem:[%s28654_s9] sm:$0x1]  ;;  %v29338_v13 = vld [vmem:[#allocation44_spill] sm:$0xff]  ;;  %s22123_s9 = smov 16  }
 0x8e1   :  { %v15709_v9 = vadd.f32 %v15708_v19, %v15639_v54  ;;  %v15768_v41 = vadd.f32 %v15767_v43, %v15766_v11  ;;  %v15781_v54 = vld [vmem:[%s28653_s8] sm:$0x1]  ;;  %s22122_s8 = smov 8  }
 0x8e3   :  { %v15770_v39 = vadd.f32 %v15769_v12, %v15768_v41  ;;  %v29339_v12 = vld [vmem:[#allocation9_spill] sm:$0xff] }
 0x8e5   :  { %v15772_v35 = vadd.f32 %v15771_v42, %v15770_v39  ;;  %v29340_v39 = vld [vmem:[#allocation11_spill] sm:$0xff] }
 0x8e7   :  { %v15773_v38 = vrot.slane %v15772_v35, 4 }
 0x8e9   :  { %v15774_v33 = vadd.f32 %v15773_v38, %v15772_v35 }
 0x8eb   :  { %v15775_v48 = vrot.slane %v15774_v33, 2 }
 0x8ed   :  { %v15776_v29 = vadd.f32 %v15775_v48, %v15774_v33 }
 0x8ef   :  { %v15777_v3 = vrot.slane %v15776_v29, 1 }
 0x8f1   :  { %v15778_v10 = vadd.f32 %v15777_v3, %v15776_v29  ;;  %v29345_v29 = vld [vmem:[#allocation20_spill] sm:$0xff] }
 0x8f3   :  { %v15779_v51 = vadd.f32 %v15778_v10, %v15709_v9  ;;  %v29346_v10 = vld [vmem:[#allocation15_spill] sm:$0xff] }
 0x8f5   :  { %v15780_v14 = vmul.f32 0.001953125, %v15779_v51 }
 0x8f7   :  { %v15782_v6 = vadd.f32 1e-05, %v15780_v14  ;;  %v29347_v14 = vld [vmem:[#allocation40_spill] sm:$0xff] }
 0x8f9   :  { %21990 = vrsqrt.f32 %v15782_v6 }
 0x903   :  { %v21991_v52 = vpop.eup %21990 }
 0x904   :  { %v15784_v62 = vmul.f32 %v21991_v52, %v15781_v54 }
 0x906   :  { %v15786_v5 = vmul.f32 %v15784_v62, %v27588_v37  ;;  %v27790_v48 = vrot.slane %v15784_v62, %v29338_v13 }
 0x908   :  { %v15787_v19 = vsub.f32 %v15785_v20, %v15786_v5  ;;  %v15958_v9 = vmul.f32 %v27790_v48, %v29337_v18  ;;  %v27796_v11 = vmul.f32 %v27790_v48, %v27175_v55  ;;  %v27800_v45 = vmul.f32 %v27171_v49, %v27790_v48 }
 0x909   :  { %v27804_v43 = vmul.f32 %v27790_v48, %v27185_v27  ;;  %v27808_v37 = vmul.f32 %v27183_v58, %v27790_v48  ;;  %v27812_v41 = vmul.f32 %v27790_v48, %v27205_v57  ;;  %v27816_v55 = vmul.f32 %v27203_v31, %v27790_v48 }
 0x90a   :  { %v27819_v18 = vrot.slane %v15787_v19, %v29338_v13  ;;  %v27823_v49 = vmul.f32 %v27790_v48, %v27224_v30  ;;  %v27827_v27 = vmul.f32 %v27222_v61, %v27790_v48  ;;  %v27831_v58 = vmul.f32 %v27790_v48, %v27250_v1  ;;  %v29342_v1 = vld [vmem:[#allocation7_spill] sm:$0xff]  ;;  %v29348_v13 = vld [vmem:[#allocation21_spill] sm:$0xff]  ;;  %v29349_v19 = vld [vmem:[#allocation10_spill] sm:$0xff] }
 0x90b   :  { %v27835_v57 = vmul.f32 %v27248_v50, %v27790_v48  ;;  %v27839_v31 = vmul.f32 %v27790_v48, %v27277_v36  ;;  %v27843_v30 = vmul.f32 %v29339_v12, %v27790_v48  ;;  %v27847_v61 = vmul.f32 %v27790_v48, %v29340_v39  ;;  %v29343_v50 = vld [vmem:[#allocation34_spill] sm:$0xff] }
 0x90c   :  { %v27850_v42 = vadd.f32 %v15958_v9, %v27819_v18  ;;  %v27854_v35 = vmul.f32 %v29342_v1, %v27790_v48  ;;  %v27858_v38 = vmul.f32 %v27790_v48, %v29343_v50  ;;  %v29344_v36 = vld [vmem:[#allocation22_spill] sm:$0xff]  ;;  %v27866_v3 = vmul.f32 %v27790_v48, %v29345_v29  ;;  %v29351_v1 = vld [vmem:[#allocation60_spill] sm:$0xff]  ;;  %v29352_v50 = vld [vmem:[#allocation59_spill] sm:$0xff] }
 0x90d   :  { %v27862_v33 = vmul.f32 %v29344_v36, %v27790_v48  ;;  %v15849_v51 = vmul.f32 %v29346_v10, %v27790_v48  ;;  %v27872_v6 = vmul.f32 %v27790_v48, %v29347_v14  ;;  %v27876_v54 = vmul.f32 %v27209_v7, %v27790_v48  ;;  %v29350_v12 = vld [vmem:[#allocation58_spill] sm:$0xff]  ;;  %v29353_v36 = vld [vmem:[#allocation51_spill] sm:$0xff]  ;;  %v29356_v10 = vld [vmem:[#allocation16_spill] sm:$0xff] }
 0x90e   :  { %29341 = vst [vmem:[#allocation29_spill] sm:$0xff] %v27850_v42  ;;  %v27880_v52 = vmul.f32 %v27790_v48, %v27235_v2  ;;  %v27884_v62 = vmul.f32 %v27229_v15, %v27790_v48  ;;  %v27888_v20 = vmul.f32 %v27790_v48, %v27262_v59  ;;  %v27892_v5 = vmul.f32 %v27255_v24, %v27790_v48  ;;  %v29354_v29 = vld [vmem:[#allocation50_spill] sm:$0xff]  ;;  %v29363_v42 = vld [vmem:[#allocation28_spill] sm:$0xff] }
 0x90f   :  { %v27896_v7 = vmul.f32 %v27790_v48, %v27290_v16  ;;  %v27900_v2 = vmul.f32 %v27283_v26, %v27790_v48  ;;  %v27904_v15 = vmul.f32 %v27790_v48, %v27316_v34  ;;  %v27908_v59 = vmul.f32 %v27309_v22, %v27790_v48 }
 0x910   :  { %v27912_v24 = vmul.f32 %v27790_v48, %v27342_v56  ;;  %v27916_v16 = vmul.f32 %v27337_v44, %v27790_v48  ;;  %v27920_v26 = vmul.f32 %v27790_v48, %v27362_v0  ;;  %v27924_v34 = vmul.f32 %v27357_v4, %v27790_v48 }
 0x911   :  { %v27928_v22 = vmul.f32 %v27790_v48, %v27463_v53  ;;  %v27932_v56 = vmul.f32 %v29348_v13, %v27790_v48  ;;  %v27936_v44 = vmul.f32 %v27790_v48, %v29349_v19  ;;  %v27940_v0 = vmul.f32 %v27467_v47, %v27790_v48  ;;  %v29358_v13 = vld [vmem:[#allocation19_spill] sm:$0xff] }
 0x912   :  { %v27944_v4 = vmul.f32 %v27790_v48, %v27485_v63  ;;  %v27948_v53 = vmul.f32 %v27483_v32, %v27790_v48  ;;  %v27952_v9 = vmul.f32 %v27790_v48, %v27499_v46  ;;  %v27956_v39 = vmul.f32 %v29350_v12, %v27790_v48  ;;  %v29359_v12 = vld [vmem:[#allocation26_spill] sm:$0xff] }
 0x913   :  { %v27960_v47 = vmul.f32 %v27790_v48, %v29351_v1  ;;  %v27964_v63 = vmul.f32 %v29352_v50, %v27790_v48  ;;  %v27968_v32 = vmul.f32 %v27790_v48, %v29353_v36  ;;  %v27972_v46 = vmul.f32 %v29354_v29, %v27790_v48  ;;  %v29361_v50 = vld [vmem:[#allocation57_spill] sm:$0xff] }
 0x914   :  { %v27976_v14 = vmul.f32 %v27790_v48, %v29356_v10  ;;  %v27980_v19 = vmul.f32 %v29358_v13, %v27790_v48  ;;  %v27984_v1 = vmul.f32 %v27790_v48, %v29359_v12  ;;  %v27988_v36 = vmul.f32 %v29361_v50, %v27790_v48 }
 0x915   :  { %29355 = vst [vmem:[#allocation32_spill] sm:$0xff] %v27972_v46  ;;  %v27992_v29 = vmul.f32 %v27790_v48, %v29363_v42  ;;  %v29364_v46 = vld [vmem:[#allocation25_spill] sm:$0xff]  ;;  %v28004_v12 = vmul.f32 %v29326_v8, %v27790_v48  ;;  %v28024_v8 = vmul.f32 %v27790_v48, %v29331_v21 }
 0x916   :  { %29357 = vst [vmem:[#allocation38_spill] sm:$0xff] %v27976_v14  ;;  %29360 = vst [vmem:[#allocation37_spill] sm:$0xff] %v27984_v1  ;;  %v27996_v10 = vmul.f32 %v29364_v46, %v27790_v48  ;;  %v29365_v14 = vld [vmem:[#allocation27_spill] sm:$0xff]  ;;  %v28016_v46 = vmul.f32 %v27790_v48, %v29329_v23  ;;  %v28036_v23 = vmul.f32 %v29334_v17, %v27790_v48 }
 0x917   :  { %29362 = vst [vmem:[#allocation45_spill] sm:$0xff] %v27988_v36  ;;  %v28000_v13 = vmul.f32 %v27790_v48, %v29365_v14  ;;  %v29366_v1 = vld [vmem:[#allocation31_spill] sm:$0xff]  ;;  %v29367_v36 = vld [vmem:[#allocation36_spill] sm:$0xff]  ;;  %v28020_v14 = vmul.f32 %v29330_v40, %v27790_v48  ;;  %29369 = vst [vmem:[#allocation49_spill] sm:$0xff] %v28024_v8  ;;  %v28040_v40 = vmul.f32 %v27790_v48, %v29335_v28 }
 0x918   :  { %v28008_v50 = vmul.f32 %v27790_v48, %v29366_v1  ;;  %v28012_v42 = vmul.f32 %v29367_v36, %v27790_v48  ;;  %v28028_v1 = vmul.f32 %v29332_v60, %v27790_v48  ;;  %v28032_v36 = vmul.f32 %v27790_v48, %v29333_v25  ;;  %v29372_v8 = vld [vmem:[#allocation23_spill] sm:$0xff] }
 0x919   :  { %29368 = vst [vmem:[#allocation48_spill] sm:$0xff] %v28020_v14  ;;  %v29371_v14 = vld [vmem:[#allocation39_spill] sm:$0xff]  ;;  %v28048_v60 = vmul.f32 %v29372_v8, %v27790_v48  ;;  %v28053_v25 = vadd.f32 %v27819_v18, %v27796_v11  ;;  %v28057_v17 = vadd.f32 %v27819_v18, %v27800_v45  ;;  %v28061_v28 = vadd.f32 %v27819_v18, %v27804_v43 }
 0x91a   :  { %29370 = vst [vmem:[#allocation52_spill] sm:$0xff] %v28028_v1  ;;  %v28044_v21 = vmul.f32 %v29371_v14, %v27790_v48  ;;  %v15865_v1 = vadd.f32 %v15849_v51, %v27819_v18  ;;  %v28065_v14 = vadd.f32 %v27819_v18, %v27808_v37  ;;  %v28069_v48 = vadd.f32 %v27819_v18, %v27812_v41 }
 0x91b   :  { %v28073_v11 = vadd.f32 %v27819_v18, %v27816_v55  ;;  %v28077_v45 = vadd.f32 %v27819_v18, %v27823_v49  ;;  %v28081_v43 = vadd.f32 %v27819_v18, %v27827_v27  ;;  %v28085_v37 = vadd.f32 %v27819_v18, %v27831_v58 }
 0x91c   :  { %v15881_v51 = vmax.f32 %v15865_v1, 0.0  ;;  %v28089_v41 = vadd.f32 %v27819_v18, %v27835_v57  ;;  %v28093_v55 = vadd.f32 %v27819_v18, %v27839_v31  ;;  %v28097_v49 = vadd.f32 %v27819_v18, %v27843_v30 }
 0x91d   :  { %29373 = vst [vmem:[#allocation53_spill] sm:$0xff] %v28073_v11  ;;  %29374 = vst [vmem:[#allocation12_spill] sm:$0xff] %v28077_v45  ;;  %v28101_v27 = vadd.f32 %v27819_v18, %v27847_v61  ;;  %v28105_v58 = vadd.f32 %v27819_v18, %v27854_v35  ;;  %v28110_v57 = vadd.f32 %v27819_v18, %v27858_v38 }
 0x91e   :  { %29375 = vst [vmem:[#allocation8_spill] sm:$0xff] %v28081_v43  ;;  %16010 = vrot.lane.b32.xlu1 %v15881_v51, %s22122_s8  ;;  %v28114_v31 = vadd.f32 %v27819_v18, %v27862_v33  ;;  %v15864_v30 = vadd.f32 %v27866_v3, %v27819_v18  ;;  %v15866_v61 = vadd.f32 %v27872_v6, %v27819_v18 }
 0x91f   :  { %29376 = vst [vmem:[#allocation43_spill] sm:$0xff] %v28101_v27  ;;  %29377 = vst [vmem:[#allocation18_spill] sm:$0xff] %v28105_v58  ;;  %v28122_v35 = vadd.f32 %v27876_v54, %v27819_v18  ;;  %v28126_v8 = vadd.f32 %v27880_v52, %v27819_v18  ;;  %v28130_v38 = vadd.f32 %v27884_v62, %v27819_v18 }
 0x920   :  { %29378 = vst [vmem:[#allocation62_spill] sm:$0xff] %v28110_v57  ;;  %29379 = vst [vmem:[#allocation63_spill] sm:$0xff] %v28114_v31  ;;  %v28134_v33 = vadd.f32 %v27888_v20, %v27819_v18  ;;  %v28138_v3 = vadd.f32 %v27892_v5, %v27819_v18  ;;  %v15872_v6 = vadd.f32 %v27896_v7, %v27819_v18 }
 0x921   :  { %v15873_v54 = vadd.f32 %v27900_v2, %v27819_v18  ;;  %v15874_v52 = vadd.f32 %v27904_v15, %v27819_v18  ;;  %v15875_v62 = vadd.f32 %v27908_v59, %v27819_v18  ;;  %v28150_v20 = vadd.f32 %v27912_v24, %v27819_v18  ;;  %v29386_v58 = vld [vmem:[#allocation52_spill] sm:$0xff] }
 0x922   :  { %v28154_v5 = vadd.f32 %v27916_v16, %v27819_v18  ;;  %v28158_v7 = vadd.f32 %v27920_v26, %v27819_v18  ;;  %v28162_v2 = vadd.f32 %v27924_v34, %v27819_v18  ;;  %v15912_v15 = vadd.f32 %v27928_v22, %v27819_v18 }
 0x923   :  { %v15913_v59 = vadd.f32 %v27932_v56, %v27819_v18  ;;  %v15914_v24 = vadd.f32 %v27936_v44, %v27819_v18  ;;  %v28172_v16 = vadd.f32 %v27940_v0, %v27819_v18  ;;  %v28176_v26 = vadd.f32 %v27944_v4, %v27819_v18 }
 0x924   :  { %v28180_v34 = vadd.f32 %v27948_v53, %v27819_v18  ;;  %v28184_v22 = vadd.f32 %v27952_v9, %v27819_v18  ;;  %v28188_v56 = vadd.f32 %v27956_v39, %v27819_v18  ;;  %v15920_v44 = vadd.f32 %v27960_v47, %v27819_v18  ;;  %v29380_v53 = vld [vmem:[#allocation32_spill] sm:$0xff]  ;;  %v29381_v9 = vld [vmem:[#allocation38_spill] sm:$0xff]  ;;  %v29382_v47 = vld [vmem:[#allocation37_spill] sm:$0xff] }
 0x925   :  { %v15921_v0 = vadd.f32 %v27964_v63, %v27819_v18  ;;  %v15922_v4 = vadd.f32 %v27968_v32, %v27819_v18  ;;  %v28198_v1 = vadd.f32 %v29380_v53, %v27819_v18  ;;  %v28202_v51 = vadd.f32 %v29381_v9, %v27819_v18  ;;  %v29383_v63 = vld [vmem:[#allocation45_spill] sm:$0xff] }
 0x926   :  { %v28206_v39 = vadd.f32 %v27980_v19, %v27819_v18  ;;  %v28210_v31 = vadd.f32 %v29382_v47, %v27819_v18  ;;  %v28214_v57 = vadd.f32 %v29383_v63, %v27819_v18  ;;  %v15960_v32 = vadd.f32 %v27992_v29, %v27819_v18 }
 0x927   :  { %v15961_v53 = vadd.f32 %v27996_v10, %v27819_v18  ;;  %v15962_v9 = vadd.f32 %v28000_v13, %v27819_v18  ;;  %v28224_v19 = vadd.f32 %v28004_v12, %v27819_v18  ;;  %v28228_v47 = vadd.f32 %v28008_v50, %v27819_v18  ;;  %v29384_v10 = vld [vmem:[#allocation48_spill] sm:$0xff]  ;;  %v29385_v13 = vld [vmem:[#allocation49_spill] sm:$0xff] }
 0x928   :  { %v28232_v63 = vadd.f32 %v28012_v42, %v27819_v18  ;;  %v28236_v29 = vadd.f32 %v28016_v46, %v27819_v18  ;;  %v28240_v43 = vadd.f32 %v29384_v10, %v27819_v18  ;;  %v15968_v12 = vadd.f32 %v29385_v13, %v27819_v18 }
 0x929   :  { %v15969_v45 = vadd.f32 %v29386_v58, %v27819_v18  ;;  %v15970_v50 = vadd.f32 %v28032_v36, %v27819_v18  ;;  %v28250_v42 = vadd.f32 %v28036_v23, %v27819_v18  ;;  %v28254_v46 = vadd.f32 %v28040_v40, %v27819_v18 }
 0x92a   :  { %v28258_v10 = vadd.f32 %v28044_v21, %v27819_v18  ;;  %v28262_v13 = vadd.f32 %v28048_v60, %v27819_v18  ;;  %v15880_v58 = vmax.f32 %v15864_v30, 0.0  ;;  %v15888_v36 = vmax.f32 %v15872_v6, 0.0 }
 0x92b   :  { %v15889_v11 = vmax.f32 %v15873_v54, 0.0  ;;  %v15882_v23 = vmax.f32 %v15866_v61, 0.0  ;;  %v15890_v40 = vmax.f32 %v15874_v52, 0.0  ;;  %v15928_v21 = vmax.f32 %v15912_v15, 0.0 }
 0x92c   :  { %16008 = vrot.lane.b32.xlu0 %v15880_v58, %s22122_s8  ;;  %v15929_v27 = vmax.f32 %v15913_v59, 0.0  ;;  %v15936_v18 = vmax.f32 %v15920_v44, 0.0  ;;  %v15937_v60 = vmax.f32 %v15921_v0, 0.0  ;;  %v15891_v30 = vmax.f32 %v15875_v62, 0.0 }
 0x92d   :  { %16026 = vrot.lane.b32.xlu1 %v15889_v11, %s22122_s8  ;;  %v15883_v11 = vmax.f32 %v28122_v35, 0.0  ;;  %v15930_v61 = vmax.f32 %v15914_v24, 0.0  ;;  %v15938_v6 = vmax.f32 %v15922_v4, 0.0  ;;  %v15977_v54 = vmax.f32 %v15961_v53, 0.0 }
 0x92e   :  { %v15984_v52 = vmax.f32 %v15968_v12, 0.0  ;;  %v15985_v35 = vmax.f32 %v15969_v45, 0.0  ;;  %v15884_v62 = vmax.f32 %v28126_v8, 0.0  ;;  %v15892_v15 = vmax.f32 %v28150_v20, 0.0 }
 0x92f   :  { %v15931_v59 = vmax.f32 %v28172_v16, 0.0  ;;  %v15939_v24 = vmax.f32 %v28198_v1, 0.0  ;;  %v15978_v45 = vmax.f32 %v15962_v9, 0.0  ;;  %v15986_v44 = vmax.f32 %v15970_v50, 0.0 }
 0x930   :  { %16024 = vrot.lane.b32.xlu0 %v15888_v36, %s22122_s8  ;;  %v15885_v8 = vmax.f32 %v28130_v38, 0.0  ;;  %v15893_v20 = vmax.f32 %v28154_v5, 0.0  ;;  %v15932_v16 = vmax.f32 %v28176_v26, 0.0  ;;  %v15940_v0 = vmax.f32 %v28202_v51, 0.0 }
 0x931   :  { %16028 = vrot.lane.b32.xlu1 %v15890_v40, %s22122_s8  ;;  %v15979_v4 = vmax.f32 %v28224_v19, 0.0  ;;  %v15987_v1 = vmax.f32 %v28250_v42, 0.0  ;;  %v15886_v38 = vmax.f32 %v28134_v33, 0.0  ;;  %v15894_v5 = vmax.f32 %v28158_v7, 0.0 }
 0x932   :  { %v15933_v26 = vmax.f32 %v28180_v34, 0.0  ;;  %v15941_v51 = vmax.f32 %v28206_v39, 0.0  ;;  %v15988_v53 = vmax.f32 %v28254_v46, 0.0  ;;  %v15887_v33 = vmax.f32 %v28138_v3, 0.0 }
 0x933   :  { %v15895_v7 = vmax.f32 %v28162_v2, 0.0  ;;  %v15934_v34 = vmax.f32 %v28184_v22, 0.0  ;;  %v15942_v39 = vmax.f32 %v28210_v31, 0.0  ;;  %v15981_v9 = vmax.f32 %v28232_v63, 0.0  ;;  %v29387_v22 = vld [vmem:[#allocation29_spill] sm:$0xff] }
 0x934   :  { %16012 = vrot.lane.b32.xlu0 %v15882_v23, %s22122_s8  ;;  %v15989_v19 = vmax.f32 %v28258_v10, 0.0  ;;  %v15935_v3 = vmax.f32 %v28188_v56, 0.0  ;;  %v15943_v2 = vmax.f32 %v28214_v57, 0.0  ;;  %v15982_v31 = vmax.f32 %v28236_v29, 0.0 }
 0x935   :  { %16074 = vrot.lane.b32.xlu1 %v15929_v27, %s22123_s9  ;;  %v15976_v27 = vmax.f32 %v15960_v32, 0.0  ;;  %v15980_v32 = vmax.f32 %v28228_v47, 0.0  ;;  %v15990_v47 = vmax.f32 %v29387_v22, 0.0  ;;  %v15983_v63 = vmax.f32 %v28240_v43, 0.0 }
 0x936   :  { %v15991_v12 = vmax.f32 %v28262_v13, 0.0  ;;  %v15833_v57 = vmax.f32 %v28057_v17, 0.0  ;;  %v15832_v29 = vmax.f32 %v28053_v25, 0.0  ;;  %v15840_v10 = vmax.f32 %v28085_v37, 0.0 }
 0x937   :  { %v15841_v43 = vmax.f32 %v28089_v41, 0.0  ;;  %v15834_v17 = vmax.f32 %v28061_v28, 0.0  ;;  %v15842_v40 = vmax.f32 %v28093_v55, 0.0 }
 0x938   :  { %16072 = vrot.lane.b32.xlu0 %v15928_v21, %s22123_s9 }
 0x939   :  { %16090 = vrot.lane.b32.xlu1 %v15937_v60, %s22123_s9 }
 0x93c   :  { %16088 = vrot.lane.b32.xlu0 %v15936_v18, %s22123_s9 }
 0x93d   :  { %16030 = vrot.lane.b32.xlu1 %v15891_v30, %s22122_s8 }
 0x940   :  { %16014 = vrot.lane.b32.xlu0 %v15883_v11, %s22122_s8 }
 0x941   :  { %16092 = vrot.lane.b32.xlu1 %v15938_v6, %s22123_s9 }
 0x944   :  { %16076 = vrot.lane.b32.xlu0 %v15930_v61, %s22123_s9 }
 0x945   :  { %16138 = vrot.lane.b32.xlu1 %v15977_v54, %s22124_s29  ;;  %v15843_v54 = vmax.f32 %v28097_v49, 0.0 }
 0x948   :  { %16136 = vrot.lane.b32.xlu0 %v15976_v27, %s22124_s29  ;;  %v15835_v27 = vmax.f32 %v28065_v14, 0.0 }
 0x949   :  { %16154 = vrot.lane.b32.xlu1 %v15985_v35, %s22124_s29 }
 0x94c   :  { %16152 = vrot.lane.b32.xlu0 %v15984_v52, %s22124_s29 }
 0x94d   :  { %16032 = vrot.lane.b32.xlu1 %v15892_v15, %s22122_s8 }
 0x950   :  { %16016 = vrot.lane.b32.xlu0 %v15884_v62, %s22122_s8 }
 0x951   :  { %16094 = vrot.lane.b32.xlu1 %v15939_v24, %s22123_s9 }
 0x954   :  { %16078 = vrot.lane.b32.xlu0 %v15931_v59, %s22123_s9 }
 0x955   :  { %16156 = vrot.lane.b32.xlu1 %v15986_v44, %s22124_s29 }
 0x958   :  { %16140 = vrot.lane.b32.xlu0 %v15978_v45, %s22124_s29 }
 0x959   :  { %16034 = vrot.lane.b32.xlu1 %v15893_v20, %s22122_s8 }
 0x95c   :  { %16018 = vrot.lane.b32.xlu0 %v15885_v8, %s22122_s8 }
 0x95d   :  { %16096 = vrot.lane.b32.xlu1 %v15940_v0, %s22123_s9 }
 0x960   :  { %16080 = vrot.lane.b32.xlu0 %v15932_v16, %s22123_s9 }
 0x961   :  { %16158 = vrot.lane.b32.xlu1 %v15987_v1, %s22124_s29 }
 0x964   :  { %16142 = vrot.lane.b32.xlu0 %v15979_v4, %s22124_s29 }
 0x965   :  { %16036 = vrot.lane.b32.xlu1 %v15894_v5, %s22122_s8 }
 0x968   :  { %16020 = vrot.lane.b32.xlu0 %v15886_v38, %s22122_s8 }
 0x969   :  { %16098 = vrot.lane.b32.xlu1 %v15941_v51, %s22123_s9 }
 0x96c   :  { %16082 = vrot.lane.b32.xlu0 %v15933_v26, %s22123_s9 }
 0x96d   :  { %16160 = vrot.lane.b32.xlu1 %v15988_v53, %s22124_s29 }
 0x970   :  { %16144 = vrot.lane.b32.xlu0 %v15980_v32, %s22124_s29 }
 0x971   :  { %16038 = vrot.lane.b32.xlu1 %v15895_v7, %s22122_s8 }
 0x974   :  { %16022 = vrot.lane.b32.xlu0 %v15887_v33, %s22122_s8 }
 0x975   :  { %16100 = vrot.lane.b32.xlu1 %v15942_v39, %s22123_s9 }
 0x978   :  { %16084 = vrot.lane.b32.xlu0 %v15934_v34, %s22123_s9 }
 0x979   :  { %16162 = vrot.lane.b32.xlu1 %v15989_v19, %s22124_s29 }
 0x97c   :  { %16146 = vrot.lane.b32.xlu0 %v15981_v9, %s22124_s29 }
 0x97d   :  { %16102 = vrot.lane.b32.xlu1 %v15943_v2, %s22123_s9 }
 0x980   :  { %16086 = vrot.lane.b32.xlu0 %v15935_v3, %s22123_s9 }
 0x981   :  { %16164 = vrot.lane.b32.xlu1 %v15990_v47, %s22124_s29 }
 0x984   :  { %16148 = vrot.lane.b32.xlu0 %v15982_v31, %s22124_s29 }
 0x985   :  { %16166 = vrot.lane.b32.xlu1 %v15991_v12, %s22124_s29 }
 0x988   :  { %16150 = vrot.lane.b32.xlu0 %v15983_v63, %s22124_s29 }
 0x990   :  { %v16011_v56 = vpop.permute.xlu1 %16010 }
 0x991   :  { %v16185_v50 = vsel %vm198_vm4, %v15833_v57, %v16011_v56 }
 0x99e   :  { %v16009_v42 = vpop.permute.xlu0 %16008 }
 0x99f   :  { %v16184_v46 = vsel %vm198_vm4, %v15832_v29, %v16009_v42  ;;  %v16027_v13 = vpop.permute.xlu1 %16026 }
 0x9a0   :  { %v16193_v23 = vsel %vm198_vm4, %v15841_v43, %v16027_v13 }
 0x9a2   :  { %v16025_v58 = vpop.permute.xlu0 %16024 }
 0x9a3   :  { %v16192_v36 = vsel %vm198_vm4, %v15840_v10, %v16025_v58  ;;  %v16029_v18 = vpop.permute.xlu1 %16028 }
 0x9a4   :  { %v28354_v60 = vsel %vm198_vm4, %v15842_v40, %v16029_v18 }
 0x9a6   :  { %v16013_v21 = vpop.permute.xlu0 %16012 }
 0x9a7   :  { %v28351_v25 = vsel %vm198_vm4, %v15834_v17, %v16013_v21  ;;  %v16075_v41 = vpop.permute.xlu1 %16074 }
 0x9a8   :  { %v16202_v30 = vsel %vm16200_vm6, %v16185_v50, %v16075_v41 }
 0x9aa   :  { %v16073_v37 = vpop.permute.xlu0 %16072 }
 0x9ab   :  { %v16201_v11 = vsel %vm16200_vm6, %v16184_v46, %v16073_v37  ;;  %v16091_v6 = vpop.permute.xlu1 %16090 }
 0x9ac   :  { %v16210_v55 = vsel %vm16200_vm6, %v16193_v23, %v16091_v6 }
 0x9ae   :  { %v16089_v61 = vpop.permute.xlu0 %16088 }
 0x9af   :  { %v16209_v28 = vsel %vm16200_vm6, %v16192_v36, %v16089_v61  ;;  %v16031_v35 = vpop.permute.xlu1 %16030 }
 0x9b0   :  { %v28366_v15 = vsel %vm198_vm4, %v15843_v54, %v16031_v35 }
 0x9b2   :  { %v16015_v52 = vpop.permute.xlu0 %16014 }
 0x9b3   :  { %v28363_v62 = vsel %vm198_vm4, %v15835_v27, %v16015_v52  ;;  %v16093_v24 = vpop.permute.xlu1 %16092 }
 0x9b6   :  { %v16077_v59 = vpop.permute.xlu0 %16076 }
 0x9b7   :  { %v16139_v44 = vpop.permute.xlu1 %16138  ;;  %v16203_v35 = vsel %vm16200_vm6, %v28351_v25, %v16077_v59 }
 0x9b8   :  { %v16219_v20 = vsel %vm16217_vm7, %v16202_v30, %v16139_v44  ;;  %v16211_v44 = vsel %vm16200_vm6, %v28354_v60, %v16093_v24 }
 0x9b9   :  { %v16250_v49 = vrot.slane %v16219_v20, 7  ;;  %v16322_v16 = vrot.slane %v16219_v20, 1  ;;  %v16356_v1 = vrot.slane %v16219_v20, 2  ;;  %v16390_v38 = vrot.slane %v16219_v20, 3 }
 0x9ba   :  { %v16137_v45 = vpop.permute.xlu0 %16136  ;;  %v16420_v5 = vrot.slane %v16219_v20, 4  ;;  %v16454_v26 = vrot.slane %v16219_v20, 5  ;;  %v16488_v32 = vrot.slane %v16219_v20, 6 }
 0x9bb   :  { %v16218_v8 = vsel %vm16217_vm7, %v16201_v11, %v16137_v45  ;;  %v16155_v7 = vpop.permute.xlu1 %16154 }
 0x9bc   :  { %v16287_v14 = vrot.slane %v16218_v8, 1  ;;  %v16321_v0 = vrot.slane %v16218_v8, 2  ;;  %v16355_v4 = vrot.slane %v16218_v8, 3  ;;  %v16389_v53 = vrot.slane %v16218_v8, 4 }
 0x9bd   :  { %v16419_v33 = vrot.slane %v16218_v8, 5  ;;  %v16453_v39 = vrot.slane %v16218_v8, 6  ;;  %v16487_v9 = vrot.slane %v16218_v8, 7  ;;  %v16227_v19 = vsel %vm16217_vm7, %v16210_v55, %v16155_v7 }
 0x9be   :  { %v16153_v51 = vpop.permute.xlu0 %16152  ;;  %v16271_v2 = vrot.slane %v16227_v19, 7  ;;  %v16336_v31 = vrot.slane %v16227_v19, 1  ;;  %v16370_v63 = vrot.slane %v16227_v19, 2  ;;  %v16434_v12 = vrot.slane %v16227_v19, 4 }
 0x9bf   :  { %v16226_v34 = vsel %vm16217_vm7, %v16209_v28, %v16153_v51  ;;  %v16468_v57 = vrot.slane %v16227_v19, 5  ;;  %v16502_v56 = vrot.slane %v16227_v19, 6  ;;  %v16404_v29 = vrot.slane %v16227_v19, 3  ;;  %v28374_v43 = vpop.permute.xlu1 %16032 }
 0x9c0   :  { %v16301_v3 = vrot.slane %v16226_v34, 1  ;;  %v16335_v22 = vrot.slane %v16226_v34, 2  ;;  %v16369_v47 = vrot.slane %v16226_v34, 3  ;;  %v16433_v42 = vrot.slane %v16226_v34, 5 }
 0x9c1   :  { %v16467_v46 = vrot.slane %v16226_v34, 6  ;;  %v16501_v10 = vrot.slane %v16226_v34, 7  ;;  %v16403_v58 = vrot.slane %v16226_v34, 4  ;;  %v16288_v36 = vsel %vm16251_vm8, %v16219_v20, %v16287_v14 }
 0x9c2   :  { %v28372_v50 = vpop.permute.xlu0 %16016  ;;  %v16302_v13 = vsel %vm16251_vm8, %v16227_v19, %v16301_v3  ;;  %v16421_v23 = vsel %vm16251_vm8, %v16420_v5, %v16419_v33  ;;  %v16435_v17 = vsel %vm16251_vm8, %v16434_v12, %v16433_v42  ;;  %v16337_v40 = vsel %vm16251_vm8, %v16336_v31, %v16335_v22 }
 0x9c3   :  { %v16323_v21 = vsel %vm16251_vm8, %v16322_v16, %v16321_v0  ;;  %v16469_v18 = vsel %vm16251_vm8, %v16468_v57, %v16467_v46  ;;  %v16455_v41 = vsel %vm16251_vm8, %v16454_v26, %v16453_v39  ;;  %v16371_v11 = vsel %vm16251_vm8, %v16370_v63, %v16369_v47  ;;  %v16095_v6 = vpop.permute.xlu1 %16094 }
 0x9c4   :  { %v16357_v30 = vsel %vm16251_vm8, %v16356_v1, %v16355_v4  ;;  %v16503_v61 = vsel %vm16251_vm8, %v16502_v56, %v16501_v10  ;;  %v16489_v28 = vsel %vm16251_vm8, %v16488_v32, %v16487_v9  ;;  %v16272_v55 = vsel %vm16251_vm8, %v16271_v2, %v16226_v34 }
 0x9c5   :  { %v16252_v27 = vsel %vm16251_vm8, %v16250_v49, %v16218_v8  ;;  %v16405_v54 = vsel %vm16251_vm8, %v16404_v29, %v16403_v58  ;;  %v16391_v52 = vsel %vm16251_vm8, %v16390_v38, %v16389_v53 }
 0x9c6   :  { %v16079_v37 = vpop.permute.xlu0 %16078 }
 0x9c7   :  { %v16157_v20 = vpop.permute.xlu1 %16156  ;;  %v16204_v58 = vsel %vm16200_vm6, %v28363_v62, %v16079_v37 }
 0x9c8   :  { %v16228_v16 = vsel %vm16217_vm7, %v16211_v44, %v16157_v20 }
 0x9c9   :  { %v16273_v4 = vrot.slane %v16228_v16, 6  ;;  %v16303_v8 = vrot.slane %v16228_v16, 7  ;;  %v16372_v5 = vrot.slane %v16228_v16, 1  ;;  %v16436_v38 = vrot.slane %v16228_v16, 3 }
 0x9ca   :  { %v16141_v45 = vpop.permute.xlu0 %16140  ;;  %v16470_v26 = vrot.slane %v16228_v16, 4  ;;  %v16504_v51 = vrot.slane %v16228_v16, 5  ;;  %v16406_v59 = vrot.slane %v16228_v16, 2  ;;  %v16338_v19 = vsel %vm16254_vm9, %v16228_v16, %v16337_v40 }
 0x9cb   :  { %v16220_v14 = vsel %vm16217_vm7, %v16203_v35, %v16141_v45  ;;  %v28400_v53 = vpop.permute.xlu1 %16034  ;;  %v16304_v7 = vsel %vm16254_vm9, %v16303_v8, %v16302_v13  ;;  %v16437_v39 = vsel %vm16254_vm9, %v16436_v38, %v16435_v17  ;;  %v16373_v47 = vsel %vm16254_vm9, %v16372_v5, %v16371_v11 }
 0x9cc   :  { %v16289_v0 = vrot.slane %v16220_v14, 7  ;;  %v16253_v49 = vrot.slane %v16220_v14, 6  ;;  %v16358_v1 = vrot.slane %v16220_v14, 1  ;;  %v16422_v32 = vrot.slane %v16220_v14, 3 }
 0x9cd   :  { %v16456_v60 = vrot.slane %v16220_v14, 4  ;;  %v16490_v24 = vrot.slane %v16220_v14, 5  ;;  %v16392_v33 = vrot.slane %v16220_v14, 2  ;;  %v16324_v3 = vsel %vm16254_vm9, %v16220_v14, %v16323_v21 }
 0x9ce   :  { %v28398_v25 = vpop.permute.xlu0 %16018  ;;  %v16290_v34 = vsel %vm16254_vm9, %v16289_v0, %v16288_v36  ;;  %v16423_v9 = vsel %vm16254_vm9, %v16422_v32, %v16421_v23  ;;  %v16471_v2 = vsel %vm16254_vm9, %v16470_v26, %v16469_v18  ;;  %v16359_v63 = vsel %vm16254_vm9, %v16358_v1, %v16357_v30 }
 0x9cf   :  { %v16457_v22 = vsel %vm16254_vm9, %v16456_v60, %v16455_v41  ;;  %v16505_v12 = vsel %vm16254_vm9, %v16504_v51, %v16503_v61  ;;  %v16097_v57 = vpop.permute.xlu1 %16096  ;;  %v16491_v56 = vsel %vm16254_vm9, %v16490_v24, %v16489_v28  ;;  %v16274_v29 = vsel %vm16254_vm9, %v16273_v4, %v16272_v55  ;;  %v29388_v60 = vld [vmem:[#allocation43_spill] sm:$0xff] }
 0x9d0   :  { %v16255_v42 = vsel %vm16254_vm9, %v16253_v49, %v16252_v27  ;;  %v16407_v46 = vsel %vm16254_vm9, %v16406_v59, %v16405_v54  ;;  %v16393_v10 = vsel %vm16254_vm9, %v16392_v33, %v16391_v52  ;;  %v16212_v36 = vsel %vm16200_vm6, %v28366_v15, %v16095_v6 }
 0x9d1   :  { %v15836_v38 = vmax.f32 %v28069_v48, 0.0  ;;  %v15844_v24 = vmax.f32 %v29388_v60, 0.0  ;;  %v29393_v60 = vld [vmem:[#allocation62_spill] sm:$0xff] }
 0x9d2   :  { %v16081_v31 = vpop.permute.xlu0 %16080 }
 0x9d3   :  { %v16159_v23 = vpop.permute.xlu1 %16158  ;;  %v16196_v48 = vsel %vm198_vm4, %v15844_v24, %v28374_v43 }
 0x9d4   :  { %v16229_v40 = vsel %vm16217_vm7, %v16212_v36, %v16159_v23 }
 0x9d5   :  { %v16305_v11 = vrot.slane %v16229_v40, 6  ;;  %v16438_v30 = vrot.slane %v16229_v40, 2  ;;  %v16339_v61 = vrot.slane %v16229_v40, 7  ;;  %v16472_v28 = vrot.slane %v16229_v40, 3 }
 0x9d6   :  { %v16143_v13 = vpop.permute.xlu0 %16142  ;;  %v16374_v20 = vsel %vm16257_vm10, %v16229_v40, %v16373_v47  ;;  %v16506_v16 = vrot.slane %v16229_v40, 4  ;;  %v16275_v4 = vrot.slane %v16229_v40, 5  ;;  %v16408_v1 = vrot.slane %v16229_v40, 1 }
 0x9d7   :  { %v16221_v17 = vsel %vm16217_vm7, %v16204_v58, %v16143_v13  ;;  %v28429_v27 = vpop.permute.xlu1 %16036  ;;  %v16306_v54 = vsel %vm16257_vm10, %v16305_v11, %v16304_v7  ;;  %v16439_v52 = vsel %vm16257_vm10, %v16438_v30, %v16437_v39  ;;  %v16340_v35 = vsel %vm16257_vm10, %v16339_v61, %v16338_v19  ;;  %v29389_v13 = vld [vmem:[#allocation53_spill] sm:$0xff] }
 0x9d8   :  { %v16291_v21 = vrot.slane %v16221_v17, 6  ;;  %v16424_v18 = vrot.slane %v16221_v17, 2  ;;  %v16325_v41 = vrot.slane %v16221_v17, 7  ;;  %v16458_v6 = vrot.slane %v16221_v17, 3 }
 0x9d9   :  { %v16473_v45 = vsel %vm16257_vm10, %v16472_v28, %v16471_v2  ;;  %v16360_v14 = vsel %vm16257_vm10, %v16221_v17, %v16359_v63  ;;  %v16492_v0 = vrot.slane %v16221_v17, 4  ;;  %v16256_v49 = vrot.slane %v16221_v17, 5 }
 0x9da   :  { %v28424_v55 = vpop.permute.xlu0 %16020  ;;  %v16292_v62 = vsel %vm16257_vm10, %v16291_v21, %v16290_v34  ;;  %v16425_v37 = vsel %vm16257_vm10, %v16424_v18, %v16423_v9  ;;  %v16326_v15 = vsel %vm16257_vm10, %v16325_v41, %v16324_v3  ;;  %v16459_v44 = vsel %vm16257_vm10, %v16458_v6, %v16457_v22  ;;  %v29390_v18 = vld [vmem:[#allocation12_spill] sm:$0xff] }
 0x9db   :  { %v16394_v5 = vrot.slane %v16221_v17, 1  ;;  %v28441_v26 = vpop.permute.xlu1 %16098  ;;  %v16507_v51 = vsel %vm16257_vm10, %v16506_v16, %v16505_v12  ;;  %v16493_v59 = vsel %vm16257_vm10, %v16492_v0, %v16491_v56  ;;  %v16276_v32 = vsel %vm16257_vm10, %v16275_v4, %v16274_v29 }
 0x9dc   :  { %v16258_v33 = vsel %vm16257_vm10, %v16256_v49, %v16255_v42  ;;  %v16409_v7 = vsel %vm16257_vm10, %v16408_v1, %v16407_v46  ;;  %v16188_v39 = vsel %vm198_vm4, %v15836_v38, %v28372_v50  ;;  %v16213_v3 = vsel %vm16200_vm6, %v16196_v48, %v16097_v57 }
 0x9dd   :  { %v16395_v34 = vsel %vm16257_vm10, %v16394_v5, %v16393_v10  ;;  %v16205_v9 = vsel %vm16200_vm6, %v16188_v39, %v16081_v31  ;;  %v15837_v36 = vmax.f32 %v29389_v13, 0.0  ;;  %v15838_v41 = vmax.f32 %v29390_v18, 0.0  ;;  %v29392_v5 = vld [vmem:[#allocation8_spill] sm:$0xff] }
 0x9de   :  { %v28438_v8 = vpop.permute.xlu0 %16082  ;;  %v15839_v38 = vmax.f32 %v29392_v5, 0.0 }
 0x9df   :  { %v16161_v2 = vpop.permute.xlu1 %16160 }
 0x9e0   :  { %v16230_v47 = vsel %vm16217_vm7, %v16213_v3, %v16161_v2 }
 0x9e1   :  { %v16307_v29 = vrot.slane %v16230_v47, 5  ;;  %v16440_v42 = vrot.slane %v16230_v47, 1  ;;  %v16341_v50 = vrot.slane %v16230_v47, 6  ;;  %v16474_v46 = vrot.slane %v16230_v47, 2 }
 0x9e2   :  { %v16145_v19 = vpop.permute.xlu0 %16144  ;;  %v16375_v61 = vrot.slane %v16230_v47, 7 }
 0x9e3   :  { %v16222_v22 = vsel %vm16217_vm7, %v16205_v9, %v16145_v19  ;;  %v16039_v23 = vpop.permute.xlu1 %16038  ;;  %v16308_v17 = vsel %vm16260_vm11, %v16307_v29, %v16306_v54  ;;  %v16441_v40 = vsel %vm16260_vm11, %v16440_v42, %v16439_v52  ;;  %v16342_v21 = vsel %vm16260_vm11, %v16341_v50, %v16340_v35  ;;  %v29391_v35 = vld [vmem:[#allocation18_spill] sm:$0xff] }
 0x9e4   :  { %v16293_v63 = vrot.slane %v16222_v22, 5  ;;  %v16426_v12 = vrot.slane %v16222_v22, 1  ;;  %v16327_v56 = vrot.slane %v16222_v22, 6  ;;  %v16460_v58 = vrot.slane %v16222_v22, 2 }
 0x9e5   :  { %v16475_v11 = vsel %vm16260_vm11, %v16474_v46, %v16473_v45  ;;  %v16361_v28 = vrot.slane %v16222_v22, 7  ;;  %v16376_v16 = vsel %vm16260_vm11, %v16375_v61, %v16374_v20  ;;  %v16259_v0 = vrot.slane %v16222_v22, 4 }
 0x9e6   :  { %v16023_v10 = vpop.permute.xlu0 %16022  ;;  %v16294_v43 = vsel %vm16260_vm11, %v16293_v63, %v16292_v62  ;;  %v16427_v31 = vsel %vm16260_vm11, %v16426_v12, %v16425_v37  ;;  %v16328_v57 = vsel %vm16260_vm11, %v16327_v56, %v16326_v15  ;;  %v16461_v30 = vsel %vm16260_vm11, %v16460_v58, %v16459_v44 }
 0x9e7   :  { %v16508_v62 = vrot.slane %v16230_v47, 3  ;;  %v16494_v37 = vrot.slane %v16222_v22, 3  ;;  %v16277_v15 = vrot.slane %v16230_v47, 4  ;;  %v28470_v54 = vsel %vm16260_vm11, %v16230_v47, %v16409_v7  ;;  %v16101_v45 = vpop.permute.xlu1 %16100 }
 0x9e8   :  { %v28473_v52 = vsel %vm16260_vm11, %v16222_v22, %v16395_v34  ;;  %v15845_v4 = vmax.f32 %v29391_v35, 0.0  ;;  %v16362_v44 = vsel %vm16260_vm11, %v16361_v28, %v16360_v14  ;;  %v15846_v20 = vmax.f32 %v29393_v60, 0.0  ;;  %v29394_v34 = vld [vmem:[#allocation63_spill] sm:$0xff] }
 0x9e9   :  { %v16509_v49 = vsel %vm16260_vm11, %v16508_v62, %v16507_v51  ;;  %v16495_v1 = vsel %vm16260_vm11, %v16494_v37, %v16493_v59  ;;  %v16278_v24 = vsel %vm16260_vm11, %v16277_v15, %v16276_v32  ;;  %v28483_v7 = vsel %vm16260_vm11, %v16259_v0, %v16258_v33 }
 0x9ea   :  { %v16085_v6 = vpop.permute.xlu0 %16084  ;;  %v15847_v39 = vmax.f32 %v29394_v34, 0.0  ;;  %v16197_v48 = vsel %vm198_vm4, %v15845_v4, %v28400_v53  ;;  %v16189_v14 = vsel %vm198_vm4, %v15837_v36, %v28398_v25  ;;  %v16198_v51 = vsel %vm198_vm4, %v15846_v20, %v28429_v27 }
 0x9eb   :  { %v16190_v59 = vsel %vm198_vm4, %v15838_v41, %v28424_v55  ;;  %v16214_v32 = vsel %vm16200_vm6, %v16197_v48, %v28441_v26  ;;  %v16206_v33 = vsel %vm16200_vm6, %v16189_v14, %v28438_v8  ;;  %v16191_v19 = vsel %vm198_vm4, %v15839_v38, %v16023_v10  ;;  %v16163_v3 = vpop.permute.xlu1 %16162 }
 0x9ec   :  { %v16199_v53 = vsel %vm198_vm4, %v15847_v39, %v16039_v23  ;;  %v16207_v25 = vsel %vm16200_vm6, %v16190_v59, %v16085_v6  ;;  %v28505_v55 = vsel %vm16217_vm7, %v16214_v32, %v16163_v3  ;;  %v16215_v10 = vsel %vm16200_vm6, %v16198_v51, %v16101_v45 }
 0x9ed   :  { %v16309_v22 = vrot.slane %v28505_v55, 4  ;;  %v16442_v47 = vsel %vm16263_vm12, %v28505_v55, %v16441_v40  ;;  %v16343_v63 = vrot.slane %v28505_v55, 5  ;;  %v16476_v12 = vrot.slane %v28505_v55, 1 }
 0x9ee   :  { %v16147_v9 = vpop.permute.xlu0 %16146  ;;  %v16377_v46 = vrot.slane %v28505_v55, 6  ;;  %v16510_v41 = vrot.slane %v28505_v55, 2 }
 0x9ef   :  { %v28502_v27 = vsel %vm16217_vm7, %v16206_v33, %v16147_v9  ;;  %v16310_v58 = vsel %vm16263_vm12, %v16309_v22, %v16308_v17  ;;  %v16344_v13 = vsel %vm16263_vm12, %v16343_v63, %v16342_v21  ;;  %v16477_v36 = vsel %vm16263_vm12, %v16476_v12, %v16475_v11 }
 0x9f0   :  { %v16295_v26 = vrot.slane %v28502_v27, 4  ;;  %v16428_v8 = vsel %vm16263_vm12, %v28502_v27, %v16427_v31  ;;  %v16329_v2 = vrot.slane %v28502_v27, 5  ;;  %v16462_v50 = vrot.slane %v28502_v27, 1  ;;  %v16103_v31 = vpop.permute.xlu1 %16102 }
 0x9f1   :  { %v16216_v18 = vsel %vm16200_vm6, %v16199_v53, %v16103_v31  ;;  %v16496_v17 = vrot.slane %v28502_v27, 2  ;;  %v16279_v21 = vrot.slane %v28505_v55, 3  ;;  %v16262_v28 = vrot.slane %v28502_v27, 3 }
 0x9f2   :  { %v16087_v56 = vpop.permute.xlu0 %16086  ;;  %v16296_v29 = vsel %vm16263_vm12, %v16295_v26, %v16294_v43  ;;  %v16330_v42 = vsel %vm16263_vm12, %v16329_v2, %v16328_v57  ;;  %v16463_v40 = vsel %vm16263_vm12, %v16462_v50, %v16461_v30  ;;  %v28527_v43 = vsel %vm16263_vm12, %v16377_v46, %v16376_v16 }
 0x9f3   :  { %v16208_v23 = vsel %vm16200_vm6, %v16191_v19, %v16087_v56  ;;  %v16363_v57 = vrot.slane %v28502_v27, 6  ;;  %v16411_v30 = vrot.slane %v28505_v55, 7  ;;  %v16397_v62 = vrot.slane %v28502_v27, 7 }
 0x9f4   :  { %v16165_v37 = vpop.permute.xlu1 %16164  ;;  %v16511_v6 = vsel %vm16263_vm12, %v16510_v41, %v16509_v49  ;;  %v16497_v16 = vsel %vm16263_vm12, %v16496_v17, %v16495_v1  ;;  %v16280_v0 = vsel %vm16263_vm12, %v16279_v21, %v16278_v24 }
 0x9f5   :  { %v16364_v11 = vsel %vm16263_vm12, %v16363_v57, %v16362_v44  ;;  %v28545_v35 = vsel %vm16217_vm7, %v16215_v10, %v16165_v37 }
 0x9f6   :  { %v16149_v61 = vpop.permute.xlu0 %16148  ;;  %v16311_v5 = vrot.slane %v28545_v35, 3  ;;  %v16443_v38 = vrot.slane %v28545_v35, 7  ;;  %v16345_v60 = vrot.slane %v28545_v35, 4  ;;  %v16478_v49 = vsel %vm16266_vm13, %v28545_v35, %v16477_v36 }
 0x9f7   :  { %v28539_v15 = vsel %vm16217_vm7, %v16207_v25, %v16149_v61  ;;  %v16379_v46 = vrot.slane %v28545_v35, 5 }
 0x9f8   :  { %v16297_v4 = vrot.slane %v28539_v15, 3  ;;  %v16429_v45 = vrot.slane %v28539_v15, 7  ;;  %v16331_v44 = vrot.slane %v28539_v15, 4  ;;  %v16464_v39 = vsel %vm16266_vm13, %v28539_v15, %v16463_v40  ;;  %v16167_v48 = vpop.permute.xlu1 %16166 }
 0x9f9   :  { %v16312_v51 = vsel %vm16266_vm13, %v16311_v5, %v16310_v58  ;;  %v16444_v59 = vsel %vm16266_vm13, %v16443_v38, %v16442_v47  ;;  %v16346_v32 = vsel %vm16266_vm13, %v16345_v60, %v16344_v13  ;;  %v16233_v33 = vsel %vm16217_vm7, %v16216_v18, %v16167_v48 }
 0x9fa   :  { %v16151_v1 = vpop.permute.xlu0 %16150  ;;  %v16298_v20 = vsel %vm16266_vm13, %v16297_v4, %v16296_v29  ;;  %v16430_v24 = vsel %vm16266_vm13, %v16429_v45, %v16428_v8  ;;  %v16332_v34 = vsel %vm16266_vm13, %v16331_v44, %v16330_v42  ;;  %v16313_v25 = vrot.slane %v16233_v33, 2 }
 0x9fb   :  { %v28561_v14 = vsel %vm16217_vm7, %v16208_v23, %v16151_v1  ;;  %v16445_v3 = vrot.slane %v16233_v33, 6  ;;  %v16347_v26 = vrot.slane %v16233_v33, 3  ;;  %v16479_v8 = vrot.slane %v16233_v33, 7 }
 0x9fc   :  { %v16299_v9 = vrot.slane %v28561_v14, 2  ;;  %v16431_v53 = vrot.slane %v28561_v14, 6  ;;  %v16333_v19 = vrot.slane %v28561_v14, 3  ;;  %v16465_v63 = vrot.slane %v28561_v14, 7 }
 0x9fd   :  { %v16314_v12 = vsel %vm16269_vm14, %v16313_v25, %v16312_v51  ;;  %v16446_v56 = vsel %vm16269_vm14, %v16445_v3, %v16444_v59  ;;  %v16348_v29 = vsel %vm16269_vm14, %v16347_v26, %v16346_v32  ;;  %v16480_v42 = vsel %vm16269_vm14, %v16479_v8, %v16478_v49 }
 0x9fe   :  { %v16300_v2 = vsel %vm16269_vm14, %v16299_v9, %v16298_v20  ;;  %v16432_v22 = vsel %vm16269_vm14, %v16431_v53, %v16430_v24  ;;  %v16334_v47 = vsel %vm16269_vm14, %v16333_v19, %v16332_v34  ;;  %16317 = vrot.lane.b32.xlu1 %v16314_v12, %s22125_s11  ;;  %v16466_v50 = vsel %vm16269_vm14, %v16465_v63, %v16464_v39 }
 0x9ff   :  { %16315 = vrot.lane.b32.xlu0 %v16300_v2, %s22125_s11  ;;  %v16381_v10 = vrot.slane %v16233_v33, 4  ;;  %v16365_v31 = vrot.slane %v28539_v15, 5  ;;  %v16367_v58 = vrot.slane %v28561_v14, 4  ;;  %v16512_v13 = vrot.slane %v28545_v35, 1 }
 0xa00   :  { %v16498_v36 = vrot.slane %v28539_v15, 1  ;;  %v16281_v23 = vrot.slane %v28545_v35, 2  ;;  %v16380_v40 = vsel %vm16266_vm13, %v16379_v46, %v28527_v43  ;;  %v16283_v18 = vrot.slane %v16233_v33, 1 }
 0xa01   :  { %v16366_v57 = vsel %vm16266_vm13, %v16365_v31, %v16364_v11  ;;  %v16265_v41 = vrot.slane %v28539_v15, 2  ;;  %v16382_v17 = vsel %vm16269_vm14, %v16381_v10, %v16380_v40  ;;  %v16513_v61 = vsel %vm16266_vm13, %v16512_v13, %v16511_v6 }
 0xa02   :  { %v16368_v21 = vsel %vm16269_vm14, %v16367_v58, %v16366_v57  ;;  %v16499_v37 = vsel %vm16266_vm13, %v16498_v36, %v16497_v16  ;;  %16449 = vrot.lane.b32.xlu1 %v16446_v56, %s22125_s11  ;;  %v16514_v4 = vsel %vm16269_vm14, %v16233_v33, %v16513_v61  ;;  %v16282_v11 = vsel %vm16266_vm13, %v16281_v23, %v16280_v0 }
 0xa03   :  { %16447 = vrot.lane.b32.xlu0 %v16432_v22, %s22125_s11  ;;  %v16500_v43 = vsel %vm16269_vm14, %v28561_v14, %v16499_v37  ;;  %v16268_v45 = vrot.slane %v28561_v14, 1  ;;  %v16284_v44 = vsel %vm16269_vm14, %v16283_v18, %v16282_v11  ;;  %v16264_v5 = vsel %vm16263_vm12, %v16262_v28, %v28483_v7 }
 0xa04   :  { %v16412_v6 = vsel %vm16263_vm12, %v16411_v30, %v28470_v54  ;;  %v16413_v16 = vrot.slane %v28545_v35, 6  ;;  %v16267_v38 = vsel %vm16266_vm13, %v16265_v41, %v16264_v5  ;;  %v16415_v60 = vrot.slane %v16233_v33, 5 }
 0xa05   :  { %v16398_v0 = vsel %vm16263_vm12, %v16397_v62, %v28473_v52  ;;  %v16399_v49 = vrot.slane %v28539_v15, 6  ;;  %v16270_v7 = vsel %vm16269_vm14, %v16268_v45, %v16267_v38  ;;  %v16401_v54 = vrot.slane %v28561_v14, 5 }
 0xa06   :  { %v16414_v55 = vsel %vm16266_vm13, %v16413_v16, %v16412_v6  ;;  %16351 = vrot.lane.b32.xlu1 %v16348_v29, %s22126_s5 }
 0xa07   :  { %16349 = vrot.lane.b32.xlu0 %v16334_v47, %s22126_s5  ;;  %v16416_v28 = vsel %vm16269_vm14, %v16415_v60, %v16414_v55  ;;  %v16400_v30 = vsel %vm16266_vm13, %v16399_v49, %v16398_v0 }
 0xa08   :  { %v16402_v35 = vsel %vm16269_vm14, %v16401_v54, %v16400_v30 }
 0xa0a   :  { %16483 = vrot.lane.b32.xlu1 %v16480_v42, %s22126_s5 }
 0xa0b   :  { %16481 = vrot.lane.b32.xlu0 %v16466_v50, %s22126_s5 }
 0xa0e   :  { %16385 = vrot.lane.b32.xlu1 %v16382_v17, %s22127_s6 }
 0xa0f   :  { %16383 = vrot.lane.b32.xlu0 %v16368_v21, %s22127_s6 }
 0xa12   :  { %16517 = vrot.lane.b32.xlu1 %v16514_v4, %s22127_s6 }
 0xa13   :  { %16515 = vrot.lane.b32.xlu0 %v16500_v43, %s22127_s6 }
 0xa70   :  { %v16318_v27 = vpop.permute.xlu1 %16317 }
 0xa71   :  { %v16316_v52 = vpop.permute.xlu0 %16315  ;;  %v16523_v48 = vsel %vm16521_vm15, %v16284_v44, %v16318_v27 }
 0xa72   :  { %v16522_v39 = vsel %vm16521_vm15, %v16270_v7, %v16316_v52 }
 0xa74   :  { %v16450_v15 = vpop.permute.xlu1 %16449 }
 0xa75   :  { %v16448_v62 = vpop.permute.xlu0 %16447  ;;  %v16531_v19 = vsel %vm16521_vm15, %v16416_v28, %v16450_v15 }
 0xa76   :  { %v16530_v53 = vsel %vm16521_vm15, %v16402_v35, %v16448_v62 }
 0xa78   :  { %v16352_v20 = vpop.permute.xlu1 %16351 }
 0xa79   :  { %v16350_v1 = vpop.permute.xlu0 %16349  ;;  %v16526_v59 = vsel %vm16524_vm0, %v16523_v48, %v16352_v20 }
 0xa7a   :  { %v16525_v14 = vsel %vm16524_vm0, %v16522_v39, %v16350_v1 }
 0xa7c   :  { %v16484_v34 = vpop.permute.xlu1 %16483 }
 0xa7d   :  { %v16482_v24 = vpop.permute.xlu0 %16481  ;;  %v16533_v26 = vsel %vm16524_vm0, %v16531_v19, %v16484_v34 }
 0xa7e   :  { %v16532_v25 = vsel %vm16524_vm0, %v16530_v53, %v16482_v24 }
 0xa80   :  { %v16386_v32 = vpop.permute.xlu1 %16385 }
 0xa81   :  { %v16384_v51 = vpop.permute.xlu0 %16383  ;;  %v16529_v9 = vsel %vm16527_vm1, %v16526_v59, %v16386_v32 }
 0xa82   :  { %v16528_v33 = vsel %vm16527_vm1, %v16525_v14, %v16384_v51  ;;  %16538 = vst [vmem:[#allocation4 + $0x10] sm:$0xff] %v16529_v9 }
 0xa83   :  { %16536 = vst [vmem:[#allocation4] sm:$0xff] %v16528_v33 }
 0xa84   :  { %v16518_v8 = vpop.permute.xlu1 %16517 }
 0xa85   :  { %v16516_v3 = vpop.permute.xlu0 %16515  ;;  %v16535_v22 = vsel %vm16527_vm1, %v16533_v26, %v16518_v8 }
 0xa86   :  { %v16534_v2 = vsel %vm16527_vm1, %v16532_v25, %v16516_v3  ;;  %16539 = vst [vmem:[#allocation4 + $0x18] sm:$0xff] %v16535_v22 }
 0xa87   :  { %16537 = vst [vmem:[#allocation4 + $0x8] sm:$0xff] %v16534_v2 }
 0xa88   :  { %22104 = shalt.err (!%p22101_p4)
}
 0xa89   :  { %s22105_s18 = scalar_lea.hbm %s28655_s10, 512 }
 0xa8a   :  { %p22106_p5 = scmp.ne.s32.totalorder %s28655_s10, %s22105_s18  ;;  %p22109_p6 = scmp.lt.u32.totalorder %s22105_s18, %s28655_s10 }
 0xa8c   :  { %p22111_p7 = pnand %p22109_p6, %p22106_p5 }
 0xa8e   :  { %22114 = shalt.err (!%p22111_p7)
}
 0xa8f   :  { %s22129_s2 = smov 256  }
 0xa90   :  { %16551 = dma.vmem_to_hbm [thread:$0]  %s16546_s13, 512, %s28655_s10, [#allocation5], %s22129_s2, %s22129_s2, %s22123_s9  }
 0xa91   :  { %22115 = dma.done.wait [#allocation5], 512  }
 0xa92   :  { %22116 = vsyncadd [#allocation5], 4294966784 }
 0xa93   :  { %16555 = vsyncpa [#allocation5], 1 }

</bundles_post_ra>
